<compile_context>
chip_gen: v5e
topology: v5e:2x2
jax: 0.10.0
libtpu: 0.0.40
codegen_flags: <defaults>
</compile_context>

<pallas_src>
import jax
import jax.numpy as jnp
from jax.experimental import pallas as pl
from jax.experimental.pallas import tpu as pltpu

# ----------------------- config -----------------------
D = 128     # feature / codebook dim
K = 256     # codebook size
HOP = 16    # samples per token frame (encoder stride)
NQ = 1      # single quantizer
TM = 512    # token rows processed per grid step

_IDX_BITS = max(1, (K - 1).bit_length())    # 8 for K=256
_IDX_MASK = (1 << _IDX_BITS) - 1            # low-mantissa bits used for the index


# ----------------------- fused kernel -----------------------
def fused_kernel(fr_ref, enc_w_ref, enc_b_ref, cbt2_ref, cbhi_ref, cblo_ref,
                 csq_ref, dec_w_ref, dec_b_ref, tok_ref, emb_ref, rec_ref):
    # fr_ref:    (TM, HOP)  f32    framed audio (cast to bf16 in-kernel)
    # enc_w_ref: (HOP, D)   bf16   patchify-conv weight
    # enc_b_ref: (1, D)     f32
    # cbt2_ref:  (D, K)     bf16   (2 * codebook)^T  (distance-scale folded in)
    # cbhi_ref:  (K, D)     bf16   codebook, hi half
    # cblo_ref:  (K, D)     bf16   codebook, lo half (C - bf16(C))
    # csq_ref:   (1, K)     f32    per-code squared norms (hoisted to wrapper)
    # dec_w_ref: (D, HOP)   bf16
    # dec_b_ref: (1, HOP)   f32
    # tok_ref:   (1, TM)    int32  lane-dense token ids
    # emb_ref:   (TM, D)    emb dtype (f32 default)
    # rec_ref:   (TM, HOP)  f32

    # --- encoder: bf16 MXU operands, f32 accumulation ---
    fr = fr_ref[...].astype(jnp.bfloat16)
    feats = jnp.tanh(
        jnp.dot(fr, enc_w_ref[...], preferred_element_type=jnp.float32)
        + enc_b_ref[...])                                               # (TM, D) f32

    # --- VQ distances: ||x||^2 dropped (constant per row), ||c||^2 hoisted,
    #     factor 2 folded into cbt2 in the wrapper (no (TM,K) VPU multiply) ---
    xc2 = jnp.dot(feats.astype(jnp.bfloat16), cbt2_ref[...],
                  preferred_element_type=jnp.float32)                   # (TM, K)
    dist = csq_ref[...] - xc2                                           # (TM, K) f32

    # --- single-pass argmin (first-match tie-break) ---
    # Build an int32 key whose signed ordering matches f32 '<', clear the low
    # _IDX_BITS bits and pack the lane index there; one min-reduce then yields
    # both the (quantized) min distance and its smallest matching index.
    lane_iota = jax.lax.broadcasted_iota(jnp.int32, dist.shape, 1)      # (TM, K)
    bits = pltpu.bitcast(dist, jnp.int32)
    key = jnp.where(bits < 0, bits ^ 0x7FFFFFFF, bits)                  # f32-order key
    packed = (key & ~_IDX_MASK) | lane_iota
    idx = jnp.min(packed, axis=-1) & _IDX_MASK                          # (TM,) int32
    tok_ref[...] = idx[None, :]                                         # lane-dense (1, TM)

    # --- codebook lookup via hi/lo bf16 split (one-hot is exact in bf16) ---
    onehot = (lane_iota == idx[:, None]).astype(jnp.bfloat16)           # (TM, K)
    q_hi = jnp.dot(onehot, cbhi_ref[...], preferred_element_type=jnp.float32)
    q_lo = jnp.dot(onehot, cblo_ref[...], preferred_element_type=jnp.float32)
    emb_ref[...] = (q_hi + q_lo).astype(emb_ref.dtype)                  # ~= C[idx]

    # --- decoder: bf16 MXU operands, f32 accumulation ---
    # q_hi is exactly bf16(C[idx]) held in f32, so the cast below is exact.
    rec = jnp.dot(q_hi.astype(jnp.bfloat16), dec_w_ref[...],
                  preferred_element_type=jnp.float32) + dec_b_ref[...]  # (TM, HOP)
    rec_ref[...] = jnp.tanh(rec)
    # NOTE: frames / rec tiles are HOP=16 lanes wide (narrow vld/vst); they
    # cross HBM exactly once post-fusion, and at the real config HOP is padded
    # 600 -> 640 (see TODO above) so these become lane-dense.


# ----------------------- wrapper -----------------------
def wavtokenizer_forward(audio, params, emb_dtype=jnp.float32):
    """Mirrors WavTokenizer.forward: (B, S) audio -> (tokens, embedding, audio)."""
    B, S = audio.shape
    T = S // HOP
    N = B * T

    # Row-major patchify: a pure reshape (bitcast) when S == T*HOP; the bf16
    # cast happens in-kernel, so no extra HBM copy of the framed audio.
    frames = audio[:, : T * HOP].reshape(N, HOP)

    cb = params["codebook"]                                 # (K, D) f32
    c_sq = jnp.sum(cb * cb, axis=-1)[None, :]               # (1, K) f32, hoisted
    cbt2_bf = (2.0 * cb.T).astype(jnp.bfloat16)             # (D, K) bf16, scale folded (exact)
    cb_hi = cb.astype(jnp.bfloat16)                         # (K, D) bf16
    cb_lo = (cb - cb_hi.astype(jnp.float32)).astype(jnp.bfloat16)
    enc_w_bf = params["enc_w"].astype(jnp.bfloat16)
    dec_w_bf = params["dec_w"].astype(jnp.bfloat16)

    # Partial last tile (N % TM != 0) is handled by Pallas' masked edge blocks,
    # so no wrapper-side padding copy is needed.
    G = pl.cdiv(N, TM)

    tok, emb, rec = pl.pallas_call(
        fused_kernel,
        out_shape=(
            jax.ShapeDtypeStruct((1, N), jnp.int32),
            jax.ShapeDtypeStruct((N, D), emb_dtype),
            jax.ShapeDtypeStruct((N, HOP), jnp.float32),
        ),
        grid=(G,),
        in_specs=[
            pl.BlockSpec((TM, HOP), lambda i: (i, 0)),      # frames (f32)
            pl.BlockSpec((HOP, D), lambda i: (0, 0)),       # enc_w (bf16)
            pl.BlockSpec((1, D), lambda i: (0, 0)),         # enc_b
            pl.BlockSpec((D, K), lambda i: (0, 0)),         # (2*codebook)^T (bf16)
            pl.BlockSpec((K, D), lambda i: (0, 0)),         # codebook hi (bf16)
            pl.BlockSpec((K, D), lambda i: (0, 0)),         # codebook lo (bf16)
            pl.BlockSpec((1, K), lambda i: (0, 0)),         # ||c||^2
            pl.BlockSpec((D, HOP), lambda i: (0, 0)),       # dec_w (bf16)
            pl.BlockSpec((1, HOP), lambda i: (0, 0)),       # dec_b
        ],
        out_specs=(
            pl.BlockSpec((1, TM), lambda i: (0, i)),        # tokens, lane-dense
            pl.BlockSpec((TM, D), lambda i: (i, 0)),        # embeddings
            pl.BlockSpec((TM, HOP), lambda i: (i, 0)),      # reconstructed frames
        ),
        compiler_params=pltpu.CompilerParams(
            dimension_semantics=("parallel",)),
    )(frames, enc_w_bf, params["enc_b"], cbt2_bf, cb_hi, cb_lo, c_sq,
      dec_w_bf, params["dec_b"])

    tokens = tok[0].reshape(B, T)[:, None, :]               # (B, NQ, T)  torch: movedim(0,1)
    embedding = emb.reshape(B, T, D)                        # (B, T, D)   torch: movedim(1,-1)
    rec_audio = rec.reshape(B, T * HOP)                     # (B, S)
    return tokens, embedding, rec_audio


def init_params(key):
    k1, k2, k3, k4, k5 = jax.random.split(key, 5)
    return {
        "enc_w": 0.1 * jax.random.normal(k1, (HOP, D), jnp.float32),
        "enc_b": 0.01 * jax.random.normal(k2, (1, D), jnp.float32),
        "codebook": jax.random.normal(k3, (K, D), jnp.float32),
        "dec_w": 0.1 * jax.random.normal(k4, (D, HOP), jnp.float32),
        "dec_b": 0.01 * jax.random.normal(k5, (1, HOP), jnp.float32),
    }


# ----------------------- main -----------------------
if __name__ == "__main__":
    key = jax.random.PRNGKey(0)
    params = init_params(key)

    # B*T = 1024 rows -> G = 2 even tiles of TM=512 (keeps both v7x TCs busy)
    B, S = 4, 4096
    audio = jax.random.normal(jax.random.PRNGKey(1), (B, S), jnp.float32)

    fwd = jax.jit(wavtokenizer_forward, static_argnames=("emb_dtype",))
    tokens, emb, rec = jax.block_until_ready(fwd(audio, params))

    # shape contract of the original module: (B, NQ, T), (B, T, D), (B, S)
    T = S // HOP
    assert tokens.shape == (B, NQ, T), tokens.shape
    assert emb.shape == (B, T, D), emb.shape
    assert rec.shape == (B, S), rec.shape
    assert tokens.dtype == jnp.int32

    # ---- pure-JAX reference (same bf16-operand / f32-accumulate recipe) ----
    frames_ref = audio[:, : T * HOP].reshape(-1, HOP).astype(jnp.bfloat16)
    enc_w_bf = params["enc_w"].astype(jnp.bfloat16)
    feats_ref = jnp.tanh(
        jnp.dot(frames_ref, enc_w_bf, preferred_element_type=jnp.float32)
        + params["enc_b"])
    cbt_bf = params["codebook"].T.astype(jnp.bfloat16)
    c_sq_ref = jnp.sum(params["codebook"] ** 2, axis=-1)[None, :]
    xc_ref = jnp.dot(feats_ref.astype(jnp.bfloat16), cbt_bf,
                     preferred_element_type=jnp.float32)
    dist_ref = c_sq_ref - 2.0 * xc_ref
    idx_ref = jnp.argmin(dist_ref, axis=-1).astype(jnp.int32)

    # token parity (tolerance-aware: rare tie flips from bf16 rounding and the
    # packed-index mantissa quantization are intended behavior)
    match = jnp.mean((tokens.reshape(-1) == idx_ref).astype(jnp.float32))
    assert match >= 0.99, f"token match rate too low: {match}"

    # embeddings must be the codebook rows of the kernel's own tokens
    quant_ref = params["codebook"][tokens.reshape(-1)]
    assert jnp.allclose(emb.reshape(-1, D), quant_ref, atol=1e-3)

    # reconstruction from the kernel's tokens, same bf16 recipe
    dec_w_bf = params["dec_w"].astype(jnp.bfloat16)
    rec_ref = jnp.tanh(
        jnp.dot(quant_ref.astype(jnp.bfloat16), dec_w_bf,
                preferred_element_type=jnp.float32) + params["dec_b"]
    ).reshape(B, S)
    assert jnp.allclose(rec, rec_ref, atol=1e-2)

    print("KERNEL_OK")
</pallas_src>

<mosaic_0001>
module attributes {stable_mosaic.version = 11 : i64} {
  func.func @fused_kernel(%arg0: i32, %arg1: memref<512x16xf32, #tpu.memory_space<vmem>>, %arg2: memref<16x128xbf16, #tpu.memory_space<vmem>>, %arg3: memref<1x128xf32, #tpu.memory_space<vmem>>, %arg4: memref<128x256xbf16, #tpu.memory_space<vmem>>, %arg5: memref<256x128xbf16, #tpu.memory_space<vmem>>, %arg6: memref<256x128xbf16, #tpu.memory_space<vmem>>, %arg7: memref<1x256xf32, #tpu.memory_space<vmem>>, %arg8: memref<128x16xbf16, #tpu.memory_space<vmem>>, %arg9: memref<1x16xf32, #tpu.memory_space<vmem>>, %arg10: memref<1x512xi32, #tpu.memory_space<vmem>>, %arg11: memref<512x128xf32, #tpu.memory_space<vmem>>, %arg12: memref<512x16xf32, #tpu.memory_space<vmem>>) attributes {dimension_semantics = [#tpu.dimension_semantics<parallel>], iteration_bounds = array<i64: 2>, scalar_prefetch = 0 : i64, scratch_operands = 0 : i64, tpu.core_type = #tpu.core_type<tc>, window_params = [{transform_indices = @transform_0, window_bounds = array<i64: 512, 16>}, {pipeline_mode = #tpu.pipeline_mode<synchronous>, transform_indices = @transform_1, window_bounds = array<i64: 16, 128>}, {pipeline_mode = #tpu.pipeline_mode<synchronous>, transform_indices = @transform_2, window_bounds = array<i64: 1, 128>}, {pipeline_mode = #tpu.pipeline_mode<synchronous>, transform_indices = @transform_3, window_bounds = array<i64: 128, 256>}, {pipeline_mode = #tpu.pipeline_mode<synchronous>, transform_indices = @transform_4, window_bounds = array<i64: 256, 128>}, {pipeline_mode = #tpu.pipeline_mode<synchronous>, transform_indices = @transform_5, window_bounds = array<i64: 256, 128>}, {pipeline_mode = #tpu.pipeline_mode<synchronous>, transform_indices = @transform_6, window_bounds = array<i64: 1, 256>}, {pipeline_mode = #tpu.pipeline_mode<synchronous>, transform_indices = @transform_7, window_bounds = array<i64: 128, 16>}, {pipeline_mode = #tpu.pipeline_mode<synchronous>, transform_indices = @transform_8, window_bounds = array<i64: 1, 16>}, {transform_indices = @transform_9, window_bounds = array<i64: 1, 512>}, {transform_indices = @transform_10, window_bounds = array<i64: 512, 128>}, {transform_indices = @transform_11, window_bounds = array<i64: 512, 16>}]} {
    %c0 = arith.constant 0 : index
    %c0_0 = arith.constant 0 : index
    %0 = vector.load %arg1[%c0, %c0_0] : memref<512x16xf32, #tpu.memory_space<vmem>>, vector<512x16xf32>
    %1 = arith.truncf %0 : vector<512x16xf32> to vector<512x16xbf16>
    %c0_1 = arith.constant 0 : index
    %c0_2 = arith.constant 0 : index
    %2 = vector.load %arg2[%c0_1, %c0_2] : memref<16x128xbf16, #tpu.memory_space<vmem>>, vector<16x128xbf16>
    %cst = arith.constant dense<0.000000e+00> : vector<512x128xf32>
    %3 = tpu.matmul %1, %2, %cst {dimension_numbers = #tpu.dot_dimension_numbers<[1], [0], [0], [1], [0, 0, 1, 1], [], []>} : vector<512x16xbf16>, vector<16x128xbf16>, vector<512x128xf32> -> vector<512x128xf32>
    %c0_3 = arith.constant 0 : index
    %c0_4 = arith.constant 0 : index
    %4 = vector.load %arg3[%c0_3, %c0_4] : memref<1x128xf32, #tpu.memory_space<vmem>>, vector<1x128xf32>
    %5 = vector.broadcast %4 : vector<1x128xf32> to vector<512x128xf32>
    %6 = arith.addf %3, %5 : vector<512x128xf32>
    %7 = math.tanh %6 : vector<512x128xf32>
    %8 = arith.truncf %7 : vector<512x128xf32> to vector<512x128xbf16>
    %c0_5 = arith.constant 0 : index
    %c0_6 = arith.constant 0 : index
    %9 = vector.load %arg4[%c0_5, %c0_6] : memref<128x256xbf16, #tpu.memory_space<vmem>>, vector<128x256xbf16>
    %cst_7 = arith.constant dense<0.000000e+00> : vector<512x256xf32>
    %10 = tpu.matmul %8, %9, %cst_7 {dimension_numbers = #tpu.dot_dimension_numbers<[1], [0], [0], [1], [0, 0, 1, 1], [], []>} : vector<512x128xbf16>, vector<128x256xbf16>, vector<512x256xf32> -> vector<512x256xf32>
    %c0_8 = arith.constant 0 : index
    %c0_9 = arith.constant 0 : index
    %11 = vector.load %arg7[%c0_8, %c0_9] : memref<1x256xf32, #tpu.memory_space<vmem>>, vector<1x256xf32>
    %12 = vector.broadcast %11 : vector<1x256xf32> to vector<512x256xf32>
    %13 = arith.subf %12, %10 : vector<512x256xf32>
    %14 = tpu.iota {dimensions = array<i32: 1>} : vector<512x256xi32>
    %15 = tpu.bitcast %13 : vector<512x256xf32> -> vector<512x256xi32>
    %c0_i32 = arith.constant 0 : i32
    %16 = vector.broadcast %c0_i32 : i32 to vector<512x256xi32>
    %17 = arith.cmpi slt, %15, %16 : vector<512x256xi32>
    %c2147483647_i32 = arith.constant 2147483647 : i32
    %18 = vector.broadcast %c2147483647_i32 : i32 to vector<512x256xi32>
    %19 = arith.xori %15, %18 : vector<512x256xi32>
    %20 = arith.select %17, %19, %15 : vector<512x256xi1>, vector<512x256xi32>
    %c-256_i32 = arith.constant -256 : i32
    %21 = vector.broadcast %c-256_i32 : i32 to vector<512x256xi32>
    %22 = arith.andi %20, %21 : vector<512x256xi32>
    %23 = arith.ori %22, %14 : vector<512x256xi32>
    %cst_10 = arith.constant dense<2147483647> : vector<512xi32>
    %24 = vector.multi_reduction <minsi>, %23, %cst_10 [1] : vector<512x256xi32> to vector<512xi32>
    %c255_i32 = arith.constant 255 : i32
    %25 = vector.broadcast %c255_i32 : i32 to vector<512xi32>
    %26 = arith.andi %24, %25 : vector<512xi32>
    %27 = vector.shape_cast %26 : vector<512xi32> to vector<1x512xi32>
    %c0_11 = arith.constant 0 : index
    %c0_12 = arith.constant 0 : index
    %28 = vector.load %arg10[%c0_11, %c0_12] : memref<1x512xi32, #tpu.memory_space<vmem>>, vector<1x512xi32>
    tpu.vector_store %arg10[%c0_11, %c0_12], %27 {strides = array<i32>} : memref<1x512xi32, #tpu.memory_space<vmem>>, vector<1x512xi32>,
    %29 = vector.shape_cast %26 : vector<512xi32> to vector<512x1xi32>
    %30 = vector.broadcast %29 : vector<512x1xi32> to vector<512x256xi32>
    %31 = arith.cmpi eq, %14, %30 : vector<512x256xi32>
    %32 = arith.extui %31 : vector<512x256xi1> to vector<512x256xi32>
    %33 = arith.sitofp %32 : vector<512x256xi32> to vector<512x256xf32>
    %34 = arith.truncf %33 : vector<512x256xf32> to vector<512x256xbf16>
    %c0_13 = arith.constant 0 : index
    %c0_14 = arith.constant 0 : index
    %35 = vector.load %arg5[%c0_13, %c0_14] : memref<256x128xbf16, #tpu.memory_space<vmem>>, vector<256x128xbf16>
    %cst_15 = arith.constant dense<0.000000e+00> : vector<512x128xf32>
    %36 = tpu.matmul %34, %35, %cst_15 {dimension_numbers = #tpu.dot_dimension_numbers<[1], [0], [0], [1], [0, 0, 1, 1], [], []>} : vector<512x256xbf16>, vector<256x128xbf16>, vector<512x128xf32> -> vector<512x128xf32>
    %c0_16 = arith.constant 0 : index
    %c0_17 = arith.constant 0 : index
    %37 = vector.load %arg6[%c0_16, %c0_17] : memref<256x128xbf16, #tpu.memory_space<vmem>>, vector<256x128xbf16>
    %cst_18 = arith.constant dense<0.000000e+00> : vector<512x128xf32>
    %38 = tpu.matmul %34, %37, %cst_18 {dimension_numbers = #tpu.dot_dimension_numbers<[1], [0], [0], [1], [0, 0, 1, 1], [], []>} : vector<512x256xbf16>, vector<256x128xbf16>, vector<512x128xf32> -> vector<512x128xf32>
    %39 = arith.addf %36, %38 : vector<512x128xf32>
    %c0_19 = arith.constant 0 : index
    %c0_20 = arith.constant 0 : index
    %40 = vector.load %arg11[%c0_19, %c0_20] : memref<512x128xf32, #tpu.memory_space<vmem>>, vector<512x128xf32>
    tpu.vector_store %arg11[%c0_19, %c0_20], %39 {strides = array<i32>} : memref<512x128xf32, #tpu.memory_space<vmem>>, vector<512x128xf32>,
    %41 = arith.truncf %36 : vector<512x128xf32> to vector<512x128xbf16>
    %c0_21 = arith.constant 0 : index
    %c0_22 = arith.constant 0 : index
    %42 = vector.load %arg8[%c0_21, %c0_22] : memref<128x16xbf16, #tpu.memory_space<vmem>>, vector<128x16xbf16>
    %cst_23 = arith.constant dense<0.000000e+00> : vector<512x16xf32>
    %43 = tpu.matmul %41, %42, %cst_23 {dimension_numbers = #tpu.dot_dimension_numbers<[1], [0], [0], [1], [0, 0, 1, 1], [], []>} : vector<512x128xbf16>, vector<128x16xbf16>, vector<512x16xf32> -> vector<512x16xf32>
    %c0_24 = arith.constant 0 : index
    %c0_25 = arith.constant 0 : index
    %44 = vector.load %arg9[%c0_24, %c0_25] : memref<1x16xf32, #tpu.memory_space<vmem>>, vector<1x16xf32>
    %45 = vector.broadcast %44 : vector<1x16xf32> to vector<512x16xf32>
    %46 = arith.addf %43, %45 : vector<512x16xf32>
    %47 = math.tanh %46 : vector<512x16xf32>
    %c0_26 = arith.constant 0 : index
    %c0_27 = arith.constant 0 : index
    %48 = vector.load %arg12[%c0_26, %c0_27] : memref<512x16xf32, #tpu.memory_space<vmem>>, vector<512x16xf32>
    tpu.vector_store %arg12[%c0_26, %c0_27], %47 {strides = array<i32>} : memref<512x16xf32, #tpu.memory_space<vmem>>, vector<512x16xf32>,
    return
  }
  func.func @transform_0(%arg0: i32) -> (i32, i32) {
    %c0_i32 = arith.constant 0 : i32
    %c0_i32_0 = arith.constant 0 : i32
    return %arg0, %c0_i32 : i32, i32
  }
  func.func @transform_1(%arg0: i32) -> (i32, i32) {
    %c0_i32 = arith.constant 0 : i32
    %c0_i32_0 = arith.constant 0 : i32
    %c0_i32_1 = arith.constant 0 : i32
    return %c0_i32, %c0_i32_0 : i32, i32
  }
  func.func @transform_2(%arg0: i32) -> (i32, i32) {
    %c0_i32 = arith.constant 0 : i32
    %c0_i32_0 = arith.constant 0 : i32
    %c0_i32_1 = arith.constant 0 : i32
    return %c0_i32, %c0_i32_0 : i32, i32
  }
  func.func @transform_3(%arg0: i32) -> (i32, i32) {
    %c0_i32 = arith.constant 0 : i32
    %c0_i32_0 = arith.constant 0 : i32
    %c0_i32_1 = arith.constant 0 : i32
    return %c0_i32, %c0_i32_0 : i32, i32
  }
  func.func @transform_4(%arg0: i32) -> (i32, i32) {
    %c0_i32 = arith.constant 0 : i32
    %c0_i32_0 = arith.constant 0 : i32
    %c0_i32_1 = arith.constant 0 : i32
    return %c0_i32, %c0_i32_0 : i32, i32
  }
  func.func @transform_5(%arg0: i32) -> (i32, i32) {
    %c0_i32 = arith.constant 0 : i32
    %c0_i32_0 = arith.constant 0 : i32
    %c0_i32_1 = arith.constant 0 : i32
    return %c0_i32, %c0_i32_0 : i32, i32
  }
  func.func @transform_6(%arg0: i32) -> (i32, i32) {
    %c0_i32 = arith.constant 0 : i32
    %c0_i32_0 = arith.constant 0 : i32
    %c0_i32_1 = arith.constant 0 : i32
    return %c0_i32, %c0_i32_0 : i32, i32
  }
  func.func @transform_7(%arg0: i32) -> (i32, i32) {
    %c0_i32 = arith.constant 0 : i32
    %c0_i32_0 = arith.constant 0 : i32
    %c0_i32_1 = arith.constant 0 : i32
    return %c0_i32, %c0_i32_0 : i32, i32
  }
  func.func @transform_8(%arg0: i32) -> (i32, i32) {
    %c0_i32 = arith.constant 0 : i32
    %c0_i32_0 = arith.constant 0 : i32
    %c0_i32_1 = arith.constant 0 : i32
    return %c0_i32, %c0_i32_0 : i32, i32
  }
  func.func @transform_9(%arg0: i32) -> (i32, i32) {
    %c0_i32 = arith.constant 0 : i32
    %c0_i32_0 = arith.constant 0 : i32
    return %c0_i32, %arg0 : i32, i32
  }
  func.func @transform_10(%arg0: i32) -> (i32, i32) {
    %c0_i32 = arith.constant 0 : i32
    %c0_i32_0 = arith.constant 0 : i32
    return %arg0, %c0_i32 : i32, i32
  }
  func.func @transform_11(%arg0: i32) -> (i32, i32) {
    %c0_i32 = arith.constant 0 : i32
    %c0_i32_0 = arith.constant 0 : i32
    return %arg0, %c0_i32 : i32, i32
  }
}

</mosaic_0001>

<bundles_post_ra>
// kernel: wavtokenizer_forward.1
= control target key start
LH: loop header
LB: loop body
LE: loop exit
PB: predicated region body
PF: predicated region fallthrough
CT: control target
= control target key end

     0   :  { %s12109_s0 = inlined_call_operand.vmem [shape: f32[1024,16], index: 0, kind: input, shape index: {}]   ;;  %s12110_s1 = inlined_call_operand.vmem [shape: bf16[16,128], index: 1, kind: input, shape index: {}]   ;;  %s12111_s2 = inlined_call_operand.vmem [shape: f32[1,128], index: 2, kind: input, shape index: {}]   ;;  %s12112_s3 = inlined_call_operand.vmem [shape: bf16[128,256], index: 3, kind: input, shape index: {}]   ;;  %s12113_s4 = inlined_call_operand.vmem [shape: bf16[256,128], index: 4, kind: input, shape index: {}]   ;;  %s12114_s5 = inlined_call_operand.vmem [shape: bf16[256,128], index: 5, kind: input, shape index: {}]   ;;  %s12115_s6 = inlined_call_operand.vmem [shape: f32[1,256], index: 6, kind: input, shape index: {}]   ;;  %s12116_s7 = inlined_call_operand.vmem [shape: bf16[128,16], index: 7, kind: input, shape index: {}]   ;;  %s12117_s8 = inlined_call_operand.vmem [shape: f32[1,16], index: 8, kind: input, shape index: {}]   ;;  %s12118_s9 = inlined_call_operand.hbm [shape: s32[1,1024], index: 9, kind: output, shape index: {0}]   ;;  %s12119_s10 = inlined_call_operand.hbm [shape: f32[1024,128], index: 10, kind: output, shape index: {1}]   ;;  %s12120_s11 = inlined_call_operand.vmem [shape: f32[1024,16], index: 11, kind: output, shape index: {2}]  }
   0x1   :  { %12182 = sst [smem:[#allocation93_spill]] %s12109_s0 }
   0x2   :  { %12183 = sst [smem:[#allocation94_spill]] %s12110_s1 }
   0x3   :  { %12184 = sst [smem:[#allocation95_spill]] %s12111_s2 }
   0x4   :  { %12185 = sst [smem:[#allocation96_spill]] %s12112_s3 }
   0x5   :  { %12186 = sst [smem:[#allocation97_spill]] %s12113_s4 }
   0x6   :  { %12187 = sst [smem:[#allocation98_spill]] %s12114_s5 }
   0x7   :  { %12188 = sst [smem:[#allocation99_spill]] %s12115_s6 }
   0x8   :  { %12189 = sst [smem:[#allocation100_spill]] %s12116_s7 }
   0x9   :  { %17 = vsyncpa [#allocation3], 0 }
   0xa   :  { %19 = vsyncpa [#allocation3 + $0x1], 0 }
   0xb   :  { %20 = vsyncpa [#allocation5], 0 }
   0xc   :  { %22 = vsyncpa [#allocation5 + $0x1], 0  ;;  %s8025_s17 = smov 0   ;;  %s8027_s18 = smov 0  }
   0xd   :  { %s8029_s19 = smov 0   ;;  %s8031_s20 = smov 0  }
   0xe LB: > { %s8046_s21 = sadd.s32 4294967295, %s7959_s20   ;;  %s6835_s22 = sadd.s32 4294967294, %s7959_s20   ;;  %s7959_s20 = sphi %s8031_s20, %s12609_s20   ;;  %s7955_s19 = sphi %s8029_s19, %s12608_s19   ;;  %s7951_s18 = sphi %s8027_s18, %s12607_s18   ;;  %s7947_s17 = sphi %s8025_s17, %s12606_s17  }
   0xf   : > { %s8050_s23 = sadd.s32 1, %s7959_s20   ;;  %s229_s24 = sadd.s32 1, %s7955_s19 }
  0x10   : > { %s226_s25 = ssub.s32 %s7959_s20, %s8050_s23  ;;  %p239_p0 = scmp.ne.s32.totalorder %s7955_s19, %s7951_s18 }
  0x11   : > { %p227_p1 = scmp.eq.s32.totalorder %s226_s25, 0  ;;  %p240_p2 = scmp.eq.s32.totalorder %s8046_s21, 1 }
  0x12   : > { %p245_p3 = scmp.ne.s32.totalorder %s7951_s18, %s7947_s17  ;;  %p246_p4 = scmp.eq.s32.totalorder %s6835_s22, 1 }
  0x13   : > { %s8061_s26 = scalar_select %p227_p1, %s7955_s19, %s229_s24  }
  0x14   : > { %p8063_p5 = por %p240_p2, %p239_p0  ;;  %p8067_p6 = por %p246_p4, %p245_p3 }
  0x15   : > { %p6838_p7 = scmp.ge.s32.totalorder %s7959_s20, 1  ;;  %p349_p8 = scmp.lt.s32.totalorder %s7959_s20, 3 }
  0x17   : > { %p350_p9 = pnand %p6838_p7, %p349_p8 }
  0x19   : > { %353 = sbr.rel (%p350_p9) target bundleno = 2352 (0x930), region = 56 }
  0x1e   : > { %s12192_s1 = sld [smem:[#allocation94_spill]]  ;;  %s6841_s12 = sshll.u32 %s8046_s21, 6  ;;  %vm522_vm0 = vcmask 130048  }
  0x1f   : > { %p400_p10 = scmp.lt.s32.totalorder %s6841_s12, 127  ;;  %s12193_s0 = sld [smem:[#allocation93_spill]] }
  0x20   : > { %s12194_s3 = sld [smem:[#allocation96_spill]]  ;;  %s9582_s24 = sand.u32 1, %s7951_s18  }
  0x21   : > { %s12611_s12 = smov (!%p400_p10, %s6841_s12), 127  ;;  %s12195_s2 = sld [smem:[#allocation95_spill]] }
  0x22   : > { %s12121_s13 = sshll.u32 %s12611_s12, 3  ;;  %s12196_s6 = sld [smem:[#allocation99_spill]] }
  0x23   : > { %s12201_s4 = sld [smem:[#allocation97_spill]]  ;;  %s6840_s25 = sshll.u32 %s9582_s24, 9 }
  0x24   : > { %v7496_v0 = vld [vmem:[%s12192_s1] sm:$0xff]  ;;  %s12249_s5 = sld [smem:[#allocation98_spill]]  ;;  %s9606_s29 = scalar_lea.vmem [#allocation4], %s6840_s25 }
  0x25   : > { %626 = vmatpush.bf16.msra.mxu0 %v7496_v0  ;;  %s8085_s16 = scalar_lea.vmem %s12193_s0, %s12121_s13  ;;  %s12429_s7 = sld [smem:[#allocation100_spill]] }
  0x26   : > { %v414_v1 = vld [vmem:[%s8085_s16] sm:$0xff]  ;;  %v415_v2 = vld [vmem:[%s8085_s16 + $0x8] sm:$0xff]  ;;  %v416_v4 = vld [vmem:[%s8085_s16 + $0x10] sm:$0xff]  ;;  %s12545_s30 = sshll.u32 %s12611_s12, 3  ;;  %s6839_s12 = sshll.u32 %s9582_s24, 2 }
  0x27   : > { %v478_v3 = vpack.c.bf16 %v415_v2, %v414_v1  ;;  %v417_v5 = vld [vmem:[%s8085_s16 + $0x18] sm:$0xff]  ;;  %v418_v7 = vld [vmem:[%s8085_s16 + $0x20] sm:$0xff]  ;;  %v419_v8 = vld [vmem:[%s8085_s16 + $0x28] sm:$0xff]  ;;  %s11718_s0 = scalar_lea.vmem %s12120_s11, %s12545_s30  ;;  %s11827_s1 = scalar_lea.vmem [#allocation2], %s6839_s12 }
  0x28   : > { %v479_v6 = vpack.c.bf16 %v417_v5, %v416_v4  ;;  %v480_v9 = vpack.c.bf16 %v419_v8, %v418_v7  ;;  %v420_v10 = vld [vmem:[%s8085_s16 + $0x30] sm:$0xff]  ;;  %v421_v11 = vld [vmem:[%s8085_s16 + $0x38] sm:$0xff]  ;;  %v422_v13 = vld [vmem:[%s8085_s16 + $0x40] sm:$0xff]  ;;  %s7491_s13 = sshll.u32 %s8046_s21, 2  ;;  %s6694_s15 = sshll.u32 %s11827_s1, 4  ;;  %s6695_s15 = int_to_ptr.vmem [resolvable:$true] %s6694_s15 }
  0x29   : > { %6849 = vmatmul.msk.bf16.vlgmr.msra.gmra.mxu0 %vm522_vm0, %v478_v3  ;;  %v481_v12 = vpack.c.bf16 %v421_v11, %v420_v10  ;;  %v423_v14 = vld [vmem:[%s8085_s16 + $0x48] sm:$0xff]  ;;  %v424_v16 = vld [vmem:[%s8085_s16 + $0x50] sm:$0xff]  ;;  %v425_v17 = vld [vmem:[%s8085_s16 + $0x58] sm:$0xff]  ;;  %s6692_s30 = scalar_lea.hbm %s12118_s9, %s7491_s13  ;;  %s7885_s13 = scalar_lea.hbm %s12118_s9, 8 }
  0x2a   : > { %v482_v15 = vpack.c.bf16 %v423_v14, %v422_v13  ;;  %v483_v18 = vpack.c.bf16 %v425_v17, %v424_v16  ;;  %v6939_v19 = vld [vmem:[%s12194_s3 + $0x70] sm:$0xf]  ;;  %v7512_v20 = vld [vmem:[%s12194_s3 + $0x74] sm:$0xf0]  ;;  %v7511_v21 = vld [vmem:[%s12194_s3 + $0x74] sm:$0xf] }
  0x2b   : > { %v6940_v22 = vor.u32 %v7512_v20, %v6939_v19  ;;  %v6941_v23 = vld [vmem:[%s12194_s3 + $0x78] sm:$0xf0]  ;;  %v6931_v24 = vld [vmem:[%s12194_s3 + $0x60] sm:$0xf]  ;;  %v7510_v25 = vld [vmem:[%s12194_s3 + $0x64] sm:$0xf0] }
  0x2c   : > { %v6944_v26 = vor.u32 %v7511_v21, %v6941_v23  ;;  %v7509_v27 = vld [vmem:[%s12194_s3 + $0x64] sm:$0xf]  ;;  %v6933_v28 = vld [vmem:[%s12194_s3 + $0x68] sm:$0xf0]  ;;  %v6932_v29 = vor.u32 %v7510_v25, %v6931_v24  ;;  %v6923_v31 = vld [vmem:[%s12194_s3 + $0x50] sm:$0xf] }
  0x2d   : > { %980 = vmatpush.bf16.msra.mxu1 %v6940_v22  ;;  %v6936_v30 = vor.u32 %v7509_v27, %v6933_v28  ;;  %v7508_v32 = vld [vmem:[%s12194_s3 + $0x54] sm:$0xf0]  ;;  %v7507_v33 = vld [vmem:[%s12194_s3 + $0x54] sm:$0xf]  ;;  %v6925_v34 = vld [vmem:[%s12194_s3 + $0x58] sm:$0xf0] }
  0x2e   : > { %1149 = vmatpush.bf16.msra.mxu2 %v6944_v26  ;;  %v6924_v35 = vor.u32 %v7508_v32, %v6923_v31  ;;  %v6928_v36 = vor.u32 %v7507_v33, %v6925_v34  ;;  %v426_v37 = vld [vmem:[%s8085_s16 + $0x60] sm:$0xff]  ;;  %v427_v38 = vld [vmem:[%s8085_s16 + $0x68] sm:$0xff]  ;;  %v6907_v46 = vld [vmem:[%s12194_s3 + $0x30] sm:$0xf]  ;;  %s6696_s14 = sshll.u32 %s6692_s30, 4  ;;  %s6697_s14 = int_to_ptr.hbm [resolvable:$true] %s6696_s14 }
  0x2f   : > { %v6915_v39 = vld [vmem:[%s12194_s3 + $0x40] sm:$0xf]  ;;  %v7506_v40 = vld [vmem:[%s12194_s3 + $0x44] sm:$0xf0]  ;;  %v7505_v41 = vld [vmem:[%s12194_s3 + $0x44] sm:$0xf]  ;;  %v484_v42 = vpack.c.bf16 %v427_v38, %v426_v37 }
  0x30   : > { %v6916_v43 = vor.u32 %v7506_v40, %v6915_v39  ;;  %v6917_v44 = vld [vmem:[%s12194_s3 + $0x48] sm:$0xf0]  ;;  %v7504_v47 = vld [vmem:[%s12194_s3 + $0x34] sm:$0xf0]  ;;  %v7503_v48 = vld [vmem:[%s12194_s3 + $0x34] sm:$0xf] }
  0x31   : > { %981 = vmatpush.bf16.msra.mxu1 %v6932_v29  ;;  %v6920_v45 = vor.u32 %v7505_v41, %v6917_v44  ;;  %v6908_v49 = vor.u32 %v7504_v47, %v6907_v46  ;;  %v6909_v50 = vld [vmem:[%s12194_s3 + $0x38] sm:$0xf0]  ;;  %v6899_v52 = vld [vmem:[%s12194_s3 + $0x20] sm:$0xf]  ;;  %v7502_v53 = vld [vmem:[%s12194_s3 + $0x24] sm:$0xf0] }
  0x32   : > { %1150 = vmatpush.bf16.msra.mxu2 %v6936_v30  ;;  %v6912_v51 = vor.u32 %v7503_v48, %v6909_v50  ;;  %v7501_v54 = vld [vmem:[%s12194_s3 + $0x24] sm:$0xf]  ;;  %v6900_v55 = vor.u32 %v7502_v53, %v6899_v52  ;;  %v6901_v56 = vld [vmem:[%s12194_s3 + $0x28] sm:$0xf0]  ;;  %v6891_v58 = vld [vmem:[%s12194_s3 + $0x10] sm:$0xf] }
  0x33   : > { %v6904_v57 = vor.u32 %v7501_v54, %v6901_v56  ;;  %v7500_v59 = vld [vmem:[%s12194_s3 + $0x14] sm:$0xf0]  ;;  %v7499_v60 = vld [vmem:[%s12194_s3 + $0x14] sm:$0xf]  ;;  %v6893_v62 = vld [vmem:[%s12194_s3 + $0x18] sm:$0xf0] }
  0x34   : > { %v6892_v61 = vor.u32 %v7500_v59, %v6891_v58  ;;  %v428_v63 = vld [vmem:[%s8085_s16 + $0x70] sm:$0xff]  ;;  %v429_v0 = vld [vmem:[%s8085_s16 + $0x78] sm:$0xff]  ;;  %v6896_v1 = vor.u32 %v7499_v60, %v6893_v62  ;;  %v6883_v2 = vld [vmem:[%s12194_s3] sm:$0xf] }
  0x35   : > { %982 = vmatpush.bf16.msra.mxu1 %v6924_v35  ;;  %v7498_v3 = vld [vmem:[%s12194_s3 + $0x4] sm:$0xf0]  ;;  %v7497_v4 = vld [vmem:[%s12194_s3 + $0x4] sm:$0xf]  ;;  %v485_v5 = vpack.c.bf16 %v429_v0, %v428_v63  ;;  %v6885_v7 = vld [vmem:[%s12194_s3 + $0x8] sm:$0xf0] }
  0x36   : > { %1151 = vmatpush.bf16.msra.mxu2 %v6928_v36  ;;  %v6888_v8 = vor.u32 %v7497_v4, %v6885_v7  ;;  %v431_v10 = vld [vmem:[%s8085_s16 + $0x88] sm:$0xff]  ;;  %v8212_v13 = vld [vmem:[%s12195_s2] ss:$0 sm:$0xff]  ;;  %v432_v17 = vld [vmem:[%s8085_s16 + $0x90] sm:$0xff] }
  0x37   : > { %v434_v27 = vld [vmem:[%s8085_s16 + $0xa0] sm:$0xff]  ;;  %v435_v28 = vld [vmem:[%s8085_s16 + $0xa8] sm:$0xff]  ;;  %v436_v37 = vld [vmem:[%s8085_s16 + $0xb0] sm:$0xff] }
  0x38   : > { %v488_v30 = vpack.c.bf16 %v435_v28, %v434_v27  ;;  %v437_v38 = vld [vmem:[%s8085_s16 + $0xb8] sm:$0xff]  ;;  %v438_v47 = vld [vmem:[%s8085_s16 + $0xc0] sm:$0xff]  ;;  %v439_v48 = vld [vmem:[%s8085_s16 + $0xc8] sm:$0xff] }
  0x39   : > { %6850 = vmatmul.msk.bf16.gmra.mxu0 %vm522_vm0, %v479_v6  ;;  %983 = vmatpush.bf16.msra.mxu1 %v6916_v43  ;;  %v6884_v6 = vor.u32 %v7498_v3, %v6883_v2  ;;  %v489_v40 = vpack.c.bf16 %v437_v38, %v436_v37  ;;  %v490_v50 = vpack.c.bf16 %v439_v48, %v438_v47  ;;  %v441_v58 = vld [vmem:[%s8085_s16 + $0xd8] sm:$0xff]  ;;  %v442_v3 = vld [vmem:[%s8085_s16 + $0xe0] sm:$0xff]  ;;  %v443_v4 = vld [vmem:[%s8085_s16 + $0xe8] sm:$0xff]  ;;  %v12122_v48 = vlaneseq }
  0x3a   : > { %1152 = vmatpush.bf16.msra.mxu2 %v6920_v45 }
  0x3d   : > { %984 = vmatpush.bf16.msra.mxu1 %v6908_v49 }
  0x3e   : > { %1153 = vmatpush.bf16.msra.mxu2 %v6912_v51 }
  0x41   : > { %985 = vmatpush.bf16.msra.mxu1 %v6900_v55 }
  0x42   : > { %1154 = vmatpush.bf16.msra.mxu2 %v6904_v57  ;;  %v440_v57 = vld [vmem:[%s8085_s16 + $0xd0] sm:$0xff] }
  0x43   : > { %v491_v60 = vpack.c.bf16 %v441_v58, %v440_v57 }
  0x45   : > { %986 = vmatpush.bf16.msra.mxu1 %v6892_v61 }
  0x46   : > { %1155 = vmatpush.bf16.msra.mxu2 %v6896_v1 }
  0x49   : > { %6851 = vmatmul.msk.bf16.gmra.mxu0 %vm522_vm0, %v480_v9  ;;  %987 = vmatpush.bf16.msra.mxu1 %v6884_v6  ;;  %v430_v9 = vld [vmem:[%s8085_s16 + $0x80] sm:$0xff]  ;;  %v492_v6 = vpack.c.bf16 %v443_v4, %v442_v3 }
  0x4a   : > { %1156 = vmatpush.bf16.msra.mxu2 %v6888_v8  ;;  %v486_v11 = vpack.c.bf16 %v431_v10, %v430_v9 }
  0x59   : > { %6852 = vmatmul.msk.bf16.gmra.mxu0 %vm522_vm0, %v481_v12 }
  0x69   : > { %6853 = vmatmul.msk.bf16.gmra.mxu0 %vm522_vm0, %v482_v15 }
  0x79   : > { %6854 = vmatmul.msk.bf16.gmra.mxu0 %vm522_vm0, %v483_v18  ;;  %v433_v18 = vld [vmem:[%s8085_s16 + $0x98] sm:$0xff] }
  0x7a   : > { %v487_v19 = vpack.c.bf16 %v433_v18, %v432_v17 }
  0x89   : > { %6855 = vmatmul.msk.bf16.gmra.mxu0 %vm522_vm0, %v484_v42 }
  0x99   : > { %6856 = vmatmul.msk.bf16.gmra.mxu0 %vm522_vm0, %v485_v5 }
  0xa6   : > { %v628_v12 = vpop.f32.mrf.mxu0 }
  0xa7   : > { %v629_v14 = vadd.f32 %v8212_v13, %v628_v12 }
  0xa9   : > { %6857 = vmatmul.msk.bf16.gmra.mxu0 %vm522_vm0, %v486_v11  ;;  %7607 = vtanh.f32 %v629_v14  ;;  %v444_v14 = vld [vmem:[%s8085_s16 + $0xf0] sm:$0xff] }
  0xae   : > { %v630_v15 = vpop.f32.mrf.mxu0 }
  0xaf   : > { %v631_v16 = vadd.f32 %v8212_v13, %v630_v15  ;;  %v7608_v20 = vpop.eup %7607  ;;  %v445_v15 = vld [vmem:[%s8085_s16 + $0xf8] sm:$0xff] }
  0xb0   : > { %v493_v17 = vpack.c.bf16 %v445_v15, %v444_v14 }
  0xb1   : > { %7609 = vtanh.f32 %v631_v16 }
  0xb6   : > { %v633_v21 = vpop.f32.mrf.mxu0 }
  0xb7   : > { %v7610_v22 = vpop.eup %7609  ;;  %v634_v24 = vadd.f32 %v8212_v13, %v633_v21 }
  0xb8   : > { %v852_v23 = vpack.c.bf16 %v7610_v22, %v7608_v20 }
  0xb9   : > { %6858 = vmatmul.msk.bf16.gmra.mxu0 %vm522_vm0, %v487_v19  ;;  %7611 = vtanh.f32 %v634_v24  ;;  %v446_v24 = vld [vmem:[%s8085_s16 + $0x100] sm:$0xff] }
  0xba   : > { %988 = vmatmul.bf16.vlgmr.msra.gmra.mxu1 %v852_v23  ;;  %1157 = vmatmul.bf16.vlgmr.msra.gmra.mxu2 %v852_v23 }
  0xbe   : > { %v635_v25 = vpop.f32.mrf.mxu0 }
  0xbf   : > { %v636_v26 = vadd.f32 %v8212_v13, %v635_v25  ;;  %v7612_v29 = vpop.eup %7611  ;;  %v447_v25 = vld [vmem:[%s8085_s16 + $0x108] sm:$0xff] }
  0xc0   : > { %v494_v27 = vpack.c.bf16 %v447_v25, %v446_v24 }
  0xc1   : > { %7613 = vtanh.f32 %v636_v26 }
  0xc6   : > { %v638_v31 = vpop.f32.mrf.mxu0 }
  0xc7   : > { %v7614_v32 = vpop.eup %7613  ;;  %v639_v34 = vadd.f32 %v8212_v13, %v638_v31 }
  0xc8   : > { %v853_v33 = vpack.c.bf16 %v7614_v32, %v7612_v29 }
  0xc9   : > { %6859 = vmatmul.msk.bf16.gmra.mxu0 %vm522_vm0, %v488_v30  ;;  %7615 = vtanh.f32 %v639_v34  ;;  %v1318_v34 = vld [vmem:[%s12196_s6] sm:$0x3] }
  0xca   : > { %993 = vmatmul.bf16.gmra.mxu1 %v853_v33  ;;  %1162 = vmatmul.bf16.gmra.mxu2 %v853_v33  ;;  %v8262_v37 = vperm.slane %v1318_v34, 0 }
  0xce   : > { %v640_v35 = vpop.f32.mrf.mxu0 }
  0xcf   : > { %v641_v36 = vadd.f32 %v8212_v13, %v640_v35  ;;  %v7616_v39 = vpop.eup %7615  ;;  %v448_v35 = vld [vmem:[%s8085_s16 + $0x110] sm:$0xff] }
  0xd1   : > { %7617 = vtanh.f32 %v641_v36  ;;  %v449_v36 = vld [vmem:[%s8085_s16 + $0x118] sm:$0xff] }
  0xd6   : > { %v643_v41 = vpop.f32.mrf.mxu0 }
  0xd7   : > { %v7618_v42 = vpop.eup %7617  ;;  %v644_v44 = vadd.f32 %v8212_v13, %v643_v41 }
  0xd8   : > { %v854_v43 = vpack.c.bf16 %v7618_v42, %v7616_v39  ;;  %v495_v39 = vpack.c.bf16 %v449_v36, %v448_v35 }
  0xd9   : > { %6860 = vmatmul.msk.bf16.gmra.mxu0 %vm522_vm0, %v489_v40  ;;  %7619 = vtanh.f32 %v644_v44 }
  0xda   : > { %998 = vmatmul.bf16.gmra.mxu1 %v854_v43  ;;  %1167 = vmatmul.bf16.gmra.mxu2 %v854_v43 }
  0xde   : > { %v645_v45 = vpop.f32.mrf.mxu0 }
  0xdf   : > { %v646_v46 = vadd.f32 %v8212_v13, %v645_v45  ;;  %v7620_v49 = vpop.eup %7619 }
  0xe1   : > { %7621 = vtanh.f32 %v646_v46  ;;  %v8266_v46 = vperm.slane %v1318_v34, 1 }
  0xe6   : > { %v648_v51 = vpop.f32.mrf.mxu0 }
  0xe7   : > { %v7622_v52 = vpop.eup %7621  ;;  %v649_v54 = vadd.f32 %v8212_v13, %v648_v51 }
  0xe8   : > { %v855_v53 = vpack.c.bf16 %v7622_v52, %v7620_v49 }
  0xe9   : > { %6861 = vmatmul.msk.bf16.gmra.mxu0 %vm522_vm0, %v490_v50  ;;  %7623 = vtanh.f32 %v649_v54 }
  0xea   : > { %1003 = vmatmul.bf16.gmra.mxu1 %v855_v53  ;;  %1172 = vmatmul.bf16.gmra.mxu2 %v855_v53 }
  0xee   : > { %v650_v55 = vpop.f32.mrf.mxu0 }
  0xef   : > { %v651_v56 = vadd.f32 %v8212_v13, %v650_v55  ;;  %v7624_v59 = vpop.eup %7623  ;;  %v8272_v55 = vand.u32 127, %v12122_v48 }
  0xf1   : > { %7625 = vtanh.f32 %v651_v56 }
  0xf6   : > { %v653_v61 = vpop.f32.mrf.mxu0 }
  0xf7   : > { %v7626_v62 = vpop.eup %7625  ;;  %v654_v0 = vadd.f32 %v8212_v13, %v653_v61 }
  0xf8   : > { %v856_v63 = vpack.c.bf16 %v7626_v62, %v7624_v59  ;;  %v8276_v59 = vadd.s32 128, %v8272_v55  ;;  %v450_v62 = vld [vmem:[%s8085_s16 + $0x120] sm:$0xff] }
  0xf9   : > { %6862 = vmatmul.msk.bf16.gmra.mxu0 %vm522_vm0, %v491_v60  ;;  %7627 = vtanh.f32 %v654_v0 }
  0xfa   : > { %1008 = vmatmul.bf16.gmra.mxu1 %v856_v63  ;;  %1177 = vmatmul.bf16.gmra.mxu2 %v856_v63  ;;  %v451_v63 = vld [vmem:[%s8085_s16 + $0x128] sm:$0xff] }
  0xfb   : > { %v496_v3 = vpack.c.bf16 %v451_v63, %v450_v62 }
  0xfe   : > { %v655_v1 = vpop.f32.mrf.mxu0 }
  0xff   : > { %v656_v2 = vadd.f32 %v8212_v13, %v655_v1  ;;  %v7628_v5 = vpop.eup %7627 }
 0x101   : > { %7629 = vtanh.f32 %v656_v2 }
 0x106   : > { %v658_v7 = vpop.f32.mrf.mxu0 }
 0x107   : > { %v7630_v8 = vpop.eup %7629  ;;  %v659_v10 = vadd.f32 %v8212_v13, %v658_v7 }
 0x108   : > { %v857_v9 = vpack.c.bf16 %v7630_v8, %v7628_v5 }
 0x109   : > { %6863 = vmatmul.msk.bf16.gmra.mxu0 %vm522_vm0, %v492_v6  ;;  %7631 = vtanh.f32 %v659_v10 }
 0x10a   : > { %1013 = vmatmul.bf16.gmra.mxu1 %v857_v9  ;;  %1182 = vmatmul.bf16.gmra.mxu2 %v857_v9 }
 0x10e   : > { %v660_v11 = vpop.f32.mrf.mxu0 }
 0x10f   : > { %v661_v12 = vadd.f32 %v8212_v13, %v660_v11  ;;  %v7632_v16 = vpop.eup %7631 }
 0x111   : > { %7633 = vtanh.f32 %v661_v12 }
 0x116   : > { %v663_v18 = vpop.f32.mrf.mxu0 }
 0x117   : > { %v7634_v19 = vpop.eup %7633  ;;  %v664_v21 = vadd.f32 %v8212_v13, %v663_v18 }
 0x118   : > { %v858_v20 = vpack.c.bf16 %v7634_v19, %v7632_v16 }
 0x119   : > { %6864 = vmatmul.msk.bf16.gmra.mxu0 %vm522_vm0, %v493_v17  ;;  %7635 = vtanh.f32 %v664_v21 }
 0x11a   : > { %1018 = vmatmul.bf16.gmra.mxu1 %v858_v20  ;;  %1187 = vmatmul.bf16.gmra.mxu2 %v858_v20 }
 0x11e   : > { %v665_v22 = vpop.f32.mrf.mxu0 }
 0x11f   : > { %v666_v23 = vadd.f32 %v8212_v13, %v665_v22  ;;  %v7636_v26 = vpop.eup %7635 }
 0x121   : > { %7637 = vtanh.f32 %v666_v23 }
 0x126   : > { %v668_v28 = vpop.f32.mrf.mxu0 }
 0x127   : > { %v7638_v29 = vpop.eup %7637  ;;  %v669_v31 = vadd.f32 %v8212_v13, %v668_v28 }
 0x128   : > { %v859_v30 = vpack.c.bf16 %v7638_v29, %v7636_v26 }
 0x129   : > { %6865 = vmatmul.msk.bf16.gmra.mxu0 %vm522_vm0, %v494_v27  ;;  %7639 = vtanh.f32 %v669_v31 }
 0x12a   : > { %1023 = vmatmul.bf16.gmra.mxu1 %v859_v30  ;;  %1192 = vmatmul.bf16.gmra.mxu2 %v859_v30 }
 0x12e   : > { %v670_v32 = vpop.f32.mrf.mxu0 }
 0x12f   : > { %v671_v33 = vadd.f32 %v8212_v13, %v670_v32  ;;  %v7640_v38 = vpop.eup %7639 }
 0x131   : > { %7641 = vtanh.f32 %v671_v33 }
 0x136   : > { %v673_v40 = vpop.f32.mrf.mxu0 }
 0x137   : > { %v7642_v41 = vpop.eup %7641  ;;  %v989_v42 = vpop.f32.mrf.mxu1  ;;  %v674_v47 = vadd.f32 %v8212_v13, %v673_v40  ;;  %v453_v40 = vld [vmem:[%s8085_s16 + $0x138] sm:$0xff] }
 0x138   : > { %v1324_v43 = vsub.f32 %v8262_v37, %v989_v42  ;;  %v860_v44 = vpack.c.bf16 %v7642_v41, %v7640_v38 }
 0x139   : > { %6866 = vmatmul.msk.bf16.gmra.mxu0 %vm522_vm0, %v495_v39  ;;  %7643 = vtanh.f32 %v674_v47  ;;  %v452_v39 = vld [vmem:[%s8085_s16 + $0x130] sm:$0xff] }
 0x13a   : > { %v1711_v45 = vxor.u32 2147483647, %v1324_v43  ;;  %1028 = vmatmul.bf16.gmra.mxu1 %v860_v44  ;;  %1197 = vmatmul.bf16.gmra.mxu2 %v860_v44  ;;  %vm1583_vm1 = vcmp.lt.s32.totalorder %v1324_v43, 0 }
 0x13c   : > { %v1839_v50 = vsel %vm1583_vm1, %v1711_v45, %v1324_v43 }
 0x13d   : > { %v1158_v49 = vpop.f32.mrf.mxu2  ;;  %v1967_v58 = vand.u32 4294967040, %v1839_v50 }
 0x13e   : > { %v1325_v51 = vsub.f32 %v8266_v46, %v1158_v49  ;;  %v675_v52 = vpop.f32.mrf.mxu0  ;;  %v497_v49 = vpack.c.bf16 %v453_v40, %v452_v39 }
 0x13f   : > { %v676_v53 = vadd.f32 %v8212_v13, %v675_v52  ;;  %v991_v54 = vpop.f32.mrf.mxu1  ;;  %v7644_v1 = vpop.eup %7643  ;;  %v2095_v4 = vor.u32 %v1967_v58, %v8272_v55 }
 0x140   : > { %vm1584_vm2 = vcmp.lt.s32.totalorder %v1325_v51, 0  ;;  %v1712_v56 = vxor.u32 2147483647, %v1325_v51  ;;  %v1326_v57 = vsub.f32 %v8262_v37, %v991_v54 }
 0x141   : > { %7645 = vtanh.f32 %v676_v53 }
 0x142   : > { %v1840_v60 = vsel %vm1584_vm2, %v1712_v56, %v1325_v51  ;;  %v1713_v61 = vxor.u32 2147483647, %v1326_v57  ;;  %vm1585_vm3 = vcmp.lt.s32.totalorder %v1326_v57, 0 }
 0x143   : > { %v1968_v0 = vand.u32 4294967040, %v1840_v60 }
 0x144   : > { %v1841_v6 = vsel %vm1585_vm3, %v1713_v61, %v1326_v57 }
 0x145   : > { %v1160_v2 = vpop.f32.mrf.mxu2  ;;  %v2096_v5 = vor.u32 %v1968_v0, %v8276_v59  ;;  %v1969_v15 = vand.u32 4294967040, %v1841_v6 }
 0x146   : > { %v1327_v7 = vsub.f32 %v8266_v46, %v1160_v2  ;;  %v678_v8 = vpop.f32.mrf.mxu0 }
 0x147   : > { %v7646_v9 = vpop.eup %7645  ;;  %v994_v10 = vpop.f32.mrf.mxu1  ;;  %vm2223_vm4 = vcmp.lt.s32.totalorder %v2095_v4, %v2096_v5  ;;  %v679_v21 = vadd.f32 %v8212_v13, %v678_v8  ;;  %v2097_v25 = vor.u32 %v1969_v15, %v8272_v55 }
 0x148   : > { %vm1586_vm5 = vcmp.lt.s32.totalorder %v1327_v7, 0  ;;  %v1714_v11 = vxor.u32 2147483647, %v1327_v7  ;;  %v1328_v12 = vsub.f32 %v8262_v37, %v994_v10  ;;  %v861_v14 = vpack.c.bf16 %v7646_v9, %v7644_v1 }
 0x149   : > { %6867 = vmatmul.msk.bf16.gmra.mxu0 %vm522_vm0, %v496_v3  ;;  %v8285_v16 = vsel %vm2223_vm4, %v2095_v4, %v2096_v5  ;;  %7647 = vtanh.f32 %v679_v21  ;;  %v454_v21 = vld [vmem:[%s8085_s16 + $0x140] sm:$0xff] }
 0x14a   : > { %v1842_v17 = vsel %vm1586_vm5, %v1714_v11, %v1327_v7  ;;  %vm1587_vm6 = vcmp.lt.s32.totalorder %v1328_v12, 0  ;;  %v1715_v18 = vxor.u32 2147483647, %v1328_v12  ;;  %1033 = vmatmul.bf16.gmra.mxu1 %v861_v14  ;;  %1202 = vmatmul.bf16.gmra.mxu2 %v861_v14  ;;  %v2226_v19 = vshra.s32 %v8285_v16, 16 }
 0x14b   : > { %v1970_v20 = vand.u32 4294967040, %v1842_v17 }
 0x14c   : > { %v1843_v22 = vsel %vm1587_vm6, %v1715_v18, %v1328_v12  ;;  %v8289_v23 = vcvt.s32.f32 %v2226_v19 }
 0x14d   : > { %v1163_v24 = vpop.f32.mrf.mxu2  ;;  %v2098_v26 = vor.u32 %v1970_v20, %v8276_v59  ;;  %v1971_v29 = vand.u32 4294967040, %v1843_v22  ;;  %v455_v22 = vld [vmem:[%s8085_s16 + $0x148] sm:$0xff] }
 0x14e   : > { %v1329_v27 = vsub.f32 %v8266_v46, %v1163_v24  ;;  %2229 = vmin.xlane.f32.xlu0 %v8289_v23  ;;  %v680_v28 = vpop.f32.mrf.mxu0 }
 0x14f   : > { %v681_v30 = vadd.f32 %v8212_v13, %v680_v28  ;;  %v996_v31 = vpop.f32.mrf.mxu1  ;;  %vm2239_vm7 = vcmp.lt.s32.totalorder %v2097_v25, %v2098_v26  ;;  %v2099_v43 = vor.u32 %v1971_v29, %v8272_v55  ;;  %v7648_v45 = vpop.eup %7647 }
 0x150   : > { %vm1588_vm8 = vcmp.lt.s32.totalorder %v1329_v27, 0  ;;  %v1716_v32 = vxor.u32 2147483647, %v1329_v27  ;;  %v1330_v33 = vsub.f32 %v8262_v37, %v996_v31  ;;  %v8297_v34 = vsel %vm2239_vm7, %v2097_v25, %v2098_v26 }
 0x151   : > { %7649 = vtanh.f32 %v681_v30  ;;  %v2242_v35 = vshra.s32 %v8297_v34, 16  ;;  %v498_v30 = vpack.c.bf16 %v455_v22, %v454_v21 }
 0x152   : > { %v1844_v36 = vsel %vm1588_vm8, %v1716_v32, %v1329_v27  ;;  %vm1589_vm9 = vcmp.lt.s32.totalorder %v1330_v33, 0  ;;  %v1717_v38 = vxor.u32 2147483647, %v1330_v33 }
 0x153   : > { %v1972_v41 = vand.u32 4294967040, %v1844_v36  ;;  %v8302_v42 = vcvt.s32.f32 %v2242_v35 }
 0x154   : > { %v1845_v44 = vsel %vm1589_vm9, %v1717_v38, %v1330_v33 }
 0x155   : > { %v1165_v47 = vpop.f32.mrf.mxu2  ;;  %v2100_v50 = vor.u32 %v1972_v41, %v8276_v59  ;;  %v1973_v54 = vand.u32 4294967040, %v1845_v44 }
 0x156   : > { %v1331_v51 = vsub.f32 %v8266_v46, %v1165_v47  ;;  %2245 = vmin.xlane.f32.xlu0 %v8302_v42  ;;  %v683_v52 = vpop.f32.mrf.mxu0 }
 0x157   : > { %v7650_v53 = vpop.eup %7649  ;;  %v999_v56 = vpop.f32.mrf.mxu1  ;;  %vm2255_vm10 = vcmp.lt.s32.totalorder %v2099_v43, %v2100_v50  ;;  %v684_v2 = vadd.f32 %v8212_v13, %v683_v52  ;;  %v2101_v3 = vor.u32 %v1973_v54, %v8272_v55 }
 0x158   : > { %vm1590_vm11 = vcmp.lt.s32.totalorder %v1331_v51, 0  ;;  %v1718_v57 = vxor.u32 2147483647, %v1331_v51  ;;  %v1332_v58 = vsub.f32 %v8262_v37, %v999_v56  ;;  %v862_v60 = vpack.c.bf16 %v7650_v53, %v7648_v45 }
 0x159   : > { %6868 = vmatmul.msk.bf16.gmra.mxu0 %vm522_vm0, %v497_v49  ;;  %v8310_v61 = vsel %vm2255_vm10, %v2099_v43, %v2100_v50  ;;  %7651 = vtanh.f32 %v684_v2 }
 0x15a   : > { %v1846_v62 = vsel %vm1590_vm11, %v1718_v57, %v1331_v51  ;;  %vm1591_vm12 = vcmp.lt.s32.totalorder %v1332_v58, 0  ;;  %v1719_v63 = vxor.u32 2147483647, %v1332_v58  ;;  %1038 = vmatmul.bf16.gmra.mxu1 %v862_v60  ;;  %1207 = vmatmul.bf16.gmra.mxu2 %v862_v60  ;;  %v2258_v0 = vshra.s32 %v8310_v61, 16 }
 0x15b   : > { %v1974_v1 = vand.u32 4294967040, %v1846_v62 }
 0x15c   : > { %v1847_v4 = vsel %vm1591_vm12, %v1719_v63, %v1332_v58  ;;  %v8315_v5 = vcvt.s32.f32 %v2258_v0 }
 0x15d   : > { %v1168_v6 = vpop.f32.mrf.mxu2  ;;  %v2102_v7 = vor.u32 %v1974_v1, %v8276_v59  ;;  %v1975_v10 = vand.u32 4294967040, %v1847_v4  ;;  %v456_v4 = vld [vmem:[%s8085_s16 + $0x150] sm:$0xff] }
 0x15e   : > { %v1333_v8 = vsub.f32 %v8266_v46, %v1168_v6  ;;  %2261 = vmin.xlane.f32.xlu1 %v8315_v5  ;;  %v685_v9 = vpop.f32.mrf.mxu0  ;;  %v457_v6 = vld [vmem:[%s8085_s16 + $0x158] sm:$0xff] }
 0x15f   : > { %v686_v11 = vadd.f32 %v8212_v13, %v685_v9  ;;  %v1001_v12 = vpop.f32.mrf.mxu1  ;;  %vm2271_vm13 = vcmp.lt.s32.totalorder %v2101_v3, %v2102_v7  ;;  %v2103_v26 = vor.u32 %v1975_v10, %v8272_v55  ;;  %v7652_v28 = vpop.eup %7651 }
 0x160   : > { %vm1592_vm14 = vcmp.lt.s32.totalorder %v1333_v8, 0  ;;  %v1720_v14 = vxor.u32 2147483647, %v1333_v8  ;;  %v1334_v15 = vsub.f32 %v8262_v37, %v1001_v12  ;;  %v8322_v17 = vsel %vm2271_vm13, %v2101_v3, %v2102_v7 }
 0x161   : > { %7653 = vtanh.f32 %v686_v11  ;;  %v2274_v18 = vshra.s32 %v8322_v17, 16  ;;  %v499_v12 = vpack.c.bf16 %v457_v6, %v456_v4 }
 0x162   : > { %v1848_v19 = vsel %vm1592_vm14, %v1720_v14, %v1333_v8  ;;  %vm1593_vm15 = vcmp.lt.s32.totalorder %v1334_v15, 0  ;;  %v1721_v20 = vxor.u32 2147483647, %v1334_v15 }
 0x163   : > { %v1976_v24 = vand.u32 4294967040, %v1848_v19  ;;  %v8327_v25 = vcvt.s32.f32 %v2274_v18 }
 0x164   : > { %v1849_v27 = vsel %vm1593_vm15, %v1721_v20, %v1334_v15 }
 0x165   : > { %v1170_v29 = vpop.f32.mrf.mxu2  ;;  %v2104_v31 = vor.u32 %v1976_v24, %v8276_v59  ;;  %v1977_v36 = vand.u32 4294967040, %v1849_v27 }
 0x166   : > { %v1335_v32 = vsub.f32 %v8266_v46, %v1170_v29  ;;  %2277 = vmin.xlane.f32.xlu1 %v8327_v25  ;;  %v688_v33 = vpop.f32.mrf.mxu0 }
 0x167   : > { %v7654_v35 = vpop.eup %7653  ;;  %v1004_v38 = vpop.f32.mrf.mxu1  ;;  %vm2287_vm1 = vcmp.lt.s32.totalorder %v2103_v26, %v2104_v31  ;;  %v689_v50 = vadd.f32 %v8212_v13, %v688_v33  ;;  %v2105_v51 = vor.u32 %v1977_v36, %v8272_v55 }
 0x168   : > { %vm1594_vm2 = vcmp.lt.s32.totalorder %v1335_v32, 0  ;;  %v1722_v39 = vxor.u32 2147483647, %v1335_v32  ;;  %v1336_v40 = vsub.f32 %v8262_v37, %v1004_v38  ;;  %v863_v41 = vpack.c.bf16 %v7654_v35, %v7652_v28 }
 0x169   : > { %6869 = vmatmul.msk.bf16.gmra.mxu0 %vm522_vm0, %v498_v30  ;;  %v8335_v43 = vsel %vm2287_vm1, %v2103_v26, %v2104_v31  ;;  %7655 = vtanh.f32 %v689_v50  ;;  %v458_v31 = vld [vmem:[%s8085_s16 + $0x160] sm:$0xff] }
 0x16a   : > { %v1850_v44 = vsel %vm1594_vm2, %v1722_v39, %v1335_v32  ;;  %vm1595_vm3 = vcmp.lt.s32.totalorder %v1336_v40, 0  ;;  %v1723_v45 = vxor.u32 2147483647, %v1336_v40  ;;  %1043 = vmatmul.bf16.gmra.mxu1 %v863_v41  ;;  %1212 = vmatmul.bf16.gmra.mxu2 %v863_v41  ;;  %v2290_v47 = vshra.s32 %v8335_v43, 16  ;;  %v459_v32 = vld [vmem:[%s8085_s16 + $0x168] sm:$0xff] }
 0x16b   : > { %v1978_v49 = vand.u32 4294967040, %v1850_v44  ;;  %v500_v36 = vpack.c.bf16 %v459_v32, %v458_v31 }
 0x16c   : > { %v1851_v52 = vsel %vm1595_vm3, %v1723_v45, %v1336_v40  ;;  %v8340_v53 = vcvt.s32.f32 %v2290_v47 }
 0x16d   : > { %v1173_v54 = vpop.f32.mrf.mxu2  ;;  %v2106_v56 = vor.u32 %v1978_v49, %v8276_v59  ;;  %v1979_v60 = vand.u32 4294967040, %v1851_v52  ;;  %v461_v52 = vld [vmem:[%s8085_s16 + $0x178] sm:$0xff] }
 0x16e   : > { %v1337_v57 = vsub.f32 %v8266_v46, %v1173_v54  ;;  %2293 = vmin.xlane.f32.xlu2 %v8340_v53  ;;  %v690_v58 = vpop.f32.mrf.mxu0 }
 0x16f   : > { %v691_v62 = vadd.f32 %v8212_v13, %v690_v58  ;;  %v8346_v63 = vpop.f32.mrf.mxu1  ;;  %vm2303_vm4 = vcmp.lt.s32.totalorder %v2105_v51, %v2106_v56  ;;  %v2107_v9 = vor.u32 %v1979_v60, %v8272_v55  ;;  %v7656_v10 = vpop.eup %7655 }
 0x170   : > { %vm1596_vm5 = vcmp.lt.s32.totalorder %v1337_v57, 0  ;;  %v1724_v0 = vxor.u32 2147483647, %v1337_v57  ;;  %v8348_v1 = vsel %vm2303_vm4, %v2105_v51, %v2106_v56  ;;  %v460_v51 = vld [vmem:[%s8085_s16 + $0x170] sm:$0xff] }
 0x171   : > { %7657 = vtanh.f32 %v691_v62  ;;  %v2306_v2 = vshra.s32 %v8348_v1, 16 }
 0x172   : > { %v1852_v3 = vsel %vm1596_vm5, %v1724_v0, %v1337_v57  ;;  %v501_v57 = vpack.c.bf16 %v461_v52, %v460_v51 }
 0x173   : > { %v1980_v7 = vand.u32 4294967040, %v1852_v3  ;;  %v8353_v8 = vcvt.s32.f32 %v2306_v2 }
 0x175   : > { %v8356_v11 = vpop.f32.mrf.mxu2  ;;  %v2108_v14 = vor.u32 %v1980_v7, %v8276_v59 }
 0x176   : > { %2309 = vmin.xlane.f32.xlu2 %v8353_v8  ;;  %v693_v15 = vpop.f32.mrf.mxu0  ;;  %v1339_v31 = vsub.f32 %v8266_v46, %v8356_v11 }
 0x177   : > { %v7658_v18 = vpop.eup %7657  ;;  %v8360_v19 = vpop.f32.mrf.mxu1  ;;  %vm2319_vm6 = vcmp.lt.s32.totalorder %v2107_v9, %v2108_v14  ;;  %v694_v24 = vadd.f32 %v8212_v13, %v693_v15 }
 0x178   : > { %v864_v20 = vpack.c.bf16 %v7658_v18, %v7656_v10  ;;  %v8363_v21 = vsel %vm2319_vm6, %v2107_v9, %v2108_v14  ;;  %v462_v9 = vld [vmem:[%s8085_s16 + $0x180] sm:$0xff]  ;;  %v463_v10 = vld [vmem:[%s8085_s16 + $0x188] sm:$0xff]  ;;  %vm1598_vm8 = vcmp.lt.s32.totalorder %v1339_v31, 0  ;;  %v1340_v11 = vsub.f32 %v8262_v37, %v8360_v19 }
 0x179   : > { %6870 = vmatmul.msk.bf16.gmra.mxu0 %vm522_vm0, %v499_v12  ;;  %v2322_v22 = vshra.s32 %v8363_v21, 16  ;;  %7659 = vtanh.f32 %v694_v24  ;;  %v502_v15 = vpack.c.bf16 %v463_v10, %v462_v9 }
 0x17a   : > { %1048 = vmatmul.bf16.gmra.mxu1 %v864_v20  ;;  %1217 = vmatmul.bf16.gmra.mxu2 %v864_v20  ;;  %v1727_v9 = vxor.u32 2147483647, %v1340_v11  ;;  %vm1599_vm9 = vcmp.lt.s32.totalorder %v1340_v11, 0 }
 0x17b   : > { %v8367_v26 = vcvt.s32.f32 %v2322_v22 }
 0x17d   : > { %v8369_v27 = vpop.f32.mrf.mxu2 }
 0x17e   : > { %2325 = vmin.xlane.f32.xlu2 %v8367_v26  ;;  %v695_v28 = vpop.f32.mrf.mxu0 }
 0x17f   : > { %v696_v29 = vadd.f32 %v8212_v13, %v695_v28  ;;  %v8373_v30 = vpop.f32.mrf.mxu1  ;;  %v7660_v33 = vpop.eup %7659 }
 0x181   : > { %7661 = vtanh.f32 %v696_v29  ;;  %v1338_v29 = vsub.f32 %v8262_v37, %v8346_v63 }
 0x183   : > { %vm1597_vm7 = vcmp.lt.s32.totalorder %v1338_v29, 0 }
 0x185   : > { %v8377_v35 = vpop.f32.mrf.mxu2 }
 0x186   : > { %v698_v38 = vpop.f32.mrf.mxu0 }
 0x187   : > { %v7662_v39 = vpop.eup %7661  ;;  %v8379_v40 = vpop.f32.mrf.mxu1  ;;  %v699_v44 = vadd.f32 %v8212_v13, %v698_v38 }
 0x188   : > { %v865_v41 = vpack.c.bf16 %v7662_v39, %v7660_v33  ;;  %v1725_v39 = vxor.u32 2147483647, %v1338_v29 }
 0x189   : > { %6871 = vmatmul.msk.bf16.gmra.mxu0 %vm522_vm0, %v500_v36  ;;  %7663 = vtanh.f32 %v699_v44  ;;  %v464_v44 = vld [vmem:[%s8085_s16 + $0x190] sm:$0xff] }
 0x18a   : > { %1053 = vmatmul.bf16.gmra.mxu1 %v865_v41  ;;  %1222 = vmatmul.bf16.gmra.mxu2 %v865_v41  ;;  %v1726_v41 = vxor.u32 2147483647, %v1339_v31  ;;  %v1853_v63 = vsel %vm1597_vm7, %v1725_v39, %v1338_v29 }
 0x18c   : > { %v1854_v51 = vsel %vm1598_vm8, %v1726_v41, %v1339_v31  ;;  %v2225_v31 = vand.u32 65535, %v8285_v16  ;;  %v1344_v16 = vsub.f32 %v8262_v37, %v8379_v40 }
 0x18d   : > { %v8383_v45 = vpop.f32.mrf.mxu2 }
 0x18e   : > { %v700_v47 = vpop.f32.mrf.mxu0  ;;  %vm1603_vm15 = vcmp.lt.s32.totalorder %v1344_v16, 0 }
 0x18f   : > { %v701_v49 = vadd.f32 %v8212_v13, %v700_v47  ;;  %v8386_v50 = vpop.f32.mrf.mxu1  ;;  %v7664_v54 = vpop.eup %7663  ;;  %v465_v47 = vld [vmem:[%s8085_s16 + $0x198] sm:$0xff] }
 0x191   : > { %7665 = vtanh.f32 %v701_v49 }
 0x195   : > { %v8390_v56 = vpop.f32.mrf.mxu2 }
 0x196   : > { %v703_v58 = vpop.f32.mrf.mxu0 }
 0x197   : > { %v7666_v60 = vpop.eup %7665  ;;  %v8392_v62 = vpop.f32.mrf.mxu1  ;;  %v704_v2 = vadd.f32 %v8212_v13, %v703_v58 }
 0x198   : > { %v866_v0 = vpack.c.bf16 %v7666_v60, %v7664_v54  ;;  %v503_v54 = vpack.c.bf16 %v465_v47, %v464_v44  ;;  %v1345_v47 = vsub.f32 %v8266_v46, %v8383_v45 }
 0x199   : > { %6872 = vmatmul.msk.bf16.gmra.mxu0 %vm522_vm0, %v501_v57  ;;  %7667 = vtanh.f32 %v704_v2  ;;  %v1341_v57 = vsub.f32 %v8266_v46, %v8369_v27  ;;  %v1981_v2 = vand.u32 4294967040, %v1853_v63  ;;  %v1342_v27 = vsub.f32 %v8262_v37, %v8373_v30  ;;  %v466_v63 = vld [vmem:[%s8085_s16 + $0x1a0] sm:$0xff] }
 0x19a   : > { %1058 = vmatmul.bf16.gmra.mxu1 %v866_v0  ;;  %1227 = vmatmul.bf16.gmra.mxu2 %v866_v0  ;;  %vm1604_vm1 = vcmp.lt.s32.totalorder %v1345_v47, 0 }
 0x19b   : > { %v1728_v10 = vxor.u32 2147483647, %v1341_v57  ;;  %vm1600_vm10 = vcmp.lt.s32.totalorder %v1341_v57, 0  ;;  %vm1601_vm12 = vcmp.lt.s32.totalorder %v1342_v27, 0 }
 0x19d   : > { %v8396_v3 = vpop.f32.mrf.mxu2 }
 0x19e   : > { %v705_v4 = vpop.f32.mrf.mxu0 }
 0x19f   : > { %v706_v6 = vadd.f32 %v8212_v13, %v705_v4  ;;  %v8399_v7 = vpop.f32.mrf.mxu1  ;;  %v7668_v12 = vpop.eup %7667  ;;  %v1982_v4 = vand.u32 4294967040, %v1854_v51  ;;  %v467_v51 = vld [vmem:[%s8085_s16 + $0x1a8] sm:$0xff] }
 0x1a1   : > { %7669 = vtanh.f32 %v706_v6 }
 0x1a5   : > { %v8403_v14 = vpop.f32.mrf.mxu2 }
 0x1a6   : > { %v708_v18 = vpop.f32.mrf.mxu0 }
 0x1a7   : > { %v7670_v20 = vpop.eup %7669  ;;  %v8405_v22 = vpop.f32.mrf.mxu1  ;;  %v709_v28 = vadd.f32 %v8212_v13, %v708_v18  ;;  %v2110_v18 = vor.u32 %v1982_v4, %v8276_v59  ;;  %v504_v4 = vpack.c.bf16 %v467_v51, %v466_v63 }
 0x1a8   : > { %v867_v24 = vpack.c.bf16 %v7670_v20, %v7668_v12  ;;  %v1343_v12 = vsub.f32 %v8266_v46, %v8377_v35  ;;  %v1855_v20 = vsel %vm1599_vm9, %v1727_v9, %v1340_v11  ;;  %v1729_v35 = vxor.u32 2147483647, %v1342_v27 }
 0x1a9   : > { %6873 = vmatmul.msk.bf16.gmra.mxu0 %vm522_vm0, %v502_v15  ;;  %7671 = vtanh.f32 %v709_v28  ;;  %v2109_v15 = vor.u32 %v1981_v2, %v8272_v55  ;;  %v1856_v28 = vsel %vm1600_vm10, %v1728_v10, %v1341_v57  ;;  %v1732_v9 = vxor.u32 2147483647, %v1345_v47 }
 0x1aa   : > { %1063 = vmatmul.bf16.gmra.mxu1 %v867_v24  ;;  %1232 = vmatmul.bf16.gmra.mxu2 %v867_v24  ;;  %v1730_v39 = vxor.u32 2147483647, %v1343_v12  ;;  %v1984_v41 = vand.u32 4294967040, %v1856_v28  ;;  %vm1602_vm13 = vcmp.lt.s32.totalorder %v1343_v12, 0 }
 0x1ab   : > { %vm2335_vm11 = vcmp.lt.s32.totalorder %v2109_v15, %v2110_v18 }
 0x1ac   : > { %v8452_v11 = vsel %vm2335_vm11, %v2109_v15, %v2110_v18  ;;  %v1858_v57 = vsel %vm1602_vm13, %v1730_v39, %v1343_v12  ;;  %v2112_v45 = vor.u32 %v1984_v41, %v8276_v59  ;;  %v1346_v41 = vsub.f32 %v8262_v37, %v8386_v50 }
 0x1ad   : > { %v8413_v32 = vpop.f32.mrf.mxu2  ;;  %v1986_v12 = vand.u32 4294967040, %v1858_v57  ;;  %v2257_v57 = vand.u32 65535, %v8310_v61  ;;  %v468_v61 = vld [vmem:[%s8085_s16 + $0x1b0] sm:$0xff] }
 0x1ae   : > { %v710_v33 = vpop.f32.mrf.mxu0  ;;  %vm1605_vm5 = vcmp.lt.s32.totalorder %v1346_v41, 0 }
 0x1af   : > { %v711_v36 = vadd.f32 %v8212_v13, %v710_v33  ;;  %v8416_v38 = vpop.f32.mrf.mxu1  ;;  %v7672_v49 = vpop.eup %7671  ;;  %v2114_v39 = vor.u32 %v1986_v12, %v8276_v59  ;;  %v1349_v12 = vsub.f32 %v8266_v46, %v8396_v3 }
 0x1b1   : > { %7673 = vtanh.f32 %v711_v36  ;;  %v1983_v36 = vand.u32 4294967040, %v1855_v20  ;;  %v1736_v3 = vxor.u32 2147483647, %v1349_v12  ;;  %vm1608_vm10 = vcmp.lt.s32.totalorder %v1349_v12, 0 }
 0x1b3   : > { %v2111_v40 = vor.u32 %v1983_v36, %v8272_v55 }
 0x1b5   : > { %v8422_v52 = vpop.f32.mrf.mxu2  ;;  %vm2351_vm2 = vcmp.lt.s32.totalorder %v2111_v40, %v2112_v45 }
 0x1b6   : > { %v713_v58 = vpop.f32.mrf.mxu0 }
 0x1b7   : > { %v7674_v60 = vpop.eup %7673  ;;  %v8426_v0 = vpop.f32.mrf.mxu1  ;;  %v714_v19 = vadd.f32 %v8212_v13, %v713_v58 }
 0x1b8   : > { %v868_v6 = vpack.c.bf16 %v7674_v60, %v7672_v49  ;;  %v2227_v49 = vcvt.s32.f32 %v2225_v31  ;;  %v1860_v31 = vsel %vm1604_vm1, %v1732_v9, %v1345_v47  ;;  %v469_v9 = vld [vmem:[%s8085_s16 + $0x1b8] sm:$0xff] }
 0x1b9   : > { %6874 = vmatmul.msk.bf16.gmra.mxu0 %vm522_vm0, %v503_v54  ;;  %7675 = vtanh.f32 %v714_v19  ;;  %v1857_v54 = vsel %vm1601_vm12, %v1729_v35, %v1342_v27  ;;  %v2241_v19 = vand.u32 65535, %v8297_v34 }
 0x1ba   : > { %1068 = vmatmul.bf16.gmra.mxu1 %v868_v6  ;;  %1237 = vmatmul.bf16.gmra.mxu2 %v868_v6  ;;  %v1731_v6 = vxor.u32 2147483647, %v1344_v16  ;;  %v1985_v27 = vand.u32 4294967040, %v1857_v54 }
 0x1bb   : > { %v2243_v34 = vcvt.s32.f32 %v2241_v19 }
 0x1bc   : > { %v2113_v35 = vor.u32 %v1985_v27, %v8272_v55 }
 0x1bd   : > { %v8436_v24 = vpop.f32.mrf.mxu2 }
 0x1be   : > { %v715_v29 = vpop.f32.mrf.mxu0  ;;  %vm2367_vm4 = vcmp.lt.s32.totalorder %v2113_v35, %v2114_v39 }
 0x1bf   : > { %v716_v33 = vadd.f32 %v8212_v13, %v715_v29  ;;  %v8440_v30 = vpop.f32.mrf.mxu1  ;;  %v7676_v60 = vpop.eup %7675  ;;  %v1859_v29 = vsel %vm1603_vm15, %v1731_v6, %v1344_v16  ;;  %v1347_v16 = vsub.f32 %v8266_v46, %v8390_v56  ;;  %v2259_v6 = vcvt.s32.f32 %v2257_v57 }
 0x1c0   : > { %v1987_v51 = vand.u32 4294967040, %v1859_v29 }
 0x1c1   : > { %7677 = vtanh.f32 %v716_v33  ;;  %v8442_v44 = vpop.xlane.xlu0 %2229  ;;  %vm1606_vm6 = vcmp.lt.s32.totalorder %v1347_v16, 0 }
 0x1c2   : > { %vm2231_vm14 = vcmp.eq.f32.partialorder %v8289_v23, %v8442_v44  ;;  %v2338_v23 = vshra.s32 %v8452_v11, 16  ;;  %v2115_v19 = vor.u32 %v1987_v51, %v8272_v55 }
 0x1c3   : > { %v2232_v58 = vsel %vm2231_vm14, %v2227_v49, inf  ;;  %v8476_v49 = vsel %vm2351_vm2, %v2111_v40, %v2112_v45  ;;  %v1348_v45 = vsub.f32 %v8262_v37, %v8392_v62 }
 0x1c4   : > { %2233 = vmin.xlane.f32.xlu0 %v2232_v58  ;;  %v8465_v33 = vcvt.s32.f32 %v2338_v23  ;;  %v2354_v56 = vshra.s32 %v8476_v49, 16 }
 0x1c5   : > { %v8454_v2 = vpop.f32.mrf.mxu2  ;;  %vm1607_vm8 = vcmp.lt.s32.totalorder %v1348_v45, 0 }
 0x1c6   : > { %v718_v10 = vpop.f32.mrf.mxu0 }
 0x1c7   : > { %v7678_v15 = vpop.eup %7677  ;;  %v8460_v18 = vpop.f32.mrf.mxu1  ;;  %v719_v36 = vadd.f32 %v8212_v13, %v718_v10  ;;  %v8492_v10 = vsel %vm2367_vm4, %v2113_v35, %v2114_v39 }
 0x1c8   : > { %v869_v20 = vpack.c.bf16 %v7678_v15, %v7676_v60  ;;  %v1733_v60 = vxor.u32 2147483647, %v1346_v41  ;;  %v2370_v35 = vshra.s32 %v8492_v10, 16 }
 0x1c9   : > { %v8462_v28 = vpop.xlane.xlu0 %2245  ;;  %6875 = vmatmul.msk.bf16.gmra.mxu0 %vm522_vm0, %v504_v4  ;;  %7679 = vtanh.f32 %v719_v36  ;;  %v1734_v4 = vxor.u32 2147483647, %v1347_v16  ;;  %v2273_v36 = vand.u32 65535, %v8322_v17 }
 0x1ca   : > { %1073 = vmatmul.bf16.gmra.mxu1 %v869_v20  ;;  %1242 = vmatmul.bf16.gmra.mxu2 %v869_v20  ;;  %vm2247_vm3 = vcmp.eq.f32.partialorder %v8302_v42, %v8462_v28  ;;  %v1988_v42 = vand.u32 4294967040, %v1860_v31  ;;  %v1861_v15 = vsel %vm1605_vm5, %v1733_v60, %v1346_v41  ;;  %v505_v31 = vpack.c.bf16 %v469_v9, %v468_v61 }
 0x1cb   : > { %v2248_v47 = vsel %vm2247_vm3, %v2243_v34, inf  ;;  %v1862_v27 = vsel %vm1606_vm6, %v1734_v4, %v1347_v16  ;;  %v1989_v41 = vand.u32 4294967040, %v1861_v15  ;;  %v2275_v17 = vcvt.s32.f32 %v2273_v36 }
 0x1cc   : > { %2249 = vmin.xlane.f32.xlu1 %v2248_v47  ;;  %2341 = vmin.xlane.f32.xlu0 %v8465_v33  ;;  %v2116_v23 = vor.u32 %v1988_v42, %v8276_v59  ;;  %v1990_v16 = vand.u32 4294967040, %v1862_v27  ;;  %v8512_v57 = vcvt.s32.f32 %v2370_v35  ;;  %v1350_v61 = vsub.f32 %v8262_v37, %v8399_v7  ;;  %v470_v35 = vld [vmem:[%s8085_s16 + $0x1c0] sm:$0xff] }
 0x1cd   : > { %v8479_v63 = vpop.f32.mrf.mxu2  ;;  %v2117_v4 = vor.u32 %v1989_v41, %v8272_v55  ;;  %v1351_v9 = vsub.f32 %v8266_v46, %v8403_v14 }
 0x1ce   : > { %v720_v54 = vpop.f32.mrf.mxu0  ;;  %vm2383_vm9 = vcmp.lt.s32.totalorder %v2115_v19, %v2116_v23  ;;  %v1737_v14 = vxor.u32 2147483647, %v1350_v61  ;;  %vm1609_vm13 = vcmp.lt.s32.totalorder %v1350_v61, 0 }
 0x1cf   : > { %v721_v50 = vadd.f32 %v8212_v13, %v720_v54  ;;  %v8483_v58 = vpop.f32.mrf.mxu1  ;;  %v8496_v13 = vcvt.s32.f32 %v2354_v56  ;;  %v7680_v20 = vpop.eup %7679  ;;  %v8519_v56 = vld [vmem:[%s12195_s2] ss:$0 sm:$0xff]  ;;  %vm1610_vm14 = vcmp.lt.s32.totalorder %v1351_v9, 0 }
 0x1d1   : > { %7681 = vtanh.f32 %v721_v50  ;;  %v8486_v40 = vpop.xlane.xlu1 %2261  ;;  %v8514_v50 = vsel %vm2383_vm9, %v2115_v19, %v2116_v23 }
 0x1d2   : > { %vm2263_vm7 = vcmp.eq.f32.partialorder %v8315_v5, %v8486_v40  ;;  %v1735_v5 = vxor.u32 2147483647, %v1348_v45  ;;  %v2386_v15 = vshra.s32 %v8514_v50, 16 }
 0x1d3   : > { %v2264_v62 = vsel %vm2263_vm7, %v2259_v6, inf  ;;  %v1864_v6 = vsel %vm1608_vm10, %v1736_v3, %v1349_v12 }
 0x1d4   : > { %2265 = vmin.xlane.f32.xlu1 %v2264_v62  ;;  %2357 = vmin.xlane.f32.xlu0 %v8496_v13  ;;  %v1863_v54 = vsel %vm1607_vm8, %v1735_v5, %v1348_v45  ;;  %v2118_v45 = vor.u32 %v1990_v16, %v8276_v59  ;;  %v2289_v62 = vand.u32 65535, %v8335_v43  ;;  %v1992_v12 = vand.u32 4294967040, %v1864_v6 }
 0x1d5   : > { %v8503_v29 = vpop.f32.mrf.mxu2  ;;  %v1352_v43 = vsub.f32 %v8262_v37, %v8405_v22 }
 0x1d6   : > { %v723_v34 = vpop.f32.mrf.mxu0  ;;  %vm2399_vm12 = vcmp.lt.s32.totalorder %v2117_v4, %v2118_v45  ;;  %v2291_v36 = vcvt.s32.f32 %v2289_v62  ;;  %v2120_v3 = vor.u32 %v1992_v12, %v8276_v59 }
 0x1d7   : > { %v7682_v39 = vpop.eup %7681  ;;  %v8507_v47 = vpop.f32.mrf.mxu1  ;;  %v724_v60 = vadd.f32 %v8519_v56, %v723_v34  ;;  %v8540_v34 = vcvt.s32.f32 %v2386_v15  ;;  %v8546_v41 = vsel %vm2399_vm12, %v2117_v4, %v2118_v45  ;;  %v2305_v15 = vand.u32 65535, %v8348_v1 }
 0x1d8   : > { %v870_v51 = vpack.c.bf16 %v7682_v39, %v7680_v20  ;;  %v471_v39 = vld [vmem:[%s8085_s16 + $0x1c8] sm:$0xff]  ;;  %v2402_v45 = vshra.s32 %v8546_v41, 16  ;;  %vm1611_vm1 = vcmp.lt.s32.totalorder %v1352_v43, 0 }
 0x1d9   : > { %v8509_v42 = vpop.xlane.xlu1 %2277  ;;  %6876 = vmatmul.msk.bf16.gmra.mxu0 %vm522_vm0, %v505_v31  ;;  %7683 = vtanh.f32 %v724_v60  ;;  %v1738_v31 = vxor.u32 2147483647, %v1351_v9  ;;  %v506_v4 = vpack.c.bf16 %v471_v39, %v470_v35  ;;  %v2307_v1 = vcvt.s32.f32 %v2305_v15  ;;  %v472_v15 = vld [vmem:[%s8085_s16 + $0x1d0] sm:$0xff] }
 0x1da   : > { %1078 = vmatmul.bf16.gmra.mxu1 %v870_v51  ;;  %1247 = vmatmul.bf16.gmra.mxu2 %v870_v51  ;;  %vm2279_vm11 = vcmp.eq.f32.partialorder %v8327_v25, %v8509_v42  ;;  %v1991_v25 = vand.u32 4294967040, %v1863_v54  ;;  %v1865_v51 = vsel %vm1609_vm13, %v1737_v14, %v1350_v61 }
 0x1db   : > { %v2280_v19 = vsel %vm2279_vm11, %v2275_v17, inf  ;;  %v1866_v54 = vsel %vm1610_vm14, %v1738_v31, %v1351_v9  ;;  %v1353_v17 = vsub.f32 %v8266_v46, %v8413_v32  ;;  %v1993_v61 = vand.u32 4294967040, %v1865_v51 }
 0x1dc   : > { %2281 = vmin.xlane.f32.xlu2 %v2280_v19  ;;  %2373 = vmin.xlane.f32.xlu1 %v8512_v57  ;;  %v2119_v16 = vor.u32 %v1991_v25, %v8272_v55  ;;  %v1994_v9 = vand.u32 4294967040, %v1866_v54 }
 0x1dd   : > { %v8531_v23 = vpop.f32.mrf.mxu2  ;;  %v1740_v32 = vxor.u32 2147483647, %v1353_v17  ;;  %vm1612_vm3 = vcmp.lt.s32.totalorder %v1353_v17, 0  ;;  %v2121_v35 = vor.u32 %v1993_v61, %v8272_v55 }
 0x1de   : > { %v725_v27 = vpop.f32.mrf.mxu0  ;;  %vm2415_vm2 = vcmp.lt.s32.totalorder %v2119_v16, %v2120_v3  ;;  %v2122_v39 = vor.u32 %v1994_v9, %v8276_v59 }
 0x1df   : > { %v726_v7 = vadd.f32 %v8519_v56, %v725_v27  ;;  %v8536_v20 = vpop.f32.mrf.mxu1  ;;  %v7684_v6 = vpop.eup %7683  ;;  %v8566_v31 = vsel %vm2415_vm2, %v2119_v16, %v2120_v3  ;;  %v1868_v51 = vsel %vm1612_vm3, %v1740_v32, %v1353_v17 }
 0x1e0   : > { %v2418_v16 = vshra.s32 %v8566_v31, 16  ;;  %vm2431_vm5 = vcmp.lt.s32.totalorder %v2121_v35, %v2122_v39 }
 0x1e1   : > { %7685 = vtanh.f32 %v726_v7  ;;  %v8538_v5 = vpop.xlane.xlu2 %2293  ;;  %v8564_v7 = vcvt.s32.f32 %v2402_v45  ;;  %v8587_v61 = vsel %vm2431_vm5, %v2121_v35, %v2122_v39 }
 0x1e2   : > { %vm2295_vm15 = vcmp.eq.f32.partialorder %v8340_v53, %v8538_v5  ;;  %v1739_v53 = vxor.u32 2147483647, %v1352_v43 }
 0x1e3   : > { %v2296_v60 = vsel %vm2295_vm15, %v2291_v36, inf }
 0x1e4   : > { %2297 = vmin.xlane.f32.xlu2 %v2296_v60  ;;  %2389 = vmin.xlane.f32.xlu1 %v8540_v34  ;;  %v1867_v14 = vsel %vm1611_vm1, %v1739_v53, %v1352_v43  ;;  %v8583_v53 = vcvt.s32.f32 %v2418_v16 }
 0x1e5   : > { %v8555_v22 = vpop.f32.mrf.mxu2  ;;  %v1995_v3 = vand.u32 4294967040, %v1867_v14 }
 0x1e6   : > { %v728_v19 = vpop.f32.mrf.mxu0 }
 0x1e7   : > { %v7686_v25 = vpop.eup %7685  ;;  %v8559_v27 = vpop.f32.mrf.mxu1  ;;  %v729_v36 = vadd.f32 %v8519_v56, %v728_v19 }
 0x1e8   : > { %v871_v62 = vpack.c.bf16 %v7686_v25, %v7684_v6  ;;  %v2321_v6 = vand.u32 65535, %v8363_v21  ;;  %v473_v25 = vld [vmem:[%s8085_s16 + $0x1d8] sm:$0xff]  ;;  %v2123_v21 = vor.u32 %v1995_v3, %v8272_v55 }
 0x1e9   : > { %v8561_v12 = vpop.xlane.xlu2 %2309  ;;  %6877 = vmatmul.msk.bf16.gmra.mxu0 %vm522_vm0, %v506_v4  ;;  %7687 = vtanh.f32 %v729_v36  ;;  %v2434_v36 = vshra.s32 %v8587_v61, 16 }
 0x1ea   : > { %1083 = vmatmul.bf16.gmra.mxu1 %v871_v62  ;;  %1252 = vmatmul.bf16.gmra.mxu2 %v871_v62  ;;  %vm2311_vm4 = vcmp.eq.f32.partialorder %v8353_v8, %v8561_v12  ;;  %v1996_v8 = vand.u32 4294967040, %v1868_v51  ;;  %v2323_v19 = vcvt.s32.f32 %v2321_v6 }
 0x1eb   : > { %v2312_v54 = vsel %vm2311_vm4, %v2307_v1, inf  ;;  %v507_v1 = vpack.c.bf16 %v473_v25, %v472_v15  ;;  %v474_v25 = vld [vmem:[%s8085_s16 + $0x1e0] sm:$0xff] }
 0x1ec   : > { %2313 = vmin.xlane.f32.xlu0 %v2312_v54  ;;  %2405 = vmin.xlane.f32.xlu2 %v8564_v7  ;;  %v2124_v9 = vor.u32 %v1996_v8, %v8276_v59  ;;  %v8600_v54 = vcvt.s32.f32 %v2434_v36 }
 0x1ed   : > { %v8574_v43 = vpop.f32.mrf.mxu2 }
 0x1ee   : > { %v730_v60 = vpop.f32.mrf.mxu0  ;;  %vm2447_vm7 = vcmp.lt.s32.totalorder %v2123_v21, %v2124_v9 }
 0x1ef   : > { %v731_v4 = vadd.f32 %v8519_v56, %v730_v60  ;;  %v8579_v45 = vpop.f32.mrf.mxu1  ;;  %v7688_v62 = vpop.eup %7687  ;;  %v8602_v16 = vsel %vm2447_vm7, %v2123_v21, %v2124_v9  ;;  %v475_v21 = vld [vmem:[%s8085_s16 + $0x1e8] sm:$0xff] }
 0x1f0   : > { %v2450_v6 = vshra.s32 %v8602_v16, 16 }
 0x1f1   : > { %7689 = vtanh.f32 %v731_v4  ;;  %v8581_v17 = vpop.xlane.xlu2 %2325 }
 0x1f2   : > { %vm2327_vm6 = vcmp.eq.f32.partialorder %v8367_v26, %v8581_v17  ;;  %v8612_v15 = vcvt.s32.f32 %v2450_v6 }
 0x1f3   : > { %v2328_v32 = vsel %vm2327_vm6, %v2323_v19, inf }
 0x1f4   : > { %2329 = vmin.xlane.f32.xlu0 %v2328_v32  ;;  %2421 = vmin.xlane.f32.xlu2 %v8583_v53 }
 0x1f5   : > { %v8594_v14 = vpop.f32.mrf.mxu2 }
 0x1f6   : > { %v733_v51 = vpop.f32.mrf.mxu0 }
 0x1f7   : > { %v7690_v35 = vpop.eup %7689  ;;  %v8597_v39 = vpop.f32.mrf.mxu1  ;;  %v734_v3 = vadd.f32 %v8519_v56, %v733_v51 }
 0x1f8   : > { %v872_v26 = vpack.c.bf16 %v7690_v35, %v7688_v62  ;;  %v508_v62 = vpack.c.bf16 %v475_v21, %v474_v25 }
 0x1f9   : > { %6878 = vmatmul.msk.bf16.gmra.mxu0 %vm522_vm0, %v507_v1  ;;  %7691 = vtanh.f32 %v734_v3  ;;  %v7528_v3 = vld [vmem:[%s12201_s4 + $0x78] sm:$0xff] }
 0x1fa   : > { %1088 = vmatmul.bf16.gmra.mxu1 %v872_v26  ;;  %1257 = vmatmul.bf16.gmra.mxu2 %v872_v26  ;;  %v7520_v26 = vld [vmem:[%s12201_s4 + $0x38] sm:$0xff] }
 0x1fb   : > { %5342 = vmatpush.bf16.msra.mxu3 %v7520_v26  ;;  %5511 = vmatpush.bf16.msrb.mxu0 %v7528_v3  ;;  %v477_v26 = vld [vmem:[%s8085_s16 + $0x1f8] sm:$0xff]  ;;  %v7517_v3 = vld [vmem:[%s12201_s4 + $0x20] sm:$0xff] }
 0x1fc   : > { %2437 = vmin.xlane.f32.xlu0 %v8600_v54 }
 0x1fd   : > { %v8606_v60 = vpop.f32.mrf.mxu2 }
 0x1fe   : > { %12197 = vst [vmem:[#allocation8_spill] sm:$0xff] %v8606_v60  ;;  %v735_v8 = vpop.f32.mrf.mxu0  ;;  %v1358_v60 = vsub.f32 %v8262_v37, %v8440_v30 }
 0x1ff   : > { %v736_v4 = vadd.f32 %v8519_v56, %v735_v8  ;;  %v8610_v19 = vpop.f32.mrf.mxu1  ;;  %v7692_v9 = vpop.eup %7691  ;;  %v7519_v8 = vld [vmem:[%s12201_s4 + $0x30] sm:$0xff] }
 0x200   : > { %12198 = vst [vmem:[#allocation9_spill] sm:$0xff] %v8610_v19  ;;  %5343 = vmatpush.bf16.msra.mxu3 %v7519_v8  ;;  %vm1617_vm14 = vcmp.lt.s32.totalorder %v1358_v60, 0 }
 0x201   : > { %7693 = vtanh.f32 %v736_v4  ;;  %v7527_v4 = vld [vmem:[%s12201_s4 + $0x70] sm:$0xff] }
 0x202   : > { %5512 = vmatpush.bf16.msrb.mxu0 %v7527_v4 }
 0x204   : > { %2453 = vmin.xlane.f32.xlu0 %v8612_v15 }
 0x205   : > { %v8617_v32 = vpop.f32.mrf.mxu2 }
 0x206   : > { %12199 = vst [vmem:[#allocation10_spill] sm:$0xff] %v8617_v32  ;;  %v738_v1 = vpop.f32.mrf.mxu0 }
 0x207   : > { %v7694_v36 = vpop.eup %7693  ;;  %v8619_v51 = vpop.f32.mrf.mxu1  ;;  %v739_v6 = vadd.f32 %v8519_v56, %v738_v1  ;;  %v7518_v1 = vld [vmem:[%s12201_s4 + $0x28] sm:$0xff] }
 0x208   : > { %12200 = vst [vmem:[#allocation11_spill] sm:$0xff] %v8619_v51  ;;  %v873_v35 = vpack.c.bf16 %v7694_v36, %v7692_v9  ;;  %v7526_v36 = vld [vmem:[%s12201_s4 + $0x68] sm:$0xff]  ;;  %5344 = vmatpush.bf16.msra.mxu3 %v7518_v1 }
 0x209   : > { %6879 = vmatmul.msk.bf16.gmra.mxu0 %vm522_vm0, %v508_v62  ;;  %7695 = vtanh.f32 %v739_v6  ;;  %v7525_v6 = vld [vmem:[%s12201_s4 + $0x60] sm:$0xff] }
 0x20a   : > { %1093 = vmatmul.bf16.gmra.mxu1 %v873_v35  ;;  %1262 = vmatmul.bf16.gmra.mxu2 %v873_v35  ;;  %v476_v35 = vld [vmem:[%s8085_s16 + $0x1f0] sm:$0xff]  ;;  %s7553_s16 = sshll.u32 %s8046_s21, 9 }
 0x20b   : > { %5513 = vmatpush.bf16.msrb.mxu0 %v7526_v36  ;;  %s6707_s3 = scalar_lea.hbm %s12119_s10, %s7553_s16 }
 0x20c   : > { %5345 = vmatpush.bf16.msra.mxu3 %v7517_v3 }
 0x20d   : > { %v8635_v25 = vpop.f32.mrf.mxu2 }
 0x20e   : > { %12202 = vst [vmem:[#allocation12_spill] sm:$0xff] %v8635_v25  ;;  %v740_v21 = vpop.f32.mrf.mxu0 }
 0x20f   : > { %v741_v9 = vadd.f32 %v8519_v56, %v740_v21  ;;  %v8638_v62 = vpop.f32.mrf.mxu1  ;;  %v7696_v8 = vpop.eup %7695  ;;  %v509_v21 = vpack.c.bf16 %v477_v26, %v476_v35  ;;  %5514 = vmatpush.bf16.msrb.mxu0 %v7525_v6  ;;  %v1355_v35 = vsub.f32 %v8266_v46, %v8422_v52  ;;  %v7515_v52 = vld [vmem:[%s12201_s4 + $0x10] sm:$0xff] }
 0x210   : > { %12203 = vst [vmem:[#allocation13_spill] sm:$0xff] %v8638_v62 }
 0x211   : > { %7697 = vtanh.f32 %v741_v9  ;;  %v1742_v6 = vxor.u32 2147483647, %v1355_v35  ;;  %vm1614_vm9 = vcmp.lt.s32.totalorder %v1355_v35, 0 }
 0x215   : > { %v8654_v4 = vpop.f32.mrf.mxu2 }
 0x216   : > { %12204 = vst [vmem:[#allocation14_spill] sm:$0xff] %v8654_v4  ;;  %v743_v48 = vpop.f32.mrf.mxu0  ;;  %v1354_v4 = vsub.f32 %v8262_v37, %v8416_v38 }
 0x217   : > { %v7698_v62 = vpop.eup %7697  ;;  %v8656_v25 = vpop.f32.mrf.mxu1  ;;  %v744_v1 = vadd.f32 %v8519_v56, %v743_v48  ;;  %v7524_v48 = vld [vmem:[%s12201_s4 + $0x58] sm:$0xff] }
 0x218   : > { %12205 = vst [vmem:[#allocation15_spill] sm:$0xff] %v8656_v25  ;;  %v874_v9 = vpack.c.bf16 %v7698_v62, %v7696_v8  ;;  %v7516_v62 = vld [vmem:[%s12201_s4 + $0x18] sm:$0xff]  ;;  %5515 = vmatpush.bf16.msrb.mxu0 %v7524_v48  ;;  %v1741_v38 = vxor.u32 2147483647, %v1354_v4  ;;  %vm1613_vm8 = vcmp.lt.s32.totalorder %v1354_v4, 0 }
 0x219   : > { %6880 = vmatmul.msk.bf16.gmra.mxu0 %vm522_vm0, %v509_v21  ;;  %7699 = vtanh.f32 %v744_v1  ;;  %5346 = vmatpush.bf16.msra.mxu3 %v7516_v62  ;;  %v1870_v62 = vsel %vm1614_vm9, %v1742_v6, %v1355_v35 }
 0x21a   : > { %1098 = vmatmul.bf16.gmra.mxu1 %v874_v9  ;;  %1267 = vmatmul.bf16.gmra.mxu2 %v874_v9  ;;  %v1998_v25 = vand.u32 4294967040, %v1870_v62  ;;  %v1356_v62 = vsub.f32 %v8262_v37, %v8426_v0 }
 0x21c   : > { %v2126_v35 = vor.u32 %v1998_v25, %v8276_v59  ;;  %vm1615_vm11 = vcmp.lt.s32.totalorder %v1356_v62, 0 }
 0x21d   : > { %v8660_v36 = vpop.f32.mrf.mxu2  ;;  %5347 = vmatpush.bf16.msra.mxu3 %v7515_v52  ;;  %v7514_v52 = vld [vmem:[%s12201_s4 + $0x8] sm:$0xff] }
 0x21e   : > { %12206 = vst [vmem:[#allocation16_spill] sm:$0xff] %v8660_v36  ;;  %v745_v51 = vpop.f32.mrf.mxu0 }
 0x21f   : > { %v746_v26 = vadd.f32 %v8519_v56, %v745_v51  ;;  %v8667_v3 = vpop.f32.mrf.mxu1  ;;  %v7523_v51 = vld [vmem:[%s12201_s4 + $0x50] sm:$0xff]  ;;  %v7700_v8 = vpop.eup %7699 }
 0x220   : > { %12207 = vst [vmem:[#allocation17_spill] sm:$0xff] %v8667_v3  ;;  %5516 = vmatpush.bf16.msrb.mxu0 %v7523_v51  ;;  %v7522_v51 = vld [vmem:[%s12201_s4 + $0x48] sm:$0xff] }
 0x221   : > { %7701 = vtanh.f32 %v746_v26  ;;  %v1869_v26 = vsel %vm1613_vm8, %v1741_v38, %v1354_v4  ;;  %5348 = vmatpush.bf16.msra.mxu3 %v7514_v52 }
 0x222   : > { %v1997_v36 = vand.u32 4294967040, %v1869_v26 }
 0x224   : > { %v2125_v4 = vor.u32 %v1997_v36, %v8272_v55  ;;  %5517 = vmatpush.bf16.msrb.mxu0 %v7522_v51  ;;  %v7521_v36 = vld [vmem:[%s12201_s4 + $0x40] sm:$0xff] }
 0x225   : > { %v8681_v21 = vpop.f32.mrf.mxu2 }
 0x226   : > { %12208 = vst [vmem:[#allocation18_spill] sm:$0xff] %v8681_v21  ;;  %v748_v9 = vpop.f32.mrf.mxu0  ;;  %vm2463_vm10 = vcmp.lt.s32.totalorder %v2125_v4, %v2126_v35 }
 0x227   : > { %v7702_v1 = vpop.eup %7701  ;;  %v8683_v3 = vpop.f32.mrf.mxu1  ;;  %v749_v32 = vadd.f32 %v8519_v56, %v748_v9  ;;  %v7513_v9 = vld [vmem:[%s12201_s4] sm:$0xff]  ;;  %s6672_s4 = scalar_lea.sflag [#allocation3], %s9582_s24 }
 0x228   : > { %v875_v48 = vpack.c.bf16 %v7702_v1, %v7700_v8  ;;  %12209 = vst [vmem:[#allocation19_spill] sm:$0xff] %v8683_v3  ;;  %v8697_v8 = vsel %vm2463_vm10, %v2125_v4, %v2126_v35  ;;  %5349 = vmatpush.bf16.msra.mxu3 %v7513_v9  ;;  %5518 = vmatpush.bf16.msrb.mxu0 %v7521_v36  ;;  %v1743_v36 = vxor.u32 2147483647, %v1356_v62 }
 0x229   : > { %7703 = vtanh.f32 %v749_v32  ;;  %v2236_v32 = vcvt.f32.s32 %v8442_v44  ;;  %v1357_v35 = vsub.f32 %v8266_v46, %v8436_v24  ;;  %v2337_v44 = vand.u32 65535, %v8452_v11 }
 0x22a   : > { %1103 = vmatmul.bf16.gmra.mxu1 %v875_v48  ;;  %1272 = vmatmul.bf16.gmra.mxu2 %v875_v48 }
 0x22b   : > { %v2237_v51 = vshll.u32 %v2236_v32, 16  ;;  %vm1616_vm12 = vcmp.lt.s32.totalorder %v1357_v35, 0 }
 0x22d   : > { %v8695_v6 = vpop.f32.mrf.mxu2 }
 0x22e   : > { %v750_v19 = vpop.f32.mrf.mxu0  ;;  %12210 = vst [vmem:[#allocation20_spill] sm:$0xff] %v8695_v6 }
 0x22f   : > { %v751_v38 = vadd.f32 %v8519_v56, %v750_v19  ;;  %v8705_v25 = vpop.f32.mrf.mxu1  ;;  %v7704_v19 = vpop.eup %7703 }
 0x230   : > { %12211 = vst [vmem:[#allocation21_spill] sm:$0xff] %v8705_v25  ;;  %v2252_v25 = vcvt.f32.s32 %v8462_v28 }
 0x231   : > { %7705 = vtanh.f32 %v751_v38 }
 0x235   : > { %v8712_v38 = vpop.f32.mrf.mxu2 }
 0x236   : > { %v753_v1 = vpop.f32.mrf.mxu0  ;;  %12212 = vst [vmem:[#allocation22_spill] sm:$0xff] %v8712_v38  ;;  %v2253_v38 = vshll.u32 %v2252_v25, 16 }
 0x237   : > { %v7706_v26 = vpop.eup %7705  ;;  %v2234_v48 = vpop.xlane.xlu0 %2233  ;;  %v754_v24 = vadd.f32 %v8519_v56, %v753_v1 }
 0x238   : > { %v876_v52 = vpack.c.bf16 %v7706_v26, %v7704_v19  ;;  %v2235_v4 = vcvt.f32.s32 %v2234_v48  ;;  %v8718_v0 = vpop.f32.mrf.mxu1  ;;  %v1744_v19 = vxor.u32 2147483647, %v1357_v35 }
 0x239   : > { %12213 = vst [vmem:[#allocation23_spill] sm:$0xff] %v8718_v0  ;;  %7707 = vtanh.f32 %v754_v24 }
 0x23a   : > { %1108 = vmatmul.bf16.gmra.mxu1 %v876_v52  ;;  %1277 = vmatmul.bf16.gmra.mxu2 %v876_v52  ;;  %v2238_v9 = vadd.s32 %v2237_v51, %v2235_v4  ;;  %v1871_v51 = vsel %vm1615_vm11, %v1743_v36, %v1356_v62  ;;  %v1872_v21 = vsel %vm1616_vm12, %v1744_v19, %v1357_v35 }
 0x23b   : > { %v1999_v30 = vand.u32 4294967040, %v1871_v51 }
 0x23c   : > { %v8716_v6 = vand.u32 255, %v2238_v9  ;;  %v2339_v9 = vcvt.s32.f32 %v2337_v44 }
 0x23d   : > { %v8739_v19 = vpop.f32.mrf.mxu2 }
 0x23e   : > { %v755_v32 = vpop.f32.mrf.mxu0  ;;  %v3311_v26 = vperm.slane %v8716_v6, 0  ;;  %v3312_v48 = vperm.slane %v8716_v6, 1  ;;  %v3313_v52 = vperm.slane %v8716_v6, 2  ;;  %v3314_v11 = vperm.slane %v8716_v6, 3  ;;  %12214 = vst [vmem:[#allocation24_spill] sm:$0xff] %v8739_v19 }
 0x23f   : > { %v2250_v4 = vpop.xlane.xlu1 %2249  ;;  %v8725_v28 = vpop.xlane.xlu0 %2341  ;;  %v3315_v0 = vperm.slane %v8716_v6, 4  ;;  %v756_v3 = vadd.f32 %v8519_v56, %v755_v32  ;;  %v3316_v62 = vperm.slane %v8716_v6, 5  ;;  %v3317_v25 = vperm.slane %v8716_v6, 6 }
 0x240   : > { %3823 = vst [vmem:[#allocation1] ss:$9 sm:$0xff] %v3311_v26  ;;  %v2251_v1 = vcvt.f32.s32 %v2250_v4  ;;  %vm2343_vm13 = vcmp.eq.f32.partialorder %v8465_v33, %v8725_v28  ;;  %v1359_v32 = vsub.f32 %v8266_v46, %v8454_v2  ;;  %v3318_v35 = vperm.slane %v8716_v6, 7 }
 0x241   : > { %3825 = vst [vmem:[#allocation1 + $0x1] ss:$9 sm:$0xff] %v3312_v48  ;;  %v2344_v44 = vsel %vm2343_vm13, %v2339_v9, inf  ;;  %7709 = vtanh.f32 %v756_v3  ;;  %v2000_v26 = vand.u32 4294967040, %v1872_v21  ;;  %v1745_v48 = vxor.u32 2147483647, %v1358_v60  ;;  %v7708_v3 = vpop.eup %7707 }
 0x242   : > { %3827 = vst [vmem:[#allocation1 + $0x2] ss:$9 sm:$0xff] %v3313_v52  ;;  %v2254_v36 = vadd.s32 %v2253_v38, %v2251_v1  ;;  %2345 = vmin.xlane.f32.xlu1 %v2344_v44  ;;  %v2353_v38 = vand.u32 65535, %v8476_v49  ;;  %v8744_v52 = vpop.f32.mrf.mxu1  ;;  %v1746_v2 = vxor.u32 2147483647, %v1359_v32  ;;  %vm1618_vm15 = vcmp.lt.s32.totalorder %v1359_v32, 0 }
 0x243   : > { %3829 = vst [vmem:[#allocation1 + $0x3] ss:$9 sm:$0xff] %v3314_v11  ;;  %v2127_v21 = vor.u32 %v1999_v30, %v8272_v55  ;;  %vm4766_vm1 = vcmp.eq.s32.totalorder %v8272_v55, %v8716_v6  ;;  %v2369_v9 = vand.u32 65535, %v8492_v10  ;;  %v1873_v1 = vsel %vm1617_vm14, %v1745_v48, %v1358_v60 }
 0x244   : > { %3831 = vst [vmem:[#allocation1 + $0x4] ss:$9 sm:$0xff] %v3315_v0  ;;  %v8741_v33 = vand.u32 255, %v2254_v36  ;;  %v2128_v0 = vor.u32 %v2000_v26, %v8276_v59  ;;  %v2355_v49 = vcvt.s32.f32 %v2353_v38  ;;  %vm4767_vm4 = vcmp.eq.s32.totalorder %v8276_v59, %v8716_v6 }
 0x245   : > { %3833 = vst [vmem:[#allocation1 + $0x5] ss:$9 sm:$0xff] %v3316_v62  ;;  %v2268_v36 = vcvt.f32.s32 %v8486_v40  ;;  %v12123_v10 = vmov 1.0|1.0   ;;  %v2466_v48 = vshra.s32 %v8697_v8, 16 }
 0x246   : > { %v758_v24 = vpop.f32.mrf.mxu0  ;;  %3835 = vst [vmem:[#allocation1 + $0x6] ss:$9 sm:$0xff] %v3317_v25  ;;  %vm4768_vm2 = vcmp.eq.s32.totalorder %v8272_v55, %v8741_v33  ;;  %vm4769_vm5 = vcmp.eq.s32.totalorder %v8276_v59, %v8741_v33  ;;  %v1874_v25 = vsel %vm1618_vm15, %v1746_v2, %v1359_v32  ;;  %v3319_v44 = vperm.slane %v8741_v33, 0  ;;  %v8780_v32 = vpop.f32.mrf.mxu2 }
 0x247   : > { %12215 = vst [vmem:[#allocation25_spill] sm:$0xff] %v8744_v52  ;;  %v2266_v11 = vpop.xlane.xlu1 %2265  ;;  %v8746_v4 = vpop.xlane.xlu0 %2357  ;;  %vm8755_vm3 = vmpackc.low %vm4768_vm2, %vm4766_vm1  ;;  %v3320_v30 = vperm.slane %v8741_v33, 1  ;;  %vm2479_vm8 = vcmp.lt.s32.totalorder %v2127_v21, %v2128_v0  ;;  %v759_v52 = vadd.f32 %v8519_v56, %v758_v24  ;;  %v3325_v24 = vperm.slane %v8741_v33, 6 }
 0x248   : > { %3837 = vst [vmem:[#allocation1 + $0x7] ss:$9 sm:$0xff] %v3318_v35  ;;  %v7710_v51 = vpop.eup %7709  ;;  %vm2359_vm6 = vcmp.eq.f32.partialorder %v8496_v13, %v8746_v4  ;;  %7138 = vmatmul.msk.bf16.vlgmr.msra.gmra.mxu3 %vm8755_vm3, %v12123_v10  ;;  %vm8770_vm7 = vmpackc.low %vm4769_vm5, %vm4767_vm4  ;;  %v2284_v35 = vcvt.f32.s32 %v8509_v42  ;;  %v3321_v13 = vperm.slane %v8741_v33, 2  ;;  %v2267_v26 = vcvt.f32.s32 %v2266_v11 }
 0x249   : > { %v2360_v6 = vsel %vm2359_vm6, %v2355_v49, inf  ;;  %7202 = vmatmul.msk.bf16.vlgmr.msrb.gmra.mxu0 %vm8770_vm7, %v12123_v10  ;;  %v877_v40 = vpack.c.bf16 %v7710_v51, %v7708_v3  ;;  %12220 = vst [vmem:[#allocation26_spill] sm:$0xff] %v8780_v32  ;;  %v8783_v2 = vsel %vm2479_vm8, %v2127_v21, %v2128_v0  ;;  %v3322_v49 = vperm.slane %v8741_v33, 3 }
 0x24a   : > { %2361 = vmin.xlane.f32.xlu1 %v2360_v6  ;;  %v2001_v3 = vand.u32 4294967040, %v1873_v1  ;;  %v2269_v51 = vshll.u32 %v2268_v36, 16  ;;  %v3323_v6 = vperm.slane %v8741_v33, 4  ;;  %v2002_v21 = vand.u32 4294967040, %v1874_v25  ;;  %v8795_v1 = vpop.f32.mrf.mxu1 }
 0x24b   : > { %1113 = vmatmul.bf16.gmra.mxu1 %v877_v40  ;;  %1282 = vmatmul.bf16.gmra.mxu2 %v877_v40  ;;  %v3324_v0 = vperm.slane %v8741_v33, 5  ;;  %v2285_v19 = vshll.u32 %v2284_v35, 16  ;;  %12222 = vst [vmem:[#allocation28_spill] sm:$0xff] %v8795_v1  ;;  %v8797_v36 = vcvt.s32.f32 %v2466_v48  ;;  %7711 = vtanh.f32 %v759_v52 }
 0x24c   : > { %v2270_v40 = vadd.s32 %v2269_v51, %v2267_v26  ;;  %v2129_v25 = vor.u32 %v2001_v3, %v8272_v55  ;;  %v2130_v52 = vor.u32 %v2002_v21, %v8276_v59 }
 0x24e   : > { %v760_v38 = vpop.f32.mrf.mxu0  ;;  %vm2495_vm10 = vcmp.lt.s32.totalorder %v2129_v25, %v2130_v52 }
 0x24f   : > { %v8785_v42 = vld [vmem:[#allocation1] sm:$0xff]  ;;  %v761_v11 = vadd.f32 %v8519_v56, %v760_v38  ;;  %v2282_v10 = vpop.xlane.xlu2 %2281  ;;  %v8791_v32 = vpop.xlane.xlu1 %2373  ;;  %v8820_v3 = vsel %vm2495_vm10, %v2129_v25, %v2130_v52 }
 0x250   : > { %12221 = vst [vmem:[#allocation27_spill] sm:$0xff] %v8785_v42  ;;  %v2371_v42 = vcvt.s32.f32 %v2369_v9  ;;  %v2283_v38 = vcvt.f32.s32 %v2282_v10  ;;  %vm2375_vm9 = vcmp.eq.f32.partialorder %v8512_v57, %v8791_v32  ;;  %v2482_v57 = vshra.s32 %v8783_v2, 16 }
 0x251   : > { %3839 = vst [vmem:[#allocation1] ss:$9 sm:$0xff] %v3319_v44  ;;  %v3326_v44 = vperm.slane %v8741_v33, 7  ;;  %7713 = vtanh.f32 %v761_v11  ;;  %v2385_v33 = vand.u32 65535, %v8514_v50  ;;  %v7712_v26 = vpop.eup %7711 }
 0x252   : > { %3840 = vst [vmem:[#allocation1 + $0x1] ss:$9 sm:$0xff] %v3320_v30  ;;  %v2376_v9 = vsel %vm2375_vm9, %v2371_v42, inf  ;;  %v2286_v35 = vadd.s32 %v2285_v19, %v2283_v38  ;;  %2469 = vmin.xlane.f32.xlu1 %v8797_v36  ;;  %v3249_v30 = vand.u32 255, %v2270_v40  ;;  %v8818_v50 = vcvt.s32.f32 %v2482_v57 }
 0x253   : > { %3841 = vst [vmem:[#allocation1 + $0x2] ss:$9 sm:$0xff] %v3321_v13  ;;  %2377 = vmin.xlane.f32.xlu2 %v2376_v9  ;;  %v8809_v13 = vpop.f32.mrf.mxu2  ;;  %v2387_v42 = vcvt.s32.f32 %v2385_v33  ;;  %v2498_v33 = vshra.s32 %v8820_v3, 16 }
 0x254   : > { %3842 = vst [vmem:[#allocation1 + $0x3] ss:$9 sm:$0xff] %v3322_v49  ;;  %v8806_v10 = vand.u32 255, %v2286_v35  ;;  %v3327_v19 = vperm.slane %v3249_v30, 0  ;;  %vm4770_vm11 = vcmp.eq.s32.totalorder %v8272_v55, %v3249_v30  ;;  %v3328_v51 = vperm.slane %v3249_v30, 1 }
 0x255   : > { %3843 = vst [vmem:[#allocation1 + $0x4] ss:$9 sm:$0xff] %v3323_v6  ;;  %v8822_v6 = vpop.f32.mrf.mxu1  ;;  %vm4771_vm15 = vcmp.eq.s32.totalorder %v8276_v59, %v3249_v30  ;;  %v3329_v21 = vperm.slane %v3249_v30, 2  ;;  %v3330_v9 = vperm.slane %v3249_v30, 3  ;;  %v3332_v25 = vperm.slane %v3249_v30, 5 }
 0x256   : > { %3844 = vst [vmem:[#allocation1 + $0x5] ss:$9 sm:$0xff] %v3324_v0  ;;  %vm4772_vm12 = vcmp.eq.s32.totalorder %v8272_v55, %v8806_v10  ;;  %vm4773_vm13 = vcmp.eq.s32.totalorder %v8276_v59, %v8806_v10  ;;  %v12227_v0 = vmov 1.0|1.0   ;;  %v3333_v52 = vperm.slane %v3249_v30, 6 }
 0x257   : > { %3845 = vst [vmem:[#allocation1 + $0x6] ss:$9 sm:$0xff] %v3325_v24  ;;  %v7714_v48 = vpop.eup %7713  ;;  %v8812_v49 = vpop.xlane.xlu1 %2389  ;;  %vm8824_vm14 = vmpackc.low %vm4772_vm12, %vm4770_vm11  ;;  %v3334_v57 = vperm.slane %v3249_v30, 7 }
 0x258   : > { %3846 = vst [vmem:[#allocation1 + $0x7] ss:$9 sm:$0xff] %v3326_v44  ;;  %vm2391_vm1 = vcmp.eq.f32.partialorder %v8540_v34, %v8812_v49  ;;  %7140 = vmatmul.msk.bf16.gmra.mxu3 %vm8824_vm14, %v12227_v0  ;;  %vm8834_vm2 = vmpackc.low %vm4773_vm13, %vm4771_vm15  ;;  %v878_v44 = vpack.c.bf16 %v7714_v48, %v7712_v26  ;;  %v3331_v34 = vperm.slane %v3249_v30, 4  ;;  %v2298_v35 = vpop.xlane.xlu2 %2297  ;;  %v1360_v48 = vsub.f32 %v8262_v37, %v8460_v18 }
 0x259   : > { %12223 = vst [vmem:[#allocation29_spill] sm:$0xff] %v8809_v13  ;;  %v2392_v40 = vsel %vm2391_vm1, %v2387_v42, inf  ;;  %7204 = vmatmul.msk.bf16.gmra.mxu0 %vm8834_vm2, %v12227_v0  ;;  %v763_v42 = vpop.f32.mrf.mxu0 }
 0x25a   : > { %12224 = vst [vmem:[#allocation30_spill] sm:$0xff] %v8822_v6  ;;  %2485 = vmin.xlane.f32.xlu1 %v8818_v50  ;;  %v1747_v30 = vxor.u32 2147483647, %v1360_v48  ;;  %vm1619_vm4 = vcmp.lt.s32.totalorder %v1360_v48, 0  ;;  %v1363_v6 = vsub.f32 %v8266_v46, %v8503_v29  ;;  %v3341_v29 = vperm.slane %v8806_v10, 6 }
 0x25b   : > { %2393 = vmin.xlane.f32.xlu2 %v2392_v40  ;;  %1118 = vmatmul.bf16.gmra.mxu1 %v878_v44  ;;  %v8845_v26 = vpop.f32.mrf.mxu2 }
 0x25c   : > { %1287 = vmatmul.bf16.gmra.mxu2 %v878_v44  ;;  %12231 = vst [vmem:[#allocation32_spill] sm:$0xff] %v8845_v26  ;;  %vm1622_vm9 = vcmp.lt.s32.totalorder %v1363_v6, 0 }
 0x25d   : > { %v8853_v40 = vpop.f32.mrf.mxu1 }
 0x25e   : > { %12233 = vst [vmem:[#allocation34_spill] sm:$0xff] %v8853_v40  ;;  %v2299_v40 = vcvt.f32.s32 %v2298_v35 }
 0x25f   : > { %v8839_v38 = vld [vmem:[#allocation1] sm:$0xff]  ;;  %v2314_v18 = vpop.xlane.xlu0 %2313 }
 0x260   : > { %12230 = vst [vmem:[#allocation31_spill] sm:$0xff] %v8839_v38  ;;  %v3337_v38 = vperm.slane %v8806_v10, 2  ;;  %v2315_v26 = vcvt.f32.s32 %v2314_v18 }
 0x261   : > { %3848 = vst [vmem:[#allocation1] ss:$9 sm:$0xff] %v3327_v19  ;;  %v8849_v19 = vcvt.s32.f32 %v2498_v33  ;;  %v1875_v33 = vsel %vm1619_vm4, %v1747_v30, %v1360_v48  ;;  %v3338_v30 = vperm.slane %v8806_v10, 3 }
 0x262   : > { %3849 = vst [vmem:[#allocation1 + $0x1] ss:$9 sm:$0xff] %v3328_v51  ;;  %v1361_v51 = vsub.f32 %v8266_v46, %v8479_v63  ;;  %v8860_v63 = vpop.xlane.xlu2 %2405  ;;  %v2003_v1 = vand.u32 4294967040, %v1875_v33  ;;  %v1750_v33 = vxor.u32 2147483647, %v1363_v6 }
 0x263   : > { %3850 = vst [vmem:[#allocation1 + $0x2] ss:$9 sm:$0xff] %v3329_v21  ;;  %2501 = vmin.xlane.f32.xlu2 %v8849_v19  ;;  %v2401_v21 = vand.u32 65535, %v8546_v41  ;;  %v8864_v41 = vpop.f32.mrf.mxu2  ;;  %vm2407_vm6 = vcmp.eq.f32.partialorder %v8564_v7, %v8860_v63  ;;  %v3340_v7 = vperm.slane %v8806_v10, 5 }
 0x264   : > { %3851 = vst [vmem:[#allocation1 + $0x3] ss:$9 sm:$0xff] %v3330_v9  ;;  %v1748_v44 = vxor.u32 2147483647, %v1361_v51  ;;  %vm1620_vm5 = vcmp.lt.s32.totalorder %v1361_v51, 0  ;;  %v2300_v9 = vcvt.f32.s32 %v8538_v5 }
 0x265   : > { %3852 = vst [vmem:[#allocation1 + $0x4] ss:$9 sm:$0xff] %v3331_v34  ;;  %v2316_v34 = vcvt.f32.s32 %v8561_v12  ;;  %v1362_v12 = vsub.f32 %v8262_v37, %v8483_v58  ;;  %v764_v58 = vadd.f32 %v8519_v56, %v763_v42  ;;  %v1364_v42 = vsub.f32 %v8262_v37, %v8507_v47 }
 0x266   : > { %3853 = vst [vmem:[#allocation1 + $0x5] ss:$9 sm:$0xff] %v3332_v25  ;;  %v3335_v25 = vperm.slane %v8806_v10, 0  ;;  %v1876_v5 = vsel %vm1620_vm5, %v1748_v44, %v1361_v51  ;;  %v2301_v13 = vshll.u32 %v2300_v9, 16  ;;  %v3342_v9 = vperm.slane %v8806_v10, 7 }
 0x267   : > { %12232 = vst [vmem:[#allocation33_spill] sm:$0xff] %v8849_v19  ;;  %v2317_v35 = vshll.u32 %v2316_v34, 16  ;;  %v2004_v51 = vand.u32 4294967040, %v1876_v5  ;;  %v8879_v19 = vpop.f32.mrf.mxu1  ;;  %vm1621_vm8 = vcmp.lt.s32.totalorder %v1362_v12, 0  ;;  %7715 = vtanh.f32 %v764_v58  ;;  %v8898_v5 = vpop.xlane.xlu0 %2329 }
 0x268   : > { %3854 = vst [vmem:[#allocation1 + $0x6] ss:$9 sm:$0xff] %v3333_v52  ;;  %v3336_v52 = vperm.slane %v8806_v10, 1  ;;  %v2302_v44 = vadd.s32 %v2301_v13, %v2299_v40  ;;  %vm1623_vm11 = vcmp.lt.s32.totalorder %v1364_v42, 0 }
 0x269   : > { %3855 = vst [vmem:[#allocation1 + $0x7] ss:$9 sm:$0xff] %v3334_v57  ;;  %v2403_v57 = vcvt.s32.f32 %v2401_v21  ;;  %v765_v21 = vpop.f32.mrf.mxu0 }
 0x26a   : > { %12234 = vst [vmem:[#allocation35_spill] sm:$0xff] %v8864_v41  ;;  %v3339_v41 = vperm.slane %v8806_v10, 4  ;;  %v766_v34 = vadd.f32 %v8519_v56, %v765_v21  ;;  %v8887_v13 = vand.u32 255, %v2302_v44  ;;  %v2131_v10 = vor.u32 %v2003_v1, %v8272_v55 }
 0x26b   : > { %v2408_v18 = vsel %vm2407_vm6, %v2403_v57, inf  ;;  %v2132_v56 = vor.u32 %v2004_v51, %v8276_v59  ;;  %v8894_v47 = vpop.f32.mrf.mxu2  ;;  %v2417_v1 = vand.u32 65535, %v8566_v31 }
 0x26c   : > { %2409 = vmin.xlane.f32.xlu0 %v2408_v18  ;;  %7717 = vtanh.f32 %v766_v34  ;;  %vm4774_vm12 = vcmp.eq.s32.totalorder %v8272_v55, %v8887_v13  ;;  %vm4775_vm5 = vcmp.eq.s32.totalorder %v8276_v59, %v8887_v13  ;;  %v3344_v18 = vperm.slane %v8887_v13, 1 }
 0x26d   : > { %vm2511_vm10 = vcmp.lt.s32.totalorder %v2131_v10, %v2132_v56  ;;  %v3345_v44 = vperm.slane %v8887_v13, 2 }
 0x26e   : > { %v12285_v11 = vld [vmem:[#allocation33_spill] sm:$0xff] }
 0x26f   : > { %v8920_v58 = vpop.f32.mrf.mxu1 }
 0x270   : > { %v8872_v48 = vld [vmem:[#allocation1] sm:$0xff]  ;;  %12238 = vst [vmem:[#allocation37_spill] sm:$0xff] %v8920_v58  ;;  %v3348_v58 = vperm.slane %v8887_v13, 5 }
 0x271   : > { %12235 = vst [vmem:[#allocation36_spill] sm:$0xff] %v8872_v48  ;;  %v2318_v48 = vadd.s32 %v2317_v35, %v2315_v26 }
 0x272   : > { %3857 = vst [vmem:[#allocation1] ss:$9 sm:$0xff] %v3335_v25  ;;  %v1749_v25 = vxor.u32 2147483647, %v1362_v12 }
 0x273   : > { %3858 = vst [vmem:[#allocation1 + $0x1] ss:$9 sm:$0xff] %v3336_v52  ;;  %v8889_v26 = vand.u32 255, %v2318_v48  ;;  %v1878_v52 = vsel %vm1622_vm9, %v1750_v33, %v1363_v6  ;;  %v8900_v48 = vsel %vm2511_vm10, %v2131_v10, %v2132_v56  ;;  %v7716_v6 = vpop.eup %7715  ;;  %v3346_v33 = vperm.slane %v8887_v13, 3 }
 0x274   : > { %3859 = vst [vmem:[#allocation1 + $0x2] ss:$9 sm:$0xff] %v3337_v38  ;;  %v1365_v38 = vsub.f32 %v8266_v46, %v8531_v23  ;;  %v1877_v40 = vsel %vm1621_vm8, %v1749_v25, %v1362_v12  ;;  %v1751_v23 = vxor.u32 2147483647, %v1364_v42  ;;  %v3343_v12 = vperm.slane %v8887_v13, 0  ;;  %v7718_v51 = vpop.eup %7717 }
 0x275   : > { %3860 = vst [vmem:[#allocation1 + $0x3] ss:$9 sm:$0xff] %v3338_v30  ;;  %vm4776_vm13 = vcmp.eq.s32.totalorder %v8272_v55, %v8889_v26  ;;  %vm4777_vm15 = vcmp.eq.s32.totalorder %v8276_v59, %v8889_v26  ;;  %v2514_v21 = vshra.s32 %v8900_v48, 16  ;;  %v2005_v35 = vand.u32 4294967040, %v1877_v40 }
 0x276   : > { %3861 = vst [vmem:[#allocation1 + $0x4] ss:$9 sm:$0xff] %v3339_v41  ;;  %v1752_v57 = vxor.u32 2147483647, %v1365_v38  ;;  %v8896_v41 = vpop.f32.mrf.mxu0  ;;  %vm1624_vm1 = vcmp.lt.s32.totalorder %v1365_v38, 0  ;;  %vm8910_vm4 = vmpackc.low %vm4776_vm13, %vm4774_vm12  ;;  %v2419_v10 = vcvt.s32.f32 %v2417_v1  ;;  %v3347_v56 = vperm.slane %v8887_v13, 4 }
 0x277   : > { %3862 = vst [vmem:[#allocation1 + $0x5] ss:$9 sm:$0xff] %v3340_v7  ;;  %v8918_v7 = vpop.xlane.xlu2 %2421  ;;  %7142 = vmatmul.msk.bf16.gmra.mxu3 %vm8910_vm4, %v12227_v0  ;;  %vm8925_vm6 = vmpackc.low %vm4777_vm15, %vm4775_vm5  ;;  %v8941_v40 = vcvt.s32.f32 %v2514_v21  ;;  %v3350_v21 = vperm.slane %v8887_v13, 7 }
 0x278   : > { %3863 = vst [vmem:[#allocation1 + $0x6] ss:$9 sm:$0xff] %v3341_v29  ;;  %v2006_v29 = vand.u32 4294967040, %v1878_v52  ;;  %7206 = vmatmul.msk.bf16.gmra.mxu0 %vm8925_vm6, %v12227_v0  ;;  %v1880_v34 = vsel %vm1624_vm1, %v1752_v57, %v1365_v38  ;;  %vm2423_vm8 = vcmp.eq.f32.partialorder %v8583_v53, %v8918_v7  ;;  %v2433_v52 = vand.u32 65535, %v8587_v61  ;;  %v8950_v61 = vpop.f32.mrf.mxu2 }
 0x279   : > { %3864 = vst [vmem:[#allocation1 + $0x7] ss:$9 sm:$0xff] %v3342_v9  ;;  %v1879_v9 = vsel %vm1623_vm11, %v1751_v23, %v1364_v42  ;;  %v2424_v42 = vsel %vm2423_vm8, %v2419_v10, inf  ;;  %v879_v38 = vpack.c.bf16 %v7718_v51, %v7716_v6  ;;  %v2133_v23 = vor.u32 %v2005_v35, %v8272_v55  ;;  %2517 = vmin.xlane.f32.xlu2 %v8941_v40  ;;  %v8952_v35 = vpop.xlane.xlu0 %2437 }
 0x27a   : > { %v3349_v57 = vperm.slane %v8887_v13, 6  ;;  %2425 = vmin.xlane.f32.xlu0 %v2424_v42  ;;  %v2134_v1 = vor.u32 %v2006_v29, %v8276_v59  ;;  %v2007_v53 = vand.u32 4294967040, %v1879_v9  ;;  %12242 = vst [vmem:[#allocation39_spill] sm:$0xff] %v8950_v61  ;;  %v1366_v51 = vsub.f32 %v8262_v37, %v8536_v20  ;;  %v8956_v29 = vpop.f32.mrf.mxu1  ;;  %v8967_v9 = vld [vmem:[%s12195_s2] ss:$0 sm:$0xff] }
 0x27b   : > { %1123 = vmatmul.bf16.gmra.mxu1 %v879_v38  ;;  %1292 = vmatmul.bf16.gmra.mxu2 %v879_v38  ;;  %12243 = vst [vmem:[#allocation40_spill] sm:$0xff] %v8956_v29  ;;  %vm2439_vm10 = vcmp.eq.f32.partialorder %v8600_v54, %v8952_v35  ;;  %v769_v20 = vadd.f32 %v8967_v9, %v8896_v41  ;;  %v2428_v31 = vcvt.f32.s32 %v8918_v7  ;;  %v12298_v7 = vld [vmem:[#allocation14_spill] sm:$0xff] }
 0x27c   : > { %vm2527_vm9 = vcmp.lt.s32.totalorder %v2133_v23, %v2134_v1  ;;  %v1368_v10 = vsub.f32 %v8262_v37, %v8559_v27  ;;  %vm1625_vm12 = vcmp.lt.s32.totalorder %v1366_v51, 0  ;;  %v1753_v41 = vxor.u32 2147483647, %v1366_v51 }
 0x27d   : > { %v8960_v13 = vsel %vm2527_vm9, %v2133_v23, %v2134_v1  ;;  %7719 = vtanh.f32 %v769_v20  ;;  %v3351_v23 = vperm.slane %v8889_v26, 0 }
 0x27e   : > { %v770_v6 = vpop.f32.mrf.mxu0  ;;  %v1755_v27 = vxor.u32 2147483647, %v1368_v10  ;;  %vm1627_vm15 = vcmp.lt.s32.totalorder %v1368_v10, 0  ;;  %v1881_v20 = vsel %vm1625_vm12, %v1753_v41, %v1366_v51  ;;  %v3356_v51 = vperm.slane %v8889_v26, 5 }
 0x27f   : > { %v771_v54 = vadd.f32 %v8967_v9, %v770_v6 }
 0x280   : > { %v8935_v25 = vld [vmem:[#allocation1] sm:$0xff] }
 0x281   : > { %12241 = vst [vmem:[#allocation38_spill] sm:$0xff] %v8935_v25  ;;  %7721 = vtanh.f32 %v771_v54  ;;  %v2331_v54 = vcvt.f32.s32 %v8898_v5  ;;  %v9001_v25 = vpop.xlane.xlu0 %2453  ;;  %v3357_v5 = vperm.slane %v8889_v26, 6 }
 0x282   : > { %3866 = vst [vmem:[#allocation1] ss:$9 sm:$0xff] %v3343_v12  ;;  %v2008_v12 = vand.u32 4294967040, %v1880_v34  ;;  %v2530_v34 = vshra.s32 %v8960_v13, 16  ;;  %v8990_v6 = vpop.f32.mrf.mxu1  ;;  %vm2455_vm5 = vcmp.eq.f32.partialorder %v8612_v15, %v9001_v25 }
 0x283   : > { %3867 = vst [vmem:[#allocation1 + $0x1] ss:$9 sm:$0xff] %v3344_v18  ;;  %v2435_v18 = vcvt.s32.f32 %v2433_v52 }
 0x284   : > { %3868 = vst [vmem:[#allocation1 + $0x2] ss:$9 sm:$0xff] %v3345_v44  ;;  %v1367_v44 = vsub.f32 %v8266_v46, %v8555_v22  ;;  %v2136_v22 = vor.u32 %v2008_v12, %v8276_v59  ;;  %v8979_v52 = vcvt.s32.f32 %v2530_v34  ;;  %v3354_v34 = vperm.slane %v8889_v26, 3 }
 0x285   : > { %3869 = vst [vmem:[#allocation1 + $0x3] ss:$9 sm:$0xff] %v3346_v33  ;;  %v2135_v33 = vor.u32 %v2007_v53, %v8272_v55  ;;  %v3352_v53 = vperm.slane %v8889_v26, 1 }
 0x286   : > { %3870 = vst [vmem:[#allocation1 + $0x4] ss:$9 sm:$0xff] %v3347_v56  ;;  %v1369_v56 = vsub.f32 %v8266_v46, %v8574_v43  ;;  %2533 = vmin.xlane.f32.xlu0 %v8979_v52  ;;  %vm1626_vm13 = vcmp.lt.s32.totalorder %v1367_v44, 0  ;;  %v1754_v38 = vxor.u32 2147483647, %v1367_v44  ;;  %v2332_v43 = vcvt.f32.s32 %v8581_v17  ;;  %v773_v12 = vpop.f32.mrf.mxu0 }
 0x287   : > { %3871 = vst [vmem:[#allocation1 + $0x5] ss:$9 sm:$0xff] %v3348_v58  ;;  %v2440_v58 = vsel %vm2439_vm10, %v2435_v18, inf  ;;  %vm2543_vm11 = vcmp.lt.s32.totalorder %v2135_v33, %v2136_v22  ;;  %v2449_v18 = vand.u32 65535, %v8602_v16 }
 0x288   : > { %3872 = vst [vmem:[#allocation1 + $0x6] ss:$9 sm:$0xff] %v3349_v57  ;;  %2441 = vmin.xlane.f32.xlu1 %v2440_v58  ;;  %v8982_v42 = vsel %vm2543_vm11, %v2135_v33, %v2136_v22  ;;  %v8985_v57 = vpop.f32.mrf.mxu2  ;;  %v1756_v1 = vxor.u32 2147483647, %v1369_v56  ;;  %vm1628_vm1 = vcmp.lt.s32.totalorder %v1369_v56, 0  ;;  %v1882_v33 = vsel %vm1626_vm13, %v1754_v38, %v1367_v44 }
 0x289   : > { %3873 = vst [vmem:[#allocation1 + $0x7] ss:$9 sm:$0xff] %v3350_v21  ;;  %v3353_v21 = vperm.slane %v8889_v26, 2  ;;  %v2546_v17 = vshra.s32 %v8982_v42, 16  ;;  %v3355_v22 = vperm.slane %v8889_v26, 4  ;;  %v2333_v29 = vshll.u32 %v2332_v43, 16 }
 0x28a   : > { %12244 = vst [vmem:[#allocation41_spill] sm:$0xff] %v8985_v57  ;;  %v1883_v57 = vsel %vm1627_vm15, %v1755_v27, %v1368_v10  ;;  %v1884_v16 = vsel %vm1628_vm1, %v1756_v1, %v1369_v56  ;;  %v2451_v61 = vcvt.s32.f32 %v2449_v18  ;;  %v3358_v44 = vperm.slane %v8889_v26, 7 }
 0x28b   : > { %12245 = vst [vmem:[#allocation42_spill] sm:$0xff] %v8990_v6  ;;  %v7720_v6 = vpop.eup %7719  ;;  %v2334_v38 = vadd.s32 %v2333_v29, %v2331_v54  ;;  %v2010_v10 = vand.u32 4294967040, %v1882_v33  ;;  %v2011_v56 = vand.u32 4294967040, %v1883_v57  ;;  %v2012_v27 = vand.u32 4294967040, %v1884_v16  ;;  %v9015_v29 = vpop.f32.mrf.mxu1 }
 0x28c   : > { %v7722_v41 = vpop.eup %7721  ;;  %v774_v43 = vadd.f32 %v8967_v9, %v773_v12  ;;  %12248 = vst [vmem:[#allocation45_spill] sm:$0xff] %v9015_v29 }
 0x28d   : > { %v880_v26 = vpack.c.bf16 %v7722_v41, %v7720_v6  ;;  %v9018_v18 = vand.u32 255, %v2334_v38  ;;  %v2138_v12 = vor.u32 %v2010_v10, %v8276_v59  ;;  %v2140_v6 = vor.u32 %v2012_v27, %v8276_v59  ;;  %v7543_v41 = vld [vmem:[%s12249_s5 + $0x70] sm:$0xff] }
 0x28e   : > { %7723 = vtanh.f32 %v774_v43  ;;  %v7534_v43 = vld [vmem:[%s12249_s5 + $0x28] sm:$0xff] }
 0x28f   : > { %1128 = vmatmul.bf16.gmra.mxu1 %v880_v26  ;;  %1297 = vmatmul.bf16.gmra.mxu2 %v880_v26  ;;  %v3360_v33 = vperm.slane %v9018_v18, 1  ;;  %v3362_v10 = vperm.slane %v9018_v18, 3  ;;  %vm4778_vm12 = vcmp.eq.s32.totalorder %v8272_v55, %v9018_v18  ;;  %vm4779_vm1 = vcmp.eq.s32.totalorder %v8276_v59, %v9018_v18 }
 0x290   : > { %v8994_v58 = vld [vmem:[#allocation1] sm:$0xff]  ;;  %v9010_v1 = vpop.f32.mrf.mxu2 }
 0x291   : > { %12246 = vst [vmem:[#allocation43_spill] sm:$0xff] %v8994_v58  ;;  %v2009_v58 = vand.u32 4294967040, %v1881_v20  ;;  %v7536_v20 = vld [vmem:[%s12249_s5 + $0x38] sm:$0xff] }
 0x292   : > { %3875 = vst [vmem:[#allocation1] ss:$9 sm:$0xff] %v3351_v23  ;;  %v9008_v23 = vcvt.s32.f32 %v2546_v17  ;;  %5808 = vmatpush.bf16.msrb.mxu1 %v7536_v20 }
 0x293   : > { %3876 = vst [vmem:[#allocation1 + $0x1] ss:$9 sm:$0xff] %v3352_v53  ;;  %v2456_v53 = vsel %vm2455_vm5, %v2451_v61, inf  ;;  %v2137_v57 = vor.u32 %v2009_v58, %v8272_v55  ;;  %v2139_v61 = vor.u32 %v2011_v56, %v8272_v55  ;;  %v3359_v58 = vperm.slane %v9018_v18, 0  ;;  %v9050_v27 = vpop.f32.mrf.mxu1 }
 0x294   : > { %3877 = vst [vmem:[#allocation1 + $0x2] ss:$9 sm:$0xff] %v3353_v21  ;;  %2549 = vmin.xlane.f32.xlu0 %v9008_v23  ;;  %v775_v21 = vpop.f32.mrf.mxu0  ;;  %2457 = vmin.xlane.f32.xlu1 %v2456_v53  ;;  %v7542_v53 = vld [vmem:[%s12249_s5 + $0x68] sm:$0xff]  ;;  %v7724_v26 = vpop.eup %7723 }
 0x295   : > { %3878 = vst [vmem:[#allocation1 + $0x3] ss:$9 sm:$0xff] %v3354_v34  ;;  %v776_v15 = vadd.f32 %v8967_v9, %v775_v21  ;;  %v7544_v34 = vld [vmem:[%s12249_s5 + $0x78] sm:$0xff]  ;;  %vm2559_vm8 = vcmp.lt.s32.totalorder %v2137_v57, %v2138_v12  ;;  %vm2575_vm9 = vcmp.lt.s32.totalorder %v2139_v61, %v2140_v6  ;;  %v3363_v21 = vperm.slane %v9018_v18, 4 }
 0x296   : > { %3879 = vst [vmem:[#allocation1 + $0x4] ss:$9 sm:$0xff] %v3355_v22  ;;  %5977 = vmatpush.bf16.msrb.mxu2 %v7544_v34  ;;  %v9030_v54 = vsel %vm2559_vm8, %v2137_v57, %v2138_v12  ;;  %v9032_v17 = vsel %vm2575_vm9, %v2139_v61, %v2140_v6  ;;  %v3364_v57 = vperm.slane %v9018_v18, 5  ;;  %v3365_v61 = vperm.slane %v9018_v18, 6 }
 0x297   : > { %12247 = vst [vmem:[#allocation44_spill] sm:$0xff] %v9010_v1  ;;  %7725 = vtanh.f32 %v776_v15  ;;  %v2562_v22 = vshra.s32 %v9030_v54, 16  ;;  %v2578_v12 = vshra.s32 %v9032_v17, 16  ;;  %v3366_v6 = vperm.slane %v9018_v18, 7 }
 0x298   : > { %3880 = vst [vmem:[#allocation1 + $0x5] ss:$9 sm:$0xff] %v3356_v51  ;;  %v9036_v16 = vpop.f32.mrf.mxu2  ;;  %v7535_v51 = vld [vmem:[%s12249_s5 + $0x30] sm:$0xff] }
 0x299   : > { %3881 = vst [vmem:[#allocation1 + $0x6] ss:$9 sm:$0xff] %v3357_v5  ;;  %v3361_v5 = vperm.slane %v9018_v18, 2  ;;  %v9048_v56 = vcvt.s32.f32 %v2562_v22  ;;  %5809 = vmatpush.bf16.msrb.mxu1 %v7535_v51  ;;  %v9064_v34 = vcvt.s32.f32 %v2578_v12  ;;  %v7541_v22 = vld [vmem:[%s12249_s5 + $0x60] sm:$0xff]  ;;  %v7530_v12 = vld [vmem:[%s12249_s5 + $0x8] sm:$0xff] }
 0x29a   : > { %3882 = vst [vmem:[#allocation1 + $0x7] ss:$9 sm:$0xff] %v3358_v44  ;;  %5978 = vmatpush.bf16.msrb.mxu2 %v7543_v41 }
 0x29b   : > { %12250 = vst [vmem:[#allocation46_spill] sm:$0xff] %v9036_v16 }
 0x29c   : > { %v778_v44 = vpop.f32.mrf.mxu0  ;;  %12252 = vst [vmem:[#allocation48_spill] sm:$0xff] %v9050_v27  ;;  %2565 = vmin.xlane.f32.xlu1 %v9048_v56 }
 0x29d   : > { %v7726_v15 = vpop.eup %7725  ;;  %5810 = vmatpush.bf16.msrb.mxu1 %v7534_v43  ;;  %v779_v51 = vadd.f32 %v8967_v9, %v778_v44  ;;  %v7532_v43 = vld [vmem:[%s12249_s5 + $0x18] sm:$0xff] }
 0x29e   : > { %5979 = vmatpush.bf16.msrb.mxu2 %v7542_v53  ;;  %v881_v20 = vpack.c.bf16 %v7726_v15, %v7724_v26  ;;  %v7540_v53 = vld [vmem:[%s12249_s5 + $0x58] sm:$0xff]  ;;  %v7531_v26 = vld [vmem:[%s12249_s5 + $0x10] sm:$0xff] }
 0x29f   : > { %7727 = vtanh.f32 %v779_v51  ;;  %v7529_v51 = vld [vmem:[%s12249_s5] sm:$0xff] }
 0x2a0   : > { %1133 = vmatmul.bf16.gmra.mxu1 %v881_v20  ;;  %1302 = vmatmul.bf16.gmra.mxu2 %v881_v20 }
 0x2a1   : > { %v9045_v38 = vld [vmem:[#allocation1] sm:$0xff] }
 0x2a2   : > { %12251 = vst [vmem:[#allocation47_spill] sm:$0xff] %v9045_v38  ;;  %5980 = vmatpush.bf16.msrb.mxu2 %v7541_v22 }
 0x2a3   : > { %3884 = vst [vmem:[#allocation1] ss:$9 sm:$0xff] %v3359_v58  ;;  %v9066_v58 = vpop.f32.mrf.mxu2 }
 0x2a4   : > { %3885 = vst [vmem:[#allocation1 + $0x1] ss:$9 sm:$0xff] %v3360_v33  ;;  %v7533_v33 = vld [vmem:[%s12249_s5 + $0x20] sm:$0xff]  ;;  %v780_v41 = vpop.f32.mrf.mxu0  ;;  %2581 = vmin.xlane.f32.xlu1 %v9064_v34 }
 0x2a5   : > { %3886 = vst [vmem:[#allocation1 + $0x2] ss:$9 sm:$0xff] %v3361_v5  ;;  %v781_v5 = vadd.f32 %v8967_v9, %v780_v41  ;;  %5811 = vmatpush.bf16.msrb.mxu1 %v7533_v33  ;;  %v7537_v41 = vld [vmem:[%s12249_s5 + $0x40] sm:$0xff] }
 0x2a6   : > { %3887 = vst [vmem:[#allocation1 + $0x3] ss:$9 sm:$0xff] %v3362_v10  ;;  %v9076_v10 = vpop.f32.mrf.mxu1  ;;  %5981 = vmatpush.bf16.msrb.mxu2 %v7540_v53 }
 0x2a7   : > { %3888 = vst [vmem:[#allocation1 + $0x4] ss:$9 sm:$0xff] %v3363_v21  ;;  %7729 = vtanh.f32 %v781_v5  ;;  %v7539_v21 = vld [vmem:[%s12249_s5 + $0x50] sm:$0xff] }
 0x2a8   : > { %3889 = vst [vmem:[#allocation1 + $0x5] ss:$9 sm:$0xff] %v3364_v57 }
 0x2a9   : > { %12253 = vst [vmem:[#allocation49_spill] sm:$0xff] %v9066_v58  ;;  %5812 = vmatpush.bf16.msrb.mxu1 %v7532_v43 }
 0x2aa   : > { %3890 = vst [vmem:[#allocation1 + $0x6] ss:$9 sm:$0xff] %v3365_v61  ;;  %5982 = vmatpush.bf16.msrb.mxu2 %v7539_v21  ;;  %v7538_v61 = vld [vmem:[%s12249_s5 + $0x48] sm:$0xff]  ;;  %v2348_v21 = vcvt.f32.s32 %v8725_v28  ;;  %v2364_v28 = vcvt.f32.s32 %v8746_v4  ;;  %s7879_s5 = sshra.s32 %s6697_s14, 4  ;;  %s7880_s5 = int_to_ptr.hbm [resolvable:$true] %s7879_s5 }
 0x2ab   : > { %3891 = vst [vmem:[#allocation1 + $0x7] ss:$9 sm:$0xff] %v3366_v6  ;;  %v9085_v44 = vpop.f32.mrf.mxu2  ;;  %v7728_v6 = vpop.eup %7727  ;;  %s7881_s6 = scalar_lea.hbm %s7880_s5, 4  ;;  %p7886_p0 = scmp.lt.s32.totalorder %s7880_s5, %s12118_s9 }
 0x2ac   : > { %12254 = vst [vmem:[#allocation50_spill] sm:$0xff] %v9076_v10  ;;  %v783_v15 = vpop.f32.mrf.mxu0  ;;  %p7882_p11 = scmp.ne.s32.totalorder %s7880_s5, %s7881_s6  ;;  %p7887_p1 = scmp.lt.s32.totalorder %s7885_s13, %s7881_s6 }
 0x2ad   : > { %12255 = vst [vmem:[#allocation51_spill] sm:$0xff] %v9085_v44  ;;  %5813 = vmatpush.bf16.msrb.mxu1 %v7531_v26  ;;  %v7730_v20 = vpop.eup %7729  ;;  %v784_v5 = vadd.f32 %v8967_v9, %v783_v15  ;;  %v1370_v15 = vsub.f32 %v8262_v37, %v8579_v45 }
 0x2ae   : > { %v9093_v57 = vpop.f32.mrf.mxu1  ;;  %5983 = vmatpush.bf16.msrb.mxu2 %v7538_v61  ;;  %v882_v33 = vpack.c.bf16 %v7730_v20, %v7728_v6  ;;  %v2349_v61 = vshll.u32 %v2348_v21, 16  ;;  %p7883_p12 = pnand %p7882_p11, %p8063_p5  ;;  %p7888_p2 = por %p7887_p1, %p7886_p0 }
 0x2af   : > { %12256 = vst [vmem:[#allocation52_spill] sm:$0xff] %v9093_v57  ;;  %7731 = vtanh.f32 %v784_v5  ;;  %vm1629_vm10 = vcmp.lt.s32.totalorder %v1370_v15, 0  ;;  %v1757_v5 = vxor.u32 2147483647, %v1370_v15 }
 0x2b0   : > { %1138 = vmatmul.bf16.gmra.mxu1 %v882_v33  ;;  %1307 = vmatmul.bf16.gmra.mxu2 %v882_v33  ;;  %p7884_p13 = pneg %p7883_p12 }
 0x2b1   : > { %5814 = vmatpush.bf16.msrb.mxu1 %v7530_v12 }
 0x2b2   : > { %5984 = vmatpush.bf16.msrb.mxu2 %v7537_v41  ;;  %p7889_p3 = pnand %p7888_p2, %p7884_p13 }
 0x2b3   : > { %v9101_v22 = vpop.f32.mrf.mxu2 }
 0x2b4   : > { %12257 = vst [vmem:[#allocation53_spill] sm:$0xff] %v9101_v22  ;;  %v785_v43 = vpop.f32.mrf.mxu0 }
 0x2b5   : > { %v786_v53 = vadd.f32 %v8967_v9, %v785_v43  ;;  %5815 = vmatpush.bf16.msrb.mxu1 %v7529_v51  ;;  %v2346_v12 = vpop.xlane.xlu1 %2345  ;;  %v7732_v43 = vpop.eup %7731  ;;  %v1371_v51 = vsub.f32 %v8266_v46, %v8594_v14 }
 0x2b6   : > { %v9111_v26 = vpop.f32.mrf.mxu1  ;;  %v2347_v20 = vcvt.f32.s32 %v2346_v12 }
 0x2b7   : > { %12258 = vst [vmem:[#allocation54_spill] sm:$0xff] %v9111_v26  ;;  %7733 = vtanh.f32 %v786_v53  ;;  %vm1630_vm11 = vcmp.lt.s32.totalorder %v1371_v51, 0  ;;  %v1758_v12 = vxor.u32 2147483647, %v1371_v51  ;;  %v9123_v26 = vld [vmem:[#allocation1] sm:$0xff] }
 0x2b8   : > { %v2350_v9 = vadd.s32 %v2349_v61, %v2347_v20  ;;  %12261 = vst [vmem:[#allocation57_spill] sm:$0xff] %v9123_v26  ;;  %v2365_v61 = vshll.u32 %v2364_v28, 16 }
 0x2ba   : > { %v3254_v41 = vand.u32 255, %v2350_v9 }
 0x2bb   : > { %v9114_v6 = vpop.f32.mrf.mxu2 }
 0x2bc   : > { %12259 = vst [vmem:[#allocation55_spill] sm:$0xff] %v9114_v6  ;;  %v3367_v53 = vperm.slane %v3254_v41, 0  ;;  %v3368_v21 = vperm.slane %v3254_v41, 1  ;;  %v3369_v6 = vperm.slane %v3254_v41, 2  ;;  %v3371_v22 = vperm.slane %v3254_v41, 4 }
 0x2bd   : > { %v7734_v33 = vpop.eup %7733  ;;  %v2362_v14 = vpop.xlane.xlu1 %2361  ;;  %vm4780_vm13 = vcmp.eq.s32.totalorder %v8272_v55, %v3254_v41  ;;  %v3372_v4 = vperm.slane %v3254_v41, 5  ;;  %vm4781_vm5 = vcmp.eq.s32.totalorder %v8276_v59, %v3254_v41  ;;  %v3373_v28 = vperm.slane %v3254_v41, 6 }
 0x2be   : > { %v9118_v38 = vpop.f32.mrf.mxu1  ;;  %v883_v45 = vpack.c.bf16 %v7734_v33, %v7732_v43  ;;  %3893 = vst [vmem:[#allocation1] ss:$9 sm:$0xff] %v3367_v53  ;;  %v2363_v9 = vcvt.f32.s32 %v2362_v14  ;;  %vm9130_vm15 = vmpackc.low %vm4780_vm13, %vm4778_vm12  ;;  %v1885_v43 = vsel %vm1629_vm10, %v1757_v5, %v1370_v15  ;;  %v3374_v18 = vperm.slane %v3254_v41, 7 }
 0x2bf   : > { %12260 = vst [vmem:[#allocation56_spill] sm:$0xff] %v9118_v38  ;;  %v3370_v38 = vperm.slane %v3254_v41, 3  ;;  %7144 = vmatmul.msk.bf16.gmra.mxu3 %vm9130_vm15, %v12227_v0  ;;  %vm9143_vm8 = vmpackc.low %vm4781_vm5, %vm4779_vm1 }
 0x2c0   : > { %3894 = vst [vmem:[#allocation1 + $0x1] ss:$9 sm:$0xff] %v3368_v21  ;;  %v1886_v21 = vsel %vm1630_vm11, %v1758_v12, %v1371_v51  ;;  %1143 = vmatmul.bf16.gmra.mxu1 %v883_v45  ;;  %1312 = vmatmul.bf16.gmra.mxu2 %v883_v45  ;;  %v2366_v14 = vadd.s32 %v2365_v61, %v2363_v9  ;;  %v12270_v12 = vld [vmem:[#allocation8_spill] sm:$0xff]  ;;  %v2380_v9 = vcvt.f32.s32 %v8791_v32 }
 0x2c1   : > { %3895 = vst [vmem:[#allocation1 + $0x2] ss:$9 sm:$0xff] %v3369_v6  ;;  %7208 = vmatmul.msk.bf16.gmra.mxu0 %vm9143_vm8, %v12227_v0  ;;  %v2013_v6 = vand.u32 4294967040, %v1885_v43  ;;  %v2014_v15 = vand.u32 4294967040, %v1886_v21  ;;  %v1372_v51 = vsub.f32 %v8262_v37, %v8597_v39  ;;  %v1373_v45 = vsub.f32 %v8266_v46, %v12270_v12 }
 0x2c2   : > { %3896 = vst [vmem:[#allocation1 + $0x3] ss:$9 sm:$0xff] %v3370_v38  ;;  %v9151_v5 = vand.u32 255, %v2366_v14  ;;  %v2465_v39 = vand.u32 65535, %v8697_v8 }
 0x2c3   : > { %v9125_v20 = vpop.f32.mrf.mxu2  ;;  %3897 = vst [vmem:[#allocation1 + $0x4] ss:$9 sm:$0xff] %v3371_v22  ;;  %v2141_v38 = vor.u32 %v2013_v6, %v8272_v55  ;;  %v2142_v22 = vor.u32 %v2014_v15, %v8276_v59  ;;  %vm1631_vm10 = vcmp.lt.s32.totalorder %v1372_v51, 0  ;;  %v1759_v21 = vxor.u32 2147483647, %v1372_v51  ;;  %v12272_v15 = vld [vmem:[#allocation10_spill] sm:$0xff] }
 0x2c4   : > { %12262 = vst [vmem:[#allocation58_spill] sm:$0xff] %v9125_v20  ;;  %v3375_v61 = vperm.slane %v9151_v5, 0  ;;  %v3376_v43 = vperm.slane %v9151_v5, 1  ;;  %v3377_v6 = vperm.slane %v9151_v5, 2  ;;  %v1375_v12 = vsub.f32 %v8266_v46, %v12272_v15 }
 0x2c5   : > { %3898 = vst [vmem:[#allocation1 + $0x5] ss:$9 sm:$0xff] %v3372_v4  ;;  %vm2591_vm9 = vcmp.lt.s32.totalorder %v2141_v38, %v2142_v22  ;;  %v3378_v32 = vperm.slane %v9151_v5, 3  ;;  %v1760_v20 = vxor.u32 2147483647, %v1373_v45  ;;  %v3379_v8 = vperm.slane %v9151_v5, 4 }
 0x2c6   : > { %v9138_v33 = vpop.f32.mrf.mxu1  ;;  %3899 = vst [vmem:[#allocation1 + $0x6] ss:$9 sm:$0xff] %v3373_v28  ;;  %v2378_v4 = vpop.xlane.xlu2 %2377  ;;  %vm1632_vm12 = vcmp.lt.s32.totalorder %v1373_v45, 0  ;;  %v3380_v44 = vperm.slane %v9151_v5, 5  ;;  %v1887_v10 = vsel %vm1631_vm10, %v1759_v21, %v1372_v51  ;;  %vm1634_vm1 = vcmp.lt.s32.totalorder %v1375_v12, 0 }
 0x2c7   : > { %12265 = vst [vmem:[#allocation59_spill] sm:$0xff] %v9138_v33  ;;  %v9166_v28 = vpop.xlane.xlu1 %2469  ;;  %v9177_v33 = vsel %vm2591_vm9, %v2141_v38, %v2142_v22  ;;  %v3381_v38 = vperm.slane %v9151_v5, 6  ;;  %v1762_v22 = vxor.u32 2147483647, %v1375_v12  ;;  %vm4783_vm9 = vcmp.eq.s32.totalorder %v8276_v59, %v9151_v5 }
 0x2c8   : > { %3900 = vst [vmem:[#allocation1 + $0x7] ss:$9 sm:$0xff] %v3374_v18  ;;  %v12271_v18 = vld [vmem:[#allocation9_spill] sm:$0xff]  ;;  %vm2471_vm11 = vcmp.eq.f32.partialorder %v8797_v36, %v9166_v28 }
 0x2c9   : > { %v1374_v14 = vsub.f32 %v8262_v37, %v12271_v18  ;;  %v2381_v18 = vshll.u32 %v2380_v9, 16 }
 0x2cb   : > { %v9153_v26 = vpop.f32.mrf.mxu2  ;;  %vm1633_vm13 = vcmp.lt.s32.totalorder %v1374_v14, 0 }
 0x2cc   : > { %12268 = vst [vmem:[#allocation60_spill] sm:$0xff] %v9153_v26  ;;  %v2379_v26 = vcvt.f32.s32 %v2378_v4  ;;  %v1761_v4 = vxor.u32 2147483647, %v1374_v14 }
 0x2ce   : > { %v9157_v41 = vpop.f32.mrf.mxu1  ;;  %v2382_v27 = vadd.s32 %v2381_v18, %v2379_v26  ;;  %v2015_v26 = vand.u32 4294967040, %v1887_v10  ;;  %v1889_v36 = vsel %vm1633_vm13, %v1761_v4, %v1374_v14 }
 0x2cf   : > { %12269 = vst [vmem:[#allocation61_spill] sm:$0xff] %v9157_v41  ;;  %v9174_v41 = vld [vmem:[#allocation1] sm:$0xff]  ;;  %v2017_v62 = vand.u32 4294967040, %v1889_v36  ;;  %v2412_v36 = vcvt.f32.s32 %v8860_v63 }
 0x2d0   : > { %12273 = vst [vmem:[#allocation8_spill] sm:$0xff] %v9174_v41  ;;  %v2467_v41 = vcvt.s32.f32 %v2465_v39  ;;  %7330 = vmatmul.msk.bf16.vlgmr.msrb.gmra.mxu1 %vm8755_vm3, %v12227_v0  ;;  %7394 = vmatmul.msk.bf16.vlgmr.msrb.gmra.mxu2 %vm8770_vm7, %v12227_v0  ;;  %v2143_v10 = vor.u32 %v2015_v26, %v8272_v55  ;;  %vm4782_vm3 = vcmp.eq.s32.totalorder %v8272_v55, %v9151_v5 }
 0x2d1   : > { %3902 = vst [vmem:[#allocation1] ss:$9 sm:$0xff] %v3375_v61  ;;  %v3382_v61 = vperm.slane %v9151_v5, 7  ;;  %v2145_v26 = vor.u32 %v2017_v62, %v8272_v55 }
 0x2d2   : > { %3903 = vst [vmem:[#allocation1 + $0x1] ss:$9 sm:$0xff] %v3376_v43  ;;  %v2472_v9 = vsel %vm2471_vm11, %v2467_v41, inf  ;;  %v1888_v43 = vsel %vm1632_vm12, %v1760_v20, %v1373_v45  ;;  %v1890_v41 = vsel %vm1634_vm1, %v1762_v22, %v1375_v12  ;;  %v3256_v20 = vand.u32 255, %v2382_v27  ;;  %v9208_v12 = vpop.xlane.xlu1 %2485 }
 0x2d3   : > { %v9183_v15 = vpop.f32.mrf.mxu2  ;;  %3904 = vst [vmem:[#allocation1 + $0x2] ss:$9 sm:$0xff] %v3377_v6  ;;  %2473 = vmin.xlane.f32.xlu2 %v2472_v9  ;;  %v2016_v51 = vand.u32 4294967040, %v1888_v43  ;;  %v2481_v45 = vand.u32 65535, %v8783_v2  ;;  %v2018_v21 = vand.u32 4294967040, %v1890_v41  ;;  %v2396_v6 = vcvt.f32.s32 %v8812_v49 }
 0x2d4   : > { %12274 = vst [vmem:[#allocation9_spill] sm:$0xff] %v9183_v15  ;;  %v3383_v60 = vperm.slane %v3256_v20, 0  ;;  %v3384_v14 = vperm.slane %v3256_v20, 1  ;;  %vm4784_vm7 = vcmp.eq.s32.totalorder %v8272_v55, %v3256_v20  ;;  %v3385_v27 = vperm.slane %v3256_v20, 2 }
 0x2d5   : > { %3905 = vst [vmem:[#allocation1 + $0x3] ss:$9 sm:$0xff] %v3378_v32  ;;  %v2483_v2 = vcvt.s32.f32 %v2481_v45  ;;  %vm9213_vm5 = vmpackc.low %vm4784_vm7, %vm4782_vm3  ;;  %vm4785_vm10 = vcmp.eq.s32.totalorder %v8276_v59, %v3256_v20  ;;  %vm2487_vm11 = vcmp.eq.f32.partialorder %v8818_v50, %v9208_v12  ;;  %v3386_v4 = vperm.slane %v3256_v20, 3 }
 0x2d6   : > { %v9188_v58 = vpop.f32.mrf.mxu1  ;;  %3906 = vst [vmem:[#allocation1 + $0x4] ss:$9 sm:$0xff] %v3379_v8  ;;  %v2144_v8 = vor.u32 %v2016_v51, %v8276_v59  ;;  %7146 = vmatmul.msk.bf16.gmra.mxu3 %vm9213_vm5, %v12227_v0  ;;  %vm9227_vm12 = vmpackc.low %vm4785_vm10, %vm4783_vm9  ;;  %v2397_v9 = vshll.u32 %v2396_v6, 16  ;;  %v3387_v5 = vperm.slane %v3256_v20, 4  ;;  %v3388_v50 = vperm.slane %v3256_v20, 5 }
 0x2d7   : > { %12275 = vst [vmem:[#allocation10_spill] sm:$0xff] %v9188_v58  ;;  %7210 = vmatmul.msk.bf16.gmra.mxu0 %vm9227_vm12, %v12227_v0  ;;  %v2146_v51 = vor.u32 %v2018_v21, %v8276_v59  ;;  %v3389_v41 = vperm.slane %v3256_v20, 6  ;;  %v2594_v6 = vshra.s32 %v9177_v33, 16  ;;  %v2460_v49 = vcvt.f32.s32 %v9001_v25 }
 0x2d8   : > { %3907 = vst [vmem:[#allocation1 + $0x5] ss:$9 sm:$0xff] %v3380_v44  ;;  %v2394_v44 = vpop.xlane.xlu2 %2393  ;;  %vm2607_vm13 = vcmp.lt.s32.totalorder %v2143_v10, %v2144_v8 }
 0x2d9   : > { %3908 = vst [vmem:[#allocation1 + $0x6] ss:$9 sm:$0xff] %v3381_v38  ;;  %v2395_v38 = vcvt.f32.s32 %v2394_v44  ;;  %v9234_v43 = vsel %vm2607_vm13, %v2143_v10, %v2144_v8  ;;  %vm2623_vm1 = vcmp.lt.s32.totalorder %v2145_v26, %v2146_v51  ;;  %v9252_v62 = vcvt.s32.f32 %v2594_v6 }
 0x2da   : > { %3909 = vst [vmem:[#allocation1 + $0x7] ss:$9 sm:$0xff] %v3382_v61  ;;  %v2488_v61 = vsel %vm2487_vm11, %v2483_v2, inf  ;;  %v9244_v8 = vsel %vm2623_vm1, %v2145_v26, %v2146_v51  ;;  %v2497_v2 = vand.u32 65535, %v8820_v3  ;;  %v2610_v24 = vshra.s32 %v9234_v43, 16 }
 0x2db   : > { %v9201_v39 = vpop.f32.mrf.mxu2  ;;  %2489 = vmin.xlane.f32.xlu2 %v2488_v61  ;;  %v2398_v44 = vadd.s32 %v2397_v9, %v2395_v38  ;;  %v2626_v30 = vshra.s32 %v9244_v8, 16 }
 0x2dc   : > { %12276 = vst [vmem:[#allocation62_spill] sm:$0xff] %v9201_v39  ;;  %v2499_v61 = vcvt.s32.f32 %v2497_v2  ;;  %v9269_v6 = vcvt.s32.f32 %v2610_v24 }
 0x2dd   : > { %v3257_v21 = vand.u32 255, %v2398_v44  ;;  %v2513_v44 = vand.u32 65535, %v8900_v48 }
 0x2de   : > { %v9204_v32 = vpop.f32.mrf.mxu1 }
 0x2df   : > { %12277 = vst [vmem:[#allocation63_spill] sm:$0xff] %v9204_v32  ;;  %v2410_v10 = vpop.xlane.xlu0 %2409  ;;  %v3391_v38 = vperm.slane %v3257_v21, 0  ;;  %v3392_v9 = vperm.slane %v3257_v21, 1  ;;  %v3393_v26 = vperm.slane %v3257_v21, 2  ;;  %vm4787_vm10 = vcmp.eq.s32.totalorder %v8276_v59, %v3257_v21 }
 0x2e0   : > { %7332 = vmatmul.msk.bf16.gmra.mxu1 %vm8824_vm14, %v12227_v0  ;;  %7396 = vmatmul.msk.bf16.gmra.mxu2 %vm8834_vm2, %v12227_v0  ;;  %v2411_v63 = vcvt.f32.s32 %v2410_v10  ;;  %v3396_v10 = vperm.slane %v3257_v21, 5  ;;  %vm4786_vm2 = vcmp.eq.s32.totalorder %v8272_v55, %v3257_v21  ;;  %v3398_v48 = vperm.slane %v3257_v21, 7 }
 0x2e1   : > { %v9222_v18 = vld [vmem:[#allocation1] sm:$0xff] }
 0x2e2   : > { %12280 = vst [vmem:[#allocation64_spill] sm:$0xff] %v9222_v18 }
 0x2e3   : > { %3911 = vst [vmem:[#allocation1] ss:$9 sm:$0xff] %v3383_v60  ;;  %v9239_v45 = vpop.f32.mrf.mxu2  ;;  %v3390_v60 = vperm.slane %v3256_v20, 7  ;;  %v2413_v20 = vshll.u32 %v2412_v36, 16  ;;  %2597 = vmin.xlane.f32.xlu2 %v9252_v62  ;;  %v3394_v36 = vperm.slane %v3257_v21, 3 }
 0x2e4   : > { %3912 = vst [vmem:[#allocation1 + $0x1] ss:$9 sm:$0xff] %v3384_v14 }
 0x2e5   : > { %3913 = vst [vmem:[#allocation1 + $0x2] ss:$9 sm:$0xff] %v3385_v27  ;;  %v2414_v27 = vadd.s32 %v2413_v20, %v2411_v63  ;;  %v3397_v63 = vperm.slane %v3257_v21, 6 }
 0x2e6   : > { %12283 = vst [vmem:[#allocation65_spill] sm:$0xff] %v9239_v45  ;;  %v9242_v14 = vpop.f32.mrf.mxu1 }
 0x2e7   : > { %3914 = vst [vmem:[#allocation1 + $0x3] ss:$9 sm:$0xff] %v3386_v4  ;;  %v9256_v4 = vpop.xlane.xlu2 %2501 }
 0x2e8   : > { %3915 = vst [vmem:[#allocation1 + $0x4] ss:$9 sm:$0xff] %v3387_v5  ;;  %vm2503_vm14 = vcmp.eq.f32.partialorder %v12285_v11, %v9256_v4  ;;  %v9261_v5 = vand.u32 255, %v2414_v27  ;;  %v12293_v27 = vld [vmem:[#allocation11_spill] sm:$0xff] }
 0x2e9   : > { %12284 = vst [vmem:[#allocation66_spill] sm:$0xff] %v9242_v14  ;;  %v2504_v51 = vsel %vm2503_vm14, %v2499_v61, inf  ;;  %v1376_v11 = vsub.f32 %v8262_v37, %v12293_v27  ;;  %v12294_v61 = vld [vmem:[#allocation12_spill] sm:$0xff] }
 0x2ea   : > { %3916 = vst [vmem:[#allocation1 + $0x5] ss:$9 sm:$0xff] %v3388_v50  ;;  %2505 = vmin.xlane.f32.xlu0 %v2504_v51  ;;  %vm4788_vm3 = vcmp.eq.s32.totalorder %v8272_v55, %v9261_v5  ;;  %vm4789_vm7 = vcmp.eq.s32.totalorder %v8276_v59, %v9261_v5  ;;  %v3400_v27 = vperm.slane %v9261_v5, 1 }
 0x2eb   : > { %3917 = vst [vmem:[#allocation1 + $0x6] ss:$9 sm:$0xff] %v3389_v41  ;;  %v9263_v50 = vpop.f32.mrf.mxu2  ;;  %2613 = vmin.xlane.f32.xlu2 %v9269_v6  ;;  %vm9278_vm9 = vmpackc.low %vm4788_vm3, %vm4786_vm2  ;;  %vm1635_vm1 = vcmp.lt.s32.totalorder %v1376_v11, 0 }
 0x2ec   : > { %3918 = vst [vmem:[#allocation1 + $0x7] ss:$9 sm:$0xff] %v3390_v60  ;;  %v3395_v60 = vperm.slane %v3257_v21, 4  ;;  %7148 = vmatmul.msk.bf16.gmra.mxu3 %vm9278_vm9, %v12227_v0  ;;  %vm9286_vm11 = vmpackc.low %vm4789_vm7, %vm4787_vm10 }
 0x2ed   : > { %12286 = vst [vmem:[#allocation33_spill] sm:$0xff] %v9263_v50  ;;  %7212 = vmatmul.msk.bf16.gmra.mxu0 %vm9286_vm11, %v12227_v0  ;;  %v2426_v24 = vpop.xlane.xlu0 %2425 }
 0x2ee   : > { %v9267_v41 = vpop.f32.mrf.mxu1  ;;  %v2427_v18 = vcvt.f32.s32 %v2426_v24  ;;  %v3404_v24 = vperm.slane %v9261_v5, 5 }
 0x2ef   : > { %12288 = vst [vmem:[#allocation68_spill] sm:$0xff] %v9267_v41  ;;  %v9295_v21 = vpop.xlane.xlu2 %2517 }
 0x2f0   : > { %7334 = vmatmul.msk.bf16.gmra.mxu1 %vm8910_vm4, %v12227_v0  ;;  %7398 = vmatmul.msk.bf16.gmra.mxu2 %vm8925_vm6, %v12227_v0  ;;  %vm2519_vm13 = vcmp.eq.f32.partialorder %v8941_v40, %v9295_v21  ;;  %v3399_v40 = vperm.slane %v9261_v5, 0 }
 0x2f3   : > { %v9265_v3 = vld [vmem:[#allocation1] sm:$0xff] }
 0x2f4   : > { %12287 = vst [vmem:[#allocation67_spill] sm:$0xff] %v9265_v3  ;;  %v3401_v3 = vperm.slane %v9261_v5, 2 }
 0x2f5   : > { %3920 = vst [vmem:[#allocation1] ss:$9 sm:$0xff] %v3391_v38  ;;  %v2515_v38 = vcvt.s32.f32 %v2513_v44 }
 0x2f6   : > { %3921 = vst [vmem:[#allocation1 + $0x1] ss:$9 sm:$0xff] %v3392_v9  ;;  %v1377_v9 = vsub.f32 %v8266_v46, %v12294_v61  ;;  %v12297_v61 = vld [vmem:[#allocation13_spill] sm:$0xff] }
 0x2f7   : > { %3922 = vst [vmem:[#allocation1 + $0x2] ss:$9 sm:$0xff] %v3393_v26  ;;  %v9307_v26 = vpop.f32.mrf.mxu2  ;;  %v2520_v51 = vsel %vm2519_vm13, %v2515_v38, inf  ;;  %v2529_v38 = vand.u32 65535, %v8960_v13  ;;  %v2429_v13 = vshll.u32 %v2428_v31, 16 }
 0x2f8   : > { %3923 = vst [vmem:[#allocation1 + $0x3] ss:$9 sm:$0xff] %v3394_v36  ;;  %v1763_v36 = vxor.u32 2147483647, %v1376_v11  ;;  %2521 = vmin.xlane.f32.xlu0 %v2520_v51  ;;  %v1764_v44 = vxor.u32 2147483647, %v1377_v9  ;;  %v1378_v51 = vsub.f32 %v8262_v37, %v12297_v61 }
 0x2f9   : > { %3924 = vst [vmem:[#allocation1 + $0x4] ss:$9 sm:$0xff] %v3395_v60  ;;  %v9309_v60 = vpop.f32.mrf.mxu1  ;;  %vm1636_vm4 = vcmp.lt.s32.totalorder %v1377_v9, 0  ;;  %v3403_v61 = vperm.slane %v9261_v5, 4 }
 0x2fa   : > { %3925 = vst [vmem:[#allocation1 + $0x5] ss:$9 sm:$0xff] %v3396_v10  ;;  %v1892_v41 = vsel %vm1636_vm4, %v1764_v44, %v1377_v9  ;;  %v2531_v9 = vcvt.s32.f32 %v2529_v38  ;;  %vm1637_vm14 = vcmp.lt.s32.totalorder %v1378_v51, 0 }
 0x2fb   : > { %3926 = vst [vmem:[#allocation1 + $0x6] ss:$9 sm:$0xff] %v3397_v63  ;;  %v2442_v10 = vpop.xlane.xlu1 %2441  ;;  %v2444_v63 = vcvt.f32.s32 %v8952_v35  ;;  %v1379_v35 = vsub.f32 %v8266_v46, %v12298_v7 }
 0x2fc   : > { %3927 = vst [vmem:[#allocation1 + $0x7] ss:$9 sm:$0xff] %v3398_v48  ;;  %v1891_v48 = vsel %vm1635_vm1, %v1763_v36, %v1376_v11  ;;  %v3402_v11 = vperm.slane %v9261_v5, 3  ;;  %v9327_v36 = vcvt.s32.f32 %v2626_v30  ;;  %v2430_v30 = vadd.s32 %v2429_v13, %v2427_v18 }
 0x2fd   : > { %12295 = vst [vmem:[#allocation11_spill] sm:$0xff] %v9307_v26  ;;  %v9320_v26 = vpop.xlane.xlu0 %2533  ;;  %v2445_v14 = vshll.u32 %v2444_v63, 16  ;;  %v2019_v44 = vand.u32 4294967040, %v1891_v48  ;;  %v2020_v63 = vand.u32 4294967040, %v1892_v41  ;;  %v1766_v45 = vxor.u32 2147483647, %v1379_v35 }
 0x2fe   : > { %12296 = vst [vmem:[#allocation12_spill] sm:$0xff] %v9309_v60  ;;  %v2443_v60 = vcvt.f32.s32 %v2442_v10  ;;  %vm2535_vm6 = vcmp.eq.f32.partialorder %v8979_v52, %v9320_v26  ;;  %v3405_v10 = vperm.slane %v9261_v5, 6  ;;  %v1765_v52 = vxor.u32 2147483647, %v1378_v51  ;;  %v12302_v48 = vld [vmem:[#allocation15_spill] sm:$0xff]  ;;  %v12303_v41 = vld [vmem:[#allocation16_spill] sm:$0xff] }
 0x2ff   : > { %v9335_v31 = vpop.f32.mrf.mxu2  ;;  %vm1638_vm2 = vcmp.lt.s32.totalorder %v1379_v35, 0  ;;  %v9342_v18 = vand.u32 255, %v2430_v30 }
 0x300   : > { %2629 = vmin.xlane.f32.xlu0 %v9327_v36  ;;  %v2446_v7 = vadd.s32 %v2445_v14, %v2443_v60  ;;  %12300 = vst [vmem:[#allocation14_spill] sm:$0xff] %v9335_v31  ;;  %v1381_v60 = vsub.f32 %v8266_v46, %v12303_v41  ;;  %7336 = vmatmul.msk.bf16.gmra.mxu1 %vm9130_vm15, %v12227_v0 }
 0x301   : > { %7400 = vmatmul.msk.bf16.gmra.mxu2 %vm9143_vm8, %v12227_v0  ;;  %v1893_v38 = vsel %vm1637_vm14, %v1765_v52, %v1378_v51  ;;  %vm4790_vm10 = vcmp.eq.s32.totalorder %v8272_v55, %v9342_v18  ;;  %vm4791_vm1 = vcmp.eq.s32.totalorder %v8276_v59, %v9342_v18  ;;  %v3410_v41 = vperm.slane %v9342_v18, 3 }
 0x302   : > { %v9344_v14 = vand.u32 255, %v2446_v7  ;;  %v1768_v53 = vxor.u32 2147483647, %v1381_v60  ;;  %vm1640_vm4 = vcmp.lt.s32.totalorder %v1381_v60, 0 }
 0x303   : > { %v9324_v50 = vld [vmem:[#allocation1] sm:$0xff] }
 0x304   : > { %12299 = vst [vmem:[#allocation13_spill] sm:$0xff] %v9324_v50  ;;  %v2536_v50 = vsel %vm2535_vm6, %v2531_v9, inf  ;;  %vm4792_vm15 = vcmp.eq.s32.totalorder %v8272_v55, %v9344_v14  ;;  %vm4793_vm8 = vcmp.eq.s32.totalorder %v8276_v59, %v9344_v14  ;;  %v2021_v9 = vand.u32 4294967040, %v1893_v38 }
 0x305   : > { %3929 = vst [vmem:[#allocation1] ss:$9 sm:$0xff] %v3399_v40  ;;  %v3406_v40 = vperm.slane %v9261_v5, 7  ;;  %2537 = vmin.xlane.f32.xlu1 %v2536_v50  ;;  %v2147_v5 = vor.u32 %v2019_v44, %v8272_v55  ;;  %v2148_v50 = vor.u32 %v2020_v63, %v8276_v59  ;;  %vm9370_vm13 = vmpackc.low %vm4792_vm15, %vm4790_vm10  ;;  %v3409_v63 = vperm.slane %v9342_v18, 2 }
 0x306   : > { %3930 = vst [vmem:[#allocation1 + $0x1] ss:$9 sm:$0xff] %v3400_v27  ;;  %v9338_v27 = vpop.f32.mrf.mxu1  ;;  %7150 = vmatmul.msk.bf16.gmra.mxu3 %vm9370_vm13, %v12227_v0  ;;  %vm9383_vm6 = vmpackc.low %vm4793_vm8, %vm4791_vm1  ;;  %v1896_v38 = vsel %vm1640_vm4, %v1768_v53, %v1381_v60  ;;  %v3413_v60 = vperm.slane %v9342_v18, 6  ;;  %v3416_v22 = vperm.slane %v9344_v14, 1  ;;  %v3419_v31 = vperm.slane %v9344_v14, 4 }
 0x307   : > { %3931 = vst [vmem:[#allocation1 + $0x2] ss:$9 sm:$0xff] %v3401_v3  ;;  %v1380_v3 = vsub.f32 %v8262_v37, %v12302_v48  ;;  %vm2639_vm7 = vcmp.lt.s32.totalorder %v2147_v5, %v2148_v50  ;;  %v9368_v51 = vpop.xlane.xlu0 %2549  ;;  %v9378_v30 = vpop.f32.mrf.mxu2  ;;  %7214 = vmatmul.msk.bf16.gmra.mxu0 %vm9383_vm6, %v12227_v0 }
 0x308   : > { %3932 = vst [vmem:[#allocation1 + $0x3] ss:$9 sm:$0xff] %v3402_v11  ;;  %v1894_v11 = vsel %vm1638_vm2, %v1766_v45, %v1379_v35  ;;  %v9365_v57 = vsel %vm2639_vm7, %v2147_v5, %v2148_v50  ;;  %v3407_v45 = vperm.slane %v9342_v18, 0  ;;  %vm2551_vm14 = vcmp.eq.f32.partialorder %v9008_v23, %v9368_v51 }
 0x309   : > { %3933 = vst [vmem:[#allocation1 + $0x4] ss:$9 sm:$0xff] %v3403_v61  ;;  %vm1639_vm3 = vcmp.lt.s32.totalorder %v1380_v3, 0  ;;  %v1767_v13 = vxor.u32 2147483647, %v1380_v3  ;;  %v9356_v61 = vpop.xlane.xlu1 %2457  ;;  %v2022_v44 = vand.u32 4294967040, %v1894_v11  ;;  %v2476_v35 = vcvt.f32.s32 %v9166_v28 }
 0x30a   : > { %12301 = vst [vmem:[#allocation69_spill] sm:$0xff] %v9338_v27  ;;  %v3411_v11 = vperm.slane %v9342_v18, 4  ;;  %v3412_v23 = vperm.slane %v9342_v18, 5  ;;  %v2459_v27 = vcvt.f32.s32 %v9356_v61 }
 0x30b   : > { %3934 = vst [vmem:[#allocation1 + $0x5] ss:$9 sm:$0xff] %v3404_v24  ;;  %v2545_v24 = vand.u32 65535, %v8982_v42  ;;  %v2642_v42 = vshra.s32 %v9365_v57, 16  ;;  %v1895_v48 = vsel %vm1639_vm3, %v1767_v13, %v1380_v3  ;;  %v2149_v3 = vor.u32 %v2021_v9, %v8272_v55 }
 0x30c   : > { %3935 = vst [vmem:[#allocation1 + $0x6] ss:$9 sm:$0xff] %v3405_v10  ;;  %v3408_v10 = vperm.slane %v9342_v18, 1  ;;  %v2150_v13 = vor.u32 %v2022_v44, %v8276_v59  ;;  %v2023_v53 = vand.u32 4294967040, %v1895_v48  ;;  %v12314_v48 = vld [vmem:[#allocation19_spill] sm:$0xff] }
 0x30d   : > { %3936 = vst [vmem:[#allocation1 + $0x7] ss:$9 sm:$0xff] %v3406_v40  ;;  %v2547_v40 = vcvt.s32.f32 %v2545_v24  ;;  %v9393_v52 = vcvt.s32.f32 %v2642_v42  ;;  %v2561_v24 = vand.u32 65535, %v9030_v54  ;;  %v12311_v42 = vld [vmem:[#allocation17_spill] sm:$0xff] }
 0x30e   : > { %12306 = vst [vmem:[#allocation15_spill] sm:$0xff] %v9378_v30  ;;  %v9399_v50 = vpop.f32.mrf.mxu1  ;;  %vm2655_vm3 = vcmp.lt.s32.totalorder %v2149_v3, %v2150_v13 }
 0x30f   : > { %12310 = vst [vmem:[#allocation70_spill] sm:$0xff] %v9399_v50  ;;  %v2552_v30 = vsel %vm2551_vm14, %v2547_v40, inf  ;;  %2645 = vmin.xlane.f32.xlu0 %v9393_v52  ;;  %v3414_v40 = vperm.slane %v9342_v18, 7  ;;  %v9415_v44 = vpop.f32.mrf.mxu2  ;;  %v9421_v18 = vpop.f32.mrf.mxu0  ;;  %v3418_v50 = vperm.slane %v9344_v14, 3 }
 0x310   : > { %2553 = vmin.xlane.f32.xlu1 %v2552_v30  ;;  %v12312_v30 = vld [vmem:[#allocation18_spill] sm:$0xff]  ;;  %12313 = vst [vmem:[#allocation17_spill] sm:$0xff] %v9415_v44  ;;  %7338 = vmatmul.msk.bf16.gmra.mxu1 %vm9213_vm5, %v12227_v0 }
 0x311   : > { %v9411_v54 = vpop.xlane.xlu1 %2565  ;;  %v1383_v9 = vsub.f32 %v8266_v46, %v12312_v30  ;;  %7402 = vmatmul.msk.bf16.gmra.mxu2 %vm9227_vm12, %v12227_v0 }
 0x312   : > { %vm2567_vm2 = vcmp.eq.f32.partialorder %v9048_v56, %v9411_v54  ;;  %v2151_v56 = vor.u32 %v2023_v53, %v8272_v55 }
 0x313   : > { %vm1642_vm15 = vcmp.lt.s32.totalorder %v1383_v9, 0 }
 0x314   : > { %v9396_v5 = vld [vmem:[#allocation1] sm:$0xff] }
 0x315   : > { %12309 = vst [vmem:[#allocation16_spill] sm:$0xff] %v9396_v5  ;;  %v1382_v5 = vsub.f32 %v8262_v37, %v12311_v42 }
 0x316   : > { %3938 = vst [vmem:[#allocation1] ss:$9 sm:$0xff] %v3407_v45  ;;  %v2024_v45 = vand.u32 4294967040, %v1896_v38  ;;  %v1384_v38 = vsub.f32 %v8262_v37, %v12314_v48  ;;  %v9428_v30 = vpop.f32.mrf.mxu1  ;;  %v9432_v48 = vpop.f32.mrf.mxu3 }
 0x317   : > { %3939 = vst [vmem:[#allocation1 + $0x1] ss:$9 sm:$0xff] %v3408_v10  ;;  %v2563_v10 = vcvt.s32.f32 %v2561_v24  ;;  %v12315_v24 = vld [vmem:[#allocation20_spill] sm:$0xff]  ;;  %vm1641_vm7 = vcmp.lt.s32.totalorder %v1382_v5, 0 }
 0x318   : > { %3940 = vst [vmem:[#allocation1 + $0x2] ss:$9 sm:$0xff] %v3409_v63  ;;  %v1769_v63 = vxor.u32 2147483647, %v1382_v5  ;;  %v1385_v42 = vsub.f32 %v8266_v46, %v12315_v24  ;;  %v2152_v44 = vor.u32 %v2024_v45, %v8276_v59  ;;  %vm1643_vm8 = vcmp.lt.s32.totalorder %v1384_v38, 0 }
 0x319   : > { %3941 = vst [vmem:[#allocation1 + $0x3] ss:$9 sm:$0xff] %v3410_v41  ;;  %v2568_v41 = vsel %vm2567_vm2, %v2563_v10, inf  ;;  %v3415_v10 = vperm.slane %v9344_v14, 0  ;;  %v2577_v24 = vand.u32 65535, %v9032_v17 }
 0x31a   : > { %3942 = vst [vmem:[#allocation1 + $0x4] ss:$9 sm:$0xff] %v3411_v11  ;;  %v9423_v11 = vsel %vm2655_vm3, %v2149_v3, %v2150_v13  ;;  %2569 = vmin.xlane.f32.xlu2 %v2568_v41  ;;  %v1770_v3 = vxor.u32 2147483647, %v1383_v9  ;;  %vm2671_vm10 = vcmp.lt.s32.totalorder %v2151_v56, %v2152_v44  ;;  %v1897_v45 = vsel %vm1641_vm7, %v1769_v63, %v1382_v5  ;;  %v9448_v41 = vpop.xlane.xlu1 %2581 }
 0x31b   : > { %3943 = vst [vmem:[#allocation1 + $0x5] ss:$9 sm:$0xff] %v3412_v23  ;;  %v2658_v23 = vshra.s32 %v9423_v11, 16  ;;  %v9442_v53 = vsel %vm2671_vm10, %v2151_v56, %v2152_v44  ;;  %vm1644_vm5 = vcmp.lt.s32.totalorder %v1385_v42, 0  ;;  %v3417_v44 = vperm.slane %v9344_v14, 2  ;;  %v9452_v56 = vpop.f32.mrf.mxu2 }
 0x31c   : > { %3944 = vst [vmem:[#allocation1 + $0x6] ss:$9 sm:$0xff] %v3413_v60  ;;  %v1771_v60 = vxor.u32 2147483647, %v1384_v38  ;;  %v2025_v5 = vand.u32 4294967040, %v1897_v45  ;;  %vm2583_vm12 = vcmp.eq.f32.partialorder %v9064_v34, %v9448_v41  ;;  %v2674_v17 = vshra.s32 %v9442_v53, 16 }
 0x31d   : > { %3945 = vst [vmem:[#allocation1 + $0x7] ss:$9 sm:$0xff] %v3414_v40  ;;  %v9440_v13 = vcvt.s32.f32 %v2658_v23  ;;  %v1772_v40 = vxor.u32 2147483647, %v1385_v42  ;;  %v1898_v23 = vsel %vm1642_vm15, %v1770_v3, %v1383_v9  ;;  %v2461_v45 = vshll.u32 %v2460_v49, 16 }
 0x31e   : > { %12316 = vst [vmem:[#allocation18_spill] sm:$0xff] %v9428_v30  ;;  %v1899_v63 = vsel %vm1643_vm8, %v1771_v60, %v1384_v38  ;;  %v9462_v9 = vpop.f32.mrf.mxu1  ;;  %v2026_v3 = vand.u32 4294967040, %v1898_v23  ;;  %v9464_v38 = vpop.f32.mrf.mxu0  ;;  %v3420_v60 = vperm.slane %v9344_v14, 5  ;;  %v9474_v23 = vcvt.s32.f32 %v2674_v17 }
 0x31f   : > { %2661 = vmin.xlane.f32.xlu1 %v9440_v13  ;;  %12317 = vst [vmem:[#allocation19_spill] sm:$0xff] %v9448_v41  ;;  %v1900_v25 = vsel %vm1644_vm5, %v1772_v40, %v1385_v42  ;;  %v2027_v61 = vand.u32 4294967040, %v1899_v63  ;;  %v3421_v42 = vperm.slane %v9344_v14, 6  ;;  %v2462_v32 = vadd.s32 %v2461_v45, %v2459_v27 }
 0x320   : > { %12318 = vst [vmem:[#allocation20_spill] sm:$0xff] %v9452_v56  ;;  %v2028_v40 = vand.u32 4294967040, %v1900_v25  ;;  %v3422_v56 = vperm.slane %v9344_v14, 7  ;;  %7340 = vmatmul.msk.bf16.gmra.mxu1 %vm9278_vm9, %v12227_v0 }
 0x321   : > { %12320 = vst [vmem:[#allocation72_spill] sm:$0xff] %v9462_v9  ;;  %v2155_v27 = vor.u32 %v2027_v61, %v8272_v55  ;;  %v9482_v14 = vand.u32 255, %v2462_v32  ;;  %7404 = vmatmul.msk.bf16.gmra.mxu2 %vm9286_vm11, %v12227_v0 }
 0x322   : > { %v2156_v34 = vor.u32 %v2028_v40, %v8276_v59 }
 0x323   : > { %v3424_v25 = vperm.slane %v9482_v14, 1  ;;  %v3425_v20 = vperm.slane %v9482_v14, 2  ;;  %v3426_v45 = vperm.slane %v9482_v14, 3  ;;  %v3427_v61 = vperm.slane %v9482_v14, 4 }
 0x324   : > { %v9454_v30 = vld [vmem:[#allocation1] sm:$0xff]  ;;  %vm2703_vm4 = vcmp.lt.s32.totalorder %v2155_v27, %v2156_v34  ;;  %vm4794_vm9 = vcmp.eq.s32.totalorder %v8272_v55, %v9482_v14 }
 0x325   : > { %12319 = vst [vmem:[#allocation71_spill] sm:$0xff] %v9454_v30  ;;  %v2579_v30 = vcvt.s32.f32 %v2577_v24  ;;  %v2154_v24 = vor.u32 %v2026_v3, %v8276_v59  ;;  %v9501_v63 = vsel %vm2703_vm4, %v2155_v27, %v2156_v34 }
 0x326   : > { %3947 = vst [vmem:[#allocation1] ss:$9 sm:$0xff] %v3415_v10  ;;  %v9468_v10 = vpop.f32.mrf.mxu3  ;;  %v9496_v32 = vpop.f32.mrf.mxu0  ;;  %v2706_v2 = vshra.s32 %v9501_v63, 16 }
 0x327   : > { %3948 = vst [vmem:[#allocation1 + $0x1] ss:$9 sm:$0xff] %v3416_v22  ;;  %v2584_v49 = vsel %vm2583_vm12, %v2579_v30, inf  ;;  %v2153_v22 = vor.u32 %v2025_v5, %v8272_v55  ;;  %2677 = vmin.xlane.f32.xlu1 %v9474_v23 }
 0x328   : > { %3949 = vst [vmem:[#allocation1 + $0x2] ss:$9 sm:$0xff] %v3417_v44  ;;  %2585 = vmin.xlane.f32.xlu2 %v2584_v49  ;;  %v9479_v44 = vpop.f32.mrf.mxu2  ;;  %v3429_v49 = vperm.slane %v9482_v14, 6 }
 0x329   : > { %3950 = vst [vmem:[#allocation1 + $0x3] ss:$9 sm:$0xff] %v3418_v50  ;;  %vm2687_vm1 = vcmp.lt.s32.totalorder %v2153_v22, %v2154_v24  ;;  %v9487_v50 = vpop.f32.mrf.mxu1 }
 0x32a   : > { %3951 = vst [vmem:[#allocation1 + $0x4] ss:$9 sm:$0xff] %v3419_v31  ;;  %v9485_v31 = vsel %vm2687_vm1, %v2153_v22, %v2154_v24  ;;  %v9519_v22 = vcvt.s32.f32 %v2706_v2  ;;  %v3430_v24 = vperm.slane %v9482_v14, 7 }
 0x32b   : > { %3952 = vst [vmem:[#allocation1 + $0x5] ss:$9 sm:$0xff] %v3420_v60  ;;  %v2690_v30 = vshra.s32 %v9485_v31, 16 }
 0x32c   : > { %3953 = vst [vmem:[#allocation1 + $0x6] ss:$9 sm:$0xff] %v3421_v42  ;;  %v3428_v42 = vperm.slane %v9482_v14, 5 }
 0x32d   : > { %12321 = vst [vmem:[#allocation73_spill] sm:$0xff] %v9479_v44  ;;  %v9499_v5 = vcvt.s32.f32 %v2690_v30 }
 0x32e   : > { %3954 = vst [vmem:[#allocation1 + $0x7] ss:$9 sm:$0xff] %v3422_v56  ;;  %v3423_v56 = vperm.slane %v9482_v14, 0  ;;  %v9504_v17 = vpop.f32.mrf.mxu3  ;;  %v9522_v27 = vpop.f32.mrf.mxu0 }
 0x32f   : > { %12322 = vst [vmem:[#allocation74_spill] sm:$0xff] %v9487_v50 }
 0x330   : > { %12323 = vst [vmem:[#allocation75_spill] sm:$0xff] %v9501_v63  ;;  %2693 = vmin.xlane.f32.xlu2 %v9499_v5  ;;  %v9512_v60 = vpop.f32.mrf.mxu2  ;;  %7342 = vmatmul.msk.bf16.gmra.mxu1 %vm9370_vm13, %v12227_v0 }
 0x331   : > { %12325 = vst [vmem:[#allocation77_spill] sm:$0xff] %v9512_v60  ;;  %v9516_v40 = vpop.f32.mrf.mxu1  ;;  %7406 = vmatmul.msk.bf16.gmra.mxu2 %vm9383_vm6, %v12227_v0  ;;  %vm4795_vm6 = vcmp.eq.s32.totalorder %v8276_v59, %v9482_v14 }
 0x332   : > { %12326 = vst [vmem:[#allocation78_spill] sm:$0xff] %v9516_v40 }
 0x333   : > { %12327 = vst [vmem:[#allocation79_spill] sm:$0xff] %v9519_v22 }
 0x335   : > { %v9509_v3 = vld [vmem:[#allocation1] sm:$0xff] }
 0x336   : > { %12324 = vst [vmem:[#allocation76_spill] sm:$0xff] %v9509_v3  ;;  %v9527_v30 = vpop.f32.mrf.mxu3  ;;  %v2477_v3 = vshll.u32 %v2476_v35, 16 }
 0x337   : > { %3956 = vst [vmem:[#allocation1] ss:$9 sm:$0xff] %v3423_v56 }
 0x338   : > { %3957 = vst [vmem:[#allocation1 + $0x1] ss:$9 sm:$0xff] %v3424_v25  ;;  %2709 = vmin.xlane.f32.xlu2 %v9519_v22  ;;  %v9525_v34 = vpop.f32.mrf.mxu2 }
 0x339   : > { %3958 = vst [vmem:[#allocation1 + $0x2] ss:$9 sm:$0xff] %v3425_v20  ;;  %v9529_v56 = vpop.f32.mrf.mxu1  ;;  %v9539_v20 = vpop.f32.mrf.mxu0 }
 0x33a   : > { %3959 = vst [vmem:[#allocation1 + $0x3] ss:$9 sm:$0xff] %v3426_v45 }
 0x33b   : > { %3960 = vst [vmem:[#allocation1 + $0x4] ss:$9 sm:$0xff] %v3427_v61 }
 0x33c   : > { %3961 = vst [vmem:[#allocation1 + $0x5] ss:$9 sm:$0xff] %v3428_v42 }
 0x33d   : > { %3962 = vst [vmem:[#allocation1 + $0x6] ss:$9 sm:$0xff] %v3429_v49 }
 0x33e   : > { %3963 = vst [vmem:[#allocation1 + $0x7] ss:$9 sm:$0xff] %v3430_v24  ;;  %v9543_v45 = vpop.f32.mrf.mxu3 }
 0x33f   : > { %12328 = vst [vmem:[#allocation80_spill] sm:$0xff] %v9525_v34 }
 0x340   : > { %12329 = vst [vmem:[#allocation81_spill] sm:$0xff] %v9529_v56  ;;  %v9537_v25 = vpop.f32.mrf.mxu2 }
 0x341   : > { %12330 = vst [vmem:[#allocation82_spill] sm:$0xff] %v9537_v25  ;;  %v9541_v2 = vpop.f32.mrf.mxu1  ;;  %v9549_v49 = vpop.f32.mrf.mxu0 }
 0x342   : > { %12331 = vst [vmem:[#allocation83_spill] sm:$0xff] %v9541_v2 }
 0x345   : > { %v9563_v9 = vld [vmem:[#allocation1] sm:$0xff] }
 0x346   : > { %v9552_v24 = vpop.f32.mrf.mxu3  ;;  %v2474_v7 = vpop.xlane.xlu2 %2473  ;;  %12336 = vst [vmem:[#allocation88_spill] sm:$0xff] %v9563_v9 }
 0x347   : > { %v2475_v25 = vcvt.f32.s32 %v2474_v7 }
 0x348   : > { %v9545_v61 = vpop.f32.mrf.mxu2 }
 0x349   : > { %12332 = vst [vmem:[#allocation84_spill] sm:$0xff] %v9545_v61  ;;  %v9547_v42 = vpop.f32.mrf.mxu1  ;;  %v2478_v2 = vadd.s32 %v2477_v3, %v2475_v25  ;;  %v9558_v40 = vpop.f32.mrf.mxu0 }
 0x34a   : > { %12333 = vst [vmem:[#allocation85_spill] sm:$0xff] %v9547_v42  ;;  %v2492_v42 = vcvt.f32.s32 %v9208_v12  ;;  %v12338_v12 = vld [vmem:[#allocation21_spill] sm:$0xff] }
 0x34b   : > { %v3262_v60 = vand.u32 255, %v2478_v2  ;;  %v1386_v2 = vsub.f32 %v8262_v37, %v12338_v12 }
 0x34c   : > { %v2493_v7 = vshll.u32 %v2492_v42, 16 }
 0x34d   : > { %v3431_v50 = vperm.slane %v3262_v60, 0  ;;  %v3432_v44 = vperm.slane %v3262_v60, 1  ;;  %v3433_v28 = vperm.slane %v3262_v60, 2  ;;  %v3434_v39 = vperm.slane %v3262_v60, 3 }
 0x34e   : > { %v9560_v61 = vpop.f32.mrf.mxu3  ;;  %vm4796_vm11 = vcmp.eq.s32.totalorder %v8272_v55, %v3262_v60  ;;  %v3436_v3 = vperm.slane %v3262_v60, 5  ;;  %v2490_v25 = vpop.xlane.xlu2 %2489  ;;  %vm4797_vm14 = vcmp.eq.s32.totalorder %v8276_v59, %v3262_v60  ;;  %v3437_v9 = vperm.slane %v3262_v60, 6 }
 0x34f   : > { %3965 = vst [vmem:[#allocation1] ss:$9 sm:$0xff] %v3431_v50  ;;  %vm7151_vm13 = vmpackc.low %vm4796_vm11, %vm4794_vm9  ;;  %v3438_v14 = vperm.slane %v3262_v60, 7  ;;  %vm1645_vm3 = vcmp.lt.s32.totalorder %v1386_v2, 0 }
 0x350   : > { %v9554_v56 = vpop.f32.mrf.mxu2  ;;  %3966 = vst [vmem:[#allocation1 + $0x1] ss:$9 sm:$0xff] %v3432_v44  ;;  %7152 = vmatmul.msk.bf16.gmra.mxu3 %vm7151_vm13, %v12227_v0  ;;  %vm7215_vm2 = vmpackc.low %vm4797_vm14, %vm4795_vm6  ;;  %7344 = vmatmul.msk.bf16.gmra.mxu1 %vm7151_vm13, %v12227_v0  ;;  %v12339_v44 = vld [vmem:[#allocation22_spill] sm:$0xff] }
 0x351   : > { %12334 = vst [vmem:[#allocation86_spill] sm:$0xff] %v9554_v56  ;;  %v9556_v34 = vpop.f32.mrf.mxu1  ;;  %v3435_v56 = vperm.slane %v3262_v60, 4  ;;  %7216 = vmatmul.msk.bf16.gmra.mxu0 %vm7215_vm2, %v12227_v0  ;;  %7408 = vmatmul.msk.bf16.gmra.mxu2 %vm7215_vm2, %v12227_v0  ;;  %v12340_v60 = vld [vmem:[#allocation23_spill] sm:$0xff] }
 0x352   : > { %12335 = vst [vmem:[#allocation87_spill] sm:$0xff] %v9556_v34  ;;  %v1387_v34 = vsub.f32 %v8266_v46, %v12339_v44 }
 0x353   : > { %3967 = vst [vmem:[#allocation1 + $0x2] ss:$9 sm:$0xff] %v3433_v28  ;;  %v9584_v28 = vpop.f32.mrf.mxu0 }
 0x354   : > { %3968 = vst [vmem:[#allocation1 + $0x3] ss:$9 sm:$0xff] %v3434_v39  ;;  %v1774_v12 = vxor.u32 2147483647, %v1387_v34  ;;  %vm1646_vm7 = vcmp.lt.s32.totalorder %v1387_v34, 0 }
 0x355   : > { %3969 = vst [vmem:[#allocation1 + $0x4] ss:$9 sm:$0xff] %v3435_v56  ;;  %v1388_v56 = vsub.f32 %v8262_v37, %v12340_v60  ;;  %v2508_v60 = vcvt.f32.s32 %v9256_v4 }
 0x356   : > { %3970 = vst [vmem:[#allocation1 + $0x5] ss:$9 sm:$0xff] %v3436_v3  ;;  %v9589_v39 = vpop.f32.mrf.mxu3  ;;  %v12341_v3 = vld [vmem:[#allocation24_spill] sm:$0xff]  ;;  %v1902_v16 = vsel %vm1646_vm7, %v1774_v12, %v1387_v34  ;;  %v9604_v41 = vpop.xlane.xlu2 %2597 }
 0x357   : > { %3971 = vst [vmem:[#allocation1 + $0x6] ss:$9 sm:$0xff] %v3437_v9  ;;  %v9598_v9 = vadd.f32 %v9421_v18, %v9432_v48  ;;  %v1775_v22 = vxor.u32 2147483647, %v1388_v56  ;;  %vm1647_vm10 = vcmp.lt.s32.totalorder %v1388_v56, 0  ;;  %vm2599_vm15 = vcmp.eq.f32.partialorder %v9252_v62, %v9604_v41 }
 0x358   : > { %v9565_v35 = vpop.f32.mrf.mxu2  ;;  %3972 = vst [vmem:[#allocation1 + $0x7] ss:$9 sm:$0xff] %v3438_v14 }
 0x359   : > { %12337 = vst [vmem:[#allocation89_spill] sm:$0xff] %v9565_v35  ;;  %v5817_v50 = vpop.f32.mrf.mxu1  ;;  %v2491_v35 = vcvt.f32.s32 %v2490_v25  ;;  %v1773_v25 = vxor.u32 2147483647, %v1386_v2 }
 0x35a   : > { %12342 = vst [vmem:[#allocation21_spill] sm:$0xff] %v9598_v9 }
 0x35b   : > { %v2494_v42 = vadd.s32 %v2493_v7, %v2491_v35  ;;  %v2593_v35 = vand.u32 65535, %v9177_v33  ;;  %v1389_v7 = vsub.f32 %v8266_v46, %v12341_v3  ;;  %v1901_v15 = vsel %vm1645_vm3, %v1773_v25, %v1386_v2  ;;  %v5540_v25 = vpop.f32.mrf.mxu0 }
 0x35c   : > { %v2029_v34 = vand.u32 4294967040, %v1901_v15  ;;  %v2030_v2 = vand.u32 4294967040, %v1902_v16  ;;  %v9621_v15 = vadd.f32 %v9464_v38, %v9468_v10  ;;  %v2609_v10 = vand.u32 65535, %v9234_v43 }
 0x35d   : > { %v9587_v44 = vand.u32 255, %v2494_v42  ;;  %v2595_v3 = vcvt.s32.f32 %v2593_v35  ;;  %v1776_v63 = vxor.u32 2147483647, %v1389_v7  ;;  %vm1648_vm8 = vcmp.lt.s32.totalorder %v1389_v7, 0  ;;  %v2506_v12 = vpop.xlane.xlu0 %2505 }
 0x35e   : > { %v2509_v35 = vshll.u32 %v2508_v60, 16  ;;  %12344 = vst [vmem:[#allocation23_spill] sm:$0xff] %v9621_v15  ;;  %v12345_v60 = vld [vmem:[#allocation25_spill] sm:$0xff]  ;;  %v2611_v43 = vcvt.s32.f32 %v2609_v10 }
 0x35f   : > { %v3439_v1 = vperm.slane %v9587_v44, 0  ;;  %v3440_v33 = vperm.slane %v9587_v44, 1  ;;  %v9612_v18 = vld [vmem:[#allocation1] sm:$0xff]  ;;  %v3442_v4 = vperm.slane %v9587_v44, 3  ;;  %v2600_v48 = vsel %vm2599_vm15, %v2595_v3, inf  ;;  %v5371_v3 = vpop.f32.mrf.mxu3 }
 0x360   : > { %v5986_v58 = vpop.f32.mrf.mxu2  ;;  %12343 = vst [vmem:[#allocation22_spill] sm:$0xff] %v9612_v18  ;;  %2601 = vmin.xlane.f32.xlu0 %v2600_v48  ;;  %v1904_v18 = vsel %vm1648_vm8, %v1776_v63, %v1389_v7  ;;  %v3445_v16 = vperm.slane %v9587_v44, 6  ;;  %v3446_v48 = vperm.slane %v9587_v44, 7  ;;  %vm4798_vm1 = vcmp.eq.s32.totalorder %v8272_v55, %v9587_v44 }
 0x361   : > { %v5987_v14 = vadd.f32 %v5986_v58, %v5817_v50  ;;  %v5819_v42 = vpop.f32.mrf.mxu1  ;;  %v3441_v58 = vperm.slane %v9587_v44, 2  ;;  %v3443_v50 = vperm.slane %v9587_v44, 4  ;;  %3974 = vst [vmem:[#allocation1] ss:$9 sm:$0xff] %v3439_v1  ;;  %v2032_v38 = vand.u32 4294967040, %v1904_v18 }
 0x362   : > { %3975 = vst [vmem:[#allocation1 + $0x1] ss:$9 sm:$0xff] %v3440_v33  ;;  %v1390_v33 = vsub.f32 %v8262_v37, %v12345_v60  ;;  %v9638_v18 = vadd.f32 %v9496_v32, %v9504_v17  ;;  %vm4799_vm4 = vcmp.eq.s32.totalorder %v8276_v59, %v9587_v44  ;;  %v9652_v17 = vpop.xlane.xlu2 %2613 }
 0x363   : > { %v6146_v29 = vadd.f32 %v5987_v14, %v9598_v9  ;;  %v3444_v14 = vperm.slane %v9587_v44, 5  ;;  %v2507_v9 = vcvt.f32.s32 %v2506_v12  ;;  %3976 = vst [vmem:[#allocation1 + $0x2] ss:$9 sm:$0xff] %v3441_v58  ;;  %v2158_v58 = vor.u32 %v2030_v2, %v8276_v59  ;;  %v12346_v12 = vld [vmem:[#allocation26_spill] sm:$0xff] }
 0x364   : > { %3977 = vst [vmem:[#allocation1 + $0x3] ss:$9 sm:$0xff] %v3442_v4  ;;  %vm1649_vm5 = vcmp.lt.s32.totalorder %v1390_v33, 0  ;;  %v2524_v2 = vcvt.f32.s32 %v9295_v21  ;;  %vm2615_vm14 = vcmp.eq.f32.partialorder %v9269_v6, %v9652_v17 }
 0x365   : > { %6210 = vst [vmem:[%s9606_s29] sm:$0xff] %v6146_v29  ;;  %v1903_v29 = vsel %vm1647_vm10, %v1775_v22, %v1388_v56  ;;  %v2510_v56 = vadd.s32 %v2509_v35, %v2507_v9  ;;  %v1777_v9 = vxor.u32 2147483647, %v1390_v33  ;;  %v2616_v10 = vsel %vm2615_vm14, %v2611_v43, inf }
 0x366   : > { %3978 = vst [vmem:[#allocation1 + $0x4] ss:$9 sm:$0xff] %v3443_v50  ;;  %v2031_v7 = vand.u32 4294967040, %v1903_v29  ;;  %v1391_v50 = vsub.f32 %v8266_v46, %v12346_v12 }
 0x367   : > { %3979 = vst [vmem:[#allocation1 + $0x5] ss:$9 sm:$0xff] %v3444_v14  ;;  %v9631_v4 = vand.u32 255, %v2510_v56  ;;  %v1905_v44 = vsel %vm1649_vm5, %v1777_v9, %v1390_v33 }
 0x368   : > { %v5988_v62 = vpop.f32.mrf.mxu2  ;;  %3980 = vst [vmem:[#allocation1 + $0x6] ss:$9 sm:$0xff] %v3445_v16  ;;  %v2159_v35 = vor.u32 %v2031_v7, %v8272_v55  ;;  %v5542_v16 = vpop.f32.mrf.mxu0  ;;  %v1778_v6 = vxor.u32 2147483647, %v1391_v50  ;;  %vm1650_vm3 = vcmp.lt.s32.totalorder %v1391_v50, 0  ;;  %2617 = vmin.xlane.f32.xlu0 %v2616_v10 }
 0x369   : > { %v5989_v1 = vadd.f32 %v5988_v62, %v5819_v42  ;;  %v5822_v22 = vpop.f32.mrf.mxu1  ;;  %v2157_v42 = vor.u32 %v2029_v34, %v8272_v55  ;;  %3981 = vst [vmem:[#allocation1 + $0x7] ss:$9 sm:$0xff] %v3446_v48  ;;  %v2160_v34 = vor.u32 %v2032_v38, %v8276_v59  ;;  %v9643_v62 = vadd.f32 %v5540_v25, %v5371_v3  ;;  %v5373_v25 = vpop.f32.mrf.mxu3 }
 0x36a   : > { %12347 = vst [vmem:[#allocation24_spill] sm:$0xff] %v9638_v18  ;;  %v3448_v32 = vperm.slane %v9631_v4, 1  ;;  %vm4800_vm11 = vcmp.eq.s32.totalorder %v8272_v55, %v9631_v4  ;;  %vm4801_vm13 = vcmp.eq.s32.totalorder %v8276_v59, %v9631_v4  ;;  %v3449_v3 = vperm.slane %v9631_v4, 2 }
 0x36b   : > { %v6147_v63 = vadd.f32 %v5989_v1, %v9621_v15  ;;  %12348 = vst [vmem:[#allocation25_spill] sm:$0xff] %v9643_v62  ;;  %vm2719_vm12 = vcmp.lt.s32.totalorder %v2157_v42, %v2158_v58  ;;  %v3447_v1 = vperm.slane %v9631_v4, 0  ;;  %v2522_v56 = vpop.xlane.xlu0 %2521  ;;  %vm2735_vm9 = vcmp.lt.s32.totalorder %v2159_v35, %v2160_v34  ;;  %vm7153_vm6 = vmpackc.low %vm4800_vm11, %vm4798_vm1  ;;  %v12392_v15 = vld [vmem:[#allocation52_spill] sm:$0xff] }
 0x36c   : > { %v9663_v60 = vsel %vm2735_vm9, %v2159_v35, %v2160_v34  ;;  %v3450_v7 = vperm.slane %v9631_v4, 3  ;;  %v2523_v38 = vcvt.f32.s32 %v2522_v56  ;;  %7154 = vmatmul.msk.bf16.gmra.mxu3 %vm7153_vm6, %v12227_v0  ;;  %vm7217_vm2 = vmpackc.low %vm4801_vm13, %vm4799_vm4  ;;  %7346 = vmatmul.msk.bf16.gmra.mxu1 %vm7153_vm6, %v12227_v0  ;;  %v3451_v12 = vperm.slane %v9631_v4, 4 }
 0x36d   : > { %6211 = vst [vmem:[%s9606_s29 + $0x8] sm:$0xff] %v6147_v63  ;;  %7218 = vmatmul.msk.bf16.gmra.mxu0 %vm7217_vm2, %v12227_v0  ;;  %7410 = vmatmul.msk.bf16.gmra.mxu2 %vm7217_vm2, %v12227_v0  ;;  %v9680_v35 = vsel %vm2719_vm12, %v2157_v42, %v2158_v58  ;;  %v2525_v34 = vshll.u32 %v2524_v2, 16  ;;  %v3452_v43 = vperm.slane %v9631_v4, 5  ;;  %v2625_v42 = vand.u32 65535, %v9244_v8 }
 0x36e   : > { %v3454_v33 = vperm.slane %v9631_v4, 7  ;;  %v2722_v2 = vshra.s32 %v9680_v35, 16 }
 0x36f   : > { %v2526_v58 = vadd.s32 %v2525_v34, %v2523_v38 }
 0x370   : > { %v5991_v29 = vpop.f32.mrf.mxu2  ;;  %v9665_v63 = vld [vmem:[#allocation1] sm:$0xff]  ;;  %v9699_v38 = vcvt.s32.f32 %v2722_v2  ;;  %v9708_v34 = vpop.f32.mrf.mxu0 }
 0x371   : > { %v5992_v14 = vadd.f32 %v5991_v29, %v5822_v22  ;;  %v5824_v48 = vpop.f32.mrf.mxu1  ;;  %v9661_v22 = vadd.f32 %v5542_v16, %v5373_v25  ;;  %12350 = vst [vmem:[#allocation90_spill] sm:$0xff] %v9665_v63  ;;  %v2540_v16 = vcvt.f32.s32 %v9320_v26 }
 0x372   : > { %3983 = vst [vmem:[#allocation1] ss:$9 sm:$0xff] %v3447_v1  ;;  %v3453_v1 = vperm.slane %v9631_v4, 6  ;;  %v9695_v4 = vand.u32 255, %v2526_v58  ;;  %2725 = vmin.xlane.f32.xlu0 %v9699_v38  ;;  %v2738_v58 = vshra.s32 %v9663_v60, 16 }
 0x373   : > { %v6148_v21 = vadd.f32 %v5992_v14, %v9638_v18  ;;  %12349 = vst [vmem:[#allocation26_spill] sm:$0xff] %v9661_v22  ;;  %v9686_v14 = vadd.f32 %v9522_v27, %v9527_v30  ;;  %v2033_v30 = vand.u32 4294967040, %v1905_v44 }
 0x374   : > { %3984 = vst [vmem:[#allocation1 + $0x1] ss:$9 sm:$0xff] %v3448_v32  ;;  %v1906_v32 = vsel %vm1650_vm3, %v1778_v6, %v1391_v50  ;;  %v3455_v44 = vperm.slane %v9695_v4, 0  ;;  %vm4802_vm10 = vcmp.eq.s32.totalorder %v8272_v55, %v9695_v4  ;;  %vm4803_vm12 = vcmp.eq.s32.totalorder %v8276_v59, %v9695_v4 }
 0x375   : > { %6212 = vst [vmem:[%s9606_s29 + $0x10] sm:$0xff] %v6148_v21  ;;  %v2541_v21 = vshll.u32 %v2540_v16, 16 }
 0x376   : > { %12351 = vst [vmem:[#allocation91_spill] sm:$0xff] %v9686_v14 }
 0x377   : > { %3985 = vst [vmem:[#allocation1 + $0x2] ss:$9 sm:$0xff] %v3449_v3  ;;  %v2034_v3 = vand.u32 4294967040, %v1906_v32  ;;  %v3457_v32 = vperm.slane %v9695_v4, 2 }
 0x378   : > { %v5993_v56 = vpop.f32.mrf.mxu2  ;;  %3986 = vst [vmem:[#allocation1 + $0x3] ss:$9 sm:$0xff] %v3450_v7  ;;  %v2538_v27 = vpop.xlane.xlu1 %2537  ;;  %v2627_v7 = vcvt.s32.f32 %v2625_v42 }
 0x379   : > { %v5994_v9 = vadd.f32 %v5993_v56, %v5824_v48  ;;  %3987 = vst [vmem:[#allocation1 + $0x4] ss:$9 sm:$0xff] %v3451_v12  ;;  %v5827_v25 = vpop.f32.mrf.mxu1  ;;  %v2539_v8 = vcvt.f32.s32 %v2538_v27  ;;  %v9697_v48 = vpop.xlane.xlu0 %2629  ;;  %v2162_v16 = vor.u32 %v2034_v3, %v8276_v59  ;;  %v3458_v27 = vperm.slane %v9695_v4, 3 }
 0x37a   : > { %3988 = vst [vmem:[#allocation1 + $0x5] ss:$9 sm:$0xff] %v3452_v43  ;;  %vm2631_vm7 = vcmp.eq.f32.partialorder %v9327_v36, %v9697_v48  ;;  %v2161_v43 = vor.u32 %v2033_v30, %v8272_v55  ;;  %v3456_v36 = vperm.slane %v9695_v4, 1  ;;  %v5376_v42 = vpop.f32.mrf.mxu3 }
 0x37b   : > { %v6149_v26 = vadd.f32 %v5994_v9, %v9686_v14  ;;  %3989 = vst [vmem:[#allocation1 + $0x6] ss:$9 sm:$0xff] %v3453_v1  ;;  %v2542_v50 = vadd.s32 %v2541_v21, %v2539_v8  ;;  %v2632_v10 = vsel %vm2631_vm7, %v2627_v7, inf  ;;  %v12352_v1 = vld [vmem:[#allocation28_spill] sm:$0xff]  ;;  %v12353_v9 = vld [vmem:[#allocation29_spill] sm:$0xff]  ;;  %v3460_v21 = vperm.slane %v9695_v4, 5 }
 0x37c   : > { %3990 = vst [vmem:[#allocation1 + $0x7] ss:$9 sm:$0xff] %v3454_v33  ;;  %2633 = vmin.xlane.f32.xlu1 %v2632_v10  ;;  %v1392_v56 = vsub.f32 %v8262_v37, %v12352_v1  ;;  %v2641_v33 = vand.u32 65535, %v9365_v57  ;;  %v1393_v2 = vsub.f32 %v8266_v46, %v12353_v9  ;;  %v3459_v57 = vperm.slane %v9695_v4, 4 }
 0x37d   : > { %6213 = vst [vmem:[%s9606_s29 + $0x18] sm:$0xff] %v6149_v26  ;;  %v9705_v6 = vand.u32 255, %v2542_v50  ;;  %vm2751_vm1 = vcmp.lt.s32.totalorder %v2161_v43, %v2162_v16  ;;  %v9737_v50 = vcvt.s32.f32 %v2738_v58  ;;  %v9741_v10 = vadd.f32 %v9539_v20, %v9543_v45 }
 0x37e   : > { %vm1651_vm4 = vcmp.lt.s32.totalorder %v1392_v56, 0  ;;  %v2643_v7 = vcvt.s32.f32 %v2641_v33  ;;  %v1780_v1 = vxor.u32 2147483647, %v1393_v2  ;;  %v9753_v20 = vsel %vm2751_vm1, %v2161_v43, %v2162_v16  ;;  %v5547_v16 = vpop.f32.mrf.mxu0 }
 0x37f   : > { %vm4804_vm15 = vcmp.eq.s32.totalorder %v8272_v55, %v9705_v6  ;;  %vm4805_vm8 = vcmp.eq.s32.totalorder %v8276_v59, %v9705_v6  ;;  %12354 = vst [vmem:[#allocation28_spill] sm:$0xff] %v9741_v10  ;;  %2741 = vmin.xlane.f32.xlu0 %v9737_v50  ;;  %vm1652_vm13 = vcmp.lt.s32.totalorder %v1393_v2, 0  ;;  %v9757_v45 = vadd.f32 %v9549_v49, %v9552_v24 }
 0x380   : > { %v5996_v12 = vpop.f32.mrf.mxu2  ;;  %vm7155_vm5 = vmpackc.low %vm4804_vm15, %vm4802_vm10  ;;  %v2754_v24 = vshra.s32 %v9753_v20, 16  ;;  %v3469_v14 = vperm.slane %v9705_v6, 6 }
 0x381   : > { %v5997_v30 = vadd.f32 %v5996_v12, %v5827_v25  ;;  %v5829_v8 = vpop.f32.mrf.mxu1  ;;  %7156 = vmatmul.msk.bf16.gmra.mxu3 %vm7155_vm5, %v12227_v0  ;;  %vm7219_vm9 = vmpackc.low %vm4805_vm8, %vm4803_vm12  ;;  %7348 = vmatmul.msk.bf16.gmra.mxu1 %vm7155_vm5, %v12227_v0  ;;  %v1779_v25 = vxor.u32 2147483647, %v1392_v56  ;;  %v3461_v12 = vperm.slane %v9695_v4, 6  ;;  %12355 = vst [vmem:[#allocation29_spill] sm:$0xff] %v9757_v45 }
 0x382   : > { %v9733_v3 = vpop.xlane.xlu0 %2645  ;;  %7220 = vmatmul.msk.bf16.gmra.mxu0 %vm7219_vm9, %v12227_v0  ;;  %7412 = vmatmul.msk.bf16.gmra.mxu2 %vm7219_vm9, %v12227_v0  ;;  %v5378_v49 = vpop.f32.mrf.mxu3 }
 0x383   : > { %v9720_v26 = vld [vmem:[#allocation1] sm:$0xff]  ;;  %vm2647_vm11 = vcmp.eq.f32.partialorder %v9393_v52, %v9733_v3  ;;  %v6150_v52 = vadd.f32 %v5997_v30, %v9741_v10  ;;  %v9769_v30 = vadd.f32 %v5547_v16, %v5378_v49  ;;  %v3467_v10 = vperm.slane %v9705_v6, 4 }
 0x384   : > { %3992 = vst [vmem:[#allocation1] ss:$9 sm:$0xff] %v3455_v44  ;;  %v9744_v44 = vpop.xlane.xlu1 %2553  ;;  %v2648_v58 = vsel %vm2647_vm11, %v2643_v7, inf }
 0x385   : > { %3993 = vst [vmem:[#allocation1 + $0x1] ss:$9 sm:$0xff] %v3456_v36  ;;  %v3462_v36 = vperm.slane %v9695_v4, 7  ;;  %2649 = vmin.xlane.f32.xlu1 %v2648_v58  ;;  %v9761_v4 = vsel %vm1651_vm4, %v1779_v25, %v1392_v56  ;;  %v2657_v56 = vand.u32 65535, %v9423_v11  ;;  %v9777_v25 = vadd.f32 %v9708_v34, %v5376_v42  ;;  %v12360_v34 = vld [vmem:[#allocation34_spill] sm:$0xff] }
 0x386   : > { %3994 = vst [vmem:[#allocation1 + $0x2] ss:$9 sm:$0xff] %v3457_v32  ;;  %v12356_v32 = vld [vmem:[#allocation30_spill] sm:$0xff]  ;;  %v2035_v7 = vand.u32 4294967040, %v9761_v4  ;;  %v2572_v58 = vcvt.f32.s32 %v9411_v54  ;;  %v1396_v42 = vsub.f32 %v8262_v37, %v12360_v34  ;;  %v3464_v4 = vperm.slane %v9705_v6, 1 }
 0x387   : > { %3995 = vst [vmem:[#allocation1 + $0x3] ss:$9 sm:$0xff] %v3458_v27  ;;  %v1394_v43 = vsub.f32 %v8262_v37, %v12356_v32  ;;  %v2659_v16 = vcvt.s32.f32 %v2657_v56  ;;  %v2555_v54 = vcvt.f32.s32 %v9744_v44  ;;  %v3466_v34 = vperm.slane %v9705_v6, 3 }
 0x388   : > { %v5998_v33 = vpop.f32.mrf.mxu2  ;;  %3996 = vst [vmem:[#allocation1 + $0x4] ss:$9 sm:$0xff] %v3459_v57  ;;  %v9767_v57 = vsel %vm1652_vm13, %v1780_v1, %v1393_v2  ;;  %vm1655_vm3 = vcmp.lt.s32.totalorder %v1396_v42, 0 }
 0x389   : > { %v5999_v9 = vadd.f32 %v5998_v33, %v5829_v8  ;;  %3997 = vst [vmem:[#allocation1 + $0x5] ss:$9 sm:$0xff] %v3460_v21  ;;  %v12358_v21 = vld [vmem:[#allocation32_spill] sm:$0xff]  ;;  %vm1653_vm6 = vcmp.lt.s32.totalorder %v1394_v43, 0  ;;  %v1781_v2 = vxor.u32 2147483647, %v1394_v43  ;;  %v2556_v33 = vcvt.f32.s32 %v9368_v51  ;;  %v5832_v11 = vpop.f32.mrf.mxu1 }
 0x38a   : > { %3998 = vst [vmem:[#allocation1 + $0x6] ss:$9 sm:$0xff] %v3461_v12  ;;  %v1395_v8 = vsub.f32 %v8266_v46, %v12358_v21  ;;  %v2036_v12 = vand.u32 4294967040, %v9767_v57  ;;  %v3465_v51 = vperm.slane %v9705_v6, 2 }
 0x38b   : > { %v6151_v27 = vadd.f32 %v5999_v9, %v9757_v45  ;;  %3999 = vst [vmem:[#allocation1 + $0x7] ss:$9 sm:$0xff] %v3462_v36  ;;  %v9781_v36 = vcvt.s32.f32 %v2754_v24  ;;  %v12361_v24 = vld [vmem:[#allocation35_spill] sm:$0xff]  ;;  %v2557_v29 = vshll.u32 %v2556_v33, 16  ;;  %v2573_v45 = vshll.u32 %v2572_v58, 16 }
 0x38c   : > { %12357 = vst [vmem:[#allocation30_spill] sm:$0xff] %v9769_v30  ;;  %vm1654_vm14 = vcmp.lt.s32.totalorder %v1395_v8, 0  ;;  %v1782_v49 = vxor.u32 2147483647, %v1395_v8  ;;  %v1397_v57 = vsub.f32 %v8266_v46, %v12361_v24  ;;  %v9807_v24 = vadd.f32 %v9558_v40, %v9560_v61 }
 0x38d   : > { %6214 = vst [vmem:[%s9606_s29 + $0x20] sm:$0xff] %v6150_v52  ;;  %v2570_v1 = vpop.xlane.xlu2 %2569  ;;  %v3463_v52 = vperm.slane %v9705_v6, 0  ;;  %2757 = vmin.xlane.f32.xlu1 %v9781_v36  ;;  %v3470_v58 = vperm.slane %v9705_v6, 7 }
 0x38e   : > { %12359 = vst [vmem:[#allocation32_spill] sm:$0xff] %v9777_v25  ;;  %vm1656_vm7 = vcmp.lt.s32.totalorder %v1397_v57, 0 }
 0x38f   : > { %6215 = vst [vmem:[%s9606_s29 + $0x28] sm:$0xff] %v6151_v27  ;;  %v2571_v27 = vcvt.f32.s32 %v2570_v1  ;;  %v1783_v1 = vxor.u32 2147483647, %v1396_v42 }
 0x390   : > { %v6001_v9 = vpop.f32.mrf.mxu2  ;;  %12362 = vst [vmem:[#allocation34_spill] sm:$0xff] %v9807_v24 }
 0x391   : > { %v6002_v44 = vadd.f32 %v6001_v9, %v5832_v11  ;;  %v2574_v33 = vadd.s32 %v2573_v45, %v2571_v27  ;;  %v1909_v9 = vsel %vm1653_vm6, %v1781_v2, %v1394_v43  ;;  %v1398_v45 = vsub.f32 %v8262_v37, %v8879_v19  ;;  %v9825_v43 = vpop.f32.mrf.mxu0 }
 0x392   : > { %v9791_v32 = vpop.xlane.xlu1 %2661  ;;  %v9800_v21 = vld [vmem:[#allocation1] sm:$0xff]  ;;  %v2037_v2 = vand.u32 4294967040, %v1909_v9  ;;  %v2673_v19 = vand.u32 65535, %v9442_v53 }
 0x393   : > { %vm2663_vm2 = vcmp.eq.f32.partialorder %v9440_v13, %v9791_v32  ;;  %4001 = vst [vmem:[#allocation1] ss:$9 sm:$0xff] %v3463_v52  ;;  %v3468_v13 = vperm.slane %v9705_v6, 5  ;;  %v1784_v52 = vxor.u32 2147483647, %v1397_v57  ;;  %v6152_v11 = vadd.f32 %v6002_v44, %v9807_v24 }
 0x394   : > { %v2664_v56 = vsel %vm2663_vm2, %v2659_v16, inf  ;;  %4002 = vst [vmem:[#allocation1 + $0x1] ss:$9 sm:$0xff] %v3464_v4  ;;  %v2558_v16 = vadd.s32 %v2557_v29, %v2555_v54  ;;  %v1910_v4 = vsel %vm1654_vm14, %v1782_v49, %v1395_v8  ;;  %v9819_v61 = vand.u32 255, %v2574_v33  ;;  %v5834_v29 = vpop.f32.mrf.mxu1  ;;  %v5381_v8 = vpop.f32.mrf.mxu3 }
 0x395   : > { %2665 = vmin.xlane.f32.xlu2 %v2664_v56  ;;  %4003 = vst [vmem:[#allocation1 + $0x2] ss:$9 sm:$0xff] %v3465_v51  ;;  %v9815_v56 = vsel %vm1655_vm3, %v1783_v1, %v1396_v42  ;;  %v2163_v6 = vor.u32 %v2035_v7, %v8272_v55  ;;  %v9827_v42 = vsel %vm1656_vm7, %v1784_v52, %v1397_v57  ;;  %v2038_v51 = vand.u32 4294967040, %v1910_v4 }
 0x396   : > { %4004 = vst [vmem:[#allocation1 + $0x3] ss:$9 sm:$0xff] %v3466_v34  ;;  %v9817_v40 = vand.u32 255, %v2558_v16  ;;  %vm4808_vm8 = vcmp.eq.s32.totalorder %v8272_v55, %v9819_v61  ;;  %vm4809_vm5 = vcmp.eq.s32.totalorder %v8276_v59, %v9819_v61  ;;  %vm1657_vm12 = vcmp.lt.s32.totalorder %v1398_v45, 0  ;;  %v12363_v34 = vld [vmem:[#allocation37_spill] sm:$0xff] }
 0x397   : > { %4005 = vst [vmem:[#allocation1 + $0x4] ss:$9 sm:$0xff] %v3467_v10  ;;  %v2164_v10 = vor.u32 %v2036_v12, %v8276_v59  ;;  %v1785_v53 = vxor.u32 2147483647, %v1398_v45  ;;  %v1400_v44 = vsub.f32 %v8262_v37, %v12363_v34  ;;  %v2689_v52 = vand.u32 65535, %v9485_v31 }
 0x398   : > { %4006 = vst [vmem:[#allocation1 + $0x5] ss:$9 sm:$0xff] %v3468_v13  ;;  %vm4806_vm15 = vcmp.eq.s32.totalorder %v8272_v55, %v9817_v40  ;;  %v3471_v49 = vperm.slane %v9817_v40, 0  ;;  %vm4807_vm4 = vcmp.eq.s32.totalorder %v8276_v59, %v9817_v40  ;;  %v3472_v1 = vperm.slane %v9817_v40, 1  ;;  %v12364_v13 = vld [vmem:[#allocation39_spill] sm:$0xff] }
 0x399   : > { %4007 = vst [vmem:[#allocation1 + $0x6] ss:$9 sm:$0xff] %v3469_v14  ;;  %v9831_v14 = vsub.f32 %v8266_v46, %v8894_v47  ;;  %vm2767_vm10 = vcmp.lt.s32.totalorder %v2163_v6, %v2164_v10  ;;  %vm7157_vm1 = vmpackc.low %vm4808_vm8, %vm4806_vm15  ;;  %v1401_v16 = vsub.f32 %v8266_v46, %v12364_v13  ;;  %v3473_v33 = vperm.slane %v9817_v40, 2 }
 0x39a   : > { %4008 = vst [vmem:[#allocation1 + $0x7] ss:$9 sm:$0xff] %v3470_v58  ;;  %v9838_v54 = vsel %vm2767_vm10, %v2163_v6, %v2164_v10  ;;  %v9849_v57 = vpop.xlane.xlu1 %2677  ;;  %7158 = vmatmul.msk.bf16.gmra.mxu3 %vm7157_vm1, %v12227_v0  ;;  %vm7221_vm11 = vmpackc.low %vm4809_vm5, %vm4807_vm4  ;;  %7350 = vmatmul.msk.bf16.gmra.mxu1 %vm7157_vm1, %v12227_v0  ;;  %v2675_v58 = vcvt.s32.f32 %v2673_v19  ;;  %v3474_v9 = vperm.slane %v9817_v40, 3  ;;  %v3475_v4 = vperm.slane %v9817_v40, 4  ;;  %v6003_v6 = vpop.f32.mrf.mxu2 }
 0x39b   : > { %6216 = vst [vmem:[%s9606_s29 + $0x30] sm:$0xff] %v6152_v11  ;;  %v9835_v12 = vpop.xlane.xlu2 %2585  ;;  %v2770_v47 = vshra.s32 %v9838_v54, 16  ;;  %vm1658_vm9 = vcmp.lt.s32.totalorder %v9831_v14, 0  ;;  %7222 = vmatmul.msk.bf16.gmra.mxu0 %vm7221_vm11, %v12227_v0  ;;  %7414 = vmatmul.msk.bf16.gmra.mxu2 %vm7221_vm11, %v12227_v0  ;;  %vm2679_vm13 = vcmp.eq.f32.partialorder %v9474_v23, %v9849_v57  ;;  %v6004_v34 = vadd.f32 %v6003_v6, %v5834_v29 }
 0x39c   : > { %v2680_v13 = vsel %vm2679_vm13, %v2675_v58, inf  ;;  %v2165_v27 = vor.u32 %v2037_v2, %v8272_v55  ;;  %v2166_v19 = vor.u32 %v2038_v51, %v8276_v59  ;;  %v1913_v31 = vsel %vm1657_vm12, %v1785_v53, %v1398_v45  ;;  %v5837_v23 = vpop.f32.mrf.mxu1  ;;  %v5552_v51 = vpop.f32.mrf.mxu0 }
 0x39d   : > { %v9871_v10 = vcvt.s32.f32 %v2770_v47  ;;  %v1786_v7 = vxor.u32 2147483647, %v9831_v14  ;;  %vm1659_vm6 = vcmp.lt.s32.totalorder %v1400_v44, 0  ;;  %v3476_v24 = vperm.slane %v9817_v40, 5  ;;  %2681 = vmin.xlane.f32.xlu2 %v2680_v13  ;;  %v5383_v45 = vpop.f32.mrf.mxu3 }
 0x39e   : > { %v1787_v47 = vxor.u32 2147483647, %v1400_v44  ;;  %v9881_v29 = vadd.f32 %v9584_v28, %v9589_v39  ;;  %v3477_v2 = vperm.slane %v9817_v40, 6  ;;  %vm2783_vm14 = vcmp.lt.s32.totalorder %v2165_v27, %v2166_v19 }
 0x39f   : > { %2773 = vmin.xlane.f32.xlu1 %v9871_v10  ;;  %v9886_v53 = vadd.f32 %v9825_v43, %v5381_v8  ;;  %v9890_v58 = vsel %vm2783_vm14, %v2165_v27, %v2166_v19  ;;  %v1788_v6 = vxor.u32 2147483647, %v1401_v16  ;;  %vm1660_vm2 = vcmp.lt.s32.totalorder %v1401_v16, 0 }
 0x3a0   : > { %12366 = vst [vmem:[#allocation37_spill] sm:$0xff] %v9881_v29  ;;  %v6153_v28 = vadd.f32 %v6004_v34, %v9881_v29  ;;  %v2786_v13 = vshra.s32 %v9890_v58, 16  ;;  %v1915_v8 = vsel %vm1659_vm6, %v1787_v47, %v1400_v44  ;;  %v12371_v47 = vld [vmem:[#allocation75_spill] sm:$0xff] }
 0x3a1   : > { %v9865_v11 = vld [vmem:[#allocation1] sm:$0xff]  ;;  %12367 = vst [vmem:[#allocation39_spill] sm:$0xff] %v9886_v53 }
 0x3a2   : > { %12365 = vst [vmem:[#allocation35_spill] sm:$0xff] %v9865_v11 }
 0x3a3   : > { %4010 = vst [vmem:[#allocation1] ss:$9 sm:$0xff] %v3471_v49  ;;  %v3478_v49 = vperm.slane %v9817_v40, 7  ;;  %v9893_v39 = vpop.xlane.xlu2 %2693  ;;  %v1914_v40 = vsel %vm1658_vm9, %v1786_v7, %v9831_v14  ;;  %v12369_v14 = vand.u32 4294967040, %v9815_v56  ;;  %v12370_v7 = vand.u32 4294967040, %v9827_v42 }
 0x3a4   : > { %4011 = vst [vmem:[#allocation1 + $0x1] ss:$9 sm:$0xff] %v3472_v1  ;;  %v9888_v1 = vadd.f32 %v5552_v51, %v5383_v45  ;;  %vm2695_vm3 = vcmp.eq.f32.partialorder %v9499_v5, %v9893_v39  ;;  %v2042_v19 = vand.u32 4294967040, %v1914_v40  ;;  %v1916_v5 = vsel %vm1660_vm2, %v1788_v6, %v1401_v16 }
 0x3a5   : > { %4012 = vst [vmem:[#allocation1 + $0x2] ss:$9 sm:$0xff] %v3473_v33  ;;  %v2691_v33 = vcvt.s32.f32 %v2689_v52  ;;  %v9904_v52 = vcvt.s32.f32 %v2786_v13  ;;  %v2168_v34 = vor.u32 %v12370_v7, %v8276_v59  ;;  %v2043_v51 = vand.u32 4294967040, %v1915_v8 }
 0x3a6   : > { %4013 = vst [vmem:[#allocation1 + $0x3] ss:$9 sm:$0xff] %v3474_v9  ;;  %v2041_v9 = vand.u32 4294967040, %v1913_v31  ;;  %v5839_v31 = vpop.f32.mrf.mxu1  ;;  %v3479_v13 = vperm.slane %v9819_v61, 0  ;;  %v2170_v8 = vor.u32 %v2042_v19, %v8276_v59 }
 0x3a7   : > { %12368 = vst [vmem:[#allocation92_spill] sm:$0xff] %v9888_v1  ;;  %v2696_v27 = vsel %vm2695_vm3, %v2691_v33, inf  ;;  %2789 = vmin.xlane.f32.xlu2 %v9904_v52  ;;  %v12372_v33 = vld [vmem:[#allocation19_spill] sm:$0xff] }
 0x3a8   : > { %4014 = vst [vmem:[#allocation1 + $0x4] ss:$9 sm:$0xff] %v3475_v4  ;;  %v6006_v4 = vpop.f32.mrf.mxu2  ;;  %2697 = vmin.xlane.f32.xlu0 %v2696_v27  ;;  %v2588_v42 = vcvt.f32.s32 %v12372_v33  ;;  %v2169_v40 = vor.u32 %v2041_v9, %v8272_v55  ;;  %v3481_v27 = vperm.slane %v9819_v61, 2  ;;  %v3483_v9 = vperm.slane %v9819_v61, 4 }
 0x3a9   : > { %4015 = vst [vmem:[#allocation1 + $0x5] ss:$9 sm:$0xff] %v3476_v24  ;;  %v2167_v24 = vor.u32 %v12369_v14, %v8272_v55  ;;  %v6007_v44 = vadd.f32 %v6006_v4, %v5837_v23  ;;  %v3480_v23 = vperm.slane %v9819_v61, 1  ;;  %v12373_v4 = vld [vmem:[#allocation79_spill] sm:$0xff] }
 0x3aa   : > { %4016 = vst [vmem:[#allocation1 + $0x6] ss:$9 sm:$0xff] %v3477_v2  ;;  %v2705_v2 = vand.u32 65535, %v12371_v47  ;;  %vm2815_vm15 = vcmp.lt.s32.totalorder %v2169_v40, %v2170_v8 }
 0x3ab   : > { %4017 = vst [vmem:[#allocation1 + $0x7] ss:$9 sm:$0xff] %v3478_v49  ;;  %vm2799_vm7 = vcmp.lt.s32.totalorder %v2167_v24, %v2168_v34  ;;  %v6154_v45 = vadd.f32 %v6007_v44, %v9643_v62  ;;  %v2044_v49 = vand.u32 4294967040, %v1916_v5  ;;  %v9923_v6 = vpop.xlane.xlu2 %2709  ;;  %v2587_v5 = vcvt.f32.s32 %v9835_v12 }
 0x3ac   : > { %6217 = vst [vmem:[%s9606_s29 + $0x38] sm:$0xff] %v6153_v28  ;;  %v9916_v56 = vsel %vm2799_vm7, %v2167_v24, %v2168_v34  ;;  %v2707_v28 = vcvt.s32.f32 %v2705_v2  ;;  %vm2711_vm10 = vcmp.eq.f32.partialorder %v12373_v4, %v9923_v6  ;;  %v2171_v24 = vor.u32 %v2043_v51, %v8272_v55 }
 0x3ad   : > { %v2802_v16 = vshra.s32 %v9916_v56, 16  ;;  %6218 = vst [vmem:[%s9606_s29 + $0x40] sm:$0xff] %v6154_v45  ;;  %v3482_v34 = vperm.slane %v9819_v61, 3  ;;  %v9938_v47 = vsel %vm2815_vm15, %v2169_v40, %v2170_v8  ;;  %v2172_v2 = vor.u32 %v2044_v49, %v8276_v59 }
 0x3ae   : > { %v2712_v44 = vsel %vm2711_vm10, %v2707_v28, inf  ;;  %v2589_v45 = vshll.u32 %v2588_v42, 16  ;;  %v3484_v51 = vperm.slane %v9819_v61, 5  ;;  %v3485_v12 = vperm.slane %v9819_v61, 6 }
 0x3af   : > { %v9930_v14 = vcvt.s32.f32 %v2802_v16  ;;  %v2818_v16 = vshra.s32 %v9938_v47, 16  ;;  %vm2831_vm8 = vcmp.lt.s32.totalorder %v2171_v24, %v2172_v2  ;;  %v3486_v28 = vperm.slane %v9819_v61, 7 }
 0x3b0   : > { %v6008_v19 = vpop.f32.mrf.mxu2  ;;  %2713 = vmin.xlane.f32.xlu0 %v2712_v44  ;;  %v2590_v40 = vadd.s32 %v2589_v45, %v2587_v5  ;;  %v9946_v49 = vsel %vm2831_vm8, %v2171_v24, %v2172_v2  ;;  %v2737_v62 = vand.u32 65535, %v9663_v60 }
 0x3b1   : > { %v6009_v33 = vadd.f32 %v6008_v19, %v5839_v31  ;;  %2805 = vmin.xlane.f32.xlu2 %v9930_v14  ;;  %v9949_v31 = vcvt.s32.f32 %v2818_v16  ;;  %v2834_v61 = vshra.s32 %v9946_v49, 16 }
 0x3b2   : > { %v9933_v7 = vld [vmem:[#allocation1] sm:$0xff] }
 0x3b3   : > { %4019 = vst [vmem:[#allocation1] ss:$9 sm:$0xff] %v3479_v13  ;;  %v5842_v13 = vpop.f32.mrf.mxu1  ;;  %v6155_v42 = vadd.f32 %v6009_v33, %v9661_v22  ;;  %v9959_v44 = vcvt.s32.f32 %v2834_v61 }
 0x3b4   : > { %4020 = vst [vmem:[#allocation1 + $0x1] ss:$9 sm:$0xff] %v3480_v23  ;;  %v9951_v23 = vand.u32 255, %v2590_v40 }
 0x3b5   : > { %4021 = vst [vmem:[#allocation1 + $0x2] ss:$9 sm:$0xff] %v3481_v27 }
 0x3b6   : > { %4022 = vst [vmem:[#allocation1 + $0x3] ss:$9 sm:$0xff] %v3482_v34  ;;  %v3487_v4 = vperm.slane %v9951_v23, 0  ;;  %v3488_v34 = vperm.slane %v9951_v23, 1  ;;  %v3490_v2 = vperm.slane %v9951_v23, 3  ;;  %v3491_v45 = vperm.slane %v9951_v23, 4 }
 0x3b7   : > { %4023 = vst [vmem:[#allocation1 + $0x4] ss:$9 sm:$0xff] %v3483_v9  ;;  %v3489_v9 = vperm.slane %v9951_v23, 2  ;;  %v3493_v16 = vperm.slane %v9951_v23, 6  ;;  %vm4810_vm5 = vcmp.eq.s32.totalorder %v8272_v55, %v9951_v23  ;;  %vm4811_vm9 = vcmp.eq.s32.totalorder %v8276_v59, %v9951_v23 }
 0x3b8   : > { %4024 = vst [vmem:[#allocation1 + $0x5] ss:$9 sm:$0xff] %v3484_v51  ;;  %v6011_v8 = vpop.f32.mrf.mxu2  ;;  %2821 = vmin.xlane.f32.xlu0 %v9949_v31  ;;  %v3492_v51 = vperm.slane %v9951_v23, 5 }
 0x3b9   : > { %4025 = vst [vmem:[#allocation1 + $0x6] ss:$9 sm:$0xff] %v3485_v12  ;;  %v6012_v27 = vadd.f32 %v6011_v8, %v5842_v13  ;;  %v3494_v13 = vperm.slane %v9951_v23, 7 }
 0x3ba   : > { %4026 = vst [vmem:[#allocation1 + $0x7] ss:$9 sm:$0xff] %v3486_v28 }
 0x3bb   : > { %6219 = vst [vmem:[%s9606_s29 + $0x48] sm:$0xff] %v6155_v42  ;;  %v6156_v24 = vadd.f32 %v6012_v27, %v9777_v25  ;;  %v5844_v5 = vpop.f32.mrf.mxu1  ;;  %v12379_v25 = vld [vmem:[#allocation42_spill] sm:$0xff] }
 0x3bd   : > { %6220 = vst [vmem:[%s9606_s29 + $0x50] sm:$0xff] %v6156_v24 }
 0x3c0   : > { %v6013_v33 = vpop.f32.mrf.mxu2  ;;  %2837 = vmin.xlane.f32.xlu0 %v9959_v44 }
 0x3c1   : > { %v9963_v19 = vld [vmem:[#allocation1] sm:$0xff]  ;;  %v6014_v12 = vadd.f32 %v6013_v33, %v5844_v5  ;;  %v2604_v5 = vcvt.f32.s32 %v9604_v41 }
 0x3c2   : > { %4028 = vst [vmem:[#allocation1] ss:$9 sm:$0xff] %v3487_v4 }
 0x3c3   : > { %4029 = vst [vmem:[#allocation1 + $0x1] ss:$9 sm:$0xff] %v3488_v34  ;;  %v6157_v28 = vadd.f32 %v6014_v12, %v9769_v30  ;;  %v5847_v40 = vpop.f32.mrf.mxu1 }
 0x3c4   : > { %4030 = vst [vmem:[#allocation1 + $0x2] ss:$9 sm:$0xff] %v3489_v9 }
 0x3c5   : > { %4031 = vst [vmem:[#allocation1 + $0x3] ss:$9 sm:$0xff] %v3490_v2  ;;  %v2605_v2 = vshll.u32 %v2604_v5, 16 }
 0x3c6   : > { %4032 = vst [vmem:[#allocation1 + $0x4] ss:$9 sm:$0xff] %v3491_v45 }
 0x3c7   : > { %4033 = vst [vmem:[#allocation1 + $0x5] ss:$9 sm:$0xff] %v3492_v51 }
 0x3c8   : > { %4034 = vst [vmem:[#allocation1 + $0x6] ss:$9 sm:$0xff] %v3493_v16  ;;  %v6016_v42 = vpop.f32.mrf.mxu2 }
 0x3c9   : > { %4035 = vst [vmem:[#allocation1 + $0x7] ss:$9 sm:$0xff] %v3494_v13  ;;  %v6017_v8 = vadd.f32 %v6016_v42, %v5847_v40  ;;  %v12374_v13 = vld [vmem:[#allocation40_spill] sm:$0xff] }
 0x3ca   : > { %6221 = vst [vmem:[%s9606_s29 + $0x58] sm:$0xff] %v6157_v28  ;;  %v1402_v28 = vsub.f32 %v8262_v37, %v12374_v13 }
 0x3cb   : > { %v6158_v61 = vadd.f32 %v6017_v8, %v9886_v53  ;;  %v5849_v27 = vpop.f32.mrf.mxu1  ;;  %v12375_v8 = vld [vmem:[#allocation41_spill] sm:$0xff] }
 0x3cc   : > { %v1789_v41 = vxor.u32 2147483647, %v1402_v28  ;;  %vm1661_vm11 = vcmp.lt.s32.totalorder %v1402_v28, 0 }
 0x3cd   : > { %6222 = vst [vmem:[%s9606_s29 + $0x60] sm:$0xff] %v6158_v61  ;;  %v1403_v61 = vsub.f32 %v8266_v46, %v12375_v8 }
 0x3ce   : > { %v5555_v45 = vpop.f32.mrf.mxu0  ;;  %v1917_v53 = vsel %vm1661_vm11, %v1789_v41, %v1402_v28 }
 0x3cf   : > { %vm1662_vm13 = vcmp.lt.s32.totalorder %v1403_v61, 0 }
 0x3d0   : > { %v6018_v4 = vpop.f32.mrf.mxu2 }
 0x3d1   : > { %v6019_v24 = vadd.f32 %v6018_v4, %v5849_v27 }
 0x3d3   : > { %v6159_v34 = vadd.f32 %v6019_v24, %v9888_v1  ;;  %v2602_v9 = vpop.xlane.xlu0 %2601  ;;  %v5852_v33 = vpop.f32.mrf.mxu1  ;;  %v2045_v1 = vand.u32 4294967040, %v1917_v53 }
 0x3d4   : > { %v2603_v51 = vcvt.f32.s32 %v2602_v9  ;;  %v5386_v12 = vpop.f32.mrf.mxu3 }
 0x3d5   : > { %6223 = vst [vmem:[%s9606_s29 + $0x68] sm:$0xff] %v6159_v34  ;;  %v9982_v34 = vld [vmem:[#allocation1] sm:$0xff]  ;;  %v9984_v43 = vadd.f32 %v5555_v45, %v5386_v12  ;;  %v2173_v53 = vor.u32 %v2045_v1, %v8272_v55 }
 0x3d6   : > { %v2606_v16 = vadd.s32 %v2605_v2, %v2603_v51  ;;  %12376 = vst [vmem:[#allocation75_spill] sm:$0xff] %v9982_v34  ;;  %v1790_v51 = vxor.u32 2147483647, %v1403_v61  ;;  %v5557_v12 = vpop.f32.mrf.mxu0 }
 0x3d7   : > { %12377 = vst [vmem:[#allocation19_spill] sm:$0xff] %v9984_v43 }
 0x3d8   : > { %v6021_v40 = vpop.f32.mrf.mxu2  ;;  %v3270_v42 = vand.u32 255, %v2606_v16 }
 0x3d9   : > { %v6022_v2 = vadd.f32 %v6021_v40, %v5852_v33 }
 0x3da   : > { %v3495_v27 = vperm.slane %v3270_v42, 0  ;;  %v3496_v4 = vperm.slane %v3270_v42, 1  ;;  %v3497_v24 = vperm.slane %v3270_v42, 2  ;;  %v3498_v5 = vperm.slane %v3270_v42, 3 }
 0x3db   : > { %v3499_v9 = vperm.slane %v3270_v42, 4  ;;  %vm4812_vm12 = vcmp.eq.s32.totalorder %v8272_v55, %v3270_v42  ;;  %vm4813_vm1 = vcmp.eq.s32.totalorder %v8276_v59, %v3270_v42  ;;  %v3500_v16 = vperm.slane %v3270_v42, 5  ;;  %v5854_v40 = vpop.f32.mrf.mxu1 }
 0x3dc   : > { %4037 = vst [vmem:[#allocation1] ss:$9 sm:$0xff] %v3495_v27  ;;  %vm7159_vm4 = vmpackc.low %vm4812_vm12, %vm4810_vm5  ;;  %v3501_v45 = vperm.slane %v3270_v42, 6  ;;  %v5388_v33 = vpop.f32.mrf.mxu3  ;;  %v3502_v13 = vperm.slane %v3270_v42, 7  ;;  %v2620_v27 = vcvt.f32.s32 %v9652_v17  ;;  %v1918_v42 = vsel %vm1662_vm13, %v1790_v51, %v1403_v61  ;;  %v12380_v61 = vld [vmem:[#allocation44_spill] sm:$0xff] }
 0x3dd   : > { %4038 = vst [vmem:[#allocation1 + $0x1] ss:$9 sm:$0xff] %v3496_v4  ;;  %7160 = vmatmul.msk.bf16.gmra.mxu3 %vm7159_vm4, %v12227_v0  ;;  %vm7223_vm6 = vmpackc.low %vm4813_vm1, %vm4811_vm9  ;;  %7352 = vmatmul.msk.bf16.gmra.mxu1 %vm7159_vm4, %v12227_v0  ;;  %v9996_v8 = vadd.f32 %v5557_v12, %v5388_v33  ;;  %v6160_v4 = vadd.f32 %v6022_v2, %v9984_v43  ;;  %v2618_v33 = vpop.xlane.xlu0 %2617  ;;  %v2046_v17 = vand.u32 4294967040, %v1918_v42  ;;  %v2721_v51 = vand.u32 65535, %v9680_v35 }
 0x3de   : > { %4039 = vst [vmem:[#allocation1 + $0x2] ss:$9 sm:$0xff] %v3497_v24  ;;  %7224 = vmatmul.msk.bf16.gmra.mxu0 %vm7223_vm6, %v12227_v0  ;;  %7416 = vmatmul.msk.bf16.gmra.mxu2 %vm7223_vm6, %v12227_v0  ;;  %v2619_v2 = vcvt.f32.s32 %v2618_v33  ;;  %v1405_v41 = vsub.f32 %v8266_v46, %v12380_v61 }
 0x3df   : > { %4040 = vst [vmem:[#allocation1 + $0x3] ss:$9 sm:$0xff] %v3498_v5 }
 0x3e0   : > { %12378 = vst [vmem:[#allocation79_spill] sm:$0xff] %v9996_v8  ;;  %v6023_v23 = vpop.f32.mrf.mxu2  ;;  %vm1664_vm7 = vcmp.lt.s32.totalorder %v1405_v41, 0 }
 0x3e1   : > { %4041 = vst [vmem:[#allocation1 + $0x4] ss:$9 sm:$0xff] %v3499_v9  ;;  %v6024_v24 = vadd.f32 %v6023_v23, %v5854_v40  ;;  %v2621_v9 = vshll.u32 %v2620_v27, 16  ;;  %v1404_v40 = vsub.f32 %v8262_v37, %v12379_v25  ;;  %v12381_v27 = vld [vmem:[#allocation45_spill] sm:$0xff] }
 0x3e2   : > { %4042 = vst [vmem:[#allocation1 + $0x5] ss:$9 sm:$0xff] %v3500_v16  ;;  %v2636_v16 = vcvt.f32.s32 %v9697_v48  ;;  %v1406_v25 = vsub.f32 %v8262_v37, %v12381_v27  ;;  %v1792_v48 = vxor.u32 2147483647, %v1405_v41 }
 0x3e3   : > { %4043 = vst [vmem:[#allocation1 + $0x6] ss:$9 sm:$0xff] %v3501_v45  ;;  %v6161_v12 = vadd.f32 %v6024_v24, %v9996_v8  ;;  %v2622_v28 = vadd.s32 %v2621_v9, %v2619_v2  ;;  %vm1663_vm14 = vcmp.lt.s32.totalorder %v1404_v40, 0  ;;  %v1791_v23 = vxor.u32 2147483647, %v1404_v40 }
 0x3e4   : > { %4044 = vst [vmem:[#allocation1 + $0x7] ss:$9 sm:$0xff] %v3502_v13  ;;  %v2174_v13 = vor.u32 %v2046_v17, %v8276_v59  ;;  %v2723_v9 = vcvt.s32.f32 %v2721_v51  ;;  %v2637_v2 = vshll.u32 %v2636_v16, 16  ;;  %v1793_v8 = vxor.u32 2147483647, %v1406_v25 }
 0x3e5   : > { %6224 = vst [vmem:[%s9606_s29 + $0x70] sm:$0xff] %v6160_v4  ;;  %v10013_v45 = vand.u32 255, %v2622_v28  ;;  %v10027_v17 = vpop.xlane.xlu0 %2725  ;;  %vm1665_vm10 = vcmp.lt.s32.totalorder %v1406_v25, 0 }
 0x3e6   : > { %6225 = vst [vmem:[%s9606_s29 + $0x78] sm:$0xff] %v6161_v12  ;;  %v12382_v12 = vld [vmem:[#allocation46_spill] sm:$0xff]  ;;  %vm2727_vm2 = vcmp.eq.f32.partialorder %v9699_v38, %v10027_v17  ;;  %vm2847_vm3 = vcmp.lt.s32.totalorder %v2173_v53, %v2174_v13 }
 0x3e7   : > { %v3503_v24 = vperm.slane %v10013_v45, 0  ;;  %v3504_v42 = vperm.slane %v10013_v45, 1  ;;  %v3505_v35 = vperm.slane %v10013_v45, 2  ;;  %v1407_v33 = vsub.f32 %v8266_v46, %v12382_v12 }
 0x3e8   : > { %v3506_v1 = vperm.slane %v10013_v45, 3  ;;  %v3507_v28 = vperm.slane %v10013_v45, 4  ;;  %v3508_v27 = vperm.slane %v10013_v45, 5  ;;  %v2728_v43 = vsel %vm2727_vm2, %v2723_v9, inf }
 0x3e9   : > { %v10033_v12 = vsel %vm2847_vm3, %v2173_v53, %v2174_v13  ;;  %v3509_v51 = vperm.slane %v10013_v45, 6  ;;  %2729 = vmin.xlane.f32.xlu1 %v2728_v43  ;;  %v1794_v16 = vxor.u32 2147483647, %v1407_v33  ;;  %vm1666_vm15 = vcmp.lt.s32.totalorder %v1407_v33, 0 }
 0x3ea   : > { %v5560_v38 = vpop.f32.mrf.mxu0  ;;  %v1919_v9 = vsel %vm1663_vm14, %v1791_v23, %v1404_v40  ;;  %v1920_v13 = vsel %vm1664_vm7, %v1792_v48, %v1405_v41  ;;  %vm4814_vm8 = vcmp.eq.s32.totalorder %v8272_v55, %v10013_v45  ;;  %vm4815_vm4 = vcmp.eq.s32.totalorder %v8276_v59, %v10013_v45 }
 0x3eb   : > { %v10019_v4 = vld [vmem:[#allocation1] sm:$0xff]  ;;  %v1922_v22 = vsel %vm1666_vm15, %v1794_v16, %v1407_v33 }
 0x3ec   : > { %4046 = vst [vmem:[#allocation1] ss:$9 sm:$0xff] %v3503_v24  ;;  %v3510_v24 = vperm.slane %v10013_v45, 7  ;;  %v2050_v23 = vand.u32 4294967040, %v1922_v22 }
 0x3ed   : > { %4047 = vst [vmem:[#allocation1 + $0x1] ss:$9 sm:$0xff] %v3504_v42  ;;  %v5857_v42 = vpop.f32.mrf.mxu1 }
 0x3ee   : > { %4048 = vst [vmem:[#allocation1 + $0x2] ss:$9 sm:$0xff] %v3505_v35 }
 0x3ef   : > { %v2634_v61 = vpop.xlane.xlu1 %2633  ;;  %4049 = vst [vmem:[#allocation1 + $0x3] ss:$9 sm:$0xff] %v3506_v1  ;;  %v5391_v53 = vpop.f32.mrf.mxu3 }
 0x3f0   : > { %v2635_v5 = vcvt.f32.s32 %v2634_v61  ;;  %4050 = vst [vmem:[#allocation1 + $0x4] ss:$9 sm:$0xff] %v3507_v28  ;;  %v1921_v61 = vsel %vm1665_vm10, %v1793_v8, %v1406_v25  ;;  %v6026_v43 = vpop.f32.mrf.mxu2  ;;  %v10042_v1 = vadd.f32 %v5560_v38, %v5391_v53 }
 0x3f1   : > { %4051 = vst [vmem:[#allocation1 + $0x5] ss:$9 sm:$0xff] %v3508_v27  ;;  %v2049_v28 = vand.u32 4294967040, %v1921_v61  ;;  %v6027_v40 = vadd.f32 %v6026_v43, %v5857_v42  ;;  %v2652_v27 = vcvt.f32.s32 %v9733_v3  ;;  %v2178_v61 = vor.u32 %v2050_v23, %v8276_v59 }
 0x3f2   : > { %v2638_v30 = vadd.s32 %v2637_v2, %v2635_v5  ;;  %4052 = vst [vmem:[#allocation1 + $0x6] ss:$9 sm:$0xff] %v3509_v51  ;;  %v2047_v5 = vand.u32 4294967040, %v1919_v9  ;;  %v2048_v2 = vand.u32 4294967040, %v1920_v13  ;;  %v10050_v51 = vpop.xlane.xlu0 %2741  ;;  %v5562_v22 = vpop.f32.mrf.mxu0  ;;  %v2850_v23 = vshra.s32 %v10033_v12, 16 }
 0x3f3   : > { %4053 = vst [vmem:[#allocation1 + $0x7] ss:$9 sm:$0xff] %v3510_v24  ;;  %v6162_v33 = vadd.f32 %v6027_v40, %v10042_v1  ;;  %vm2743_vm9 = vcmp.eq.f32.partialorder %v9737_v50, %v10050_v51  ;;  %v2177_v45 = vor.u32 %v2049_v28, %v8272_v55 }
 0x3f4   : > { %v10039_v35 = vand.u32 255, %v2638_v30  ;;  %12383 = vst [vmem:[#allocation40_spill] sm:$0xff] %v10042_v1  ;;  %v2739_v30 = vcvt.s32.f32 %v2737_v62  ;;  %v2175_v62 = vor.u32 %v2047_v5, %v8272_v55  ;;  %v2176_v24 = vor.u32 %v2048_v2, %v8276_v59 }
 0x3f5   : > { %6226 = vst [vmem:[%s9606_s29 + $0x80] sm:$0xff] %v6162_v33  ;;  %v5859_v42 = vpop.f32.mrf.mxu1  ;;  %v2653_v5 = vshll.u32 %v2652_v27, 16  ;;  %vm2879_vm6 = vcmp.lt.s32.totalorder %v2177_v45, %v2178_v61  ;;  %v2668_v27 = vcvt.f32.s32 %v9791_v32 }
 0x3f6   : > { %v3511_v8 = vperm.slane %v10039_v35, 0  ;;  %v3512_v25 = vperm.slane %v10039_v35, 1  ;;  %v3513_v60 = vperm.slane %v10039_v35, 2  ;;  %v3514_v48 = vperm.slane %v10039_v35, 3 }
 0x3f7   : > { %vm4816_vm5 = vcmp.eq.s32.totalorder %v8272_v55, %v10039_v35  ;;  %vm4817_vm12 = vcmp.eq.s32.totalorder %v8276_v59, %v10039_v35  ;;  %v5393_v16 = vpop.f32.mrf.mxu3  ;;  %v2744_v9 = vsel %vm2743_vm9, %v2739_v30, inf  ;;  %v3515_v50 = vperm.slane %v10039_v35, 4 }
 0x3f8   : > { %v2650_v41 = vpop.xlane.xlu1 %2649  ;;  %vm7161_vm1 = vmpackc.low %vm4816_vm5, %vm4814_vm8  ;;  %v10069_v53 = vadd.f32 %v5562_v22, %v5393_v16  ;;  %v6028_v13 = vpop.f32.mrf.mxu2  ;;  %vm2863_vm13 = vcmp.lt.s32.totalorder %v2175_v62, %v2176_v24  ;;  %v3516_v2 = vperm.slane %v10039_v35, 5  ;;  %2745 = vmin.xlane.f32.xlu1 %v2744_v9  ;;  %v3517_v40 = vperm.slane %v10039_v35, 6 }
 0x3f9   : > { %v2651_v3 = vcvt.f32.s32 %v2650_v41  ;;  %7162 = vmatmul.msk.bf16.gmra.mxu3 %vm7161_vm1, %v12227_v0  ;;  %vm7225_vm11 = vmpackc.low %vm4817_vm12, %vm4815_vm4  ;;  %7354 = vmatmul.msk.bf16.gmra.mxu1 %vm7161_vm1, %v12227_v0  ;;  %v6029_v43 = vadd.f32 %v6028_v13, %v5859_v42  ;;  %v3518_v28 = vperm.slane %v10039_v35, 7  ;;  %v10082_v30 = vsel %vm2863_vm13, %v2175_v62, %v2176_v24 }
 0x3fa   : > { %v10065_v38 = vld [vmem:[#allocation1] sm:$0xff]  ;;  %12384 = vst [vmem:[#allocation41_spill] sm:$0xff] %v10069_v53  ;;  %7226 = vmatmul.msk.bf16.gmra.mxu0 %vm7225_vm11, %v12227_v0  ;;  %7418 = vmatmul.msk.bf16.gmra.mxu2 %vm7225_vm11, %v12227_v0  ;;  %v10086_v33 = vsel %vm2879_vm6, %v2177_v45, %v2178_v61  ;;  %v10088_v22 = vcvt.s32.f32 %v2850_v23  ;;  %v2753_v62 = vand.u32 65535, %v9753_v20  ;;  %v2866_v42 = vshra.s32 %v10082_v30, 16 }
 0x3fb   : > { %4055 = vst [vmem:[#allocation1] ss:$9 sm:$0xff] %v3511_v8  ;;  %v2654_v8 = vadd.s32 %v2653_v5, %v2651_v3  ;;  %v2669_v3 = vshll.u32 %v2668_v27, 16 }
 0x3fc   : > { %4056 = vst [vmem:[#allocation1 + $0x1] ss:$9 sm:$0xff] %v3512_v25  ;;  %v6163_v25 = vadd.f32 %v6029_v43, %v10069_v53  ;;  %v2755_v43 = vcvt.s32.f32 %v2753_v62  ;;  %v12388_v62 = vld [vmem:[#allocation49_spill] sm:$0xff] }
 0x3fd   : > { %4057 = vst [vmem:[#allocation1 + $0x2] ss:$9 sm:$0xff] %v3513_v60 }
 0x3fe   : > { %4058 = vst [vmem:[#allocation1 + $0x3] ss:$9 sm:$0xff] %v3514_v48  ;;  %v3273_v48 = vand.u32 255, %v2654_v8  ;;  %v5862_v20 = vpop.f32.mrf.mxu1 }
 0x3ff   : > { %4059 = vst [vmem:[#allocation1 + $0x4] ss:$9 sm:$0xff] %v3515_v50  ;;  %v5565_v50 = vpop.f32.mrf.mxu0 }
 0x400   : > { %4060 = vst [vmem:[#allocation1 + $0x5] ss:$9 sm:$0xff] %v3516_v2  ;;  %2853 = vmin.xlane.f32.xlu1 %v10088_v22  ;;  %v3519_v16 = vperm.slane %v3273_v48, 0  ;;  %v10093_v24 = vpop.xlane.xlu1 %2757  ;;  %v3520_v9 = vperm.slane %v3273_v48, 1  ;;  %v3521_v61 = vperm.slane %v3273_v48, 2  ;;  %v3522_v2 = vperm.slane %v3273_v48, 3 }
 0x401   : > { %4061 = vst [vmem:[#allocation1 + $0x6] ss:$9 sm:$0xff] %v3517_v40  ;;  %v3523_v40 = vperm.slane %v3273_v48, 4  ;;  %vm2759_vm14 = vcmp.eq.f32.partialorder %v9781_v36, %v10093_v24  ;;  %v3525_v41 = vperm.slane %v3273_v48, 6  ;;  %v2769_v36 = vand.u32 65535, %v9838_v54 }
 0x402   : > { %4062 = vst [vmem:[#allocation1 + $0x7] ss:$9 sm:$0xff] %v3518_v28  ;;  %v2760_v23 = vsel %vm2759_vm14, %v2755_v43, inf  ;;  %vm4818_vm2 = vcmp.eq.s32.totalorder %v8272_v55, %v3273_v48  ;;  %vm4819_vm15 = vcmp.eq.s32.totalorder %v8276_v59, %v3273_v48  ;;  %v12390_v43 = vld [vmem:[#allocation51_spill] sm:$0xff] }
 0x403   : > { %6227 = vst [vmem:[%s9606_s29 + $0x88] sm:$0xff] %v6163_v25  ;;  %v10104_v25 = vcvt.s32.f32 %v2866_v42  ;;  %2761 = vmin.xlane.f32.xlu2 %v2760_v23 }
 0x404   : > { %v5396_v13 = vpop.f32.mrf.mxu3 }
 0x405   : > { %v6031_v45 = vpop.f32.mrf.mxu2  ;;  %v10102_v8 = vadd.f32 %v5565_v50, %v5396_v13  ;;  %v2771_v13 = vcvt.s32.f32 %v2769_v36 }
 0x406   : > { %v6032_v27 = vadd.f32 %v6031_v45, %v5862_v20  ;;  %v2684_v20 = vcvt.f32.s32 %v9849_v57  ;;  %v5864_v23 = vpop.f32.mrf.mxu1 }
 0x407   : > { %12386 = vst [vmem:[#allocation44_spill] sm:$0xff] %v10102_v8 }
 0x408   : > { %v2666_v35 = vpop.xlane.xlu2 %2665  ;;  %2869 = vmin.xlane.f32.xlu1 %v10104_v25  ;;  %v6164_v42 = vadd.f32 %v6032_v27, %v10102_v8  ;;  %v2700_v27 = vcvt.f32.s32 %v9893_v39 }
 0x409   : > { %v2667_v60 = vcvt.f32.s32 %v2666_v35  ;;  %v10096_v5 = vld [vmem:[#allocation1] sm:$0xff]  ;;  %v3524_v35 = vperm.slane %v3273_v48, 5 }
 0x40a   : > { %12385 = vst [vmem:[#allocation42_spill] sm:$0xff] %v10096_v5  ;;  %v2701_v53 = vshll.u32 %v2700_v27, 16  ;;  %v12393_v27 = vld [vmem:[#allocation53_spill] sm:$0xff] }
 0x40b   : > { %v2670_v32 = vadd.s32 %v2669_v3, %v2667_v60  ;;  %4064 = vst [vmem:[#allocation1] ss:$9 sm:$0xff] %v3519_v16  ;;  %v12387_v60 = vld [vmem:[#allocation48_spill] sm:$0xff]  ;;  %v3526_v16 = vperm.slane %v3273_v48, 7  ;;  %v12389_v48 = vld [vmem:[#allocation50_spill] sm:$0xff]  ;;  %v1413_v5 = vsub.f32 %v8266_v46, %v12393_v27 }
 0x40c   : > { %4065 = vst [vmem:[#allocation1 + $0x1] ss:$9 sm:$0xff] %v3520_v9  ;;  %v1408_v3 = vsub.f32 %v8262_v37, %v12387_v60  ;;  %v1410_v50 = vsub.f32 %v8262_v37, %v12389_v48 }
 0x40d   : > { %v10098_v28 = vand.u32 255, %v2670_v32  ;;  %v1409_v32 = vsub.f32 %v8266_v46, %v12388_v62  ;;  %4066 = vst [vmem:[#allocation1 + $0x2] ss:$9 sm:$0xff] %v3521_v61  ;;  %v6033_v60 = vpop.f32.mrf.mxu2  ;;  %v2882_v62 = vshra.s32 %v10086_v33, 16  ;;  %vm1672_vm6 = vcmp.lt.s32.totalorder %v1413_v5, 0 }
 0x40e   : > { %4067 = vst [vmem:[#allocation1 + $0x3] ss:$9 sm:$0xff] %v3522_v2  ;;  %vm1667_vm5 = vcmp.lt.s32.totalorder %v1408_v3, 0  ;;  %v1795_v45 = vxor.u32 2147483647, %v1408_v3  ;;  %v5567_v2 = vpop.f32.mrf.mxu0  ;;  %vm1669_vm4 = vcmp.lt.s32.totalorder %v1410_v50, 0 }
 0x40f   : > { %vm4820_vm3 = vcmp.eq.s32.totalorder %v8272_v55, %v10098_v28  ;;  %vm4821_vm7 = vcmp.eq.s32.totalorder %v8276_v59, %v10098_v28  ;;  %4068 = vst [vmem:[#allocation1 + $0x4] ss:$9 sm:$0xff] %v3523_v40  ;;  %v1796_v61 = vxor.u32 2147483647, %v1409_v32  ;;  %vm1668_vm1 = vcmp.lt.s32.totalorder %v1409_v32, 0 }
 0x410   : > { %vm7163_vm10 = vmpackc.low %vm4820_vm3, %vm4818_vm2  ;;  %4069 = vst [vmem:[#allocation1 + $0x5] ss:$9 sm:$0xff] %v3524_v35  ;;  %v2682_v54 = vpop.xlane.xlu2 %2681  ;;  %v5398_v35 = vpop.f32.mrf.mxu3  ;;  %v10137_v36 = vsel %vm1667_vm5, %v1795_v45, %v1408_v3  ;;  %v1797_v57 = vxor.u32 2147483647, %v1410_v50  ;;  %v3528_v39 = vperm.slane %v10098_v28, 1  ;;  %v3532_v34 = vperm.slane %v10098_v28, 5 }
 0x411   : > { %7164 = vmatmul.msk.bf16.gmra.mxu3 %vm7163_vm10, %v12227_v0  ;;  %vm7227_vm8 = vmpackc.low %vm4821_vm7, %vm4819_vm15  ;;  %7356 = vmatmul.msk.bf16.gmra.mxu1 %vm7163_vm10, %v12227_v0  ;;  %4070 = vst [vmem:[#allocation1 + $0x6] ss:$9 sm:$0xff] %v3525_v41  ;;  %v1411_v41 = vsub.f32 %v8266_v46, %v12390_v43  ;;  %v2683_v1 = vcvt.f32.s32 %v2682_v54  ;;  %v1412_v54 = vsub.f32 %v8262_v37, %v12392_v15 }
 0x412   : > { %v10121_v9 = vpop.xlane.xlu1 %2773  ;;  %7228 = vmatmul.msk.bf16.gmra.mxu0 %vm7227_vm8, %v12227_v0  ;;  %7420 = vmatmul.msk.bf16.gmra.mxu2 %vm7227_vm8, %v12227_v0  ;;  %4071 = vst [vmem:[#allocation1 + $0x7] ss:$9 sm:$0xff] %v3526_v16  ;;  %v10139_v16 = vsel %vm1668_vm1, %v1796_v61, %v1409_v32  ;;  %v3530_v32 = vperm.slane %v10098_v28, 3 }
 0x413   : > { %vm2775_vm12 = vcmp.eq.f32.partialorder %v9871_v10, %v10121_v9  ;;  %6228 = vst [vmem:[%s9606_s29 + $0x90] sm:$0xff] %v6164_v42  ;;  %v2785_v10 = vand.u32 65535, %v9890_v58  ;;  %v3527_v42 = vperm.slane %v10098_v28, 0  ;;  %vm1670_vm9 = vcmp.lt.s32.totalorder %v1411_v41, 0 }
 0x414   : > { %v2776_v40 = vsel %vm2775_vm12, %v2771_v13, inf  ;;  %v10142_v13 = vadd.f32 %v5567_v2, %v5398_v35  ;;  %v1798_v43 = vxor.u32 2147483647, %v1411_v41  ;;  %v3529_v58 = vperm.slane %v10098_v28, 2 }
 0x415   : > { %2777 = vmin.xlane.f32.xlu2 %v2776_v40  ;;  %v2685_v40 = vshll.u32 %v2684_v20, 16  ;;  %v2787_v61 = vcvt.s32.f32 %v2785_v10  ;;  %v10151_v2 = vcvt.s32.f32 %v2882_v62  ;;  %v3531_v35 = vperm.slane %v10098_v28, 4 }
 0x416   : > { %12391 = vst [vmem:[#allocation45_spill] sm:$0xff] %v10142_v13  ;;  %v6034_v20 = vadd.f32 %v6033_v60, %v5864_v23  ;;  %v3533_v10 = vperm.slane %v10098_v28, 6  ;;  %v2051_v23 = vand.u32 4294967040, %v10137_v36  ;;  %v2052_v15 = vand.u32 4294967040, %v10139_v16 }
 0x417   : > { %v2686_v62 = vadd.s32 %v2685_v40, %v2683_v1  ;;  %v3534_v60 = vperm.slane %v10098_v28, 7  ;;  %v5867_v1 = vpop.f32.mrf.mxu1  ;;  %v1799_v16 = vxor.u32 2147483647, %v1412_v54  ;;  %v1800_v28 = vxor.u32 2147483647, %v1413_v5  ;;  %v12395_v40 = vld [vmem:[#allocation54_spill] sm:$0xff] }
 0x418   : > { %vm1671_vm13 = vcmp.lt.s32.totalorder %v1412_v54, 0 }
 0x419   : > { %v10146_v3 = vld [vmem:[#allocation1] sm:$0xff]  ;;  %v10190_v27 = vsel %vm1671_vm13, %v1799_v16, %v1412_v54 }
 0x41a   : > { %v10149_v45 = vpop.xlane.xlu2 %2789  ;;  %4073 = vst [vmem:[#allocation1] ss:$9 sm:$0xff] %v3527_v42  ;;  %v2055_v16 = vand.u32 4294967040, %v10190_v27 }
 0x41b   : > { %v2698_v48 = vpop.xlane.xlu0 %2697  ;;  %4074 = vst [vmem:[#allocation1 + $0x1] ss:$9 sm:$0xff] %v3528_v39  ;;  %vm2791_vm11 = vcmp.eq.f32.partialorder %v9904_v52, %v10149_v45  ;;  %v10169_v52 = vsel %vm1669_vm4, %v1797_v57, %v1410_v50  ;;  %v10179_v50 = vand.u32 255, %v2686_v62 }
 0x41c   : > { %v2699_v18 = vcvt.f32.s32 %v2698_v48  ;;  %4075 = vst [vmem:[#allocation1 + $0x2] ss:$9 sm:$0xff] %v3529_v58  ;;  %v2792_v29 = vsel %vm2791_vm11, %v2787_v61, inf  ;;  %v5570_v48 = vpop.f32.mrf.mxu0  ;;  %v10172_v58 = vsel %vm1670_vm9, %v1798_v43, %v1411_v41  ;;  %v2053_v57 = vand.u32 4294967040, %v10169_v52 }
 0x41d   : > { %2885 = vmin.xlane.f32.xlu2 %v10151_v2  ;;  %4076 = vst [vmem:[#allocation1 + $0x3] ss:$9 sm:$0xff] %v3530_v32  ;;  %2793 = vmin.xlane.f32.xlu0 %v2792_v29  ;;  %v5401_v39 = vpop.f32.mrf.mxu3  ;;  %v1414_v29 = vsub.f32 %v8262_v37, %v12395_v40  ;;  %v2801_v43 = vand.u32 65535, %v9916_v56  ;;  %v2054_v61 = vand.u32 4294967040, %v10172_v58  ;;  %vm4822_vm14 = vcmp.eq.s32.totalorder %v8272_v55, %v10179_v50  ;;  %v12397_v58 = vld [vmem:[#allocation56_spill] sm:$0xff] }
 0x41e   : > { %v2702_v42 = vadd.s32 %v2701_v53, %v2699_v18  ;;  %4077 = vst [vmem:[#allocation1 + $0x4] ss:$9 sm:$0xff] %v3531_v35  ;;  %v6165_v18 = vadd.f32 %v6034_v20, %v10142_v13  ;;  %v10175_v53 = vadd.f32 %v5570_v48, %v5401_v39  ;;  %v6036_v36 = vpop.f32.mrf.mxu2  ;;  %v2180_v20 = vor.u32 %v2052_v15, %v8276_v59 }
 0x41f   : > { %4078 = vst [vmem:[#allocation1 + $0x5] ss:$9 sm:$0xff] %v3532_v34  ;;  %v6037_v32 = vadd.f32 %v6036_v36, %v5867_v1  ;;  %v2179_v34 = vor.u32 %v2051_v23, %v8272_v55  ;;  %v1801_v62 = vxor.u32 2147483647, %v1414_v29  ;;  %v3535_v56 = vperm.slane %v10179_v50, 0 }
 0x420   : > { %12394 = vst [vmem:[#allocation46_spill] sm:$0xff] %v10175_v53  ;;  %v10181_v41 = vand.u32 255, %v2702_v42  ;;  %v12396_v42 = vld [vmem:[#allocation55_spill] sm:$0xff]  ;;  %vm4823_vm15 = vcmp.eq.s32.totalorder %v8276_v59, %v10179_v50  ;;  %v2803_v54 = vcvt.s32.f32 %v2801_v43  ;;  %vm1673_vm8 = vcmp.lt.s32.totalorder %v1414_v29, 0  ;;  %v12399_v43 = vld [vmem:[#allocation58_spill] sm:$0xff] }
 0x421   : > { %4079 = vst [vmem:[#allocation1 + $0x6] ss:$9 sm:$0xff] %v3533_v10  ;;  %v6166_v35 = vadd.f32 %v6037_v32, %v10175_v53  ;;  %v10192_v10 = vsel %vm1672_vm6, %v1800_v28, %v1413_v5  ;;  %v1415_v48 = vsub.f32 %v8266_v46, %v12396_v42  ;;  %vm2895_vm7 = vcmp.lt.s32.totalorder %v2179_v34, %v2180_v20  ;;  %v5869_v42 = vpop.f32.mrf.mxu1 }
 0x422   : > { %4080 = vst [vmem:[#allocation1 + $0x7] ss:$9 sm:$0xff] %v3534_v60  ;;  %vm4824_vm2 = vcmp.eq.s32.totalorder %v8272_v55, %v10181_v41  ;;  %vm4825_vm3 = vcmp.eq.s32.totalorder %v8276_v59, %v10181_v41  ;;  %v10210_v23 = vsel %vm2895_vm7, %v2179_v34, %v2180_v20  ;;  %v3536_v15 = vperm.slane %v10179_v50, 1 }
 0x423   : > { %6229 = vst [vmem:[%s9606_s29 + $0x98] sm:$0xff] %v6165_v18  ;;  %v10196_v60 = vpop.xlane.xlu0 %2713  ;;  %vm7165_vm10 = vmpackc.low %vm4824_vm2, %vm4822_vm14  ;;  %v2898_v39 = vshra.s32 %v10210_v23, 16  ;;  %v1802_v52 = vxor.u32 2147483647, %v1415_v48  ;;  %v1416_v18 = vsub.f32 %v8262_v37, %v12397_v58  ;;  %v3537_v1 = vperm.slane %v10179_v50, 2 }
 0x424   : > { %6230 = vst [vmem:[%s9606_s29 + $0xa0] sm:$0xff] %v6166_v35  ;;  %v10206_v5 = vpop.xlane.xlu2 %2805  ;;  %7166 = vmatmul.msk.bf16.gmra.mxu3 %vm7165_vm10, %v12227_v0  ;;  %vm7229_vm5 = vmpackc.low %vm4825_vm3, %vm4823_vm15  ;;  %7358 = vmatmul.msk.bf16.gmra.mxu1 %vm7165_vm10, %v12227_v0  ;;  %v2056_v28 = vand.u32 4294967040, %v10192_v10  ;;  %vm1674_vm1 = vcmp.lt.s32.totalorder %v1415_v48, 0  ;;  %v1929_v32 = vsel %vm1673_vm8, %v1801_v62, %v1414_v29  ;;  %v1417_v35 = vsub.f32 %v8266_v46, %v12399_v43  ;;  %v5572_v10 = vpop.f32.mrf.mxu0 }
 0x425   : > { %vm2807_vm12 = vcmp.eq.f32.partialorder %v9930_v14, %v10206_v5  ;;  %7230 = vmatmul.msk.bf16.gmra.mxu0 %vm7229_vm5, %v12227_v0  ;;  %7422 = vmatmul.msk.bf16.gmra.mxu2 %vm7229_vm5, %v12227_v0  ;;  %v3538_v14 = vperm.slane %v10179_v50, 3  ;;  %v3539_v34 = vperm.slane %v10179_v50, 4  ;;  %v2817_v20 = vand.u32 65535, %v9938_v47 }
 0x426   : > { %v2808_v36 = vsel %vm2807_vm12, %v2803_v54, inf  ;;  %v3540_v27 = vperm.slane %v10179_v50, 5  ;;  %v10234_v54 = vcvt.s32.f32 %v2898_v39  ;;  %v2181_v58 = vor.u32 %v2053_v57, %v8272_v55  ;;  %v6038_v47 = vpop.f32.mrf.mxu2 }
 0x427   : > { %2809 = vmin.xlane.f32.xlu0 %v2808_v36  ;;  %v2182_v36 = vor.u32 %v2054_v61, %v8276_v59  ;;  %v1930_v29 = vsel %vm1674_vm1, %v1802_v52, %v1415_v48  ;;  %vm1675_vm4 = vcmp.lt.s32.totalorder %v1416_v18, 0  ;;  %v1803_v62 = vxor.u32 2147483647, %v1416_v18 }
 0x428   : > { %v3541_v43 = vperm.slane %v10179_v50, 6  ;;  %v3542_v8 = vperm.slane %v10179_v50, 7  ;;  %2901 = vmin.xlane.f32.xlu2 %v10234_v54  ;;  %v6039_v39 = vadd.f32 %v6038_v47, %v5869_v42  ;;  %vm1676_vm11 = vcmp.lt.s32.totalorder %v1417_v35, 0 }
 0x429   : > { %v10225_v40 = vld [vmem:[#allocation1] sm:$0xff]  ;;  %vm2911_vm9 = vcmp.lt.s32.totalorder %v2181_v58, %v2182_v36  ;;  %v1804_v57 = vxor.u32 2147483647, %v1417_v35  ;;  %v2819_v48 = vcvt.s32.f32 %v2817_v20  ;;  %v2184_v42 = vor.u32 %v2056_v28, %v8276_v59 }
 0x42a   : > { %12398 = vst [vmem:[#allocation48_spill] sm:$0xff] %v10225_v40  ;;  %v10246_v52 = vsel %vm2911_vm9, %v2181_v58, %v2182_v36  ;;  %v2057_v58 = vand.u32 4294967040, %v1929_v32  ;;  %v2058_v36 = vand.u32 4294967040, %v1930_v29  ;;  %v3544_v32 = vperm.slane %v10181_v41, 1 }
 0x42b   : > { %4082 = vst [vmem:[#allocation1] ss:$9 sm:$0xff] %v3535_v56  ;;  %v5403_v56 = vpop.f32.mrf.mxu3  ;;  %v10244_v61 = vpop.xlane.xlu0 %2821 }
 0x42c   : > { %4083 = vst [vmem:[#allocation1 + $0x1] ss:$9 sm:$0xff] %v3536_v15  ;;  %v10242_v15 = vadd.f32 %v5572_v10, %v5403_v56  ;;  %vm2823_vm13 = vcmp.eq.f32.partialorder %v9949_v31, %v10244_v61  ;;  %v1931_v10 = vsel %vm1675_vm4, %v1803_v62, %v1416_v18  ;;  %v1932_v56 = vsel %vm1676_vm11, %v1804_v57, %v1417_v35 }
 0x42d   : > { %4084 = vst [vmem:[#allocation1 + $0x2] ss:$9 sm:$0xff] %v3537_v1  ;;  %v2833_v31 = vand.u32 65535, %v9946_v49  ;;  %v2059_v47 = vand.u32 4294967040, %v1931_v10  ;;  %v2716_v62 = vcvt.f32.s32 %v9923_v6  ;;  %v2185_v49 = vor.u32 %v2057_v58, %v8272_v55 }
 0x42e   : > { %4085 = vst [vmem:[#allocation1 + $0x3] ss:$9 sm:$0xff] %v3538_v14  ;;  %v6167_v1 = vadd.f32 %v6039_v39, %v10242_v15  ;;  %v2914_v14 = vshra.s32 %v10246_v52, 16  ;;  %v3545_v39 = vperm.slane %v10181_v41, 2  ;;  %v3548_v58 = vperm.slane %v10181_v41, 5 }
 0x42f   : > { %12400 = vst [vmem:[#allocation49_spill] sm:$0xff] %v10242_v15  ;;  %v2835_v35 = vcvt.s32.f32 %v2833_v31  ;;  %v2187_v6 = vor.u32 %v2059_v47, %v8272_v55 }
 0x430   : > { %4086 = vst [vmem:[#allocation1 + $0x4] ss:$9 sm:$0xff] %v3539_v34  ;;  %v2824_v34 = vsel %vm2823_vm13, %v2819_v48, inf  ;;  %v10255_v20 = vcvt.s32.f32 %v2914_v14  ;;  %v2715_v14 = vcvt.f32.s32 %v10196_v60  ;;  %v3550_v60 = vperm.slane %v10181_v41, 7 }
 0x431   : > { %4087 = vst [vmem:[#allocation1 + $0x5] ss:$9 sm:$0xff] %v3540_v27  ;;  %2825 = vmin.xlane.f32.xlu1 %v2824_v34  ;;  %v2183_v27 = vor.u32 %v2055_v16, %v8272_v55  ;;  %v3543_v16 = vperm.slane %v10181_v41, 0  ;;  %v3547_v34 = vperm.slane %v10181_v41, 4 }
 0x432   : > { %4088 = vst [vmem:[#allocation1 + $0x6] ss:$9 sm:$0xff] %v3541_v43  ;;  %2917 = vmin.xlane.f32.xlu0 %v10255_v20  ;;  %v2186_v43 = vor.u32 %v2058_v36, %v8276_v59 }
 0x433   : > { %4089 = vst [vmem:[#allocation1 + $0x7] ss:$9 sm:$0xff] %v3542_v8  ;;  %vm2927_vm6 = vcmp.lt.s32.totalorder %v2183_v27, %v2184_v42  ;;  %v2060_v8 = vand.u32 4294967040, %v1932_v56  ;;  %v10269_v29 = vpop.xlane.xlu0 %2837  ;;  %v3549_v56 = vperm.slane %v10181_v41, 6 }
 0x434   : > { %6231 = vst [vmem:[%s9606_s29 + $0xa8] sm:$0xff] %v6167_v1  ;;  %v10263_v18 = vsel %vm2927_vm6, %v2183_v27, %v2184_v42  ;;  %vm2839_vm14 = vcmp.eq.f32.partialorder %v9959_v44, %v10269_v29  ;;  %v3546_v1 = vperm.slane %v10181_v41, 3  ;;  %vm2943_vm2 = vcmp.lt.s32.totalorder %v2185_v49, %v2186_v43 }
 0x435   : > { %v2930_v28 = vshra.s32 %v10263_v18, 16  ;;  %v2840_v10 = vsel %vm2839_vm14, %v2835_v35, inf  ;;  %v10284_v27 = vsel %vm2943_vm2, %v2185_v49, %v2186_v43  ;;  %v2188_v44 = vor.u32 %v2060_v8, %v8276_v59 }
 0x436   : > { %v2717_v42 = vshll.u32 %v2716_v62, 16  ;;  %v2946_v36 = vshra.s32 %v10284_v27, 16 }
 0x437   : > { %v10276_v57 = vcvt.s32.f32 %v2930_v28  ;;  %vm2959_vm3 = vcmp.lt.s32.totalorder %v2187_v6, %v2188_v44 }
 0x438   : > { %v2718_v31 = vadd.s32 %v2717_v42, %v2715_v14  ;;  %v10292_v47 = vsel %vm2959_vm3, %v2187_v6, %v2188_v44  ;;  %v10294_v8 = vcvt.s32.f32 %v2946_v36 }
 0x439   : > { %2841 = vmin.xlane.f32.xlu1 %v2840_v10  ;;  %v2732_v10 = vcvt.f32.s32 %v10027_v17 }
 0x43a   : > { %v10279_v48 = vld [vmem:[#allocation1] sm:$0xff]  ;;  %2933 = vmin.xlane.f32.xlu0 %v10276_v57  ;;  %v10296_v62 = vand.u32 255, %v2718_v31 }
 0x43b   : > { %12401 = vst [vmem:[#allocation50_spill] sm:$0xff] %v10279_v48  ;;  %v2733_v36 = vshll.u32 %v2732_v10, 16 }
 0x43c   : > { %4091 = vst [vmem:[#allocation1] ss:$9 sm:$0xff] %v3543_v16  ;;  %v2962_v16 = vshra.s32 %v10292_v47, 16  ;;  %v3551_v28 = vperm.slane %v10296_v62, 0  ;;  %v3552_v41 = vperm.slane %v10296_v62, 1  ;;  %v3553_v35 = vperm.slane %v10296_v62, 2 }
 0x43d   : > { %4092 = vst [vmem:[#allocation1 + $0x1] ss:$9 sm:$0xff] %v3544_v32  ;;  %v3554_v43 = vperm.slane %v10296_v62, 3  ;;  %v3556_v6 = vperm.slane %v10296_v62, 5  ;;  %v3558_v14 = vperm.slane %v10296_v62, 7  ;;  %vm4826_vm15 = vcmp.eq.s32.totalorder %v8272_v55, %v10296_v62 }
 0x43e   : > { %4093 = vst [vmem:[#allocation1 + $0x2] ss:$9 sm:$0xff] %v3545_v39  ;;  %v10302_v32 = vcvt.s32.f32 %v2962_v16  ;;  %v3555_v39 = vperm.slane %v10296_v62, 4  ;;  %v12403_v16 = vld [vmem:[#allocation59_spill] sm:$0xff]  ;;  %vm4827_vm1 = vcmp.eq.s32.totalorder %v8276_v59, %v10296_v62 }
 0x43f   : > { %4094 = vst [vmem:[#allocation1 + $0x3] ss:$9 sm:$0xff] %v3546_v1  ;;  %v3557_v1 = vperm.slane %v10296_v62, 6 }
 0x440   : > { %4095 = vst [vmem:[#allocation1 + $0x4] ss:$9 sm:$0xff] %v3547_v34 }
 0x441   : > { %4096 = vst [vmem:[#allocation1 + $0x5] ss:$9 sm:$0xff] %v3548_v58  ;;  %2949 = vmin.xlane.f32.xlu1 %v10294_v8 }
 0x442   : > { %4097 = vst [vmem:[#allocation1 + $0x6] ss:$9 sm:$0xff] %v3549_v56 }
 0x443   : > { %4098 = vst [vmem:[#allocation1 + $0x7] ss:$9 sm:$0xff] %v3550_v60 }
 0x449   : > { %2965 = vmin.xlane.f32.xlu1 %v10302_v32 }
 0x44a   : > { %v10305_v49 = vld [vmem:[#allocation1] sm:$0xff] }
 0x44b   : > { %4100 = vst [vmem:[#allocation1] ss:$9 sm:$0xff] %v3551_v28  ;;  %v1418_v28 = vsub.f32 %v8262_v37, %v12403_v16 }
 0x44c   : > { %4101 = vst [vmem:[#allocation1 + $0x1] ss:$9 sm:$0xff] %v3552_v41 }
 0x44d   : > { %4102 = vst [vmem:[#allocation1 + $0x2] ss:$9 sm:$0xff] %v3553_v35  ;;  %vm1677_vm7 = vcmp.lt.s32.totalorder %v1418_v28, 0 }
 0x44e   : > { %4103 = vst [vmem:[#allocation1 + $0x3] ss:$9 sm:$0xff] %v3554_v43  ;;  %v12404_v43 = vld [vmem:[#allocation60_spill] sm:$0xff] }
 0x44f   : > { %4104 = vst [vmem:[#allocation1 + $0x4] ss:$9 sm:$0xff] %v3555_v39  ;;  %v1419_v39 = vsub.f32 %v8266_v46, %v12404_v43 }
 0x450   : > { %4105 = vst [vmem:[#allocation1 + $0x5] ss:$9 sm:$0xff] %v3556_v6 }
 0x451   : > { %4106 = vst [vmem:[#allocation1 + $0x6] ss:$9 sm:$0xff] %v3557_v1  ;;  %v1805_v1 = vxor.u32 2147483647, %v1418_v28  ;;  %vm1678_vm10 = vcmp.lt.s32.totalorder %v1419_v39, 0 }
 0x452   : > { %4107 = vst [vmem:[#allocation1 + $0x7] ss:$9 sm:$0xff] %v3558_v14 }
 0x45a   : > { %v5872_v44 = vpop.f32.mrf.mxu1 }
 0x45b   : > { %v5575_v34 = vpop.f32.mrf.mxu0 }
 0x45c   : > { %v2730_v42 = vpop.xlane.xlu1 %2729 }
 0x45d   : > { %v2731_v56 = vcvt.f32.s32 %v2730_v42 }
 0x45f   : > { %v2734_v35 = vadd.s32 %v2733_v36, %v2731_v56 }
 0x460   : > { %v5406_v58 = vpop.f32.mrf.mxu3 }
 0x461   : > { %v10314_v60 = vadd.f32 %v5575_v34, %v5406_v58  ;;  %v6041_v31 = vpop.f32.mrf.mxu2  ;;  %v3278_v6 = vand.u32 255, %v2734_v35  ;;  %v1806_v34 = vxor.u32 2147483647, %v1419_v39  ;;  %v10322_v58 = vld [vmem:[#allocation1] sm:$0xff] }
 0x462   : > { %v6042_v41 = vadd.f32 %v6041_v31, %v5872_v44  ;;  %12405 = vst [vmem:[#allocation52_spill] sm:$0xff] %v10322_v58  ;;  %v5874_v56 = vpop.f32.mrf.mxu1 }
 0x463   : > { %12402 = vst [vmem:[#allocation51_spill] sm:$0xff] %v10314_v60  ;;  %v3559_v14 = vperm.slane %v3278_v6, 0  ;;  %v3560_v10 = vperm.slane %v3278_v6, 1  ;;  %v3561_v42 = vperm.slane %v3278_v6, 2  ;;  %v3562_v50 = vperm.slane %v3278_v6, 3  ;;  %v5577_v16 = vpop.f32.mrf.mxu0 }
 0x464   : > { %v6168_v17 = vadd.f32 %v6042_v41, %v10314_v60  ;;  %v3563_v36 = vperm.slane %v3278_v6, 4  ;;  %vm4828_vm8 = vcmp.eq.s32.totalorder %v8272_v55, %v3278_v6  ;;  %vm4829_vm5 = vcmp.eq.s32.totalorder %v8276_v59, %v3278_v6 }
 0x465   : > { %4109 = vst [vmem:[#allocation1] ss:$9 sm:$0xff] %v3559_v14  ;;  %v3564_v35 = vperm.slane %v3278_v6, 5  ;;  %vm7167_vm12 = vmpackc.low %vm4828_vm8, %vm4826_vm15  ;;  %v3565_v53 = vperm.slane %v3278_v6, 6 }
 0x466   : > { %6232 = vst [vmem:[%s9606_s29 + $0xb0] sm:$0xff] %v6168_v17  ;;  %v2748_v17 = vcvt.f32.s32 %v10050_v51  ;;  %7168 = vmatmul.msk.bf16.gmra.mxu3 %vm7167_vm12, %v12227_v0  ;;  %vm7231_vm4 = vmpackc.low %vm4829_vm5, %vm4827_vm1  ;;  %7360 = vmatmul.msk.bf16.gmra.mxu1 %vm7167_vm12, %v12227_v0 }
 0x467   : > { %4110 = vst [vmem:[#allocation1 + $0x1] ss:$9 sm:$0xff] %v3560_v10  ;;  %v1934_v10 = vsel %vm1678_vm10, %v1806_v34, %v1419_v39  ;;  %7232 = vmatmul.msk.bf16.gmra.mxu0 %vm7231_vm4, %v12227_v0  ;;  %7424 = vmatmul.msk.bf16.gmra.mxu2 %vm7231_vm4, %v12227_v0  ;;  %v12407_v39 = vld [vmem:[#allocation61_spill] sm:$0xff] }
 0x468   : > { %v5408_v44 = vpop.f32.mrf.mxu3  ;;  %4111 = vst [vmem:[#allocation1 + $0x2] ss:$9 sm:$0xff] %v3561_v42 }
 0x469   : > { %v10328_v31 = vadd.f32 %v5577_v16, %v5408_v44  ;;  %v6043_v41 = vpop.f32.mrf.mxu2  ;;  %v1933_v16 = vsel %vm1677_vm7, %v1805_v1, %v1418_v28  ;;  %v3566_v44 = vperm.slane %v3278_v6, 7  ;;  %4112 = vst [vmem:[#allocation1 + $0x3] ss:$9 sm:$0xff] %v3562_v50  ;;  %v1420_v50 = vsub.f32 %v8262_v37, %v12407_v39 }
 0x46a   : > { %v6044_v43 = vadd.f32 %v6043_v41, %v5874_v56  ;;  %4113 = vst [vmem:[#allocation1 + $0x4] ss:$9 sm:$0xff] %v3563_v36  ;;  %v2061_v42 = vand.u32 4294967040, %v1933_v16  ;;  %v2062_v56 = vand.u32 4294967040, %v1934_v10  ;;  %v2749_v41 = vshll.u32 %v2748_v17, 16  ;;  %v12409_v17 = vld [vmem:[#allocation10_spill] sm:$0xff] }
 0x46b   : > { %12406 = vst [vmem:[#allocation53_spill] sm:$0xff] %v10328_v31  ;;  %v2746_v62 = vpop.xlane.xlu1 %2745  ;;  %v2849_v6 = vand.u32 65535, %v10033_v12  ;;  %vm1679_vm9 = vcmp.lt.s32.totalorder %v1420_v50, 0  ;;  %v12410_v10 = vld [vmem:[#allocation62_spill] sm:$0xff] }
 0x46c   : > { %v6169_v51 = vadd.f32 %v6044_v43, %v10328_v31  ;;  %4114 = vst [vmem:[#allocation1 + $0x5] ss:$9 sm:$0xff] %v3564_v35  ;;  %v2747_v14 = vcvt.f32.s32 %v2746_v62  ;;  %v2189_v34 = vor.u32 %v2061_v42, %v8272_v55  ;;  %v2190_v36 = vor.u32 %v2062_v56, %v8276_v59  ;;  %v12408_v35 = vld [vmem:[#allocation9_spill] sm:$0xff] }
 0x46d   : > { %4115 = vst [vmem:[#allocation1 + $0x6] ss:$9 sm:$0xff] %v3565_v53  ;;  %v1421_v43 = vsub.f32 %v8266_v46, %v12408_v35  ;;  %v1422_v53 = vsub.f32 %v8262_v37, %v12409_v17  ;;  %v1423_v12 = vsub.f32 %v8266_v46, %v12410_v10  ;;  %v2851_v62 = vcvt.s32.f32 %v2849_v6 }
 0x46e   : > { %4116 = vst [vmem:[#allocation1 + $0x7] ss:$9 sm:$0xff] %v3566_v44  ;;  %v2750_v28 = vadd.s32 %v2749_v41, %v2747_v14  ;;  %v1807_v42 = vxor.u32 2147483647, %v1420_v50  ;;  %vm2975_vm13 = vcmp.lt.s32.totalorder %v2189_v34, %v2190_v36  ;;  %v2764_v31 = vcvt.f32.s32 %v10093_v24 }
 0x46f   : > { %6233 = vst [vmem:[%s9606_s29 + $0xb8] sm:$0xff] %v6169_v51  ;;  %v10367_v17 = vsel %vm2975_vm13, %v2189_v34, %v2190_v36  ;;  %vm1680_vm6 = vcmp.lt.s32.totalorder %v1421_v43, 0  ;;  %v1809_v10 = vxor.u32 2147483647, %v1422_v53  ;;  %vm1681_vm14 = vcmp.lt.s32.totalorder %v1422_v53, 0 }
 0x470   : > { %v10346_v1 = vand.u32 255, %v2750_v28  ;;  %v1808_v28 = vxor.u32 2147483647, %v1421_v43  ;;  %v1810_v60 = vxor.u32 2147483647, %v1423_v12  ;;  %vm1682_vm2 = vcmp.lt.s32.totalorder %v1423_v12, 0 }
 0x471   : > { %v1935_v34 = vsel %vm1679_vm9, %v1807_v42, %v1420_v50  ;;  %v2865_v50 = vand.u32 65535, %v10082_v30 }
 0x472   : > { %v3567_v14 = vperm.slane %v10346_v1, 0  ;;  %v3568_v16 = vperm.slane %v10346_v1, 1  ;;  %v3569_v44 = vperm.slane %v10346_v1, 2  ;;  %v3570_v41 = vperm.slane %v10346_v1, 3 }
 0x473   : > { %v10359_v51 = vpop.xlane.xlu1 %2853  ;;  %v3571_v39 = vperm.slane %v10346_v1, 4  ;;  %v3572_v6 = vperm.slane %v10346_v1, 5  ;;  %v1936_v36 = vsel %vm1680_vm6, %v1808_v28, %v1421_v43  ;;  %v1938_v48 = vsel %vm1682_vm2, %v1810_v60, %v1423_v12 }
 0x474   : > { %vm2855_vm11 = vcmp.eq.f32.partialorder %v10088_v22, %v10359_v51  ;;  %v3573_v22 = vperm.slane %v10346_v1, 6  ;;  %v2063_v58 = vand.u32 4294967040, %v1935_v34  ;;  %v2066_v28 = vand.u32 4294967040, %v1938_v48 }
 0x475   : > { %v10361_v56 = vld [vmem:[#allocation1] sm:$0xff]  ;;  %v2856_v35 = vsel %vm2855_vm11, %v2851_v62, inf  ;;  %vm4830_vm3 = vcmp.eq.s32.totalorder %v8272_v55, %v10346_v1  ;;  %vm4831_vm7 = vcmp.eq.s32.totalorder %v8276_v59, %v10346_v1 }
 0x476   : > { %12411 = vst [vmem:[#allocation54_spill] sm:$0xff] %v10361_v56  ;;  %2857 = vmin.xlane.f32.xlu2 %v2856_v35  ;;  %v5877_v62 = vpop.f32.mrf.mxu1  ;;  %v2762_v35 = vpop.xlane.xlu2 %2761  ;;  %v2191_v60 = vor.u32 %v2063_v58, %v8272_v55  ;;  %v2194_v58 = vor.u32 %v2066_v28, %v8276_v59 }
 0x477   : > { %4118 = vst [vmem:[#allocation1] ss:$9 sm:$0xff] %v3567_v14  ;;  %v5580_v15 = vpop.f32.mrf.mxu0  ;;  %v3574_v14 = vperm.slane %v10346_v1, 7  ;;  %v2763_v11 = vcvt.f32.s32 %v2762_v35  ;;  %v2796_v1 = vcvt.f32.s32 %v10149_v45 }
 0x478   : > { %4119 = vst [vmem:[#allocation1 + $0x1] ss:$9 sm:$0xff] %v3568_v16  ;;  %v1937_v16 = vsel %vm1681_vm14, %v1809_v10, %v1422_v53 }
 0x479   : > { %4120 = vst [vmem:[#allocation1 + $0x2] ss:$9 sm:$0xff] %v3569_v44  ;;  %v2765_v44 = vshll.u32 %v2764_v31, 16  ;;  %v2065_v53 = vand.u32 4294967040, %v1937_v16 }
 0x47a   : > { %4121 = vst [vmem:[#allocation1 + $0x3] ss:$9 sm:$0xff] %v3570_v41  ;;  %v2064_v41 = vand.u32 4294967040, %v1936_v36 }
 0x47b   : > { %4122 = vst [vmem:[#allocation1 + $0x4] ss:$9 sm:$0xff] %v3571_v39  ;;  %v2766_v43 = vadd.s32 %v2765_v44, %v2763_v11  ;;  %v2193_v48 = vor.u32 %v2065_v53, %v8272_v55 }
 0x47c   : > { %v5411_v13 = vpop.f32.mrf.mxu3  ;;  %4123 = vst [vmem:[#allocation1 + $0x5] ss:$9 sm:$0xff] %v3572_v6  ;;  %v2192_v31 = vor.u32 %v2064_v41, %v8276_v59 }
 0x47d   : > { %v10374_v56 = vadd.f32 %v5580_v15, %v5411_v13  ;;  %v6046_v24 = vpop.f32.mrf.mxu2  ;;  %4124 = vst [vmem:[#allocation1 + $0x6] ss:$9 sm:$0xff] %v3573_v22  ;;  %v3280_v39 = vand.u32 255, %v2766_v43  ;;  %v2780_v13 = vcvt.f32.s32 %v10121_v9  ;;  %v2867_v15 = vcvt.s32.f32 %v2865_v50  ;;  %v10382_v22 = vpop.xlane.xlu1 %2869 }
 0x47e   : > { %v6047_v63 = vadd.f32 %v6046_v24, %v5877_v62  ;;  %4125 = vst [vmem:[#allocation1 + $0x7] ss:$9 sm:$0xff] %v3574_v14  ;;  %v5879_v62 = vpop.f32.mrf.mxu1  ;;  %vm2871_vm5 = vcmp.eq.f32.partialorder %v10104_v25, %v10382_v22  ;;  %vm2991_vm12 = vcmp.lt.s32.totalorder %v2191_v60, %v2192_v31  ;;  %vm3007_vm4 = vcmp.lt.s32.totalorder %v2193_v48, %v2194_v58 }
 0x47f   : > { %12412 = vst [vmem:[#allocation55_spill] sm:$0xff] %v10374_v56  ;;  %v3575_v12 = vperm.slane %v3280_v39, 0  ;;  %v3576_v10 = vperm.slane %v3280_v39, 1  ;;  %v5582_v6 = vpop.f32.mrf.mxu0  ;;  %v3578_v11 = vperm.slane %v3280_v39, 3  ;;  %v3579_v34 = vperm.slane %v3280_v39, 4 }
 0x480   : > { %v6170_v42 = vadd.f32 %v6047_v63, %v10374_v56  ;;  %v3577_v63 = vperm.slane %v3280_v39, 2  ;;  %vm4832_vm10 = vcmp.eq.s32.totalorder %v8272_v55, %v3280_v39  ;;  %vm4833_vm15 = vcmp.eq.s32.totalorder %v8276_v59, %v3280_v39 }
 0x481   : > { %vm7169_vm8 = vmpackc.low %vm4832_vm10, %vm4830_vm3  ;;  %v2781_v44 = vshll.u32 %v2780_v13, 16  ;;  %v3580_v41 = vperm.slane %v3280_v39, 5  ;;  %v2872_v50 = vsel %vm2871_vm5, %v2867_v15, inf  ;;  %v10406_v43 = vsel %vm2991_vm12, %v2191_v60, %v2192_v31 }
 0x482   : > { %6234 = vst [vmem:[%s9606_s29 + $0xc0] sm:$0xff] %v6170_v42  ;;  %7170 = vmatmul.msk.bf16.gmra.mxu3 %vm7169_vm8, %v12227_v0  ;;  %vm7233_vm1 = vmpackc.low %vm4833_vm15, %vm4831_vm7  ;;  %7362 = vmatmul.msk.bf16.gmra.mxu1 %vm7169_vm8, %v12227_v0  ;;  %v3581_v42 = vperm.slane %v3280_v39, 6  ;;  %v3582_v53 = vperm.slane %v3280_v39, 7  ;;  %v10414_v15 = vsel %vm3007_vm4, %v2193_v48, %v2194_v58  ;;  %v2978_v60 = vshra.s32 %v10367_v17, 16  ;;  %v12415_v48 = vld [vmem:[#allocation63_spill] sm:$0xff] }
 0x483   : > { %7234 = vmatmul.msk.bf16.gmra.mxu0 %vm7233_vm1, %v12227_v0  ;;  %7426 = vmatmul.msk.bf16.gmra.mxu2 %vm7233_vm1, %v12227_v0  ;;  %v2881_v31 = vand.u32 65535, %v10086_v33  ;;  %v1424_v33 = vsub.f32 %v8262_v37, %v12415_v48 }
 0x484   : > { %v5413_v9 = vpop.f32.mrf.mxu3  ;;  %2873 = vmin.xlane.f32.xlu2 %v2872_v50 }
 0x485   : > { %v10390_v14 = vld [vmem:[#allocation1] sm:$0xff]  ;;  %v6048_v16 = vpop.f32.mrf.mxu2  ;;  %v10399_v35 = vadd.f32 %v5582_v6, %v5413_v9  ;;  %vm1683_vm14 = vcmp.lt.s32.totalorder %v1424_v33, 0 }
 0x486   : > { %12413 = vst [vmem:[#allocation56_spill] sm:$0xff] %v10390_v14  ;;  %v6049_v24 = vadd.f32 %v6048_v16, %v5879_v62 }
 0x487   : > { %4127 = vst [vmem:[#allocation1] ss:$9 sm:$0xff] %v3575_v12 }
 0x488   : > { %v2778_v30 = vpop.xlane.xlu2 %2777  ;;  %12414 = vst [vmem:[#allocation58_spill] sm:$0xff] %v10399_v35  ;;  %v6171_v13 = vadd.f32 %v6049_v24, %v10399_v35 }
 0x489   : > { %v2779_v36 = vcvt.f32.s32 %v2778_v30  ;;  %4128 = vst [vmem:[#allocation1 + $0x1] ss:$9 sm:$0xff] %v3576_v10  ;;  %v2797_v10 = vshll.u32 %v2796_v1, 16  ;;  %v2883_v30 = vcvt.s32.f32 %v2881_v31  ;;  %v2994_v1 = vshra.s32 %v10406_v43, 16 }
 0x48a   : > { %4129 = vst [vmem:[#allocation1 + $0x2] ss:$9 sm:$0xff] %v3577_v63  ;;  %v10419_v63 = vcvt.s32.f32 %v2978_v60  ;;  %v12418_v60 = vld [vmem:[#allocation65_spill] sm:$0xff] }
 0x48b   : > { %4130 = vst [vmem:[#allocation1 + $0x3] ss:$9 sm:$0xff] %v3578_v11  ;;  %v2782_v28 = vadd.s32 %v2781_v44, %v2779_v36  ;;  %v1425_v31 = vsub.f32 %v8266_v46, %v12418_v60  ;;  %v10449_v48 = vcvt.s32.f32 %v2994_v1 }
 0x48c   : > { %4131 = vst [vmem:[#allocation1 + $0x4] ss:$9 sm:$0xff] %v3579_v34  ;;  %2981 = vmin.xlane.f32.xlu2 %v10419_v63 }
 0x48d   : > { %4132 = vst [vmem:[#allocation1 + $0x5] ss:$9 sm:$0xff] %v3580_v41  ;;  %v3281_v39 = vand.u32 255, %v2782_v28  ;;  %vm1684_vm10 = vcmp.lt.s32.totalorder %v1425_v31, 0 }
 0x48e   : > { %4133 = vst [vmem:[#allocation1 + $0x6] ss:$9 sm:$0xff] %v3581_v42  ;;  %v5882_v41 = vpop.f32.mrf.mxu1 }
 0x48f   : > { %4134 = vst [vmem:[#allocation1 + $0x7] ss:$9 sm:$0xff] %v3582_v53  ;;  %v3583_v9 = vperm.slane %v3281_v39, 0  ;;  %v3584_v58 = vperm.slane %v3281_v39, 1  ;;  %v3585_v16 = vperm.slane %v3281_v39, 2  ;;  %v5585_v24 = vpop.f32.mrf.mxu0  ;;  %v3586_v42 = vperm.slane %v3281_v39, 3 }
 0x490   : > { %v2794_v12 = vpop.xlane.xlu0 %2793  ;;  %6235 = vst [vmem:[%s9606_s29 + $0xc8] sm:$0xff] %v6171_v13  ;;  %v10421_v11 = vpop.xlane.xlu2 %2885  ;;  %v3587_v53 = vperm.slane %v3281_v39, 4  ;;  %v1811_v13 = vxor.u32 2147483647, %v1424_v33  ;;  %vm4834_vm11 = vcmp.eq.s32.totalorder %v8272_v55, %v3281_v39  ;;  %vm4835_vm3 = vcmp.eq.s32.totalorder %v8276_v59, %v3281_v39 }
 0x491   : > { %v2795_v6 = vcvt.f32.s32 %v2794_v12  ;;  %vm2887_vm9 = vcmp.eq.f32.partialorder %v10151_v2, %v10421_v11  ;;  %v3588_v12 = vperm.slane %v3281_v39, 5 }
 0x492   : > { %v2888_v34 = vsel %vm2887_vm9, %v2883_v30, inf  ;;  %v2897_v30 = vand.u32 65535, %v10210_v23  ;;  %v12419_v23 = vld [vmem:[#allocation66_spill] sm:$0xff] }
 0x493   : > { %v2798_v45 = vadd.s32 %v2797_v10, %v2795_v6  ;;  %2889 = vmin.xlane.f32.xlu0 %v2888_v34  ;;  %v3589_v10 = vperm.slane %v3281_v39, 6  ;;  %v3590_v6 = vperm.slane %v3281_v39, 7  ;;  %v10454_v39 = vsel %vm1683_vm14, %v1811_v13, %v1424_v33 }
 0x494   : > { %v5416_v36 = vpop.f32.mrf.mxu3  ;;  %v10458_v34 = vsub.f32 %v8262_v37, %v12419_v23  ;;  %2997 = vmin.xlane.f32.xlu2 %v10449_v48 }
 0x495   : > { %v6051_v62 = vpop.f32.mrf.mxu2  ;;  %v10428_v44 = vand.u32 255, %v2798_v45  ;;  %v10432_v2 = vadd.f32 %v5585_v24, %v5416_v36  ;;  %v12420_v36 = vld [vmem:[#allocation33_spill] sm:$0xff]  ;;  %v2899_v24 = vcvt.s32.f32 %v2897_v30  ;;  %v2913_v30 = vand.u32 65535, %v10246_v52 }
 0x496   : > { %v10430_v50 = vld [vmem:[#allocation1] sm:$0xff]  ;;  %v6052_v28 = vadd.f32 %v6051_v62, %v5882_v41  ;;  %v1427_v62 = vsub.f32 %v8266_v46, %v12420_v36  ;;  %v12421_v41 = vld [vmem:[#allocation68_spill] sm:$0xff]  ;;  %vm1685_vm8 = vcmp.lt.s32.totalorder %v10458_v34, 0 }
 0x497   : > { %12416 = vst [vmem:[#allocation59_spill] sm:$0xff] %v10430_v50  ;;  %vm4836_vm13 = vcmp.eq.s32.totalorder %v8272_v55, %v10428_v44  ;;  %vm4837_vm6 = vcmp.eq.s32.totalorder %v8276_v59, %v10428_v44  ;;  %v5587_v33 = vpop.f32.mrf.mxu0  ;;  %v3591_v23 = vperm.slane %v10428_v44, 0  ;;  %v3594_v56 = vperm.slane %v10428_v44, 3 }
 0x498   : > { %4136 = vst [vmem:[#allocation1] ss:$9 sm:$0xff] %v3583_v9  ;;  %vm7171_vm2 = vmpackc.low %vm4836_vm13, %vm4834_vm11  ;;  %v6172_v9 = vadd.f32 %v6052_v28, %v10432_v2  ;;  %vm1686_vm5 = vcmp.lt.s32.totalorder %v1427_v62, 0  ;;  %v3595_v50 = vperm.slane %v10428_v44, 4 }
 0x499   : > { %12417 = vst [vmem:[#allocation60_spill] sm:$0xff] %v10432_v2  ;;  %7172 = vmatmul.msk.bf16.gmra.mxu3 %vm7171_vm2, %v12227_v0  ;;  %vm7235_vm7 = vmpackc.low %vm4837_vm6, %vm4835_vm3  ;;  %7364 = vmatmul.msk.bf16.gmra.mxu1 %vm7171_vm2, %v12227_v0 }
 0x49a   : > { %4137 = vst [vmem:[#allocation1 + $0x1] ss:$9 sm:$0xff] %v3584_v58  ;;  %v10442_v45 = vpop.xlane.xlu0 %2809  ;;  %v1812_v58 = vxor.u32 2147483647, %v1425_v31  ;;  %7236 = vmatmul.msk.bf16.gmra.mxu0 %vm7235_vm7, %v12227_v0  ;;  %7428 = vmatmul.msk.bf16.gmra.mxu2 %vm7235_vm7, %v12227_v0 }
 0x49b   : > { %4138 = vst [vmem:[#allocation1 + $0x2] ss:$9 sm:$0xff] %v3585_v16  ;;  %v10463_v16 = vpop.xlane.xlu2 %2901 }
 0x49c   : > { %4139 = vst [vmem:[#allocation1 + $0x3] ss:$9 sm:$0xff] %v3586_v42  ;;  %v1428_v42 = vsub.f32 %v8262_v37, %v12421_v41  ;;  %vm2903_vm15 = vcmp.eq.f32.partialorder %v10234_v54, %v10463_v16  ;;  %v10471_v1 = vsel %vm1684_vm10, %v1812_v58, %v1425_v31  ;;  %v5418_v60 = vpop.f32.mrf.mxu3  ;;  %v2828_v54 = vcvt.f32.s32 %v10244_v61 }
 0x49d   : > { %4140 = vst [vmem:[#allocation1 + $0x4] ss:$9 sm:$0xff] %v3587_v53  ;;  %v5884_v53 = vpop.f32.mrf.mxu1  ;;  %v2904_v13 = vsel %vm2903_vm15, %v2899_v24, inf  ;;  %v3592_v58 = vperm.slane %v10428_v44, 1  ;;  %v10480_v36 = vadd.f32 %v5587_v33, %v5418_v60  ;;  %v3010_v24 = vshra.s32 %v10414_v15, 16 }
 0x49e   : > { %4141 = vst [vmem:[#allocation1 + $0x5] ss:$9 sm:$0xff] %v3588_v12  ;;  %v6053_v12 = vpop.f32.mrf.mxu2  ;;  %2905 = vmin.xlane.f32.xlu0 %v2904_v13  ;;  %vm1687_vm12 = vcmp.lt.s32.totalorder %v1428_v42, 0  ;;  %v1815_v41 = vxor.u32 2147483647, %v1428_v42  ;;  %v2811_v13 = vcvt.f32.s32 %v10442_v45  ;;  %v2915_v33 = vcvt.s32.f32 %v2913_v30  ;;  %v12424_v45 = vld [vmem:[#allocation11_spill] sm:$0xff] }
 0x49f   : > { %4142 = vst [vmem:[#allocation1 + $0x6] ss:$9 sm:$0xff] %v3589_v10  ;;  %v1813_v10 = vxor.u32 2147483647, %v10458_v34  ;;  %v2829_v60 = vshll.u32 %v2828_v54, 16  ;;  %v6054_v40 = vadd.f32 %v6053_v12, %v5884_v53  ;;  %v10498_v14 = vcvt.s32.f32 %v3010_v24 }
 0x4a0   : > { %4143 = vst [vmem:[#allocation1 + $0x7] ss:$9 sm:$0xff] %v3590_v6  ;;  %v2812_v6 = vcvt.f32.s32 %v10206_v5  ;;  %v3593_v5 = vperm.slane %v10428_v44, 2  ;;  %v2068_v35 = vand.u32 4294967040, %v10471_v1  ;;  %v3597_v30 = vperm.slane %v10428_v44, 6 }
 0x4a1   : > { %6236 = vst [vmem:[%s9606_s29 + $0xd0] sm:$0xff] %v6172_v9  ;;  %v1814_v9 = vxor.u32 2147483647, %v1427_v62  ;;  %v10509_v1 = vsel %vm1687_vm12, %v1815_v41, %v1428_v42 }
 0x4a2   : > { %12422 = vst [vmem:[#allocation61_spill] sm:$0xff] %v10480_v36  ;;  %v2813_v28 = vshll.u32 %v2812_v6, 16  ;;  %v3596_v6 = vperm.slane %v10428_v44, 5 }
 0x4a3   : > { %v1942_v24 = vsel %vm1686_vm5, %v1814_v9, %v1427_v62 }
 0x4a4   : > { %v2826_v31 = vpop.xlane.xlu1 %2825  ;;  %v2814_v54 = vadd.s32 %v2813_v28, %v2811_v13  ;;  %v6173_v28 = vadd.f32 %v6054_v40, %v10480_v36  ;;  %v2196_v40 = vor.u32 %v2068_v35, %v8276_v59 }
 0x4a5   : > { %v2827_v52 = vcvt.f32.s32 %v2826_v31  ;;  %v10485_v25 = vpop.xlane.xlu0 %2917  ;;  %v1429_v31 = vsub.f32 %v8266_v46, %v12424_v45  ;;  %v5887_v13 = vpop.f32.mrf.mxu1 }
 0x4a6   : > { %vm2919_vm1 = vcmp.eq.f32.partialorder %v10255_v20, %v10485_v25  ;;  %v3598_v20 = vperm.slane %v10428_v44, 7  ;;  %3013 = vmin.xlane.f32.xlu0 %v10498_v14  ;;  %6237 = vst [vmem:[%s9606_s29 + $0xd8] sm:$0xff] %v6173_v28  ;;  %v12430_v28 = vld [vmem:[#allocation69_spill] sm:$0xff] }
 0x4a7   : > { %v10487_v61 = vld [vmem:[#allocation1] sm:$0xff]  ;;  %v5421_v53 = vpop.f32.mrf.mxu3  ;;  %vm1688_vm4 = vcmp.lt.s32.totalorder %v1429_v31, 0 }
 0x4a8   : > { %12423 = vst [vmem:[#allocation9_spill] sm:$0xff] %v10487_v61  ;;  %v2920_v61 = vsel %vm2919_vm1, %v2915_v33, inf  ;;  %v6056_v12 = vpop.f32.mrf.mxu2  ;;  %v2929_v33 = vand.u32 65535, %v10263_v18 }
 0x4a9   : > { %4145 = vst [vmem:[#allocation1] ss:$9 sm:$0xff] %v3591_v23  ;;  %v2830_v23 = vadd.s32 %v2829_v60, %v2827_v52  ;;  %2921 = vmin.xlane.f32.xlu1 %v2920_v61  ;;  %v6057_v52 = vadd.f32 %v6056_v12, %v5887_v13  ;;  %v2070_v60 = vand.u32 4294967040, %v1942_v24 }
 0x4aa   : > { %4146 = vst [vmem:[#allocation1 + $0x1] ss:$9 sm:$0xff] %v3592_v58  ;;  %v1941_v58 = vsel %vm1685_vm8, %v1813_v10, %v10458_v34  ;;  %v10514_v34 = vand.u32 255, %v2814_v54  ;;  %v12427_v10 = vld [vmem:[#allocation12_spill] sm:$0xff]  ;;  %v2931_v24 = vcvt.s32.f32 %v2929_v33  ;;  %v12431_v33 = vld [vmem:[#allocation15_spill] sm:$0xff] }
 0x4ab   : > { %4147 = vst [vmem:[#allocation1 + $0x2] ss:$9 sm:$0xff] %v3593_v5  ;;  %v5590_v5 = vpop.f32.mrf.mxu0  ;;  %v10516_v62 = vand.u32 255, %v2830_v23  ;;  %v1430_v9 = vsub.f32 %v8262_v37, %v12427_v10  ;;  %v2069_v61 = vand.u32 4294967040, %v1941_v58  ;;  %v7552_v58 = vld [vmem:[%s12429_s7 + $0x38] sm:$0xff]  ;;  %v2198_v10 = vor.u32 %v2070_v60, %v8276_v59 }
 0x4ac   : > { %4148 = vst [vmem:[#allocation1 + $0x3] ss:$9 sm:$0xff] %v3594_v56  ;;  %v1816_v56 = vxor.u32 2147483647, %v1429_v31  ;;  %v10512_v44 = vadd.f32 %v5590_v5, %v5421_v53  ;;  %vm4838_vm11 = vcmp.eq.s32.totalorder %v8272_v55, %v10514_v34  ;;  %v3599_v54 = vperm.slane %v10514_v34, 0  ;;  %6374 = vmatpush.bf16.msrb.mxu3 %v7552_v58 }
 0x4ad   : > { %4149 = vst [vmem:[#allocation1 + $0x4] ss:$9 sm:$0xff] %v3595_v50  ;;  %v12426_v50 = vand.u32 4294967040, %v10454_v39  ;;  %v10532_v39 = vpop.xlane.xlu1 %2841  ;;  %vm4840_vm13 = vcmp.eq.s32.totalorder %v8272_v55, %v10516_v62  ;;  %vm4841_vm6 = vcmp.eq.s32.totalorder %v8276_v59, %v10516_v62  ;;  %vm1689_vm14 = vcmp.lt.s32.totalorder %v1430_v9, 0  ;;  %v10546_v23 = vpop.xlane.xlu0 %2933 }
 0x4ae   : > { %4150 = vst [vmem:[#allocation1 + $0x5] ss:$9 sm:$0xff] %v3596_v6  ;;  %v6174_v41 = vadd.f32 %v6057_v52, %v10512_v44  ;;  %v10529_v6 = vsel %vm1688_vm4, %v1816_v56, %v1429_v31  ;;  %vm7173_vm2 = vmpackc.low %vm4840_vm13, %vm4838_vm11  ;;  %vm4839_vm3 = vcmp.eq.s32.totalorder %v8276_v59, %v10514_v34  ;;  %v3600_v12 = vperm.slane %v10514_v34, 1  ;;  %v5889_v60 = vpop.f32.mrf.mxu1 }
 0x4af   : > { %12425 = vst [vmem:[#allocation10_spill] sm:$0xff] %v10512_v44  ;;  %v2195_v42 = vor.u32 %v12426_v50, %v8272_v55  ;;  %7174 = vmatmul.msk.bf16.gmra.mxu3 %vm7173_vm2, %v12227_v0  ;;  %vm7237_vm7 = vmpackc.low %vm4841_vm6, %vm4839_vm3  ;;  %7366 = vmatmul.msk.bf16.gmra.mxu1 %vm7173_vm2, %v12227_v0  ;;  %v1432_v5 = vsub.f32 %v8262_v37, %v12430_v28  ;;  %v3601_v13 = vperm.slane %v10514_v34, 2  ;;  %v3602_v50 = vperm.slane %v10514_v34, 3 }
 0x4b0   : > { %4151 = vst [vmem:[#allocation1 + $0x6] ss:$9 sm:$0xff] %v3597_v30  ;;  %v12428_v30 = vld [vmem:[#allocation14_spill] sm:$0xff]  ;;  %7238 = vmatmul.msk.bf16.gmra.mxu0 %vm7237_vm7, %v12227_v0  ;;  %7430 = vmatmul.msk.bf16.gmra.mxu2 %vm7237_vm7, %v12227_v0  ;;  %vm2935_vm10 = vcmp.eq.f32.partialorder %v10276_v57, %v10546_v23  ;;  %v3603_v28 = vperm.slane %v10514_v34, 4  ;;  %v2945_v57 = vand.u32 65535, %v10284_v27  ;;  %v3604_v58 = vperm.slane %v10514_v34, 5 }
 0x4b1   : > { %4152 = vst [vmem:[#allocation1 + $0x7] ss:$9 sm:$0xff] %v3598_v20  ;;  %vm3023_vm9 = vcmp.lt.s32.totalorder %v2195_v42, %v2196_v40  ;;  %v1431_v31 = vsub.f32 %v8266_v46, %v12428_v30  ;;  %v1817_v20 = vxor.u32 2147483647, %v1430_v9  ;;  %v1433_v30 = vsub.f32 %v8266_v46, %v12431_v33 }
 0x4b2   : > { %6238 = vst [vmem:[%s9606_s29 + $0xe0] sm:$0xff] %v6174_v41  ;;  %v10534_v35 = vsel %vm3023_vm9, %v2195_v42, %v2196_v40  ;;  %v2936_v42 = vsel %vm2935_vm10, %v2931_v24, inf  ;;  %v2197_v40 = vor.u32 %v2069_v61, %v8272_v55  ;;  %vm1691_vm5 = vcmp.lt.s32.totalorder %v1432_v5, 0 }
 0x4b3   : > { %v3026_v18 = vshra.s32 %v10534_v35, 16  ;;  %v1818_v41 = vxor.u32 2147483647, %v1431_v31  ;;  %2937 = vmin.xlane.f32.xlu1 %v2936_v42  ;;  %vm1690_vm15 = vcmp.lt.s32.totalorder %v1431_v31, 0  ;;  %v5592_v61 = vpop.f32.mrf.mxu0  ;;  %v1819_v24 = vxor.u32 2147483647, %v1432_v5  ;;  %v6058_v42 = vpop.f32.mrf.mxu2 }
 0x4b4   : > { %vm3039_vm8 = vcmp.lt.s32.totalorder %v2197_v40, %v2198_v10  ;;  %v3605_v33 = vperm.slane %v10514_v34, 6  ;;  %v3606_v27 = vperm.slane %v10514_v34, 7  ;;  %vm1692_vm12 = vcmp.lt.s32.totalorder %v1433_v30, 0 }
 0x4b5   : > { %v10564_v56 = vcvt.s32.f32 %v3026_v18  ;;  %v1945_v18 = vsel %vm1689_vm14, %v1817_v20, %v1430_v9  ;;  %v10579_v53 = vsel %vm3039_vm8, %v2197_v40, %v2198_v10  ;;  %v6059_v20 = vadd.f32 %v6058_v42, %v5889_v60  ;;  %v10586_v36 = vpop.xlane.xlu1 %2949 }
 0x4b6   : > { %v1946_v45 = vsel %vm1690_vm15, %v1818_v41, %v1431_v31  ;;  %v1820_v2 = vxor.u32 2147483647, %v1433_v30  ;;  %vm2951_vm1 = vcmp.eq.f32.partialorder %v10294_v8, %v10586_v36  ;;  %v1947_v31 = vsel %vm1691_vm5, %v1819_v24, %v1432_v5 }
 0x4b7   : > { %3029 = vmin.xlane.f32.xlu0 %v10564_v56  ;;  %v12433_v41 = vand.u32 4294967040, %v10509_v1  ;;  %v2074_v60 = vand.u32 4294967040, %v1946_v45  ;;  %v2961_v5 = vand.u32 65535, %v10292_v47  ;;  %v2075_v24 = vand.u32 4294967040, %v1947_v31 }
 0x4b8   : > { %v10566_v52 = vld [vmem:[#allocation1] sm:$0xff]  ;;  %v1948_v8 = vsel %vm1692_vm12, %v1820_v2, %v1433_v30  ;;  %v2844_v1 = vcvt.f32.s32 %v10269_v29  ;;  %v3607_v42 = vperm.slane %v10516_v62, 0  ;;  %v3608_v45 = vperm.slane %v10516_v62, 1 }
 0x4b9   : > { %4154 = vst [vmem:[#allocation1] ss:$9 sm:$0xff] %v3599_v54  ;;  %v5423_v54 = vpop.f32.mrf.mxu3  ;;  %v2963_v2 = vcvt.s32.f32 %v2961_v5  ;;  %v2202_v47 = vor.u32 %v2074_v60, %v8276_v59  ;;  %v2843_v31 = vcvt.f32.s32 %v10532_v39  ;;  %v3613_v39 = vperm.slane %v10516_v62, 6 }
 0x4ba   : > { %4155 = vst [vmem:[#allocation1 + $0x1] ss:$9 sm:$0xff] %v3600_v12  ;;  %v10582_v9 = vadd.f32 %v5592_v61, %v5423_v54  ;;  %v3042_v12 = vshra.s32 %v10579_v53, 16  ;;  %v2073_v61 = vand.u32 4294967040, %v1945_v18  ;;  %v2076_v54 = vand.u32 4294967040, %v1948_v8 }
 0x4bb   : > { %4156 = vst [vmem:[#allocation1 + $0x2] ss:$9 sm:$0xff] %v3601_v13  ;;  %v2947_v13 = vcvt.s32.f32 %v2945_v57  ;;  %v12434_v57 = vand.u32 4294967040, %v10529_v6  ;;  %v3614_v60 = vperm.slane %v10516_v62, 7 }
 0x4bc   : > { %4157 = vst [vmem:[#allocation1 + $0x3] ss:$9 sm:$0xff] %v3602_v50  ;;  %v6175_v34 = vadd.f32 %v6059_v20, %v10582_v9  ;;  %v10593_v50 = vcvt.s32.f32 %v3042_v12  ;;  %v2201_v30 = vor.u32 %v2073_v61, %v8272_v55  ;;  %v3609_v20 = vperm.slane %v10516_v62, 2 }
 0x4bd   : > { %12432 = vst [vmem:[#allocation62_spill] sm:$0xff] %v10582_v9  ;;  %v2952_v10 = vsel %vm2951_vm1, %v2947_v13, inf  ;;  %v10612_v18 = vpop.xlane.xlu1 %2965  ;;  %v2203_v12 = vor.u32 %v2075_v24, %v8272_v55 }
 0x4be   : > { %4158 = vst [vmem:[#allocation1 + $0x4] ss:$9 sm:$0xff] %v3603_v28  ;;  %2953 = vmin.xlane.f32.xlu2 %v2952_v10  ;;  %v2199_v28 = vor.u32 %v12433_v41, %v8272_v55  ;;  %3045 = vmin.xlane.f32.xlu1 %v10593_v50  ;;  %vm2967_vm9 = vcmp.eq.f32.partialorder %v10302_v32, %v10612_v18  ;;  %v3611_v41 = vperm.slane %v10516_v62, 4 }
 0x4bf   : > { %4159 = vst [vmem:[#allocation1 + $0x5] ss:$9 sm:$0xff] %v3604_v58  ;;  %v2200_v58 = vor.u32 %v12434_v57, %v8276_v59  ;;  %v2968_v10 = vsel %vm2967_vm9, %v2963_v2, inf  ;;  %vm3071_vm11 = vcmp.lt.s32.totalorder %v2201_v30, %v2202_v47  ;;  %v2204_v32 = vor.u32 %v2076_v54, %v8276_v59 }
 0x4c0   : > { %4160 = vst [vmem:[#allocation1 + $0x6] ss:$9 sm:$0xff] %v3605_v33  ;;  %v2845_v57 = vshll.u32 %v2844_v1, 16 }
 0x4c1   : > { %4161 = vst [vmem:[#allocation1 + $0x7] ss:$9 sm:$0xff] %v3606_v27  ;;  %vm3055_vm4 = vcmp.lt.s32.totalorder %v2199_v28, %v2200_v58  ;;  %v7551_v27 = vld [vmem:[%s12429_s7 + $0x30] sm:$0xff]  ;;  %vm3087_vm13 = vcmp.lt.s32.totalorder %v2203_v12, %v2204_v32 }
 0x4c2   : > { %6239 = vst [vmem:[%s9606_s29 + $0xe8] sm:$0xff] %v6175_v34  ;;  %v10606_v33 = vsel %vm3055_vm4, %v2199_v28, %v2200_v58  ;;  %v3610_v34 = vperm.slane %v10516_v62, 3  ;;  %6375 = vmatpush.bf16.msrb.mxu3 %v7551_v27  ;;  %v10630_v28 = vsel %vm3071_vm11, %v2201_v30, %v2202_v47  ;;  %v3612_v58 = vperm.slane %v10516_v62, 5 }
 0x4c3   : > { %v3058_v6 = vshra.s32 %v10606_v33, 16  ;;  %v3074_v61 = vshra.s32 %v10630_v28, 16  ;;  %v2846_v8 = vadd.s32 %v2845_v57, %v2843_v31  ;;  %v10638_v5 = vsel %vm3087_vm13, %v2203_v12, %v2204_v32 }
 0x4c4   : > { %v3090_v1 = vshra.s32 %v10638_v5, 16 }
 0x4c5   : > { %v10622_v29 = vcvt.s32.f32 %v3058_v6  ;;  %v10640_v24 = vcvt.s32.f32 %v3074_v61  ;;  %v3285_v54 = vand.u32 255, %v2846_v8  ;;  %v12437_v61 = vld [vmem:[#allocation70_spill] sm:$0xff] }
 0x4c6   : > { %2969 = vmin.xlane.f32.xlu2 %v2968_v10 }
 0x4c7   : > { %3061 = vmin.xlane.f32.xlu1 %v10622_v29  ;;  %v3616_v6 = vperm.slane %v3285_v54, 1  ;;  %v3617_v62 = vperm.slane %v3285_v54, 2  ;;  %v3618_v30 = vperm.slane %v3285_v54, 3  ;;  %v3619_v47 = vperm.slane %v3285_v54, 4 }
 0x4c8   : > { %v10625_v13 = vld [vmem:[#allocation1] sm:$0xff]  ;;  %v3620_v27 = vperm.slane %v3285_v54, 5  ;;  %v3622_v12 = vperm.slane %v3285_v54, 7  ;;  %vm4842_vm6 = vcmp.eq.s32.totalorder %v8272_v55, %v3285_v54  ;;  %vm4843_vm15 = vcmp.eq.s32.totalorder %v8276_v59, %v3285_v54 }
 0x4c9   : > { %12435 = vst [vmem:[#allocation63_spill] sm:$0xff] %v10625_v13 }
 0x4ca   : > { %4163 = vst [vmem:[#allocation1] ss:$9 sm:$0xff] %v3607_v42  ;;  %v3615_v42 = vperm.slane %v3285_v54, 0 }
 0x4cb   : > { %4164 = vst [vmem:[#allocation1 + $0x1] ss:$9 sm:$0xff] %v3608_v45  ;;  %v10644_v45 = vcvt.s32.f32 %v3090_v1 }
 0x4cc   : > { %4165 = vst [vmem:[#allocation1 + $0x2] ss:$9 sm:$0xff] %v3609_v20  ;;  %v3621_v20 = vperm.slane %v3285_v54, 6 }
 0x4cd   : > { %4166 = vst [vmem:[#allocation1 + $0x3] ss:$9 sm:$0xff] %v3610_v34  ;;  %v2860_v34 = vcvt.f32.s32 %v10359_v51 }
 0x4ce   : > { %4167 = vst [vmem:[#allocation1 + $0x4] ss:$9 sm:$0xff] %v3611_v41  ;;  %3077 = vmin.xlane.f32.xlu2 %v10640_v24 }
 0x4cf   : > { %4168 = vst [vmem:[#allocation1 + $0x5] ss:$9 sm:$0xff] %v3612_v58  ;;  %v2861_v41 = vshll.u32 %v2860_v34, 16 }
 0x4d0   : > { %4169 = vst [vmem:[#allocation1 + $0x6] ss:$9 sm:$0xff] %v3613_v39  ;;  %v1434_v39 = vsub.f32 %v8262_v37, %v12437_v61 }
 0x4d1   : > { %4170 = vst [vmem:[#allocation1 + $0x7] ss:$9 sm:$0xff] %v3614_v60 }
 0x4d2   : > { %vm1693_vm3 = vcmp.lt.s32.totalorder %v1434_v39, 0 }
 0x4d6   : > { %3093 = vmin.xlane.f32.xlu2 %v10644_v45 }
 0x4d8   : > { %v10646_v2 = vld [vmem:[#allocation1] sm:$0xff] }
 0x4d9   : > { %12436 = vst [vmem:[#allocation65_spill] sm:$0xff] %v10646_v2 }
 0x4da   : > { %4172 = vst [vmem:[#allocation1] ss:$9 sm:$0xff] %v3615_v42  ;;  %v12439_v42 = vld [vmem:[#allocation17_spill] sm:$0xff] }
 0x4db   : > { %4173 = vst [vmem:[#allocation1 + $0x1] ss:$9 sm:$0xff] %v3616_v6  ;;  %v1435_v6 = vsub.f32 %v8266_v46, %v12439_v42 }
 0x4dc   : > { %4174 = vst [vmem:[#allocation1 + $0x2] ss:$9 sm:$0xff] %v3617_v62 }
 0x4dd   : > { %4175 = vst [vmem:[#allocation1 + $0x3] ss:$9 sm:$0xff] %v3618_v30  ;;  %v1822_v34 = vxor.u32 2147483647, %v1435_v6  ;;  %vm1694_vm7 = vcmp.lt.s32.totalorder %v1435_v6, 0 }
 0x4de   : > { %4176 = vst [vmem:[#allocation1 + $0x4] ss:$9 sm:$0xff] %v3619_v47  ;;  %v1821_v47 = vxor.u32 2147483647, %v1434_v39 }
 0x4df   : > { %4177 = vst [vmem:[#allocation1 + $0x5] ss:$9 sm:$0xff] %v3620_v27 }
 0x4e0   : > { %4178 = vst [vmem:[#allocation1 + $0x6] ss:$9 sm:$0xff] %v3621_v20 }
 0x4e1   : > { %4179 = vst [vmem:[#allocation1 + $0x7] ss:$9 sm:$0xff] %v3622_v12 }
 0x4e3   : > { %v5892_v57 = vpop.f32.mrf.mxu1 }
 0x4e4   : > { %v5595_v31 = vpop.f32.mrf.mxu0 }
 0x4e9   : > { %v2858_v10 = vpop.xlane.xlu2 %2857  ;;  %v5426_v58 = vpop.f32.mrf.mxu3 }
 0x4ea   : > { %v2859_v32 = vcvt.f32.s32 %v2858_v10  ;;  %v10652_v8 = vadd.f32 %v5595_v31, %v5426_v58  ;;  %v6061_v1 = vpop.f32.mrf.mxu2  ;;  %v10657_v10 = vld [vmem:[#allocation1] sm:$0xff] }
 0x4eb   : > { %v6062_v62 = vadd.f32 %v6061_v1, %v5892_v57  ;;  %12440 = vst [vmem:[#allocation33_spill] sm:$0xff] %v10657_v10  ;;  %v5894_v61 = vpop.f32.mrf.mxu1 }
 0x4ec   : > { %v2862_v60 = vadd.s32 %v2861_v41, %v2859_v32  ;;  %12438 = vst [vmem:[#allocation66_spill] sm:$0xff] %v10652_v8  ;;  %v5597_v32 = vpop.f32.mrf.mxu0 }
 0x4ed   : > { %v6176_v51 = vadd.f32 %v6062_v62, %v10652_v8  ;;  %v1949_v62 = vsel %vm1693_vm3, %v1821_v47, %v1434_v39 }
 0x4ee   : > { %v3286_v30 = vand.u32 255, %v2862_v60 }
 0x4ef   : > { %6240 = vst [vmem:[%s9606_s29 + $0xf0] sm:$0xff] %v6176_v51  ;;  %v1950_v51 = vsel %vm1694_vm7, %v1822_v34, %v1435_v6  ;;  %v12442_v34 = vld [vmem:[#allocation18_spill] sm:$0xff] }
 0x4f0   : > { %v3623_v27 = vperm.slane %v3286_v30, 0  ;;  %v3624_v20 = vperm.slane %v3286_v30, 1  ;;  %v3625_v12 = vperm.slane %v3286_v30, 2  ;;  %v3626_v40 = vperm.slane %v3286_v30, 3 }
 0x4f1   : > { %v3627_v41 = vperm.slane %v3286_v30, 4  ;;  %vm4844_vm14 = vcmp.eq.s32.totalorder %v8272_v55, %v3286_v30  ;;  %vm4845_vm2 = vcmp.eq.s32.totalorder %v8276_v59, %v3286_v30  ;;  %v3628_v31 = vperm.slane %v3286_v30, 5  ;;  %v5428_v57 = vpop.f32.mrf.mxu3 }
 0x4f2   : > { %4181 = vst [vmem:[#allocation1] ss:$9 sm:$0xff] %v3623_v27  ;;  %vm7175_vm10 = vmpackc.low %vm4844_vm14, %vm4842_vm6  ;;  %v3629_v58 = vperm.slane %v3286_v30, 6  ;;  %v10666_v60 = vadd.f32 %v5597_v32, %v5428_v57  ;;  %v6063_v1 = vpop.f32.mrf.mxu2  ;;  %v3630_v42 = vperm.slane %v3286_v30, 7 }
 0x4f3   : > { %4182 = vst [vmem:[#allocation1 + $0x1] ss:$9 sm:$0xff] %v3624_v20  ;;  %7176 = vmatmul.msk.bf16.gmra.mxu3 %vm7175_vm10, %v12227_v0  ;;  %vm7239_vm8 = vmpackc.low %vm4845_vm2, %vm4843_vm15  ;;  %7368 = vmatmul.msk.bf16.gmra.mxu1 %vm7175_vm10, %v12227_v0  ;;  %v6064_v54 = vadd.f32 %v6063_v1, %v5894_v61  ;;  %v2876_v20 = vcvt.f32.s32 %v10382_v22  ;;  %v12443_v22 = vld [vmem:[#allocation20_spill] sm:$0xff] }
 0x4f4   : > { %4183 = vst [vmem:[#allocation1 + $0x2] ss:$9 sm:$0xff] %v3625_v12  ;;  %7240 = vmatmul.msk.bf16.gmra.mxu0 %vm7239_vm8, %v12227_v0  ;;  %7432 = vmatmul.msk.bf16.gmra.mxu2 %vm7239_vm8, %v12227_v0  ;;  %v2078_v12 = vand.u32 4294967040, %v1950_v51 }
 0x4f5   : > { %12441 = vst [vmem:[#allocation68_spill] sm:$0xff] %v10666_v60  ;;  %v6177_v30 = vadd.f32 %v6064_v54, %v10666_v60  ;;  %v2877_v57 = vshll.u32 %v2876_v20, 16 }
 0x4f6   : > { %4184 = vst [vmem:[#allocation1 + $0x3] ss:$9 sm:$0xff] %v3626_v40  ;;  %v2077_v40 = vand.u32 4294967040, %v1949_v62  ;;  %v2206_v47 = vor.u32 %v2078_v12, %v8276_v59  ;;  %v2892_v62 = vcvt.f32.s32 %v10421_v11 }
 0x4f7   : > { %4185 = vst [vmem:[#allocation1 + $0x4] ss:$9 sm:$0xff] %v3627_v41  ;;  %v2874_v32 = vpop.xlane.xlu2 %2873  ;;  %v1436_v41 = vsub.f32 %v8262_v37, %v12442_v34 }
 0x4f8   : > { %4186 = vst [vmem:[#allocation1 + $0x5] ss:$9 sm:$0xff] %v3628_v31  ;;  %v2875_v61 = vcvt.f32.s32 %v2874_v32  ;;  %v2205_v6 = vor.u32 %v2077_v40, %v8272_v55  ;;  %v1437_v31 = vsub.f32 %v8266_v46, %v12443_v22 }
 0x4f9   : > { %4187 = vst [vmem:[#allocation1 + $0x6] ss:$9 sm:$0xff] %v3629_v58  ;;  %v2977_v58 = vand.u32 65535, %v10367_v17  ;;  %v1823_v40 = vxor.u32 2147483647, %v1436_v41  ;;  %vm1695_vm12 = vcmp.lt.s32.totalorder %v1436_v41, 0 }
 0x4fa   : > { %4188 = vst [vmem:[#allocation1 + $0x7] ss:$9 sm:$0xff] %v3630_v42  ;;  %v2878_v39 = vadd.s32 %v2877_v57, %v2875_v61  ;;  %vm3103_vm5 = vcmp.lt.s32.totalorder %v2205_v6, %v2206_v47  ;;  %v1824_v12 = vxor.u32 2147483647, %v1437_v31  ;;  %vm1696_vm1 = vcmp.lt.s32.totalorder %v1437_v31, 0 }
 0x4fb   : > { %6241 = vst [vmem:[%s9606_s29 + $0xf8] sm:$0xff] %v6177_v30  ;;  %v10688_v54 = vsel %vm3103_vm5, %v2205_v6, %v2206_v47  ;;  %v2979_v57 = vcvt.s32.f32 %v2977_v58  ;;  %v2893_v47 = vshll.u32 %v2892_v62, 16  ;;  %v1951_v58 = vsel %vm1695_vm12, %v1823_v40, %v1436_v41  ;;  %v12446_v40 = vld [vmem:[#allocation72_spill] sm:$0xff] }
 0x4fc   : > { %v10684_v1 = vand.u32 255, %v2878_v39  ;;  %v1952_v8 = vsel %vm1696_vm1, %v1824_v12, %v1437_v31  ;;  %v2993_v31 = vand.u32 65535, %v10406_v43  ;;  %v1438_v12 = vsub.f32 %v8262_v37, %v12446_v40 }
 0x4fd   : > { %v2080_v9 = vand.u32 4294967040, %v1952_v8 }
 0x4fe   : > { %v3631_v51 = vperm.slane %v10684_v1, 0  ;;  %v3632_v20 = vperm.slane %v10684_v1, 1  ;;  %v3633_v30 = vperm.slane %v10684_v1, 2  ;;  %v3634_v32 = vperm.slane %v10684_v1, 3 }
 0x4ff   : > { %v10695_v17 = vpop.xlane.xlu2 %2981  ;;  %v3635_v61 = vperm.slane %v10684_v1, 4  ;;  %v3636_v11 = vperm.slane %v10684_v1, 5  ;;  %v3637_v34 = vperm.slane %v10684_v1, 6  ;;  %v3638_v60 = vperm.slane %v10684_v1, 7 }
 0x500   : > { %vm2983_vm4 = vcmp.eq.f32.partialorder %v10419_v63, %v10695_v17  ;;  %v5600_v22 = vpop.f32.mrf.mxu0  ;;  %v5897_v63 = vpop.f32.mrf.mxu1  ;;  %vm4846_vm9 = vcmp.eq.s32.totalorder %v8272_v55, %v10684_v1  ;;  %v2995_v43 = vcvt.s32.f32 %v2993_v31  ;;  %vm4847_vm2 = vcmp.eq.s32.totalorder %v8276_v59, %v10684_v1 }
 0x501   : > { %v10686_v42 = vld [vmem:[#allocation1] sm:$0xff]  ;;  %v2984_v6 = vsel %vm2983_vm4, %v2979_v57, inf  ;;  %vm1697_vm10 = vcmp.lt.s32.totalorder %v1438_v12, 0  ;;  %v1825_v40 = vxor.u32 2147483647, %v1438_v12 }
 0x502   : > { %12444 = vst [vmem:[#allocation11_spill] sm:$0xff] %v10686_v42  ;;  %2985 = vmin.xlane.f32.xlu0 %v2984_v6 }
 0x503   : > { %4190 = vst [vmem:[#allocation1] ss:$9 sm:$0xff] %v3631_v51 }
 0x504   : > { %4191 = vst [vmem:[#allocation1 + $0x1] ss:$9 sm:$0xff] %v3632_v20  ;;  %v2079_v20 = vand.u32 4294967040, %v1951_v58 }
 0x505   : > { %4192 = vst [vmem:[#allocation1 + $0x2] ss:$9 sm:$0xff] %v3633_v30  ;;  %v5431_v44 = vpop.f32.mrf.mxu3 }
 0x506   : > { %v2890_v39 = vpop.xlane.xlu0 %2889  ;;  %4193 = vst [vmem:[#allocation1 + $0x3] ss:$9 sm:$0xff] %v3634_v32  ;;  %v10703_v62 = vadd.f32 %v5600_v22, %v5431_v44  ;;  %v6066_v30 = vpop.f32.mrf.mxu2  ;;  %v2207_v8 = vor.u32 %v2079_v20, %v8272_v55  ;;  %v2208_v44 = vor.u32 %v2080_v9, %v8276_v59 }
 0x507   : > { %v2891_v27 = vcvt.f32.s32 %v2890_v39  ;;  %4194 = vst [vmem:[#allocation1 + $0x4] ss:$9 sm:$0xff] %v3635_v61  ;;  %v6067_v41 = vadd.f32 %v6066_v30, %v5897_v63 }
 0x508   : > { %4195 = vst [vmem:[#allocation1 + $0x5] ss:$9 sm:$0xff] %v3636_v11  ;;  %v2908_v11 = vcvt.f32.s32 %v10463_v16  ;;  %v5602_v6 = vpop.f32.mrf.mxu0  ;;  %vm3119_vm6 = vcmp.lt.s32.totalorder %v2207_v8, %v2208_v44  ;;  %v5899_v20 = vpop.f32.mrf.mxu1 }
 0x509   : > { %v2894_v51 = vadd.s32 %v2893_v47, %v2891_v27  ;;  %4196 = vst [vmem:[#allocation1 + $0x6] ss:$9 sm:$0xff] %v3637_v34  ;;  %v12447_v27 = vld [vmem:[#allocation73_spill] sm:$0xff]  ;;  %v6178_v61 = vadd.f32 %v6067_v41, %v10703_v62  ;;  %v10721_v47 = vpop.xlane.xlu2 %2997  ;;  %v10732_v22 = vsel %vm3119_vm6, %v2207_v8, %v2208_v44 }
 0x50a   : > { %12445 = vst [vmem:[#allocation12_spill] sm:$0xff] %v10703_v62  ;;  %v1439_v32 = vsub.f32 %v8266_v46, %v12447_v27  ;;  %vm2999_vm3 = vcmp.eq.f32.partialorder %v10449_v48, %v10721_v47  ;;  %v2909_v27 = vshll.u32 %v2908_v11, 16  ;;  %v3106_v11 = vshra.s32 %v10688_v54, 16 }
 0x50b   : > { %4197 = vst [vmem:[#allocation1 + $0x7] ss:$9 sm:$0xff] %v3638_v60  ;;  %v10705_v57 = vand.u32 255, %v2894_v51  ;;  %v3000_v30 = vsel %vm2999_vm3, %v2995_v43, inf  ;;  %v2956_v62 = vcvt.f32.s32 %v10586_v36 }
 0x50c   : > { %6242 = vst [vmem:[%s9606_s29 + $0x100] sm:$0xff] %v6178_v61  ;;  %3001 = vmin.xlane.f32.xlu0 %v3000_v30  ;;  %vm1698_vm15 = vcmp.lt.s32.totalorder %v1439_v32, 0  ;;  %v1826_v44 = vxor.u32 2147483647, %v1439_v32  ;;  %v1953_v30 = vsel %vm1697_vm10, %v1825_v40, %v1438_v12 }
 0x50d   : > { %v3639_v60 = vperm.slane %v10705_v57, 0  ;;  %v3640_v39 = vperm.slane %v10705_v57, 1  ;;  %vm4848_vm11 = vcmp.eq.s32.totalorder %v8272_v55, %v10705_v57  ;;  %vm4849_vm13 = vcmp.eq.s32.totalorder %v8276_v59, %v10705_v57  ;;  %v5433_v34 = vpop.f32.mrf.mxu3 }
 0x50e   : > { %v3641_v16 = vperm.slane %v10705_v57, 2  ;;  %vm7177_vm14 = vmpackc.low %vm4848_vm11, %vm4846_vm9  ;;  %v3642_v51 = vperm.slane %v10705_v57, 3  ;;  %v10739_v41 = vadd.f32 %v5602_v6, %v5433_v34  ;;  %v6068_v1 = vpop.f32.mrf.mxu2  ;;  %v3643_v48 = vperm.slane %v10705_v57, 4 }
 0x50f   : > { %7178 = vmatmul.msk.bf16.gmra.mxu3 %vm7177_vm14, %v12227_v0  ;;  %vm7241_vm7 = vmpackc.low %vm4849_vm13, %vm4847_vm2  ;;  %7370 = vmatmul.msk.bf16.gmra.mxu1 %vm7177_vm14, %v12227_v0  ;;  %v6069_v31 = vadd.f32 %v6068_v1, %v5899_v20  ;;  %v3644_v61 = vperm.slane %v10705_v57, 5  ;;  %v3645_v43 = vperm.slane %v10705_v57, 6  ;;  %v3646_v6 = vperm.slane %v10705_v57, 7 }
 0x510   : > { %12449 = vst [vmem:[#allocation69_spill] sm:$0xff] %v10739_v41  ;;  %7242 = vmatmul.msk.bf16.gmra.mxu0 %vm7241_vm7, %v12227_v0  ;;  %7434 = vmatmul.msk.bf16.gmra.mxu2 %vm7241_vm7, %v12227_v0  ;;  %v3009_v20 = vand.u32 65535, %v10414_v15  ;;  %v1954_v1 = vsel %vm1698_vm15, %v1826_v44, %v1439_v32  ;;  %v3122_v44 = vshra.s32 %v10732_v22, 16 }
 0x511   : > { %v2906_v9 = vpop.xlane.xlu0 %2905 }
 0x512   : > { %v10734_v58 = vld [vmem:[#allocation1] sm:$0xff]  ;;  %v2907_v63 = vcvt.f32.s32 %v2906_v9 }
 0x513   : > { %12448 = vst [vmem:[#allocation14_spill] sm:$0xff] %v10734_v58 }
 0x514   : > { %4199 = vst [vmem:[#allocation1] ss:$9 sm:$0xff] %v3639_v60  ;;  %v2924_v60 = vcvt.f32.s32 %v10485_v25  ;;  %v2910_v9 = vadd.s32 %v2909_v27, %v2907_v63  ;;  %v2081_v63 = vand.u32 4294967040, %v1953_v30 }
 0x515   : > { %4200 = vst [vmem:[#allocation1 + $0x1] ss:$9 sm:$0xff] %v3640_v39  ;;  %v6179_v39 = vadd.f32 %v6069_v31, %v10739_v41 }
 0x516   : > { %4201 = vst [vmem:[#allocation1 + $0x2] ss:$9 sm:$0xff] %v3641_v16  ;;  %v2925_v16 = vshll.u32 %v2924_v60, 16  ;;  %v10754_v25 = vand.u32 255, %v2910_v9  ;;  %v5902_v32 = vpop.f32.mrf.mxu1 }
 0x517   : > { %4202 = vst [vmem:[#allocation1 + $0x3] ss:$9 sm:$0xff] %v3642_v51  ;;  %v10756_v51 = vcvt.s32.f32 %v3106_v11  ;;  %v5605_v12 = vpop.f32.mrf.mxu0  ;;  %v12450_v11 = vld [vmem:[#allocation74_spill] sm:$0xff] }
 0x518   : > { %4203 = vst [vmem:[#allocation1 + $0x4] ss:$9 sm:$0xff] %v3643_v48  ;;  %v2082_v48 = vand.u32 4294967040, %v1954_v1  ;;  %v3647_v15 = vperm.slane %v10754_v25, 0  ;;  %v3650_v1 = vperm.slane %v10754_v25, 3  ;;  %vm4850_vm5 = vcmp.eq.s32.totalorder %v8272_v55, %v10754_v25 }
 0x519   : > { %4204 = vst [vmem:[#allocation1 + $0x5] ss:$9 sm:$0xff] %v3644_v61  ;;  %v10759_v31 = vpop.xlane.xlu0 %3013  ;;  %v3011_v61 = vcvt.s32.f32 %v3009_v20  ;;  %3109 = vmin.xlane.f32.xlu0 %v10756_v51  ;;  %vm4851_vm9 = vcmp.eq.s32.totalorder %v8276_v59, %v10754_v25 }
 0x51a   : > { %4205 = vst [vmem:[#allocation1 + $0x6] ss:$9 sm:$0xff] %v3645_v43  ;;  %vm3015_vm8 = vcmp.eq.f32.partialorder %v10498_v14, %v10759_v31  ;;  %v3648_v43 = vperm.slane %v10754_v25, 1  ;;  %v2209_v14 = vor.u32 %v2081_v63, %v8272_v55  ;;  %v2210_v20 = vor.u32 %v2082_v48, %v8276_v59 }
 0x51b   : > { %4206 = vst [vmem:[#allocation1 + $0x7] ss:$9 sm:$0xff] %v3646_v6  ;;  %v3016_v40 = vsel %vm3015_vm8, %v3011_v61, inf  ;;  %v3653_v63 = vperm.slane %v10754_v25, 6  ;;  %v3654_v48 = vperm.slane %v10754_v25, 7 }
 0x51c   : > { %v2922_v34 = vpop.xlane.xlu1 %2921  ;;  %6243 = vst [vmem:[%s9606_s29 + $0x108] sm:$0xff] %v6179_v39  ;;  %3017 = vmin.xlane.f32.xlu1 %v3016_v40  ;;  %v5436_v6 = vpop.f32.mrf.mxu3  ;;  %v1440_v39 = vsub.f32 %v8262_v37, %v12450_v11  ;;  %v10781_v40 = vcvt.s32.f32 %v3122_v44  ;;  %v3652_v11 = vperm.slane %v10754_v25, 5  ;;  %vm3135_vm11 = vcmp.lt.s32.totalorder %v2209_v14, %v2210_v20 }
 0x51d   : > { %v2923_v57 = vcvt.f32.s32 %v2922_v34  ;;  %v6071_v9 = vpop.f32.mrf.mxu2  ;;  %v3649_v34 = vperm.slane %v10754_v25, 2 }
 0x51e   : > { %v6072_v61 = vadd.f32 %v6071_v9, %v5902_v32  ;;  %vm1699_vm13 = vcmp.lt.s32.totalorder %v1440_v39, 0  ;;  %v10809_v9 = vsel %vm3135_vm11, %v2209_v14, %v2210_v20 }
 0x51f   : > { %v2926_v27 = vadd.s32 %v2925_v16, %v2923_v57  ;;  %v3025_v16 = vand.u32 65535, %v10534_v35  ;;  %v3651_v57 = vperm.slane %v10754_v25, 4  ;;  %v1827_v35 = vxor.u32 2147483647, %v1440_v39  ;;  %v12453_v25 = vld [vmem:[#allocation77_spill] sm:$0xff] }
 0x521   : > { %v10767_v60 = vand.u32 255, %v2926_v27  ;;  %v10779_v27 = vadd.f32 %v5605_v12, %v5436_v6  ;;  %3125 = vmin.xlane.f32.xlu0 %v10781_v40  ;;  %v3027_v32 = vcvt.s32.f32 %v3025_v16 }
 0x522   : > { %v10774_v30 = vld [vmem:[#allocation1] sm:$0xff] }
 0x523   : > { %12451 = vst [vmem:[#allocation15_spill] sm:$0xff] %v10774_v30  ;;  %vm4852_vm12 = vcmp.eq.s32.totalorder %v8272_v55, %v10767_v60  ;;  %vm4853_vm1 = vcmp.eq.s32.totalorder %v8276_v59, %v10767_v60  ;;  %v6180_v44 = vadd.f32 %v6072_v61, %v10779_v27  ;;  %v3655_v41 = vperm.slane %v10767_v60, 0 }
 0x524   : > { %4208 = vst [vmem:[#allocation1] ss:$9 sm:$0xff] %v3647_v15  ;;  %vm7179_vm4 = vmpackc.low %vm4852_vm12, %vm4850_vm5  ;;  %v5438_v14 = vpop.f32.mrf.mxu3  ;;  %v3657_v36 = vperm.slane %v10767_v60, 2  ;;  %v3658_v30 = vperm.slane %v10767_v60, 3 }
 0x525   : > { %12452 = vst [vmem:[#allocation70_spill] sm:$0xff] %v10779_v27  ;;  %7180 = vmatmul.msk.bf16.gmra.mxu3 %vm7179_vm4, %v12227_v0  ;;  %vm7243_vm6 = vmpackc.low %vm4853_vm1, %vm4851_vm9  ;;  %7372 = vmatmul.msk.bf16.gmra.mxu1 %vm7179_vm4, %v12227_v0  ;;  %v6073_v20 = vpop.f32.mrf.mxu2 }
 0x526   : > { %4209 = vst [vmem:[#allocation1 + $0x1] ss:$9 sm:$0xff] %v3648_v43  ;;  %v10795_v15 = vpop.xlane.xlu1 %2937  ;;  %7244 = vmatmul.msk.bf16.gmra.mxu0 %vm7243_vm6, %v12227_v0  ;;  %7436 = vmatmul.msk.bf16.gmra.mxu2 %vm7243_vm6, %v12227_v0  ;;  %v1441_v43 = vsub.f32 %v8266_v46, %v12453_v25 }
 0x527   : > { %4210 = vst [vmem:[#allocation1 + $0x2] ss:$9 sm:$0xff] %v3649_v34  ;;  %v10812_v34 = vsel %vm1699_vm13, %v1827_v35, %v1440_v39  ;;  %v3138_v39 = vshra.s32 %v10809_v9, 16  ;;  %v2939_v58 = vcvt.f32.s32 %v10795_v15  ;;  %v2957_v15 = vshll.u32 %v2956_v62, 16 }
 0x528   : > { %4211 = vst [vmem:[#allocation1 + $0x3] ss:$9 sm:$0xff] %v3650_v1  ;;  %v12454_v1 = vld [vmem:[#allocation78_spill] sm:$0xff]  ;;  %vm1700_vm2 = vcmp.lt.s32.totalorder %v1441_v43, 0 }
 0x529   : > { %4212 = vst [vmem:[#allocation1 + $0x4] ss:$9 sm:$0xff] %v3651_v57  ;;  %v10816_v16 = vsub.f32 %v8262_v37, %v12454_v1  ;;  %v12455_v57 = vld [vmem:[#allocation80_spill] sm:$0xff] }
 0x52a   : > { %v10797_v12 = vpop.xlane.xlu0 %3029  ;;  %4213 = vst [vmem:[#allocation1 + $0x5] ss:$9 sm:$0xff] %v3652_v11  ;;  %v10820_v61 = vsub.f32 %v8266_v46, %v12455_v57  ;;  %v5904_v11 = vpop.f32.mrf.mxu1  ;;  %v1828_v57 = vxor.u32 2147483647, %v1441_v43 }
 0x52b   : > { %vm3031_vm14 = vcmp.eq.f32.partialorder %v10564_v56, %v10797_v12  ;;  %4214 = vst [vmem:[#allocation1 + $0x6] ss:$9 sm:$0xff] %v3653_v63  ;;  %v5607_v56 = vpop.f32.mrf.mxu0  ;;  %v6074_v1 = vadd.f32 %v6073_v20, %v5904_v11  ;;  %v1829_v63 = vxor.u32 2147483647, %v10816_v16  ;;  %v3656_v11 = vperm.slane %v10767_v60, 1 }
 0x52c   : > { %v3032_v6 = vsel %vm3031_vm14, %v3027_v32, inf  ;;  %4215 = vst [vmem:[#allocation1 + $0x7] ss:$9 sm:$0xff] %v3654_v48  ;;  %v3041_v32 = vand.u32 65535, %v10579_v53  ;;  %v10826_v25 = vadd.f32 %v5607_v56, %v5438_v14  ;;  %v1830_v48 = vxor.u32 2147483647, %v10820_v61 }
 0x52d   : > { %3033 = vmin.xlane.f32.xlu1 %v3032_v6  ;;  %6244 = vst [vmem:[%s9606_s29 + $0x110] sm:$0xff] %v6180_v44  ;;  %v12457_v6 = vld [vmem:[#allocation81_spill] sm:$0xff]  ;;  %v2940_v44 = vcvt.f32.s32 %v10546_v23  ;;  %v7550_v14 = vld [vmem:[%s12429_s7 + $0x28] sm:$0xff]  ;;  %v10844_v23 = vcvt.s32.f32 %v3138_v39  ;;  %vm1701_vm7 = vcmp.lt.s32.totalorder %v10816_v16, 0  ;;  %vm1702_vm10 = vcmp.lt.s32.totalorder %v10820_v61, 0 }
 0x52e   : > { %12456 = vst [vmem:[#allocation17_spill] sm:$0xff] %v10826_v25  ;;  %v1444_v8 = vsub.f32 %v8262_v37, %v12457_v6  ;;  %v3043_v56 = vcvt.s32.f32 %v3041_v32  ;;  %v6181_v6 = vadd.f32 %v6074_v1, %v10826_v25  ;;  %v1956_v32 = vsel %vm1700_vm2, %v1828_v57, %v1441_v43  ;;  %6376 = vmatpush.bf16.msrb.mxu3 %v7550_v14 }
 0x52f   : > { %v2941_v39 = vshll.u32 %v2940_v44, 16  ;;  %v3660_v57 = vperm.slane %v10767_v60, 5  ;;  %v3661_v14 = vperm.slane %v10767_v60, 6 }
 0x530   : > { %v1831_v42 = vxor.u32 2147483647, %v1444_v8  ;;  %6245 = vst [vmem:[%s9606_s29 + $0x118] sm:$0xff] %v6181_v6  ;;  %vm1703_vm15 = vcmp.lt.s32.totalorder %v1444_v8, 0 }
 0x531   : > { %v2954_v53 = vpop.xlane.xlu2 %2953  ;;  %v10835_v35 = vpop.xlane.xlu1 %3045  ;;  %v2942_v6 = vadd.s32 %v2941_v39, %v2939_v58 }
 0x532   : > { %v2955_v2 = vcvt.f32.s32 %v2954_v53  ;;  %vm3047_vm3 = vcmp.eq.f32.partialorder %v10593_v50, %v10835_v35  ;;  %v3659_v53 = vperm.slane %v10767_v60, 4  ;;  %v12459_v50 = vld [vmem:[#allocation82_spill] sm:$0xff]  ;;  %v5441_v62 = vpop.f32.mrf.mxu3  ;;  %v10868_v27 = vsel %vm1703_vm15, %v1831_v42, %v1444_v8 }
 0x533   : > { %v10851_v13 = vld [vmem:[#allocation1] sm:$0xff]  ;;  %v3048_v1 = vsel %vm3047_vm3, %v3043_v56, inf  ;;  %v1445_v43 = vsub.f32 %v8266_v46, %v12459_v50  ;;  %v2084_v56 = vand.u32 4294967040, %v1956_v32  ;;  %v6076_v20 = vpop.f32.mrf.mxu2  ;;  %v1958_v50 = vsel %vm1702_vm10, %v1830_v48, %v10820_v61  ;;  %v5907_v32 = vpop.f32.mrf.mxu1  ;;  %v12461_v61 = vld [vmem:[#allocation83_spill] sm:$0xff] }
 0x534   : > { %12458 = vst [vmem:[#allocation18_spill] sm:$0xff] %v10851_v13  ;;  %3049 = vmin.xlane.f32.xlu2 %v3048_v1  ;;  %v2958_v44 = vadd.s32 %v2957_v15, %v2955_v2  ;;  %v1957_v1 = vsel %vm1701_vm7, %v1829_v63, %v10816_v16  ;;  %v6077_v58 = vadd.f32 %v6076_v20, %v5907_v32  ;;  %v12460_v16 = vand.u32 4294967040, %v10812_v34 }
 0x535   : > { %3141 = vmin.xlane.f32.xlu1 %v10844_v23  ;;  %4217 = vst [vmem:[#allocation1] ss:$9 sm:$0xff] %v3655_v41  ;;  %v3662_v41 = vperm.slane %v10767_v60, 7  ;;  %vm1704_vm8 = vcmp.lt.s32.totalorder %v1445_v43, 0  ;;  %v10872_v60 = vand.u32 255, %v2942_v6  ;;  %v2212_v8 = vor.u32 %v2084_v56, %v8276_v59 }
 0x536   : > { %4218 = vst [vmem:[#allocation1 + $0x1] ss:$9 sm:$0xff] %v3656_v11  ;;  %v5610_v11 = vpop.f32.mrf.mxu0  ;;  %v2211_v42 = vor.u32 %v12460_v16, %v8272_v55  ;;  %v1446_v63 = vsub.f32 %v8262_v37, %v12461_v61  ;;  %v2085_v39 = vand.u32 4294967040, %v1957_v1  ;;  %v3057_v20 = vand.u32 65535, %v10606_v33 }
 0x537   : > { %4219 = vst [vmem:[#allocation1 + $0x2] ss:$9 sm:$0xff] %v3657_v36  ;;  %v1832_v36 = vxor.u32 2147483647, %v1445_v43  ;;  %v10870_v2 = vadd.f32 %v5610_v11, %v5441_v62  ;;  %v2086_v15 = vand.u32 4294967040, %v1958_v50  ;;  %vm4854_vm12 = vcmp.eq.s32.totalorder %v8272_v55, %v10872_v60  ;;  %v12463_v11 = vld [vmem:[#allocation85_spill] sm:$0xff] }
 0x538   : > { %4220 = vst [vmem:[#allocation1 + $0x3] ss:$9 sm:$0xff] %v3658_v30  ;;  %v10874_v30 = vand.u32 255, %v2958_v44  ;;  %vm3151_vm5 = vcmp.lt.s32.totalorder %v2211_v42, %v2212_v8  ;;  %vm1705_vm9 = vcmp.lt.s32.totalorder %v1446_v63, 0  ;;  %v3663_v6 = vperm.slane %v10872_v60, 0 }
 0x539   : > { %4221 = vst [vmem:[#allocation1 + $0x4] ss:$9 sm:$0xff] %v3659_v53  ;;  %v6182_v48 = vadd.f32 %v6077_v58, %v10870_v2  ;;  %v10889_v34 = vpop.xlane.xlu2 %2969  ;;  %v10891_v56 = vsel %vm3151_vm5, %v2211_v42, %v2212_v8  ;;  %vm4855_vm13 = vcmp.eq.s32.totalorder %v8276_v59, %v10872_v60  ;;  %v3664_v1 = vperm.slane %v10872_v60, 1 }
 0x53a   : > { %4222 = vst [vmem:[#allocation1 + $0x5] ss:$9 sm:$0xff] %v3660_v57  ;;  %v10886_v57 = vsel %vm1704_vm8, %v1832_v36, %v1445_v43  ;;  %vm4856_vm1 = vcmp.eq.s32.totalorder %v8272_v55, %v10874_v30  ;;  %vm4857_vm4 = vcmp.eq.s32.totalorder %v8276_v59, %v10874_v30  ;;  %v3154_v33 = vshra.s32 %v10891_v56, 16  ;;  %v10903_v44 = vpop.xlane.xlu1 %3061 }
 0x53b   : > { %4223 = vst [vmem:[#allocation1 + $0x6] ss:$9 sm:$0xff] %v3661_v14  ;;  %v12462_v14 = vld [vmem:[#allocation84_spill] sm:$0xff]  ;;  %vm7181_vm11 = vmpackc.low %vm4856_vm1, %vm4854_vm12  ;;  %v2088_v62 = vand.u32 4294967040, %v10886_v57  ;;  %v3059_v50 = vcvt.s32.f32 %v3057_v20  ;;  %v1448_v32 = vsub.f32 %v8262_v37, %v12463_v11  ;;  %v3665_v36 = vperm.slane %v10872_v60, 2  ;;  %v12465_v57 = vld [vmem:[#allocation86_spill] sm:$0xff] }
 0x53c   : > { %4224 = vst [vmem:[#allocation1 + $0x7] ss:$9 sm:$0xff] %v3662_v41  ;;  %v1447_v43 = vsub.f32 %v8266_v46, %v12462_v14  ;;  %v1833_v41 = vxor.u32 2147483647, %v1446_v63  ;;  %7182 = vmatmul.msk.bf16.gmra.mxu3 %vm7181_vm11, %v12227_v0  ;;  %vm7245_vm6 = vmpackc.low %vm4857_vm4, %vm4855_vm13  ;;  %7374 = vmatmul.msk.bf16.gmra.mxu1 %vm7181_vm11, %v12227_v0  ;;  %vm3063_vm14 = vcmp.eq.f32.partialorder %v10622_v29, %v10903_v44  ;;  %v10918_v58 = vcvt.s32.f32 %v3154_v33 }
 0x53d   : > { %6246 = vst [vmem:[%s9606_s29 + $0x120] sm:$0xff] %v6182_v48  ;;  %7246 = vmatmul.msk.bf16.gmra.mxu0 %vm7245_vm6, %v12227_v0  ;;  %7438 = vmatmul.msk.bf16.gmra.mxu2 %vm7245_vm6, %v12227_v0  ;;  %v3666_v42 = vperm.slane %v10872_v60, 3  ;;  %v3064_v8 = vsel %vm3063_vm14, %v3059_v50, inf  ;;  %v2213_v61 = vor.u32 %v2085_v39, %v8272_v55  ;;  %v2214_v48 = vor.u32 %v2086_v15, %v8276_v59  ;;  %v5909_v15 = vpop.f32.mrf.mxu1 }
 0x53e   : > { %v1834_v20 = vxor.u32 2147483647, %v1447_v43  ;;  %v1449_v14 = vsub.f32 %v8266_v46, %v12465_v57  ;;  %v3667_v11 = vperm.slane %v10872_v60, 4  ;;  %3065 = vmin.xlane.f32.xlu2 %v3064_v8  ;;  %3157 = vmin.xlane.f32.xlu1 %v10918_v58  ;;  %v3073_v29 = vand.u32 65535, %v10630_v28  ;;  %v5612_v39 = vpop.f32.mrf.mxu0  ;;  %v6078_v8 = vpop.f32.mrf.mxu2 }
 0x53f   : > { %v1961_v33 = vsel %vm1705_vm9, %v1833_v41, %v1446_v63  ;;  %vm1706_vm2 = vcmp.lt.s32.totalorder %v1447_v43, 0  ;;  %v3668_v50 = vperm.slane %v10872_v60, 5  ;;  %vm3167_vm3 = vcmp.lt.s32.totalorder %v2213_v61, %v2214_v48 }
 0x540   : > { %vm1707_vm7 = vcmp.lt.s32.totalorder %v1448_v32, 0  ;;  %v1835_v53 = vxor.u32 2147483647, %v1448_v32  ;;  %v3669_v57 = vperm.slane %v10872_v60, 6  ;;  %v10933_v25 = vsel %vm3167_vm3, %v2213_v61, %v2214_v48 }
 0x541   : > { %v3670_v28 = vperm.slane %v10872_v60, 7  ;;  %v6079_v41 = vadd.f32 %v6078_v8, %v5909_v15  ;;  %vm1708_vm10 = vcmp.lt.s32.totalorder %v1449_v14, 0  ;;  %v1836_v13 = vxor.u32 2147483647, %v1449_v14  ;;  %v10940_v10 = vpop.xlane.xlu2 %3077  ;;  %v7549_v8 = vld [vmem:[%s12429_s7 + $0x20] sm:$0xff] }
 0x542   : > { %vm3079_vm15 = vcmp.eq.f32.partialorder %v10640_v24, %v10940_v10  ;;  %v3089_v24 = vand.u32 65535, %v10638_v5  ;;  %6377 = vmatpush.bf16.msrb.mxu3 %v7549_v8 }
 0x543   : > { %v10920_v16 = vld [vmem:[#allocation1] sm:$0xff]  ;;  %v1964_v15 = vsel %vm1708_vm10, %v1836_v13, %v1449_v14 }
 0x544   : > { %12464 = vst [vmem:[#allocation20_spill] sm:$0xff] %v10920_v16  ;;  %v1962_v16 = vsel %vm1706_vm2, %v1834_v20, %v1447_v43  ;;  %v1963_v43 = vsel %vm1707_vm7, %v1835_v53, %v1448_v32  ;;  %v12466_v20 = vand.u32 4294967040, %v10868_v27  ;;  %v3671_v27 = vperm.slane %v10874_v30, 0 }
 0x545   : > { %4226 = vst [vmem:[#allocation1] ss:$9 sm:$0xff] %v3663_v6  ;;  %v5443_v6 = vpop.f32.mrf.mxu3  ;;  %v2091_v53 = vand.u32 4294967040, %v1963_v43  ;;  %v3091_v13 = vcvt.s32.f32 %v3089_v24 }
 0x546   : > { %4227 = vst [vmem:[#allocation1 + $0x1] ss:$9 sm:$0xff] %v3664_v1  ;;  %v10936_v63 = vadd.f32 %v5612_v39, %v5443_v6  ;;  %v3170_v1 = vshra.s32 %v10933_v25, 16  ;;  %v2090_v39 = vand.u32 4294967040, %v1962_v16  ;;  %v2972_v6 = vcvt.f32.s32 %v10612_v18 }
 0x547   : > { %4228 = vst [vmem:[#allocation1 + $0x2] ss:$9 sm:$0xff] %v3665_v36  ;;  %v3075_v36 = vcvt.s32.f32 %v3073_v29  ;;  %v2216_v29 = vor.u32 %v2088_v62, %v8276_v59  ;;  %v3672_v16 = vperm.slane %v10874_v30, 1 }
 0x548   : > { %4229 = vst [vmem:[#allocation1 + $0x3] ss:$9 sm:$0xff] %v3666_v42  ;;  %v6183_v60 = vadd.f32 %v6079_v41, %v10936_v63  ;;  %v10947_v42 = vcvt.s32.f32 %v3170_v1  ;;  %v2218_v5 = vor.u32 %v2090_v39, %v8276_v59  ;;  %v2219_v41 = vor.u32 %v2091_v53, %v8272_v55 }
 0x549   : > { %4230 = vst [vmem:[#allocation1 + $0x4] ss:$9 sm:$0xff] %v3667_v11  ;;  %v3080_v48 = vsel %vm3079_vm15, %v3075_v36, inf  ;;  %v2215_v11 = vor.u32 %v12466_v20, %v8272_v55  ;;  %v3674_v36 = vperm.slane %v10874_v30, 3  ;;  %v3678_v39 = vperm.slane %v10874_v30, 7 }
 0x54a   : > { %4231 = vst [vmem:[#allocation1 + $0x5] ss:$9 sm:$0xff] %v3668_v50  ;;  %3081 = vmin.xlane.f32.xlu0 %v3080_v48  ;;  %v2089_v50 = vand.u32 4294967040, %v1961_v33  ;;  %3173 = vmin.xlane.f32.xlu2 %v10947_v42  ;;  %v10964_v33 = vpop.xlane.xlu2 %3093  ;;  %v3675_v48 = vperm.slane %v10874_v30, 4 }
 0x54b   : > { %4232 = vst [vmem:[#allocation1 + $0x6] ss:$9 sm:$0xff] %v3669_v57  ;;  %vm3183_vm8 = vcmp.lt.s32.totalorder %v2215_v11, %v2216_v29  ;;  %v2092_v57 = vand.u32 4294967040, %v1964_v15  ;;  %vm3095_vm5 = vcmp.eq.f32.partialorder %v10644_v45, %v10964_v33 }
 0x54c   : > { %4233 = vst [vmem:[#allocation1 + $0x7] ss:$9 sm:$0xff] %v3670_v28  ;;  %v10958_v32 = vsel %vm3183_vm8, %v2215_v11, %v2216_v29  ;;  %v2217_v14 = vor.u32 %v2089_v50, %v8272_v55  ;;  %v3673_v28 = vperm.slane %v10874_v30, 2  ;;  %v3096_v43 = vsel %vm3095_vm5, %v3091_v13, inf }
 0x54d   : > { %6247 = vst [vmem:[%s9606_s29 + $0x128] sm:$0xff] %v6183_v60  ;;  %v3186_v62 = vshra.s32 %v10958_v32, 16  ;;  %v2971_v60 = vcvt.f32.s32 %v10889_v34  ;;  %v2220_v45 = vor.u32 %v2092_v57, %v8276_v59  ;;  %v2973_v11 = vshll.u32 %v2972_v6, 16 }
 0x54e   : > { %vm3199_vm12 = vcmp.lt.s32.totalorder %v2217_v14, %v2218_v5  ;;  %v3676_v29 = vperm.slane %v10874_v30, 5  ;;  %v3677_v34 = vperm.slane %v10874_v30, 6 }
 0x54f   : > { %v10974_v18 = vcvt.s32.f32 %v3186_v62  ;;  %v10982_v20 = vsel %vm3199_vm12, %v2217_v14, %v2218_v5  ;;  %vm3215_vm1 = vcmp.lt.s32.totalorder %v2219_v41, %v2220_v45  ;;  %v2974_v15 = vadd.s32 %v2973_v11, %v2971_v60 }
 0x550   : > { %v3202_v50 = vshra.s32 %v10982_v20, 16  ;;  %v10990_v24 = vsel %vm3215_vm1, %v2219_v41, %v2220_v45 }
 0x551   : > { %v3293_v57 = vand.u32 255, %v2974_v15  ;;  %v3218_v6 = vshra.s32 %v10990_v24, 16 }
 0x552   : > { %3097 = vmin.xlane.f32.xlu0 %v3096_v43  ;;  %3189 = vmin.xlane.f32.xlu2 %v10974_v18  ;;  %v10992_v53 = vcvt.s32.f32 %v3202_v50 }
 0x553   : > { %v10977_v1 = vld [vmem:[#allocation1] sm:$0xff]  ;;  %v3680_v62 = vperm.slane %v3293_v57, 1  ;;  %v3681_v30 = vperm.slane %v3293_v57, 2  ;;  %v3682_v14 = vperm.slane %v3293_v57, 3  ;;  %v3683_v5 = vperm.slane %v3293_v57, 4 }
 0x554   : > { %4235 = vst [vmem:[#allocation1] ss:$9 sm:$0xff] %v3671_v27  ;;  %v3679_v27 = vperm.slane %v3293_v57, 0  ;;  %v3684_v8 = vperm.slane %v3293_v57, 5  ;;  %v3686_v41 = vperm.slane %v3293_v57, 7  ;;  %vm4858_vm4 = vcmp.eq.s32.totalorder %v8272_v55, %v3293_v57 }
 0x555   : > { %4236 = vst [vmem:[#allocation1 + $0x1] ss:$9 sm:$0xff] %v3672_v16  ;;  %v10996_v16 = vcvt.s32.f32 %v3218_v6  ;;  %vm4859_vm6 = vcmp.eq.s32.totalorder %v8276_v59, %v3293_v57 }
 0x556   : > { %4237 = vst [vmem:[#allocation1 + $0x2] ss:$9 sm:$0xff] %v3673_v28  ;;  %v3685_v28 = vperm.slane %v3293_v57, 6 }
 0x557   : > { %4238 = vst [vmem:[#allocation1 + $0x3] ss:$9 sm:$0xff] %v3674_v36  ;;  %v2988_v36 = vcvt.f32.s32 %v10695_v17 }
 0x558   : > { %4239 = vst [vmem:[#allocation1 + $0x4] ss:$9 sm:$0xff] %v3675_v48 }
 0x559   : > { %4240 = vst [vmem:[#allocation1 + $0x5] ss:$9 sm:$0xff] %v3676_v29  ;;  %v2989_v50 = vshll.u32 %v2988_v36, 16 }
 0x55a   : > { %4241 = vst [vmem:[#allocation1 + $0x6] ss:$9 sm:$0xff] %v3677_v34  ;;  %3205 = vmin.xlane.f32.xlu0 %v10992_v53 }
 0x55b   : > { %4242 = vst [vmem:[#allocation1 + $0x7] ss:$9 sm:$0xff] %v3678_v39 }
 0x562   : > { %v10998_v13 = vld [vmem:[#allocation1] sm:$0xff]  ;;  %3221 = vmin.xlane.f32.xlu0 %v10996_v16 }
 0x563   : > { %4244 = vst [vmem:[#allocation1] ss:$9 sm:$0xff] %v3679_v27 }
 0x564   : > { %4245 = vst [vmem:[#allocation1 + $0x1] ss:$9 sm:$0xff] %v3680_v62 }
 0x565   : > { %4246 = vst [vmem:[#allocation1 + $0x2] ss:$9 sm:$0xff] %v3681_v30 }
 0x566   : > { %4247 = vst [vmem:[#allocation1 + $0x3] ss:$9 sm:$0xff] %v3682_v14 }
 0x567   : > { %4248 = vst [vmem:[#allocation1 + $0x4] ss:$9 sm:$0xff] %v3683_v5 }
 0x568   : > { %4249 = vst [vmem:[#allocation1 + $0x5] ss:$9 sm:$0xff] %v3684_v8 }
 0x569   : > { %4250 = vst [vmem:[#allocation1 + $0x6] ss:$9 sm:$0xff] %v3685_v28 }
 0x56a   : > { %4251 = vst [vmem:[#allocation1 + $0x7] ss:$9 sm:$0xff] %v3686_v41 }
 0x570   : > { %v5912_v43 = vpop.f32.mrf.mxu1 }
 0x571   : > { %v5615_v60 = vpop.f32.mrf.mxu0  ;;  %v11006_v8 = vld [vmem:[#allocation1] sm:$0xff] }
 0x575   : > { %v2986_v45 = vpop.xlane.xlu0 %2985 }
 0x576   : > { %v5446_v48 = vpop.f32.mrf.mxu3  ;;  %v2987_v34 = vcvt.f32.s32 %v2986_v45 }
 0x577   : > { %v11002_v11 = vadd.f32 %v5615_v60, %v5446_v48  ;;  %v6081_v29 = vpop.f32.mrf.mxu2 }
 0x578   : > { %v6082_v39 = vadd.f32 %v6081_v29, %v5912_v43  ;;  %v2990_v15 = vadd.s32 %v2989_v50, %v2987_v34  ;;  %v5914_v60 = vpop.f32.mrf.mxu1  ;;  %v3004_v29 = vcvt.f32.s32 %v10721_v47 }
 0x579   : > { %v5617_v5 = vpop.f32.mrf.mxu0 }
 0x57a   : > { %v6184_v6 = vadd.f32 %v6082_v39, %v11002_v11  ;;  %v3294_v27 = vand.u32 255, %v2990_v15  ;;  %v3005_v15 = vshll.u32 %v3004_v29, 16 }
 0x57c   : > { %6248 = vst [vmem:[%s9606_s29 + $0x130] sm:$0xff] %v6184_v6  ;;  %v3687_v62 = vperm.slane %v3294_v27, 0  ;;  %v3688_v30 = vperm.slane %v3294_v27, 1  ;;  %v3689_v14 = vperm.slane %v3294_v27, 2  ;;  %v3690_v28 = vperm.slane %v3294_v27, 3 }
 0x57d   : > { %v3691_v41 = vperm.slane %v3294_v27, 4  ;;  %vm4860_vm9 = vcmp.eq.s32.totalorder %v8272_v55, %v3294_v27  ;;  %vm4861_vm11 = vcmp.eq.s32.totalorder %v8276_v59, %v3294_v27  ;;  %v3692_v45 = vperm.slane %v3294_v27, 5 }
 0x57e   : > { %v5448_v17 = vpop.f32.mrf.mxu3  ;;  %4253 = vst [vmem:[#allocation1] ss:$9 sm:$0xff] %v3687_v62  ;;  %vm7183_vm13 = vmpackc.low %vm4860_vm9, %vm4858_vm4  ;;  %v3693_v50 = vperm.slane %v3294_v27, 6  ;;  %v3694_v39 = vperm.slane %v3294_v27, 7  ;;  %v12467_v62 = vld [vmem:[#allocation87_spill] sm:$0xff] }
 0x57f   : > { %v6083_v36 = vpop.f32.mrf.mxu2  ;;  %v11011_v43 = vadd.f32 %v5617_v5, %v5448_v17  ;;  %4254 = vst [vmem:[#allocation1 + $0x1] ss:$9 sm:$0xff] %v3688_v30  ;;  %7184 = vmatmul.msk.bf16.gmra.mxu3 %vm7183_vm13, %v12227_v0  ;;  %vm7247_vm14 = vmpackc.low %vm4861_vm11, %vm4859_vm6  ;;  %7376 = vmatmul.msk.bf16.gmra.mxu1 %vm7183_vm13, %v12227_v0  ;;  %v3002_v57 = vpop.xlane.xlu0 %3001  ;;  %v1450_v30 = vsub.f32 %v8262_v37, %v12467_v62  ;;  %v3105_v17 = vand.u32 65535, %v10688_v54  ;;  %v3020_v37 = vcvt.f32.s32 %v10759_v31 }
 0x580   : > { %v6084_v48 = vadd.f32 %v6083_v36, %v5914_v60  ;;  %4255 = vst [vmem:[#allocation1 + $0x2] ss:$9 sm:$0xff] %v3689_v14  ;;  %7248 = vmatmul.msk.bf16.gmra.mxu0 %vm7247_vm14, %v12227_v0  ;;  %7440 = vmatmul.msk.bf16.gmra.mxu2 %vm7247_vm14, %v12227_v0  ;;  %v3003_v6 = vcvt.f32.s32 %v3002_v57  ;;  %v12468_v14 = vld [vmem:[#allocation89_spill] sm:$0xff] }
 0x581   : > { %4256 = vst [vmem:[#allocation1 + $0x3] ss:$9 sm:$0xff] %v3690_v28  ;;  %v1451_v5 = vsub.f32 %v8266_v46, %v12468_v14  ;;  %vm1709_vm2 = vcmp.lt.s32.totalorder %v1450_v30, 0  ;;  %v3107_v29 = vcvt.s32.f32 %v3105_v17  ;;  %v3021_v62 = vshll.u32 %v3020_v37, 16 }
 0x582   : > { %4257 = vst [vmem:[#allocation1 + $0x4] ss:$9 sm:$0xff] %v3691_v41  ;;  %v6185_v47 = vadd.f32 %v6084_v48, %v11011_v43  ;;  %v3006_v27 = vadd.s32 %v3005_v15, %v3003_v6  ;;  %v1837_v41 = vxor.u32 2147483647, %v1450_v30 }
 0x583   : > { %4258 = vst [vmem:[#allocation1 + $0x5] ss:$9 sm:$0xff] %v3692_v45  ;;  %v1838_v60 = vxor.u32 2147483647, %v1451_v5  ;;  %vm1710_vm3 = vcmp.lt.s32.totalorder %v1451_v5, 0 }
 0x584   : > { %4259 = vst [vmem:[#allocation1 + $0x6] ss:$9 sm:$0xff] %v3693_v50  ;;  %v11028_v28 = vand.u32 255, %v3006_v27 }
 0x585   : > { %4260 = vst [vmem:[#allocation1 + $0x7] ss:$9 sm:$0xff] %v3694_v39  ;;  %v1965_v39 = vsel %vm1709_vm2, %v1837_v41, %v1450_v30 }
 0x586   : > { %6249 = vst [vmem:[%s9606_s29 + $0x138] sm:$0xff] %v6185_v47  ;;  %v3695_v36 = vperm.slane %v11028_v28, 0  ;;  %v3696_v48 = vperm.slane %v11028_v28, 1  ;;  %v3697_v45 = vperm.slane %v11028_v28, 2  ;;  %v3698_v54 = vperm.slane %v11028_v28, 3 }
 0x587   : > { %v1966_v47 = vsel %vm1710_vm3, %v1838_v60, %v1451_v5  ;;  %v3699_v57 = vperm.slane %v11028_v28, 4  ;;  %v3700_v31 = vperm.slane %v11028_v28, 5  ;;  %v3701_v14 = vperm.slane %v11028_v28, 6 }
 0x588   : > { %v2093_v34 = vand.u32 4294967040, %v1965_v39  ;;  %v2094_v61 = vand.u32 4294967040, %v1966_v47  ;;  %v3036_v47 = vcvt.f32.s32 %v10797_v12  ;;  %vm4862_vm15 = vcmp.eq.s32.totalorder %v8272_v55, %v11028_v28 }
 0x589   : > { %vm4863_vm1 = vcmp.eq.s32.totalorder %v8276_v59, %v11028_v28 }
 0x58a   : > { %v2222_v39 = vor.u32 %v2094_v61, %v8276_v59 }
 0x58c   : > { %v11034_v46 = vpop.xlane.xlu0 %3109  ;;  %v11036_v50 = vld [vmem:[#allocation1] sm:$0xff]  ;;  %v5917_v5 = vpop.f32.mrf.mxu1 }
 0x58d   : > { %vm3111_vm7 = vcmp.eq.f32.partialorder %v10756_v51, %v11034_v46  ;;  %4262 = vst [vmem:[#allocation1] ss:$9 sm:$0xff] %v3695_v36  ;;  %v5620_v27 = vpop.f32.mrf.mxu0  ;;  %v3702_v51 = vperm.slane %v11028_v28, 7 }
 0x58e   : > { %v3112_v15 = vsel %vm3111_vm7, %v3107_v29, inf  ;;  %4263 = vst [vmem:[#allocation1 + $0x1] ss:$9 sm:$0xff] %v3696_v48  ;;  %v2221_v29 = vor.u32 %v2093_v34, %v8272_v55 }
 0x58f   : > { %v3018_v6 = vpop.xlane.xlu1 %3017  ;;  %3113 = vmin.xlane.f32.xlu1 %v3112_v15  ;;  %4264 = vst [vmem:[#allocation1 + $0x2] ss:$9 sm:$0xff] %v3697_v45  ;;  %v3121_v45 = vand.u32 65535, %v10732_v22 }
 0x590   : > { %v3019_v17 = vcvt.f32.s32 %v3018_v6  ;;  %4265 = vst [vmem:[#allocation1 + $0x3] ss:$9 sm:$0xff] %v3698_v54  ;;  %vm3231_vm10 = vcmp.lt.s32.totalorder %v2221_v29, %v2222_v39 }
 0x591   : > { %4266 = vst [vmem:[#allocation1 + $0x4] ss:$9 sm:$0xff] %v3699_v57  ;;  %v11072_v28 = vsel %vm3231_vm10, %v2221_v29, %v2222_v39 }
 0x592   : > { %v3022_v30 = vadd.s32 %v3021_v62, %v3019_v17  ;;  %v5451_v41 = vpop.f32.mrf.mxu3  ;;  %4267 = vst [vmem:[#allocation1 + $0x5] ss:$9 sm:$0xff] %v3700_v31  ;;  %v3123_v31 = vcvt.s32.f32 %v3121_v45 }
 0x593   : > { %v6086_v60 = vpop.f32.mrf.mxu2  ;;  %4268 = vst [vmem:[#allocation1 + $0x6] ss:$9 sm:$0xff] %v3701_v14  ;;  %v11045_v36 = vadd.f32 %v5620_v27, %v5451_v41 }
 0x594   : > { %v6087_v48 = vadd.f32 %v6086_v60, %v5917_v5  ;;  %4269 = vst [vmem:[#allocation1 + $0x7] ss:$9 sm:$0xff] %v3702_v51  ;;  %v3296_v37 = vand.u32 255, %v3022_v30  ;;  %v11053_v14 = vpop.xlane.xlu0 %3125  ;;  %v5919_v51 = vpop.f32.mrf.mxu1  ;;  %v3037_v60 = vshll.u32 %v3036_v47, 16 }
 0x595   : > { %v5622_v62 = vpop.f32.mrf.mxu0  ;;  %vm3127_vm4 = vcmp.eq.f32.partialorder %v10781_v40, %v11053_v14 }
 0x596   : > { %v6186_v54 = vadd.f32 %v6087_v48, %v11045_v36  ;;  %v3703_v57 = vperm.slane %v3296_v37, 0  ;;  %v3704_v6 = vperm.slane %v3296_v37, 1  ;;  %vm4864_vm8 = vcmp.eq.s32.totalorder %v8272_v55, %v3296_v37 }
 0x597   : > { %vm4865_vm5 = vcmp.eq.s32.totalorder %v8276_v59, %v3296_v37  ;;  %v3705_v22 = vperm.slane %v3296_v37, 2  ;;  %vm7185_vm12 = vmpackc.low %vm4864_vm8, %vm4862_vm15  ;;  %v3706_v27 = vperm.slane %v3296_v37, 3  ;;  %v3128_v30 = vsel %vm3127_vm4, %v3123_v31, inf }
 0x598   : > { %6250 = vst [vmem:[%s9606_s29 + $0x140] sm:$0xff] %v6186_v54  ;;  %7186 = vmatmul.msk.bf16.gmra.mxu3 %vm7185_vm12, %v12227_v0  ;;  %vm7249_vm9 = vmpackc.low %vm4865_vm5, %vm4863_vm1  ;;  %7378 = vmatmul.msk.bf16.gmra.mxu1 %vm7185_vm12, %v12227_v0  ;;  %v3707_v41 = vperm.slane %v3296_v37, 4  ;;  %v3708_v48 = vperm.slane %v3296_v37, 5  ;;  %v3709_v54 = vperm.slane %v3296_v37, 6 }
 0x599   : > { %7250 = vmatmul.msk.bf16.gmra.mxu0 %vm7249_vm9, %v12227_v0  ;;  %7442 = vmatmul.msk.bf16.gmra.mxu2 %vm7249_vm9, %v12227_v0 }
 0x59a   : > { %v5453_v12 = vpop.f32.mrf.mxu3  ;;  %3129 = vmin.xlane.f32.xlu1 %v3128_v30  ;;  %v7548_v30 = vld [vmem:[%s12429_s7 + $0x18] sm:$0xff] }
 0x59b   : > { %v6088_v61 = vpop.f32.mrf.mxu2  ;;  %v11063_v34 = vld [vmem:[#allocation1] sm:$0xff]  ;;  %v11067_v5 = vadd.f32 %v5622_v62, %v5453_v12  ;;  %v3234_v62 = vshra.s32 %v11072_v28, 16  ;;  %6378 = vmatpush.bf16.msrb.mxu3 %v7548_v30  ;;  %v3169_v30 = vand.u32 65535, %v10933_v25 }
 0x59c   : > { %4271 = vst [vmem:[#allocation1] ss:$9 sm:$0xff] %v3703_v57  ;;  %v6089_v40 = vadd.f32 %v6088_v61, %v5919_v51  ;;  %v3052_v57 = vcvt.f32.s32 %v10835_v35  ;;  %v3137_v35 = vand.u32 65535, %v10809_v9 }
 0x59d   : > { %4272 = vst [vmem:[#allocation1 + $0x1] ss:$9 sm:$0xff] %v3704_v6  ;;  %v11079_v61 = vcvt.s32.f32 %v3234_v62 }
 0x59e   : > { %4273 = vst [vmem:[#allocation1 + $0x2] ss:$9 sm:$0xff] %v3705_v22  ;;  %v6187_v29 = vadd.f32 %v6089_v40, %v11067_v5  ;;  %v3053_v6 = vshll.u32 %v3052_v57, 16  ;;  %v3139_v51 = vcvt.s32.f32 %v3137_v35 }
 0x59f   : > { %4274 = vst [vmem:[#allocation1 + $0x3] ss:$9 sm:$0xff] %v3706_v27 }
 0x5a0   : > { %v3034_v15 = vpop.xlane.xlu1 %3033  ;;  %4275 = vst [vmem:[#allocation1 + $0x4] ss:$9 sm:$0xff] %v3707_v41 }
 0x5a1   : > { %v3035_v17 = vcvt.f32.s32 %v3034_v15  ;;  %v3710_v15 = vperm.slane %v3296_v37, 7  ;;  %4276 = vst [vmem:[#allocation1 + $0x5] ss:$9 sm:$0xff] %v3708_v48 }
 0x5a2   : > { %4277 = vst [vmem:[#allocation1 + $0x6] ss:$9 sm:$0xff] %v3709_v54  ;;  %3237 = vmin.xlane.f32.xlu1 %v11079_v61 }
 0x5a3   : > { %v3038_v31 = vadd.s32 %v3037_v60, %v3035_v17  ;;  %4278 = vst [vmem:[#allocation1 + $0x7] ss:$9 sm:$0xff] %v3710_v15  ;;  %v5625_v48 = vpop.f32.mrf.mxu0  ;;  %v5922_v15 = vpop.f32.mrf.mxu1 }
 0x5a4   : > { %6251 = vst [vmem:[%s9606_s29 + $0x148] sm:$0xff] %v6187_v29 }
 0x5a5   : > { %v3297_v12 = vand.u32 255, %v3038_v31 }
 0x5a7   : > { %v3050_v39 = vpop.xlane.xlu2 %3049  ;;  %v3711_v27 = vperm.slane %v3297_v12, 0  ;;  %v3712_v17 = vperm.slane %v3297_v12, 1  ;;  %v3713_v60 = vperm.slane %v3297_v12, 2  ;;  %v3714_v57 = vperm.slane %v3297_v12, 3 }
 0x5a8   : > { %v3051_v47 = vcvt.f32.s32 %v3050_v39  ;;  %v11084_v22 = vpop.xlane.xlu1 %3141  ;;  %v5456_v41 = vpop.f32.mrf.mxu3  ;;  %v3715_v62 = vperm.slane %v3297_v12, 4  ;;  %v3717_v35 = vperm.slane %v3297_v12, 6  ;;  %vm4866_vm13 = vcmp.eq.s32.totalorder %v8272_v55, %v3297_v12 }
 0x5a9   : > { %v6091_v40 = vpop.f32.mrf.mxu2  ;;  %vm3143_vm11 = vcmp.eq.f32.partialorder %v10844_v23, %v11084_v22  ;;  %v11095_v29 = vadd.f32 %v5625_v48, %v5456_v41  ;;  %v3718_v23 = vperm.slane %v3297_v12, 7  ;;  %vm4867_vm3 = vcmp.eq.s32.totalorder %v8276_v59, %v3297_v12 }
 0x5aa   : > { %v3054_v37 = vadd.s32 %v3053_v6, %v3051_v47  ;;  %v11093_v9 = vld [vmem:[#allocation1] sm:$0xff]  ;;  %v3144_v31 = vsel %vm3143_vm11, %v3139_v51, inf  ;;  %v6092_v39 = vadd.f32 %v6091_v40, %v5922_v15  ;;  %v3153_v47 = vand.u32 65535, %v10891_v56 }
 0x5ab   : > { %4280 = vst [vmem:[#allocation1] ss:$9 sm:$0xff] %v3711_v27  ;;  %3145 = vmin.xlane.f32.xlu2 %v3144_v31  ;;  %v3716_v6 = vperm.slane %v3297_v12, 5  ;;  %v5627_v51 = vpop.f32.mrf.mxu0  ;;  %v5924_v48 = vpop.f32.mrf.mxu1  ;;  %v3084_v15 = vcvt.f32.s32 %v10940_v10 }
 0x5ac   : > { %v11089_v54 = vand.u32 255, %v3054_v37  ;;  %4281 = vst [vmem:[#allocation1 + $0x1] ss:$9 sm:$0xff] %v3712_v17  ;;  %v6188_v56 = vadd.f32 %v6092_v39, %v11095_v29  ;;  %v3155_v17 = vcvt.s32.f32 %v3153_v47  ;;  %v3171_v47 = vcvt.s32.f32 %v3169_v30 }
 0x5ad   : > { %4282 = vst [vmem:[#allocation1 + $0x2] ss:$9 sm:$0xff] %v3713_v60  ;;  %v3068_v60 = vcvt.f32.s32 %v10903_v44 }
 0x5ae   : > { %vm4868_vm6 = vcmp.eq.s32.totalorder %v8272_v55, %v11089_v54  ;;  %vm4869_vm14 = vcmp.eq.s32.totalorder %v8276_v59, %v11089_v54  ;;  %4283 = vst [vmem:[#allocation1 + $0x3] ss:$9 sm:$0xff] %v3714_v57  ;;  %v3719_v31 = vperm.slane %v11089_v54, 0  ;;  %v3722_v10 = vperm.slane %v11089_v54, 3 }
 0x5af   : > { %vm7187_vm2 = vmpackc.low %vm4868_vm6, %vm4866_vm13  ;;  %4284 = vst [vmem:[#allocation1 + $0x4] ss:$9 sm:$0xff] %v3715_v62  ;;  %v3720_v62 = vperm.slane %v11089_v54, 1  ;;  %v3726_v45 = vperm.slane %v11089_v54, 7 }
 0x5b0   : > { %7188 = vmatmul.msk.bf16.gmra.mxu3 %vm7187_vm2, %v12227_v0  ;;  %vm7251_vm7 = vmpackc.low %vm4869_vm14, %vm4867_vm3  ;;  %7380 = vmatmul.msk.bf16.gmra.mxu1 %vm7187_vm2, %v12227_v0  ;;  %4285 = vst [vmem:[#allocation1 + $0x5] ss:$9 sm:$0xff] %v3716_v6  ;;  %v5458_v41 = vpop.f32.mrf.mxu3  ;;  %v3721_v6 = vperm.slane %v11089_v54, 2 }
 0x5b1   : > { %v3066_v37 = vpop.xlane.xlu2 %3065  ;;  %v11105_v27 = vpop.xlane.xlu1 %3157  ;;  %7252 = vmatmul.msk.bf16.gmra.mxu0 %vm7251_vm7, %v12227_v0  ;;  %7444 = vmatmul.msk.bf16.gmra.mxu2 %vm7251_vm7, %v12227_v0  ;;  %4286 = vst [vmem:[#allocation1 + $0x6] ss:$9 sm:$0xff] %v3717_v35  ;;  %v11116_v57 = vadd.f32 %v5627_v51, %v5458_v41  ;;  %v3725_v41 = vperm.slane %v11089_v54, 6 }
 0x5b2   : > { %vm3159_vm10 = vcmp.eq.f32.partialorder %v10918_v58, %v11105_v27  ;;  %4287 = vst [vmem:[#allocation1 + $0x7] ss:$9 sm:$0xff] %v3718_v23  ;;  %v6093_v40 = vpop.f32.mrf.mxu2  ;;  %v3067_v25 = vcvt.f32.s32 %v3066_v37  ;;  %v3069_v23 = vshll.u32 %v3068_v60, 16  ;;  %v3724_v37 = vperm.slane %v11089_v54, 5 }
 0x5b3   : > { %v3160_v12 = vsel %vm3159_vm10, %v3155_v17, inf  ;;  %6252 = vst [vmem:[%s9606_s29 + $0x150] sm:$0xff] %v6188_v56  ;;  %v3085_v17 = vshll.u32 %v3084_v15, 16  ;;  %v6094_v51 = vadd.f32 %v6093_v40, %v5924_v48 }
 0x5b4   : > { %3161 = vmin.xlane.f32.xlu2 %v3160_v12  ;;  %v3723_v12 = vperm.slane %v11089_v54, 4  ;;  %v3070_v60 = vadd.s32 %v3069_v23, %v3067_v25 }
 0x5b5   : > { %v6189_v40 = vadd.f32 %v6094_v51, %v11116_v57 }
 0x5b7   : > { %6253 = vst [vmem:[%s9606_s29 + $0x158] sm:$0xff] %v6189_v40 }
 0x5b9   : > { %v11126_v56 = vld [vmem:[#allocation1] sm:$0xff] }
 0x5ba   : > { %4289 = vst [vmem:[#allocation1] ss:$9 sm:$0xff] %v3719_v31  ;;  %v5927_v31 = vpop.f32.mrf.mxu1 }
 0x5bb   : > { %4290 = vst [vmem:[#allocation1 + $0x1] ss:$9 sm:$0xff] %v3720_v62  ;;  %v3299_v62 = vand.u32 255, %v3070_v60 }
 0x5bc   : > { %4291 = vst [vmem:[#allocation1 + $0x2] ss:$9 sm:$0xff] %v3721_v6 }
 0x5bd   : > { %v3082_v58 = vpop.xlane.xlu0 %3081  ;;  %v11121_v39 = vpop.xlane.xlu2 %3173  ;;  %4292 = vst [vmem:[#allocation1 + $0x3] ss:$9 sm:$0xff] %v3722_v10  ;;  %vm4870_vm8 = vcmp.eq.s32.totalorder %v8272_v55, %v3299_v62  ;;  %vm4871_vm4 = vcmp.eq.s32.totalorder %v8276_v59, %v3299_v62  ;;  %v3731_v51 = vperm.slane %v3299_v62, 4 }
 0x5be   : > { %v3083_v44 = vcvt.f32.s32 %v3082_v58  ;;  %vm3175_vm15 = vcmp.eq.f32.partialorder %v10947_v42, %v11121_v39  ;;  %v5630_v42 = vpop.f32.mrf.mxu0  ;;  %4293 = vst [vmem:[#allocation1 + $0x4] ss:$9 sm:$0xff] %v3723_v12  ;;  %v3730_v12 = vperm.slane %v3299_v62, 3 }
 0x5bf   : > { %v3176_v30 = vsel %vm3175_vm15, %v3171_v47, inf  ;;  %v5461_v35 = vpop.f32.mrf.mxu3  ;;  %4294 = vst [vmem:[#allocation1 + $0x5] ss:$9 sm:$0xff] %v3724_v37  ;;  %v3201_v37 = vand.u32 65535, %v10982_v20 }
 0x5c0   : > { %3177 = vmin.xlane.f32.xlu0 %v3176_v30  ;;  %v3086_v58 = vadd.s32 %v3085_v17, %v3083_v44  ;;  %v6096_v15 = vpop.f32.mrf.mxu2  ;;  %v11136_v48 = vadd.f32 %v5630_v42, %v5461_v35  ;;  %4295 = vst [vmem:[#allocation1 + $0x6] ss:$9 sm:$0xff] %v3725_v41  ;;  %v3185_v44 = vand.u32 65535, %v10958_v32  ;;  %v3727_v35 = vperm.slane %v3299_v62, 0 }
 0x5c1   : > { %v6097_v6 = vadd.f32 %v6096_v15, %v5927_v31  ;;  %4296 = vst [vmem:[#allocation1 + $0x7] ss:$9 sm:$0xff] %v3726_v45  ;;  %v3728_v45 = vperm.slane %v3299_v62, 1  ;;  %v3729_v32 = vperm.slane %v3299_v62, 2  ;;  %v3732_v41 = vperm.slane %v3299_v62, 5 }
 0x5c2   : > { %v11138_v47 = vand.u32 255, %v3086_v58  ;;  %v3187_v10 = vcvt.s32.f32 %v3185_v44  ;;  %v5929_v58 = vpop.f32.mrf.mxu1  ;;  %v3733_v42 = vperm.slane %v3299_v62, 6  ;;  %v3734_v31 = vperm.slane %v3299_v62, 7 }
 0x5c3   : > { %v6190_v54 = vadd.f32 %v6097_v6, %v11136_v48  ;;  %v3203_v44 = vcvt.s32.f32 %v3201_v37  ;;  %v3217_v62 = vand.u32 65535, %v10990_v24 }
 0x5c4   : > { %vm4872_vm5 = vcmp.eq.s32.totalorder %v8272_v55, %v11138_v47  ;;  %vm4873_vm12 = vcmp.eq.s32.totalorder %v8276_v59, %v11138_v47  ;;  %v3737_v37 = vperm.slane %v11138_v47, 2 }
 0x5c5   : > { %v11142_v25 = vpop.xlane.xlu0 %3097  ;;  %6254 = vst [vmem:[%s9606_s29 + $0x160] sm:$0xff] %v6190_v54  ;;  %v11151_v23 = vpop.xlane.xlu2 %3189  ;;  %vm7189_vm1 = vmpackc.low %vm4872_vm5, %vm4870_vm8 }
 0x5c6   : > { %7190 = vmatmul.msk.bf16.gmra.mxu3 %vm7189_vm1, %v12227_v0  ;;  %vm7253_vm9 = vmpackc.low %vm4873_vm12, %vm4871_vm4  ;;  %7382 = vmatmul.msk.bf16.gmra.mxu1 %vm7189_vm1, %v12227_v0  ;;  %vm3191_vm11 = vcmp.eq.f32.partialorder %v10974_v18, %v11151_v23  ;;  %v5632_v60 = vpop.f32.mrf.mxu0 }
 0x5c7   : > { %7254 = vmatmul.msk.bf16.gmra.mxu0 %vm7253_vm9, %v12227_v0  ;;  %7446 = vmatmul.msk.bf16.gmra.mxu2 %vm7253_vm9, %v12227_v0  ;;  %v3192_v30 = vsel %vm3191_vm11, %v3187_v10, inf  ;;  %v5463_v15 = vpop.f32.mrf.mxu3  ;;  %v3100_v10 = vcvt.f32.s32 %v10964_v33  ;;  %v3738_v33 = vperm.slane %v11138_v47, 3 }
 0x5c8   : > { %v11158_v17 = vld [vmem:[#allocation1] sm:$0xff]  ;;  %3193 = vmin.xlane.f32.xlu1 %v3192_v30  ;;  %v6098_v40 = vpop.f32.mrf.mxu2  ;;  %v11163_v6 = vadd.f32 %v5632_v60, %v5463_v15  ;;  %v3219_v30 = vcvt.s32.f32 %v3217_v62  ;;  %v3099_v60 = vcvt.f32.s32 %v11142_v25 }
 0x5c9   : > { %4298 = vst [vmem:[#allocation1] ss:$9 sm:$0xff] %v3727_v35  ;;  %v6099_v18 = vadd.f32 %v6098_v40, %v5929_v58  ;;  %v3101_v15 = vshll.u32 %v3100_v10, 16  ;;  %v3740_v40 = vperm.slane %v11138_v47, 5 }
 0x5ca   : > { %4299 = vst [vmem:[#allocation1 + $0x1] ss:$9 sm:$0xff] %v3728_v45 }
 0x5cb   : > { %4300 = vst [vmem:[#allocation1 + $0x2] ss:$9 sm:$0xff] %v3729_v32  ;;  %v6191_v35 = vadd.f32 %v6099_v18, %v11163_v6  ;;  %v3735_v32 = vperm.slane %v11138_v47, 0  ;;  %v3102_v18 = vadd.s32 %v3101_v15, %v3099_v60  ;;  %v12473_v60 = vld [vmem:[#allocation43_spill] sm:$0xff]  ;;  %v12475_v15 = vld [vmem:[#allocation57_spill] sm:$0xff] }
 0x5cc   : > { %4301 = vst [vmem:[#allocation1 + $0x3] ss:$9 sm:$0xff] %v3730_v12  ;;  %v3736_v12 = vperm.slane %v11138_v47, 1 }
 0x5cd   : > { %4302 = vst [vmem:[#allocation1 + $0x4] ss:$9 sm:$0xff] %v3731_v51  ;;  %v11165_v54 = vpop.xlane.xlu0 %3205  ;;  %v3301_v25 = vand.u32 255, %v3102_v18 }
 0x5ce   : > { %4303 = vst [vmem:[#allocation1 + $0x5] ss:$9 sm:$0xff] %v3732_v41  ;;  %vm3207_vm13 = vcmp.eq.f32.partialorder %v10992_v53, %v11165_v54  ;;  %v7547_v53 = vld [vmem:[%s12429_s7 + $0x10] sm:$0xff]  ;;  %v7962_v41 = vmov 0  }
 0x5cf   : > { %4304 = vst [vmem:[#allocation1 + $0x6] ss:$9 sm:$0xff] %v3733_v42  ;;  %v3208_v45 = vsel %vm3207_vm13, %v3203_v44, inf  ;;  %7602 = vset.pattern.permute.xlu2 %v7962_v41  ;;  %7603 = vset.pattern.permute.xlu0 %v7962_v41  ;;  %v3739_v42 = vperm.slane %v11138_v47, 4  ;;  %v3743_v44 = vperm.slane %v3301_v25, 0  ;;  %v3747_v10 = vperm.slane %v3301_v25, 4 }
 0x5d0   : > { %4305 = vst [vmem:[#allocation1 + $0x7] ss:$9 sm:$0xff] %v3734_v31  ;;  %3209 = vmin.xlane.f32.xlu2 %v3208_v45  ;;  %6379 = vmatpush.bf16.msrb.mxu3 %v7547_v53  ;;  %v3742_v31 = vperm.slane %v11138_v47, 7  ;;  %v3745_v45 = vperm.slane %v3301_v25, 2  ;;  %v3750_v53 = vperm.slane %v3301_v25, 7  ;;  %vm4874_vm14 = vcmp.eq.s32.totalorder %v8272_v55, %v3301_v25 }
 0x5d1   : > { %6255 = vst [vmem:[%s9606_s29 + $0x168] sm:$0xff] %v6191_v35  ;;  %7604 = vset.pattern.permute.xlu1 %v7962_v41  ;;  %v3744_v35 = vperm.slane %v3301_v25, 1  ;;  %v12471_v41 = vld [vmem:[#allocation38_spill] sm:$0xff]  ;;  %vm4875_vm10 = vcmp.eq.s32.totalorder %v8276_v59, %v3301_v25 }
 0x5d5   : > { %v11177_v51 = vpop.xlane.xlu0 %3221 }
 0x5d6   : > { %vm3223_vm6 = vcmp.eq.f32.partialorder %v10996_v16, %v11177_v51  ;;  %v3741_v16 = vperm.slane %v11138_v47, 6  ;;  %v3749_v47 = vperm.slane %v3301_v25, 6 }
 0x5d7   : > { %v11185_v24 = vld [vmem:[#allocation1] sm:$0xff]  ;;  %v3224_v58 = vsel %vm3223_vm6, %v3219_v30, inf  ;;  %v12469_v30 = vld [vmem:[#allocation27_spill] sm:$0xff] }
 0x5d8   : > { %4307 = vst [vmem:[#allocation1] ss:$9 sm:$0xff] %v3735_v32  ;;  %3225 = vmin.xlane.f32.xlu0 %v3224_v58  ;;  %v3746_v32 = vperm.slane %v3301_v25, 3  ;;  %v12474_v58 = vld [vmem:[#allocation16_spill] sm:$0xff] }
 0x5d9   : > { %4308 = vst [vmem:[#allocation1 + $0x1] ss:$9 sm:$0xff] %v3736_v12  ;;  %v3748_v12 = vperm.slane %v3301_v25, 5 }
 0x5da   : > { %4309 = vst [vmem:[#allocation1 + $0x2] ss:$9 sm:$0xff] %v3737_v37  ;;  %v12470_v37 = vld [vmem:[#allocation31_spill] sm:$0xff] }
 0x5db   : > { %4310 = vst [vmem:[#allocation1 + $0x3] ss:$9 sm:$0xff] %v3738_v33  ;;  %v12472_v33 = vld [vmem:[#allocation64_spill] sm:$0xff] }
 0x5dc   : > { %4311 = vst [vmem:[#allocation1 + $0x4] ss:$9 sm:$0xff] %v3739_v42  ;;  %v3116_v42 = vcvt.f32.s32 %v11034_v46  ;;  %v12477_v46 = vld [vmem:[#allocation67_spill] sm:$0xff] }
 0x5dd   : > { %4312 = vst [vmem:[#allocation1 + $0x5] ss:$9 sm:$0xff] %v3740_v40 }
 0x5de   : > { %4313 = vst [vmem:[#allocation1 + $0x6] ss:$9 sm:$0xff] %v3741_v16 }
 0x5df   : > { %4314 = vst [vmem:[#allocation1 + $0x7] ss:$9 sm:$0xff] %v3742_v31  ;;  %v3117_v31 = vshll.u32 %v3116_v42, 16 }
 0x5e6   : > { %v11193_v62 = vld [vmem:[#allocation1] sm:$0xff] }
 0x5e7   : > { %4316 = vst [vmem:[#allocation1] ss:$9 sm:$0xff] %v3743_v44 }
 0x5e8   : > { %4317 = vst [vmem:[#allocation1 + $0x1] ss:$9 sm:$0xff] %v3744_v35  ;;  %4407 = vperm.xlu2 %7602, %v12469_v30  }
 0x5e9   : > { %4318 = vst [vmem:[#allocation1 + $0x2] ss:$9 sm:$0xff] %v3745_v45  ;;  %v12476_v45 = vld [vmem:[#allocation88_spill] sm:$0xff] }
 0x5ea   : > { %4319 = vst [vmem:[#allocation1 + $0x3] ss:$9 sm:$0xff] %v3746_v32 }
 0x5eb   : > { %4320 = vst [vmem:[#allocation1 + $0x4] ss:$9 sm:$0xff] %v3747_v10 }
 0x5ec   : > { %4321 = vst [vmem:[#allocation1 + $0x5] ss:$9 sm:$0xff] %v3748_v12  ;;  %4410 = vperm.xlu0 %7603, %v12470_v37  }
 0x5ed   : > { %4322 = vst [vmem:[#allocation1 + $0x6] ss:$9 sm:$0xff] %v3749_v47 }
 0x5ee   : > { %4323 = vst [vmem:[#allocation1 + $0x7] ss:$9 sm:$0xff] %v3750_v53 }
 0x5f0   : > { %4416 = vperm.xlu2 %7602, %v12471_v41  }
 0x5f4   : > { %4431 = vperm.xlu0 %7603, %v12472_v33  }
 0x5f8   : > { %4419 = vperm.xlu2 %7602, %v12473_v60   ;;  %v11208_v60 = vld [vmem:[#allocation1] sm:$0xff] }
 0x5fc   : > { %4440 = vperm.xlu0 %7603, %v12474_v58   ;;  %v5932_v44 = vpop.f32.mrf.mxu1 }
 0x5fd   : > { %v5635_v40 = vpop.f32.mrf.mxu0 }
 0x600   : > { %4425 = vperm.xlu2 %7602, %v12475_v15  }
 0x602   : > { %v3114_v16 = vpop.xlane.xlu1 %3113  ;;  %v5466_v35 = vpop.f32.mrf.mxu3 }
 0x603   : > { %v3115_v18 = vcvt.f32.s32 %v3114_v16  ;;  %v11204_v10 = vadd.f32 %v5635_v40, %v5466_v35  ;;  %v6101_v12 = vpop.f32.mrf.mxu2 }
 0x604   : > { %4449 = vperm.xlu0 %7603, %v12476_v45   ;;  %v6102_v30 = vadd.f32 %v6101_v12, %v5932_v44  ;;  %v5934_v44 = vpop.f32.mrf.mxu1 }
 0x605   : > { %v3118_v32 = vadd.s32 %v3117_v31, %v3115_v18  ;;  %v5637_v40 = vpop.f32.mrf.mxu0 }
 0x606   : > { %v6192_v53 = vadd.f32 %v6102_v30, %v11204_v10 }
 0x607   : > { %v3302_v47 = vand.u32 255, %v3118_v32  ;;  %v3132_v32 = vcvt.f32.s32 %v11053_v14  ;;  %v12480_v14 = vld [vmem:[#allocation71_spill] sm:$0xff] }
 0x608   : > { %4434 = vperm.xlu2 %7602, %v12477_v46   ;;  %6256 = vst [vmem:[%s9606_s29 + $0x170] sm:$0xff] %v6192_v53  ;;  %v7546_v53 = vld [vmem:[%s12429_s7 + $0x8] sm:$0xff] }
 0x609   : > { %v3751_v37 = vperm.slane %v3302_v47, 0  ;;  %v3752_v41 = vperm.slane %v3302_v47, 1  ;;  %v3753_v33 = vperm.slane %v3302_v47, 2  ;;  %v3754_v58 = vperm.slane %v3302_v47, 3  ;;  %6380 = vmatpush.bf16.msrb.mxu3 %v7546_v53 }
 0x60a   : > { %v3755_v42 = vperm.slane %v3302_v47, 4  ;;  %vm4876_vm2 = vcmp.eq.s32.totalorder %v8272_v55, %v3302_v47  ;;  %vm4877_vm3 = vcmp.eq.s32.totalorder %v8276_v59, %v3302_v47  ;;  %v3756_v15 = vperm.slane %v3302_v47, 5  ;;  %v5468_v31 = vpop.f32.mrf.mxu3 }
 0x60b   : > { %4325 = vst [vmem:[#allocation1] ss:$9 sm:$0xff] %v3751_v37  ;;  %vm11214_vm7 = vmpackc.low %vm4876_vm2, %vm4874_vm14  ;;  %v3757_v18 = vperm.slane %v3302_v47, 6  ;;  %v11223_v35 = vadd.f32 %v5637_v40, %v5468_v31  ;;  %v6103_v45 = vpop.f32.mrf.mxu2  ;;  %v3758_v12 = vperm.slane %v3302_v47, 7  ;;  %v3133_v46 = vshll.u32 %v3132_v32, 16  ;;  %v12481_v31 = vld [vmem:[#allocation22_spill] sm:$0xff] }
 0x60c   : > { %4326 = vst [vmem:[#allocation1 + $0x1] ss:$9 sm:$0xff] %v3752_v41  ;;  %4458 = vperm.xlu0 %7603, %v9720_v26   ;;  %7192 = vmatmul.msk.bf16.gmra.mxu3 %vm11214_vm7, %v12227_v0  ;;  %vm7255_vm15 = vmpackc.low %vm4877_vm3, %vm4875_vm10  ;;  %v6104_v26 = vadd.f32 %v6103_v45, %v5934_v44 }
 0x60d   : > { %4327 = vst [vmem:[#allocation1 + $0x2] ss:$9 sm:$0xff] %v3753_v33  ;;  %7256 = vmatmul.msk.bf16.gmra.mxu0 %vm7255_vm15, %v12227_v0  ;;  %7448 = vmatmul.msk.bf16.gmra.mxu2 %vm7255_vm15, %v12227_v0  ;;  %v3130_v47 = vpop.xlane.xlu1 %3129  ;;  %v3233_v33 = vand.u32 65535, %v11072_v28 }
 0x60e   : > { %4328 = vst [vmem:[#allocation1 + $0x3] ss:$9 sm:$0xff] %v3754_v58  ;;  %7384 = vmatmul.msk.bf16.gmra.mxu1 %vm11214_vm7, %v12227_v0  ;;  %v6193_v30 = vadd.f32 %v6104_v26, %v11223_v35  ;;  %v3131_v37 = vcvt.f32.s32 %v3130_v47 }
 0x60f   : > { %4329 = vst [vmem:[#allocation1 + $0x4] ss:$9 sm:$0xff] %v3755_v42  ;;  %v3235_v45 = vcvt.s32.f32 %v3233_v33 }
 0x610   : > { %4330 = vst [vmem:[#allocation1 + $0x5] ss:$9 sm:$0xff] %v3756_v15  ;;  %4443 = vperm.xlu2 %7602, %v12480_v14   ;;  %v3134_v41 = vadd.s32 %v3133_v46, %v3131_v37 }
 0x611   : > { %4331 = vst [vmem:[#allocation1 + $0x6] ss:$9 sm:$0xff] %v3757_v18 }
 0x612   : > { %4332 = vst [vmem:[#allocation1 + $0x7] ss:$9 sm:$0xff] %v3758_v12  ;;  %v3303_v58 = vand.u32 255, %v3134_v41  ;;  %v3148_v12 = vcvt.f32.s32 %v11084_v22 }
 0x613   : > { %6257 = vst [vmem:[%s9606_s29 + $0x178] sm:$0xff] %v6193_v30 }
 0x614   : > { %4467 = vperm.xlu0 %7603, %v9933_v7   ;;  %v3759_v42 = vperm.slane %v3303_v58, 0  ;;  %v3760_v15 = vperm.slane %v3303_v58, 1  ;;  %v3761_v40 = vperm.slane %v3303_v58, 2  ;;  %v3762_v18 = vperm.slane %v3303_v58, 3 }
 0x615   : > { %v11244_v44 = vpop.xlane.xlu1 %3237  ;;  %v3763_v32 = vperm.slane %v3303_v58, 4  ;;  %v3764_v7 = vperm.slane %v3303_v58, 5  ;;  %v3765_v26 = vperm.slane %v3303_v58, 6  ;;  %v3766_v30 = vperm.slane %v3303_v58, 7  ;;  %v5937_v47 = vpop.f32.mrf.mxu1 }
 0x616   : > { %vm3239_vm8 = vcmp.eq.f32.partialorder %v11079_v61, %v11244_v44  ;;  %v5640_v14 = vpop.f32.mrf.mxu0  ;;  %v3149_v61 = vshll.u32 %v3148_v12, 16  ;;  %vm4878_vm5 = vcmp.eq.s32.totalorder %v8272_v55, %v3303_v58  ;;  %vm4879_vm9 = vcmp.eq.s32.totalorder %v8276_v59, %v3303_v58 }
 0x617   : > { %v3240_v28 = vsel %vm3239_vm8, %v3235_v45, inf  ;;  %v3180_v58 = vcvt.f32.s32 %v11121_v39 }
 0x618   : > { %4452 = vperm.xlu2 %7602, %v12481_v31   ;;  %3241 = vmin.xlane.f32.xlu1 %v3240_v28 }
 0x619   : > { %v11241_v16 = vld [vmem:[#allocation1] sm:$0xff] }
 0x61a   : > { %4334 = vst [vmem:[#allocation1] ss:$9 sm:$0xff] %v3759_v42 }
 0x61b   : > { %4335 = vst [vmem:[#allocation1 + $0x1] ss:$9 sm:$0xff] %v3760_v15  ;;  %v5471_v46 = vpop.f32.mrf.mxu3 }
 0x61c   : > { %4336 = vst [vmem:[#allocation1 + $0x2] ss:$9 sm:$0xff] %v3761_v40  ;;  %4476 = vperm.xlu0 %7603, %v10019_v4   ;;  %v11250_v41 = vadd.f32 %v5640_v14, %v5471_v46  ;;  %v6106_v22 = vpop.f32.mrf.mxu2 }
 0x61d   : > { %4337 = vst [vmem:[#allocation1 + $0x3] ss:$9 sm:$0xff] %v3762_v18  ;;  %v6107_v33 = vadd.f32 %v6106_v22, %v5937_v47  ;;  %v5939_v18 = vpop.f32.mrf.mxu1  ;;  %v3181_v22 = vshll.u32 %v3180_v58, 16  ;;  %v12487_v58 = vld [vmem:[#allocation48_spill] sm:$0xff] }
 0x61e   : > { %4338 = vst [vmem:[#allocation1 + $0x4] ss:$9 sm:$0xff] %v3763_v32  ;;  %v3146_v53 = vpop.xlane.xlu2 %3145  ;;  %v5642_v40 = vpop.f32.mrf.mxu0 }
 0x61f   : > { %4339 = vst [vmem:[#allocation1 + $0x5] ss:$9 sm:$0xff] %v3764_v7  ;;  %v3147_v37 = vcvt.f32.s32 %v3146_v53  ;;  %v6194_v4 = vadd.f32 %v6107_v33, %v11250_v41  ;;  %v3164_v7 = vcvt.f32.s32 %v11105_v27 }
 0x620   : > { %4340 = vst [vmem:[#allocation1 + $0x6] ss:$9 sm:$0xff] %v3765_v26  ;;  %4461 = vperm.xlu2 %7602, %v9800_v21  }
 0x621   : > { %12482 = vst [vmem:[#allocation72_spill] sm:$0xff] %v11250_v41  ;;  %v3150_v42 = vadd.s32 %v3149_v61, %v3147_v37  ;;  %v3165_v53 = vshll.u32 %v3164_v7, 16 }
 0x622   : > { %4341 = vst [vmem:[#allocation1 + $0x7] ss:$9 sm:$0xff] %v3766_v30 }
 0x623   : > { %v3304_v15 = vand.u32 255, %v3150_v42  ;;  %6258 = vst [vmem:[%s9606_s29 + $0x180] sm:$0xff] %v6194_v4  ;;  %v5473_v31 = vpop.f32.mrf.mxu3 }
 0x624   : > { %4485 = vperm.xlu0 %7603, %v10146_v3   ;;  %v11259_v45 = vadd.f32 %v5642_v40, %v5473_v31  ;;  %v6108_v21 = vpop.f32.mrf.mxu2 }
 0x625   : > { %vm4880_vm12 = vcmp.eq.s32.totalorder %v8272_v55, %v3304_v15  ;;  %vm4881_vm1 = vcmp.eq.s32.totalorder %v8276_v59, %v3304_v15  ;;  %v6109_v3 = vadd.f32 %v6108_v21, %v5939_v18  ;;  %v3767_v28 = vperm.slane %v3304_v15, 0 }
 0x626   : > { %12483 = vst [vmem:[#allocation73_spill] sm:$0xff] %v11259_v45  ;;  %vm7193_vm4 = vmpackc.low %vm4880_vm12, %vm4878_vm5  ;;  %v3768_v26 = vperm.slane %v3304_v15, 1  ;;  %v3769_v27 = vperm.slane %v3304_v15, 2  ;;  %v3770_v47 = vperm.slane %v3304_v15, 3  ;;  %v3771_v46 = vperm.slane %v3304_v15, 4 }
 0x627   : > { %v3162_v32 = vpop.xlane.xlu2 %3161  ;;  %7194 = vmatmul.msk.bf16.gmra.mxu3 %vm7193_vm4, %v12227_v0  ;;  %vm7257_vm11 = vmpackc.low %vm4881_vm1, %vm4879_vm9  ;;  %7386 = vmatmul.msk.bf16.gmra.mxu1 %vm7193_vm4, %v12227_v0  ;;  %v3772_v61 = vperm.slane %v3304_v15, 5  ;;  %v3773_v33 = vperm.slane %v3304_v15, 6  ;;  %v3774_v39 = vperm.slane %v3304_v15, 7  ;;  %vm4601_vm4 = vcmask 130112  }
 0x628   : > { %4470 = vperm.xlu2 %7602, %v9963_v19   ;;  %7258 = vmatmul.msk.bf16.gmra.mxu0 %vm7257_vm11, %v12227_v0  ;;  %v6195_v19 = vadd.f32 %v6109_v3, %v11259_v45  ;;  %v3163_v30 = vcvt.f32.s32 %v3162_v32 }
 0x629   : > { %7450 = vmatmul.msk.bf16.gmra.mxu2 %vm7257_vm11, %v12227_v0  ;;  %v11272_v14 = vld [vmem:[#allocation1] sm:$0xff] }
 0x62a   : > { %6259 = vst [vmem:[%s9606_s29 + $0x188] sm:$0xff] %v6195_v19  ;;  %v3166_v42 = vadd.s32 %v3165_v53, %v3163_v30 }
 0x62b   : > { %4343 = vst [vmem:[#allocation1] ss:$9 sm:$0xff] %v3767_v28  ;;  %v12485_v28 = vld [vmem:[#allocation56_spill] sm:$0xff] }
 0x62c   : > { %4494 = vperm.xlu0 %7603, %v10305_v49   ;;  %4344 = vst [vmem:[#allocation1 + $0x1] ss:$9 sm:$0xff] %v3768_v26  ;;  %v3305_v21 = vand.u32 255, %v3166_v42  ;;  %v12486_v26 = vld [vmem:[#allocation36_spill] sm:$0xff] }
 0x62d   : > { %4345 = vst [vmem:[#allocation1 + $0x2] ss:$9 sm:$0xff] %v3769_v27  ;;  %v5942_v18 = vpop.f32.mrf.mxu1 }
 0x62e   : > { %v5645_v40 = vpop.f32.mrf.mxu0  ;;  %4346 = vst [vmem:[#allocation1 + $0x3] ss:$9 sm:$0xff] %v3770_v47  ;;  %vm4882_vm13 = vcmp.eq.s32.totalorder %v8272_v55, %v3305_v21  ;;  %v3775_v19 = vperm.slane %v3305_v21, 0  ;;  %vm4883_vm3 = vcmp.eq.s32.totalorder %v8276_v59, %v3305_v21  ;;  %v3776_v27 = vperm.slane %v3305_v21, 1 }
 0x62f   : > { %4347 = vst [vmem:[#allocation1 + $0x4] ss:$9 sm:$0xff] %v3771_v46  ;;  %v3777_v30 = vperm.slane %v3305_v21, 2  ;;  %v3778_v46 = vperm.slane %v3305_v21, 3 }
 0x630   : > { %4479 = vperm.xlu2 %7602, %v10065_v38   ;;  %4348 = vst [vmem:[#allocation1 + $0x5] ss:$9 sm:$0xff] %v3772_v61 }
 0x631   : > { %4349 = vst [vmem:[#allocation1 + $0x6] ss:$9 sm:$0xff] %v3773_v33  ;;  %4413 = vperm.xlu1 %7604, %v12486_v26   ;;  %v3212_v26 = vcvt.f32.s32 %v11165_v54 }
 0x632   : > { %4350 = vst [vmem:[#allocation1 + $0x7] ss:$9 sm:$0xff] %v3774_v39  ;;  %v3779_v39 = vperm.slane %v3305_v21, 4 }
 0x633   : > { %v3178_v37 = vpop.xlane.xlu0 %3177  ;;  %v5476_v49 = vpop.f32.mrf.mxu3 }
 0x634   : > { %v3179_v4 = vcvt.f32.s32 %v3178_v37  ;;  %v11279_v3 = vadd.f32 %v5645_v40, %v5476_v49  ;;  %v6111_v7 = vpop.f32.mrf.mxu2  ;;  %4503 = vperm.xlu0 %7603, %v12485_v28   ;;  %v3781_v49 = vperm.slane %v3305_v21, 6  ;;  %v3196_v28 = vcvt.f32.s32 %v11151_v23 }
 0x635   : > { %v6112_v15 = vadd.f32 %v6111_v7, %v5942_v18  ;;  %v5944_v61 = vpop.f32.mrf.mxu1 }
 0x636   : > { %v3182_v31 = vadd.s32 %v3181_v22, %v3179_v4  ;;  %12484 = vst [vmem:[#allocation74_spill] sm:$0xff] %v11279_v3  ;;  %v5647_v47 = vpop.f32.mrf.mxu0  ;;  %v12489_v4 = vld [vmem:[#allocation47_spill] sm:$0xff] }
 0x637   : > { %v6196_v38 = vadd.f32 %v6112_v15, %v11279_v3  ;;  %v12490_v15 = vld [vmem:[#allocation52_spill] sm:$0xff] }
 0x638   : > { %v11277_v32 = vand.u32 255, %v3182_v31  ;;  %4488 = vperm.xlu2 %7602, %v12487_v58   ;;  %v3780_v31 = vperm.slane %v3305_v21, 5  ;;  %v3197_v58 = vshll.u32 %v3196_v28, 16 }
 0x639   : > { %6260 = vst [vmem:[%s9606_s29 + $0x190] sm:$0xff] %v6196_v38  ;;  %v11298_v33 = vld [vmem:[#allocation1] sm:$0xff]  ;;  %4422 = vperm.xlu1 %7604, %v12489_v4  }
 0x63a   : > { %vm4884_vm6 = vcmp.eq.s32.totalorder %v8272_v55, %v11277_v32  ;;  %vm4885_vm14 = vcmp.eq.s32.totalorder %v8276_v59, %v11277_v32  ;;  %4352 = vst [vmem:[#allocation1] ss:$9 sm:$0xff] %v3775_v19  ;;  %v3784_v54 = vperm.slane %v11277_v32, 1  ;;  %v3786_v28 = vperm.slane %v11277_v32, 3 }
 0x63b   : > { %vm7195_vm2 = vmpackc.low %vm4884_vm6, %vm4882_vm13  ;;  %v5478_v53 = vpop.f32.mrf.mxu3  ;;  %4353 = vst [vmem:[#allocation1 + $0x1] ss:$9 sm:$0xff] %v3776_v27  ;;  %v3194_v7 = vpop.xlane.xlu1 %3193  ;;  %v12491_v27 = vld [vmem:[#allocation33_spill] sm:$0xff] }
 0x63c   : > { %7196 = vmatmul.msk.bf16.gmra.mxu3 %vm7195_vm2, %v12227_v0  ;;  %vm7259_vm7 = vmpackc.low %vm4885_vm14, %vm4883_vm3  ;;  %7388 = vmatmul.msk.bf16.gmra.mxu1 %vm7195_vm2, %v12227_v0  ;;  %v11296_v37 = vadd.f32 %v5647_v47, %v5478_v53  ;;  %v6113_v22 = vpop.f32.mrf.mxu2  ;;  %4354 = vst [vmem:[#allocation1 + $0x2] ss:$9 sm:$0xff] %v3777_v30  ;;  %v3195_v38 = vcvt.f32.s32 %v3194_v7  ;;  %v12492_v30 = vld [vmem:[#allocation8_spill] sm:$0xff]  ;;  %v3213_v47 = vshll.u32 %v3212_v26, 16  ;;  %vm4605_vm3 = vcmask 195712  }
 0x63d   : > { %7260 = vmatmul.msk.bf16.gmra.mxu0 %vm7259_vm7, %v12227_v0  ;;  %7452 = vmatmul.msk.bf16.gmra.mxu2 %vm7259_vm7, %v12227_v0  ;;  %v6114_v42 = vadd.f32 %v6113_v22, %v5944_v61  ;;  %4355 = vst [vmem:[#allocation1 + $0x3] ss:$9 sm:$0xff] %v3778_v46  ;;  %v3783_v46 = vperm.slane %v11277_v32, 0  ;;  %vm4609_vm7 = vcmask 261312  }
 0x63e   : > { %12488 = vst [vmem:[#allocation77_spill] sm:$0xff] %v11296_v37  ;;  %4512 = vperm.xlu0 %7603, %v10566_v52   ;;  %v3782_v52 = vperm.slane %v3305_v21, 7  ;;  %v3198_v53 = vadd.s32 %v3197_v58, %v3195_v38  ;;  %v12495_v38 = vld [vmem:[#allocation15_spill] sm:$0xff]  ;;  %v3787_v58 = vperm.slane %v11277_v32, 4 }
 0x63f   : > { %v6197_v18 = vadd.f32 %v6114_v42, %v11296_v37  ;;  %4356 = vst [vmem:[#allocation1 + $0x4] ss:$9 sm:$0xff] %v3779_v39  ;;  %v12493_v42 = vld [vmem:[#allocation59_spill] sm:$0xff]  ;;  %v3785_v39 = vperm.slane %v11277_v32, 2 }
 0x640   : > { %4497 = vperm.xlu2 %7602, %v12490_v15   ;;  %4357 = vst [vmem:[#allocation1 + $0x5] ss:$9 sm:$0xff] %v3780_v31  ;;  %v11315_v31 = vand.u32 255, %v3198_v53  ;;  %v3790_v53 = vperm.slane %v11277_v32, 7 }
 0x641   : > { %6261 = vst [vmem:[%s9606_s29 + $0x198] sm:$0xff] %v6197_v18  ;;  %4428 = vperm.xlu1 %7604, %v12492_v30  }
 0x642   : > { %4358 = vst [vmem:[#allocation1 + $0x6] ss:$9 sm:$0xff] %v3781_v49  ;;  %vm4886_vm10 = vcmp.eq.s32.totalorder %v8272_v55, %v11315_v31  ;;  %vm4887_vm5 = vcmp.eq.s32.totalorder %v8276_v59, %v11315_v31 }
 0x643   : > { %v3210_v19 = vpop.xlane.xlu2 %3209  ;;  %4359 = vst [vmem:[#allocation1 + $0x7] ss:$9 sm:$0xff] %v3782_v52  ;;  %v5947_v22 = vpop.f32.mrf.mxu1 }
 0x644   : > { %v3211_v23 = vcvt.f32.s32 %v3210_v19  ;;  %v5650_v21 = vpop.f32.mrf.mxu0  ;;  %v12496_v19 = vld [vmem:[#allocation13_spill] sm:$0xff] }
 0x646   : > { %4521 = vperm.xlu0 %7603, %v12491_v27   ;;  %v3214_v61 = vadd.s32 %v3213_v47, %v3211_v23  ;;  %v3788_v27 = vperm.slane %v11277_v32, 5  ;;  %v3789_v47 = vperm.slane %v11277_v32, 6 }
 0x648   : > { %4506 = vperm.xlu2 %7602, %v12493_v42   ;;  %v11317_v18 = vand.u32 255, %v3214_v61  ;;  %v12497_v61 = vld [vmem:[#allocation63_spill] sm:$0xff]  ;;  %v7545_v42 = vld [vmem:[%s12429_s7] sm:$0xff] }
 0x649   : > { %v5481_v4 = vpop.f32.mrf.mxu3  ;;  %4437 = vperm.xlu1 %7604, %v12496_v19   ;;  %6381 = vmatpush.bf16.msrb.mxu3 %v7545_v42  ;;  %v3792_v19 = vperm.slane %v11315_v31, 1  ;;  %v3798_v42 = vperm.slane %v11315_v31, 7 }
 0x64a   : > { %v11319_v49 = vadd.f32 %v5650_v21, %v5481_v4  ;;  %v6116_v7 = vpop.f32.mrf.mxu2  ;;  %v11324_v26 = vld [vmem:[#allocation1] sm:$0xff]  ;;  %vm4888_vm15 = vcmp.eq.s32.totalorder %v8272_v55, %v11317_v18  ;;  %vm4889_vm12 = vcmp.eq.s32.totalorder %v8276_v59, %v11317_v18 }
 0x64b   : > { %v6117_v52 = vadd.f32 %v6116_v7, %v5947_v22  ;;  %v11322_v15 = vpop.permute.xlu2 %4407  ;;  %4361 = vst [vmem:[#allocation1] ss:$9 sm:$0xff] %v3783_v46  ;;  %vm7197_vm8 = vmpackc.low %vm4888_vm15, %vm4886_vm10  ;;  %v5949_v46 = vpop.f32.mrf.mxu1  ;;  %vm4613_vm10 = vcmask 326912   ;;  %vm4617_vm15 = vcmask 392512  }
 0x64c   : > { %12494 = vst [vmem:[#allocation78_spill] sm:$0xff] %v11319_v49  ;;  %7198 = vmatmul.msk.bf16.gmra.mxu3 %vm7197_vm8, %v12227_v0  ;;  %vm7261_vm1 = vmpackc.low %vm4889_vm12, %vm4887_vm5  ;;  %7390 = vmatmul.msk.bf16.gmra.mxu1 %vm7197_vm8, %v12227_v0  ;;  %v5652_v23 = vpop.f32.mrf.mxu0  ;;  %v3226_v7 = vpop.xlane.xlu0 %3225  ;;  %vm4621_vm8 = vcmask 458112   ;;  %vm4625_vm5 = vcmask 523712   ;;  %vm4629_vm12 = vcmask 589312  }
 0x64d   : > { %4362 = vst [vmem:[#allocation1 + $0x1] ss:$9 sm:$0xff] %v3784_v54  ;;  %v6198_v30 = vadd.f32 %v6117_v52, %v11319_v49  ;;  %7262 = vmatmul.msk.bf16.gmra.mxu0 %vm7261_vm1, %v12227_v0  ;;  %7454 = vmatmul.msk.bf16.gmra.mxu2 %vm7261_vm1, %v12227_v0  ;;  %vm4633_vm1 = vcmask 654912  }
 0x64e   : > { %4530 = vperm.xlu0 %7603, %v12495_v38   ;;  %4363 = vst [vmem:[#allocation1 + $0x2] ss:$9 sm:$0xff] %v3785_v39  ;;  %v12499_v39 = vld [vmem:[#allocation76_spill] sm:$0xff]  ;;  %v3791_v38 = vperm.slane %v11315_v31, 0 }
 0x64f   : > { %4364 = vst [vmem:[#allocation1 + $0x3] ss:$9 sm:$0xff] %v3786_v28  ;;  %v12510_v28 = vld [vmem:[#allocation65_spill] sm:$0xff] }
 0x650   : > { %6262 = vst [vmem:[%s9606_s29 + $0x1a0] sm:$0xff] %v6198_v30  ;;  %4515 = vperm.xlu2 %7602, %v12497_v61   ;;  %v3797_v61 = vperm.slane %v11315_v31, 6 }
 0x651   : > { %v5483_v21 = vpop.f32.mrf.mxu3  ;;  %4365 = vst [vmem:[#allocation1 + $0x4] ss:$9 sm:$0xff] %v3787_v58  ;;  %4446 = vperm.xlu1 %7604, %v12499_v39   ;;  %v3793_v58 = vperm.slane %v11315_v31, 2 }
 0x652   : > { %v11347_v22 = vadd.f32 %v5652_v23, %v5483_v21  ;;  %v6118_v32 = vpop.f32.mrf.mxu2  ;;  %4366 = vst [vmem:[#allocation1 + $0x5] ss:$9 sm:$0xff] %v3788_v27  ;;  %v12500_v27 = vld [vmem:[#allocation11_spill] sm:$0xff]  ;;  %v3795_v23 = vperm.slane %v11315_v31, 4  ;;  %v12501_v21 = vld [vmem:[#allocation90_spill] sm:$0xff] }
 0x653   : > { %v6119_v54 = vadd.f32 %v6118_v32, %v5949_v46  ;;  %v11352_v4 = vpop.permute.xlu2 %4416  ;;  %4367 = vst [vmem:[#allocation1 + $0x6] ss:$9 sm:$0xff] %v3789_v47  ;;  %v11368_v47 = vadd.s32 4294967288, %v8272_v55  ;;  %v3796_v46 = vperm.slane %v11315_v31, 5 }
 0x654   : > { %12498 = vst [vmem:[#allocation80_spill] sm:$0xff] %v11347_v22 }
 0x655   : > { %4368 = vst [vmem:[#allocation1 + $0x7] ss:$9 sm:$0xff] %v3790_v53  ;;  %v6199_v52 = vadd.f32 %v6119_v54, %v11347_v22  ;;  %v4598_v54 = vperm.slane %v11322_v15, %v8272_v55  ;;  %v3799_v15 = vperm.slane %v11317_v18, 0 }
 0x656   : > { %4539 = vperm.xlu0 %7603, %v10977_v1   ;;  %v3794_v1 = vperm.slane %v11315_v31, 3  ;;  %v12503_v31 = vld [vmem:[#allocation35_spill] sm:$0xff] }
 0x657   : > { %6263 = vst [vmem:[%s9606_s29 + $0x1a8] sm:$0xff] %v6199_v52  ;;  %v12502_v52 = vld [vmem:[#allocation18_spill] sm:$0xff] }
 0x658   : > { %4524 = vperm.xlu2 %7602, %v12500_v27   ;;  %v3800_v27 = vperm.slane %v11317_v18, 1 }
 0x659   : > { %4455 = vperm.xlu1 %7604, %v12501_v21   ;;  %v3227_v21 = vcvt.f32.s32 %v3226_v7 }
 0x65b   : > { %v11365_v30 = vpop.permute.xlu2 %4419 }
 0x65c   : > { %v11370_v53 = vld [vmem:[#allocation1] sm:$0xff] }
 0x65d   : > { %4370 = vst [vmem:[#allocation1] ss:$9 sm:$0xff] %v3791_v38 }
 0x65e   : > { %4548 = vperm.xlu0 %7603, %v11036_v50   ;;  %4371 = vst [vmem:[#allocation1 + $0x1] ss:$9 sm:$0xff] %v3792_v19  ;;  %v4411_v32 = vpop.permute.xlu0 %4410 }
 0x65f   : > { %4372 = vst [vmem:[#allocation1 + $0x2] ss:$9 sm:$0xff] %v3793_v58  ;;  %v4600_v39 = vperm.slane %v4411_v32, %v11368_v47  ;;  %v3228_v58 = vcvt.f32.s32 %v11177_v51  ;;  %v12504_v51 = vld [vmem:[#allocation75_spill] sm:$0xff] }
 0x660   : > { %4373 = vst [vmem:[#allocation1 + $0x3] ss:$9 sm:$0xff] %v3794_v1  ;;  %4533 = vperm.xlu2 %7602, %v12502_v52   ;;  %v3801_v1 = vperm.slane %v11317_v18, 2 }
 0x661   : > { %4374 = vst [vmem:[#allocation1 + $0x4] ss:$9 sm:$0xff] %v3795_v23  ;;  %v11382_v50 = vsel %vm4601_vm4, %v4600_v39, %v4598_v54  ;;  %4464 = vperm.xlu1 %7604, %v12503_v31   ;;  %v3802_v23 = vperm.slane %v11317_v18, 3  ;;  %v3229_v32 = vshll.u32 %v3228_v58, 16  ;;  %v3805_v54 = vperm.slane %v11317_v18, 6  ;;  %v12505_v31 = vld [vmem:[#allocation42_spill] sm:$0xff] }
 0x662   : > { %4375 = vst [vmem:[#allocation1 + $0x5] ss:$9 sm:$0xff] %v3796_v46 }
 0x663   : > { %4376 = vst [vmem:[#allocation1 + $0x6] ss:$9 sm:$0xff] %v3797_v61  ;;  %v11385_v38 = vpop.permute.xlu2 %4425  ;;  %v3230_v7 = vadd.s32 %v3229_v32, %v3227_v21  ;;  %v12506_v32 = vld [vmem:[#allocation50_spill] sm:$0xff] }
 0x664   : > { %4377 = vst [vmem:[#allocation1 + $0x7] ss:$9 sm:$0xff] %v3798_v42  ;;  %v3804_v42 = vperm.slane %v11317_v18, 5 }
 0x665   : > { %v11409_v52 = vand.u32 255, %v3230_v7  ;;  %v3244_v7 = vcvt.f32.s32 %v11244_v44 }
 0x666   : > { %4557 = vperm.xlu0 %7603, %v11126_v56   ;;  %v11389_v19 = vpop.permute.xlu0 %4431  ;;  %v3803_v56 = vperm.slane %v11317_v18, 4 }
 0x667   : > { %v3808_v58 = vperm.slane %v11409_v52, 1  ;;  %vm4890_vm9 = vcmp.eq.s32.totalorder %v8272_v55, %v11409_v52  ;;  %vm4891_vm14 = vcmp.eq.s32.totalorder %v8276_v59, %v11409_v52 }
 0x668   : > { %4542 = vperm.xlu2 %7602, %v10998_v13   ;;  %v3806_v13 = vperm.slane %v11317_v18, 7  ;;  %v3807_v18 = vperm.slane %v11409_v52, 0 }
 0x669   : > { %4473 = vperm.xlu1 %7604, %v12504_v51  }
 0x66b   : > { %v11397_v46 = vld [vmem:[#allocation1] sm:$0xff]  ;;  %v11400_v61 = vpop.permute.xlu2 %4434 }
 0x66c   : > { %4379 = vst [vmem:[#allocation1] ss:$9 sm:$0xff] %v3799_v15 }
 0x66d   : > { %4380 = vst [vmem:[#allocation1 + $0x1] ss:$9 sm:$0xff] %v3800_v27  ;;  %v3809_v27 = vperm.slane %v11409_v52, 2 }
 0x66e   : > { %4566 = vperm.xlu0 %7603, %v11193_v62   ;;  %4381 = vst [vmem:[#allocation1 + $0x2] ss:$9 sm:$0xff] %v3801_v1  ;;  %v11407_v39 = vpop.permute.xlu0 %4440  ;;  %v3810_v1 = vperm.slane %v11409_v52, 3 }
 0x66f   : > { %4382 = vst [vmem:[#allocation1 + $0x3] ss:$9 sm:$0xff] %v3802_v23 }
 0x670   : > { %4383 = vst [vmem:[#allocation1 + $0x4] ss:$9 sm:$0xff] %v3803_v56  ;;  %4551 = vperm.xlu2 %7602, %v11063_v34   ;;  %v3811_v34 = vperm.slane %v11409_v52, 4  ;;  %v3813_v56 = vperm.slane %v11409_v52, 6 }
 0x671   : > { %4384 = vst [vmem:[#allocation1 + $0x5] ss:$9 sm:$0xff] %v3804_v42  ;;  %4482 = vperm.xlu1 %7604, %v12505_v31   ;;  %v3814_v42 = vperm.slane %v11409_v52, 7 }
 0x672   : > { %4385 = vst [vmem:[#allocation1 + $0x6] ss:$9 sm:$0xff] %v3805_v54  ;;  %v12507_v54 = vld [vmem:[#allocation54_spill] sm:$0xff] }
 0x673   : > { %4386 = vst [vmem:[#allocation1 + $0x7] ss:$9 sm:$0xff] %v3806_v13  ;;  %v11412_v62 = vpop.permute.xlu2 %4443 }
 0x676   : > { %4575 = vperm.xlu0 %7603, %v11272_v14   ;;  %v11417_v15 = vpop.permute.xlu0 %4449  ;;  %v3812_v14 = vperm.slane %v11409_v52, 5  ;;  %v12512_v52 = vld [vmem:[#allocation14_spill] sm:$0xff] }
 0x678   : > { %4560 = vperm.xlu2 %7602, %v11158_v17  }
 0x679   : > { %4491 = vperm.xlu1 %7604, %v12506_v32  }
 0x67a   : > { %v11422_v23 = vld [vmem:[#allocation1] sm:$0xff] }
 0x67b   : > { %4388 = vst [vmem:[#allocation1] ss:$9 sm:$0xff] %v3807_v18  ;;  %v11427_v21 = vpop.permute.xlu2 %4452  ;;  %v12508_v18 = vld [vmem:[#allocation9_spill] sm:$0xff] }
 0x67c   : > { %4389 = vst [vmem:[#allocation1 + $0x1] ss:$9 sm:$0xff] %v3808_v58 }
 0x67d   : > { %4390 = vst [vmem:[#allocation1 + $0x2] ss:$9 sm:$0xff] %v3809_v27 }
 0x67e   : > { %4584 = vperm.xlu0 %7603, %v11370_v53   ;;  %4391 = vst [vmem:[#allocation1 + $0x3] ss:$9 sm:$0xff] %v3810_v1  ;;  %v11433_v51 = vpop.permute.xlu0 %4458 }
 0x67f   : > { %4392 = vst [vmem:[#allocation1 + $0x4] ss:$9 sm:$0xff] %v3811_v34  ;;  %v3245_v34 = vshll.u32 %v3244_v7, 16 }
 0x680   : > { %4393 = vst [vmem:[#allocation1 + $0x5] ss:$9 sm:$0xff] %v3812_v14  ;;  %4569 = vperm.xlu2 %7602, %v11208_v60  }
 0x681   : > { %4394 = vst [vmem:[#allocation1 + $0x6] ss:$9 sm:$0xff] %v3813_v56  ;;  %4500 = vperm.xlu1 %7604, %v12507_v54  }
 0x682   : > { %4395 = vst [vmem:[#allocation1 + $0x7] ss:$9 sm:$0xff] %v3814_v42 }
 0x683   : > { %v11436_v17 = vpop.permute.xlu2 %4461 }
 0x686   : > { %v11439_v13 = vpop.permute.xlu0 %4467 }
 0x688   : > { %4578 = vperm.xlu2 %7602, %v11298_v33  }
 0x689   : > { %v4396_v53 = vld [vmem:[#allocation1] sm:$0xff]  ;;  %4509 = vperm.xlu1 %7604, %v12508_v18  }
 0x68a   : > { %4593 = vperm.xlu0 %7603, %v4396_v53   ;;  %v5655_v58 = vpop.f32.mrf.mxu0 }
 0x68b   : > { %v11443_v31 = vpop.permute.xlu2 %4470  ;;  %v5952_v27 = vpop.f32.mrf.mxu1 }
 0x68c   : > { %v3242_v60 = vpop.xlane.xlu1 %3241 }
 0x68d   : > { %v3243_v14 = vcvt.f32.s32 %v3242_v60 }
 0x68e   : > { %v11446_v1 = vpop.permute.xlu0 %4476 }
 0x68f   : > { %v5486_v56 = vpop.f32.mrf.mxu3  ;;  %v3246_v54 = vadd.s32 %v3245_v34, %v3243_v14 }
 0x690   : > { %v11448_v32 = vadd.f32 %v5655_v58, %v5486_v56  ;;  %v6121_v42 = vpop.f32.mrf.mxu2  ;;  %4587 = vperm.xlu2 %7602, %v11397_v46  }
 0x691   : > { %v6122_v33 = vadd.f32 %v6121_v42, %v5952_v27  ;;  %v3310_v53 = vand.u32 255, %v3246_v54  ;;  %4518 = vperm.xlu1 %7604, %v12510_v28  }
 0x692   : > { %12509 = vst [vmem:[#allocation81_spill] sm:$0xff] %v11448_v32  ;;  %v5657_v34 = vpop.f32.mrf.mxu0 }
 0x693   : > { %v11451_v44 = vpop.permute.xlu2 %4479  ;;  %v6200_v18 = vadd.f32 %v6122_v33, %v11448_v32  ;;  %v3815_v40 = vperm.slane %v3310_v53, 0  ;;  %v3816_v12 = vperm.slane %v3310_v53, 1  ;;  %v3817_v25 = vperm.slane %v3310_v53, 2  ;;  %v5954_v28 = vpop.f32.mrf.mxu1 }
 0x694   : > { %v3818_v58 = vperm.slane %v3310_v53, 3  ;;  %v3819_v60 = vperm.slane %v3310_v53, 4  ;;  %vm4892_vm11 = vcmp.eq.s32.totalorder %v8272_v55, %v3310_v53  ;;  %vm4893_vm13 = vcmp.eq.s32.totalorder %v8276_v59, %v3310_v53 }
 0x695   : > { %6264 = vst [vmem:[%s9606_s29 + $0x1b0] sm:$0xff] %v6200_v18  ;;  %v3820_v27 = vperm.slane %v3310_v53, 5  ;;  %vm7199_vm6 = vmpackc.low %vm4892_vm11, %vm4890_vm9  ;;  %v3822_v54 = vperm.slane %v3310_v53, 7  ;;  %v12513_v18 = vld [vmem:[#allocation20_spill] sm:$0xff]  ;;  %vm4637_vm9 = vcmask 720512   ;;  %vm4641_vm11 = vcmask 786112  }
 0x696   : > { %v11456_v7 = vpop.permute.xlu0 %4485  ;;  %4397 = vst [vmem:[#allocation1] ss:$9 sm:$0xff] %v3815_v40  ;;  %v3821_v40 = vperm.slane %v3310_v53, 6  ;;  %7200 = vmatmul.msk.bf16.gmra.mxu3 %vm7199_vm6, %v12227_v0  ;;  %vm7263_vm2 = vmpackc.low %vm4893_vm13, %vm4891_vm14  ;;  %7392 = vmatmul.msk.bf16.gmra.mxu1 %vm7199_vm6, %v12227_v0  ;;  %vm4645_vm13 = vcmask 851712   ;;  %vm4649_vm6 = vcmask 917312   ;;  %vm4653_vm14 = vcmask 982912  }
 0x697   : > { %v5488_v46 = vpop.f32.mrf.mxu3  ;;  %4398 = vst [vmem:[#allocation1 + $0x1] ss:$9 sm:$0xff] %v3816_v12  ;;  %7264 = vmatmul.msk.bf16.gmra.mxu0 %vm7263_vm2, %v12227_v0  ;;  %7456 = vmatmul.msk.bf16.gmra.mxu2 %vm7263_vm2, %v12227_v0  ;;  %v11483_v0 = vadd.s32 4294967272, %v8272_v55  ;;  %vm12169_vm2 = vcmask 1048512  }
 0x698   : > { %v11464_v14 = vadd.f32 %v5657_v34, %v5488_v46  ;;  %v6123_v56 = vpop.f32.mrf.mxu2  ;;  %4399 = vst [vmem:[#allocation1 + $0x2] ss:$9 sm:$0xff] %v3817_v25  ;;  %v11489_v34 = vadd.s32 4294967280, %v8272_v55 }
 0x699   : > { %v6124_v42 = vadd.f32 %v6123_v56, %v5954_v28  ;;  %4400 = vst [vmem:[#allocation1 + $0x3] ss:$9 sm:$0xff] %v3818_v58  ;;  %4527 = vperm.xlu1 %7604, %v12512_v52   ;;  %v12515_v28 = vld [vmem:[#allocation23_spill] sm:$0xff] }
 0x69a   : > { %12511 = vst [vmem:[#allocation82_spill] sm:$0xff] %v11464_v14 }
 0x69b   : > { %4401 = vst [vmem:[#allocation1 + $0x4] ss:$9 sm:$0xff] %v3819_v60  ;;  %v11472_v12 = vpop.permute.xlu2 %4488  ;;  %v6201_v25 = vadd.f32 %v6124_v42, %v11464_v14  ;;  %v11486_v60 = vadd.s32 4294967264, %v8272_v55 }
 0x69c   : > { %4402 = vst [vmem:[#allocation1 + $0x5] ss:$9 sm:$0xff] %v3820_v27  ;;  %v12514_v27 = vld [vmem:[#allocation21_spill] sm:$0xff] }
 0x69d   : > { %4403 = vst [vmem:[#allocation1 + $0x6] ss:$9 sm:$0xff] %v3821_v40  ;;  %v6274_v56 = vpack.c.bf16 %v12515_v28, %v12514_v27 }
 0x69e   : > { %4404 = vst [vmem:[#allocation1 + $0x7] ss:$9 sm:$0xff] %v3822_v54  ;;  %v11476_v33 = vpop.permute.xlu0 %4494 }
 0x69f   : > { %6265 = vst [vmem:[%s9606_s29 + $0x1b8] sm:$0xff] %v6201_v25  ;;  %v4608_v25 = vperm.slane %v11352_v4, %v11483_v0 }
 0x6a1   : > { %4536 = vperm.xlu1 %7604, %v12513_v18   ;;  %v4612_v18 = vperm.slane %v11365_v30, %v11486_v60 }
 0x6a3   : > { %v11479_v53 = vpop.permute.xlu2 %4497  ;;  %v4414_v42 = vpop.permute.xlu1 %4413 }
 0x6a4   : > { %v5957_v46 = vpop.f32.mrf.mxu1  ;;  %v4604_v54 = vperm.slane %v4414_v42, %v11489_v34 }
 0x6a5   : > { %v4405_v58 = vld [vmem:[#allocation1] sm:$0xff]  ;;  %v5660_v40 = vpop.f32.mrf.mxu0 }
 0x6a6   : > { %4596 = vperm.xlu2 %7602, %v4405_v58   ;;  %v4504_v52 = vpop.permute.xlu0 %4503  ;;  %6382 = vmatmul.bf16.vlgmr.msrb.gmra.mxu3 %v6274_v56  ;;  %v4606_v58 = vsel %vm4605_vm3, %v4604_v54, %v11382_v50  ;;  %v11506_v56 = vadd.s32 4294967248, %v8272_v55  ;;  %v11511_v50 = vadd.s32 4294967256, %v8272_v55 }
 0x6a7   : > { %v4610_v27 = vsel %vm4609_vm7, %v4608_v25, %v4606_v58  ;;  %v4690_v28 = vperm.slane %v4504_v52, %v8272_v55 }
 0x6a8   : > { %v4614_v4 = vsel %vm4613_vm10, %v4612_v18, %v4610_v27 }
 0x6a9   : > { %4545 = vperm.xlu1 %7604, %v11006_v8  }
 0x6aa   : > { %v5491_v42 = vpop.f32.mrf.mxu3 }
 0x6ab   : > { %v4507_v59 = vpop.permute.xlu2 %4506  ;;  %v11508_v30 = vadd.f32 %v5660_v40, %v5491_v42  ;;  %v4620_v40 = vperm.slane %v11385_v38, %v11506_v56  ;;  %v11533_v38 = vadd.s32 4294967240, %v8272_v55 }
 0x6ac   : > { %v4691_v20 = vperm.slane %v4507_v59, %v11368_v47  ;;  %v6126_v32 = vpop.f32.mrf.mxu2  ;;  %v4423_v59 = vpop.permute.xlu1 %4422 }
 0x6ad   : > { %12516 = vst [vmem:[#allocation83_spill] sm:$0xff] %v11508_v30  ;;  %v6127_v25 = vadd.f32 %v6126_v32, %v5957_v46  ;;  %v5662_v52 = vpop.f32.mrf.mxu0  ;;  %v4616_v18 = vperm.slane %v4423_v59, %v11511_v50  ;;  %v5959_v58 = vpop.f32.mrf.mxu1  ;;  %v11525_v32 = vadd.s32 4294967232, %v8272_v55 }
 0x6ae   : > { %v11514_v54 = vsel %vm4601_vm4, %v4691_v20, %v4690_v28 }
 0x6af   : > { %v6202_v8 = vadd.f32 %v6127_v25, %v11508_v30  ;;  %v4618_v27 = vsel %vm4617_vm15, %v4616_v18, %v4614_v4  ;;  %v11530_v25 = vadd.s32 4294967224, %v8272_v55  ;;  %v12518_v4 = vld [vmem:[#allocation24_spill] sm:$0xff] }
 0x6b0   : > { %v4622_v42 = vsel %vm4621_vm8, %v4620_v40, %v4618_v27 }
 0x6b1   : > { %6266 = vst [vmem:[%s9606_s29 + $0x1c0] sm:$0xff] %v6202_v8  ;;  %4554 = vperm.xlu1 %7604, %v11093_v9   ;;  %v12519_v8 = vld [vmem:[#allocation91_spill] sm:$0xff] }
 0x6b2   : > { %v5493_v20 = vpop.f32.mrf.mxu3  ;;  %v6275_v18 = vpack.c.bf16 %v12519_v8, %v12518_v4 }
 0x6b3   : > { %v11527_v46 = vadd.f32 %v5662_v52, %v5493_v20  ;;  %v4628_v20 = vperm.slane %v11389_v19, %v11525_v32  ;;  %v11551_v19 = vadd.s32 4294967208, %v8272_v55 }
 0x6b4   : > { %v6128_v28 = vpop.f32.mrf.mxu2  ;;  %v4429_v40 = vpop.permute.xlu1 %4428 }
 0x6b5   : > { %12517 = vst [vmem:[#allocation84_spill] sm:$0xff] %v11527_v46  ;;  %v6129_v59 = vadd.f32 %v6128_v28, %v5959_v58  ;;  %v4624_v27 = vperm.slane %v4429_v40, %v11533_v38  ;;  %v4632_v58 = vperm.slane %v11400_v61, %v11530_v25  ;;  %v11556_v61 = vadd.s32 4294967200, %v8272_v55 }
 0x6b6   : > { %6387 = vmatmul.bf16.gmra.mxu3 %v6275_v18 }
 0x6b7   : > { %v6203_v52 = vadd.f32 %v6129_v59, %v11527_v46  ;;  %v4626_v4 = vsel %vm4625_vm5, %v4624_v27, %v4622_v42  ;;  %v11559_v42 = vadd.s32 4294967216, %v8272_v55 }
 0x6b8   : > { %v4630_v9 = vsel %vm4629_vm12, %v4628_v20, %v4626_v4  ;;  %v4640_v20 = vperm.slane %v11407_v39, %v11551_v19 }
 0x6b9   : > { %6267 = vst [vmem:[%s9606_s29 + $0x1c8] sm:$0xff] %v6203_v52  ;;  %v5962_v8 = vpop.f32.mrf.mxu1  ;;  %4563 = vperm.xlu1 %7604, %v11185_v24   ;;  %v4634_v59 = vsel %vm4633_vm1, %v4632_v58, %v4630_v9 }
 0x6ba   : > { %v5665_v28 = vpop.f32.mrf.mxu0 }
 0x6bc   : > { %v4438_v27 = vpop.permute.xlu1 %4437 }
 0x6bd   : > { %v4636_v9 = vperm.slane %v4438_v27, %v11559_v42 }
 0x6bf   : > { %v5496_v30 = vpop.f32.mrf.mxu3  ;;  %v4638_v58 = vsel %vm4637_vm9, %v4636_v9, %v4634_v59  ;;  %v12523_v9 = vld [vmem:[#allocation29_spill] sm:$0xff] }
 0x6c0   : > { %v11553_v18 = vadd.f32 %v5665_v28, %v5496_v30  ;;  %v6131_v40 = vpop.f32.mrf.mxu2  ;;  %v4644_v30 = vperm.slane %v11412_v62, %v11556_v61  ;;  %v4642_v28 = vsel %vm4641_vm11, %v4640_v20, %v4638_v58  ;;  %v11578_v62 = vadd.s32 4294967192, %v8272_v55 }
 0x6c1   : > { %v6132_v52 = vadd.f32 %v6131_v40, %v5962_v8  ;;  %4572 = vperm.xlu1 %7604, %v11241_v16   ;;  %v5964_v39 = vpop.f32.mrf.mxu1 }
 0x6c2   : > { %12520 = vst [vmem:[#allocation85_spill] sm:$0xff] %v11553_v18  ;;  %v5667_v4 = vpop.f32.mrf.mxu0  ;;  %v4646_v40 = vsel %vm4645_vm13, %v4644_v30, %v4642_v28 }
 0x6c3   : > { %v6204_v24 = vadd.f32 %v6132_v52, %v11553_v18  ;;  %v11573_v52 = vadd.s32 4294967184, %v8272_v55 }
 0x6c4   : > { %v4447_v30 = vpop.permute.xlu1 %4446 }
 0x6c5   : > { %6268 = vst [vmem:[%s9606_s29 + $0x1d0] sm:$0xff] %v6204_v24  ;;  %v12522_v24 = vld [vmem:[#allocation28_spill] sm:$0xff]  ;;  %v4648_v28 = vperm.slane %v4447_v30, %v11578_v62 }
 0x6c6   : > { %v6276_v20 = vpack.c.bf16 %v12523_v9, %v12522_v24  ;;  %v4660_v24 = vperm.slane %v11433_v51, %v11368_v47  ;;  %v4662_v9 = vperm.slane %v11436_v17, %v11489_v34  ;;  %v12525_v51 = vld [vmem:[#allocation34_spill] sm:$0xff] }
 0x6c7   : > { %v5498_v8 = vpop.f32.mrf.mxu3 }
 0x6c8   : > { %v11575_v27 = vadd.f32 %v5667_v4, %v5498_v8  ;;  %v6133_v46 = vpop.f32.mrf.mxu2  ;;  %v4652_v4 = vperm.slane %v11417_v15, %v11573_v52  ;;  %6392 = vmatmul.bf16.gmra.mxu3 %v6276_v20 }
 0x6c9   : > { %v6134_v59 = vadd.f32 %v6133_v46, %v5964_v39  ;;  %v4650_v46 = vsel %vm4649_vm6, %v4648_v28, %v4646_v40  ;;  %4581 = vperm.xlu1 %7604, %v11324_v26   ;;  %v5967_v15 = vpop.f32.mrf.mxu1 }
 0x6ca   : > { %12521 = vst [vmem:[#allocation86_spill] sm:$0xff] %v11575_v27  ;;  %v4654_v8 = vsel %vm4653_vm14, %v4652_v4, %v4650_v46  ;;  %v5670_v30 = vpop.f32.mrf.mxu0  ;;  %v12526_v46 = vld [vmem:[#allocation37_spill] sm:$0xff] }
 0x6cb   : > { %v6205_v58 = vadd.f32 %v6134_v59, %v11575_v27  ;;  %v12543_v27 = vld [vmem:[#allocation40_spill] sm:$0xff] }
 0x6cc   : > { %v4456_v39 = vpop.permute.xlu1 %4455 }
 0x6cd   : > { %6269 = vst [vmem:[%s9606_s29 + $0x1d8] sm:$0xff] %v6205_v58  ;;  %v4659_v59 = vperm.slane %v4456_v39, %v8272_v55  ;;  %v6277_v39 = vpack.c.bf16 %v12526_v46, %v12525_v51 }
 0x6cf   : > { %v4661_v20 = vsel %vm4601_vm4, %v4660_v24, %v4659_v59  ;;  %v5501_v58 = vpop.f32.mrf.mxu3  ;;  %v4666_v24 = vperm.slane %v11439_v13, %v11486_v60  ;;  %v4668_v59 = vperm.slane %v11443_v31, %v11511_v50  ;;  %v11617_v13 = vadd.s32 4294967176, %v8272_v55 }
 0x6d0   : > { %v4663_v40 = vsel %vm4605_vm3, %v4662_v9, %v4661_v20  ;;  %v11599_v28 = vadd.f32 %v5670_v30, %v5501_v58  ;;  %v6136_v26 = vpop.f32.mrf.mxu2 }
 0x6d1   : > { %4590 = vperm.xlu1 %7604, %v11422_v23   ;;  %v6137_v4 = vadd.f32 %v6136_v26, %v5967_v15  ;;  %v5969_v20 = vpop.f32.mrf.mxu1  ;;  %v4656_v46 = vperm.slane %v11427_v21, %v11617_v13  ;;  %v4678_v21 = vperm.slane %v11456_v7, %v11559_v42  ;;  %v4686_v7 = vperm.slane %v11479_v53, %v11573_v52  ;;  %v11662_v53 = vpop.permute.xlu2 %4515 }
 0x6d2   : > { %12524 = vst [vmem:[#allocation87_spill] sm:$0xff] %v11599_v28  ;;  %v5672_v23 = vpop.f32.mrf.mxu0 }
 0x6d3   : > { %v6206_v16 = vadd.f32 %v6137_v4, %v11599_v28 }
 0x6d4   : > { %v4465_v18 = vpop.permute.xlu1 %4464 }
 0x6d5   : > { %v4664_v17 = vperm.slane %v4465_v18, %v11483_v0  ;;  %6270 = vst [vmem:[%s9606_s29 + $0x1e0] sm:$0xff] %v6206_v16 }
 0x6d7   : > { %v4665_v9 = vsel %vm4609_vm7, %v4664_v17, %v4663_v40  ;;  %v5503_v30 = vpop.f32.mrf.mxu3  ;;  %v4674_v17 = vperm.slane %v11451_v44, %v11525_v32  ;;  %v4680_v44 = vperm.slane %v11472_v12, %v11551_v19 }
 0x6d8   : > { %6397 = vmatmul.bf16.gmra.mxu3 %v6277_v39  ;;  %v4667_v15 = vsel %vm4613_vm10, %v4666_v24, %v4665_v9  ;;  %v11613_v58 = vadd.f32 %v5672_v23, %v5503_v30  ;;  %v6138_v26 = vpop.f32.mrf.mxu2  ;;  %v4672_v39 = vperm.slane %v11446_v1, %v11533_v38  ;;  %v4658_v9 = vsel %vm12169_vm2, %v4656_v46, %v4654_v8  ;;  %v12529_v1 = vld [vmem:[#allocation25_spill] sm:$0xff] }
 0x6d9   : > { %v4669_v18 = vsel %vm4617_vm15, %v4668_v59, %v4667_v15  ;;  %v6139_v16 = vadd.f32 %v6138_v26, %v5969_v20  ;;  %v12528_v20 = vld [vmem:[#allocation26_spill] sm:$0xff] }
 0x6da   : > { %12527 = vst [vmem:[#allocation89_spill] sm:$0xff] %v11613_v58  ;;  %v12530_v26 = vpack.c.bf16 %v12528_v20, %v12529_v1 }
 0x6db   : > { %v6207_v40 = vadd.f32 %v6139_v16, %v11613_v58 }
 0x6dc   : > { %v4474_v4 = vpop.permute.xlu1 %4473 }
 0x6dd   : > { %v4670_v51 = vperm.slane %v4474_v4, %v11506_v56  ;;  %6271 = vst [vmem:[%s9606_s29 + $0x1e8] sm:$0xff] %v6207_v40 }
 0x6df   : > { %v4671_v24 = vsel %vm4621_vm8, %v4670_v51, %v4669_v18  ;;  %v4684_v51 = vperm.slane %v11476_v33, %v11578_v62 }
 0x6e0   : > { %v4673_v59 = vsel %vm4625_vm5, %v4672_v39, %v4671_v24 }
 0x6e1   : > { %v4675_v23 = vsel %vm4629_vm12, %v4674_v17, %v4673_v59  ;;  %v12531_v59 = vld [vmem:[#allocation30_spill] sm:$0xff] }
 0x6e4   : > { %v4483_v30 = vpop.permute.xlu1 %4482 }
 0x6e5   : > { %v4676_v15 = vperm.slane %v4483_v30, %v11530_v25 }
 0x6e7   : > { %v4677_v18 = vsel %vm4633_vm1, %v4676_v15, %v4675_v23  ;;  %v12532_v23 = vld [vmem:[#allocation32_spill] sm:$0xff] }
 0x6e8   : > { %6402 = vmatmul.bf16.gmra.mxu3 %v12530_v26  ;;  %v4679_v16 = vsel %vm4637_vm9, %v4678_v21, %v4677_v18  ;;  %v12533_v30 = vpack.c.bf16 %v12531_v59, %v12532_v23  ;;  %v11658_v21 = vpop.permute.xlu0 %4512  ;;  %v12534_v26 = vld [vmem:[#allocation92_spill] sm:$0xff] }
 0x6e9   : > { %v4681_v8 = vsel %vm4641_vm11, %v4680_v44, %v4679_v16  ;;  %v12535_v44 = vld [vmem:[#allocation39_spill] sm:$0xff]  ;;  %v11671_v16 = vpop.permute.xlu2 %4524 }
 0x6ea   : > { %v12536_v18 = vpack.c.bf16 %v12534_v26, %v12535_v44 }
 0x6ec   : > { %v4492_v40 = vpop.permute.xlu1 %4491 }
 0x6ed   : > { %v4682_v4 = vperm.slane %v4492_v40, %v11556_v61 }
 0x6ef   : > { %v4683_v46 = vsel %vm4645_vm13, %v4682_v4, %v4681_v8 }
 0x6f0   : > { %v4685_v39 = vsel %vm4649_vm6, %v4684_v51, %v4683_v46  ;;  %v11664_v20 = vpop.permute.xlu0 %4521 }
 0x6f1   : > { %v4687_v12 = vsel %vm4653_vm14, %v4686_v7, %v4685_v39  ;;  %v11679_v7 = vpop.permute.xlu2 %4533 }
 0x6f4   : > { %v4501_v17 = vpop.permute.xlu1 %4500 }
 0x6f5   : > { %v4688_v24 = vperm.slane %v4501_v17, %v11617_v13  ;;  %v12538_v17 = vld [vmem:[#allocation19_spill] sm:$0xff] }
 0x6f7   : > { %v4689_v15 = vsel %vm12169_vm2, %v4688_v24, %v4687_v12  ;;  %vm4755_vm2 = vcmask 1040384   ;;  %v12537_v12 = vld [vmem:[#allocation79_spill] sm:$0xff] }
 0x6f8   : > { %6407 = vmatmul.bf16.gmra.mxu3 %v12533_v30  ;;  %v11673_v8 = vpop.permute.xlu0 %4530  ;;  %v4752_v4 = vrot.slane %v4689_v15, 7  ;;  %v12539_v24 = vpack.c.bf16 %v12537_v12, %v12538_v17 }
 0x6fa   : > { %v11677_v51 = vsel %vm4755_vm2, %v4658_v9, %v4752_v4 }
 0x6fc   : > { %v11660_v33 = vpop.permute.xlu1 %4509 }
 0x700   : > { %v11683_v39 = vpop.permute.xlu0 %4539 }
 0x704   : > { %v11666_v1 = vpop.permute.xlu1 %4518 }
 0x708   : > { %6412 = vmatmul.bf16.gmra.mxu3 %v12536_v18  ;;  %v11690_v18 = vpop.permute.xlu2 %4542  ;;  %v11696_v31 = vpop.permute.xlu0 %4548 }
 0x70c   : > { %v11675_v40 = vpop.permute.xlu1 %4527 }
 0x710   : > { %v4552_v58 = vpop.permute.xlu2 %4551 }
 0x711   : > { %v4721_v49 = vperm.slane %v4552_v58, %v8272_v55 }
 0x713   : > { %v5972_v23 = vpop.f32.mrf.mxu1 }
 0x714   : > { %v11681_v46 = vpop.permute.xlu1 %4536  ;;  %v5675_v59 = vpop.f32.mrf.mxu0 }
 0x718   : > { %6417 = vmatmul.bf16.gmra.mxu3 %v12539_v24 }
 0x719   : > { %v5506_v30 = vpop.f32.mrf.mxu3 }
 0x71a   : > { %v11688_v26 = vadd.f32 %v5675_v59, %v5506_v30  ;;  %v6141_v15 = vpop.f32.mrf.mxu2 }
 0x71b   : > { %v6142_v44 = vadd.f32 %v6141_v15, %v5972_v23  ;;  %v5974_v17 = vpop.f32.mrf.mxu1  ;;  %v4561_v23 = vpop.permute.xlu2 %4560 }
 0x71c   : > { %12540 = vst [vmem:[#allocation27_spill] sm:$0xff] %v11688_v26  ;;  %v11693_v4 = vpop.permute.xlu1 %4545  ;;  %v5677_v28 = vpop.f32.mrf.mxu0  ;;  %v4726_v58 = vperm.slane %v4561_v23, %v11483_v0  ;;  %v4699_v23 = vperm.slane %v11666_v1, %v11511_v50  ;;  %v12549_v1 = vld [vmem:[#allocation49_spill] sm:$0xff] }
 0x71d   : > { %v6208_v9 = vadd.f32 %v6142_v44, %v11688_v26  ;;  %v12542_v44 = vld [vmem:[#allocation41_spill] sm:$0xff]  ;;  %v12547_v26 = vld [vmem:[#allocation44_spill] sm:$0xff] }
 0x71e   : > { %v12544_v14 = vpack.c.bf16 %v12542_v44, %v12543_v27 }
 0x71f   : > { %6272 = vst [vmem:[%s9606_s29 + $0x1f0] sm:$0xff] %v6208_v9  ;;  %v11709_v9 = vld [vmem:[%s12117_s8] ss:$0 sm:$0xff] }
 0x721   : > { %v5508_v12 = vpop.f32.mrf.mxu3 }
 0x722   : > { %v11698_v24 = vadd.f32 %v5677_v28, %v5508_v12  ;;  %v6143_v59 = vpop.f32.mrf.mxu2 }
 0x723   : > { %v6144_v30 = vadd.f32 %v6143_v59, %v5974_v17  ;;  %v4558_v59 = vpop.permute.xlu0 %4557  ;;  %v4570_v45 = vpop.permute.xlu2 %4569 }
 0x724   : > { %12541 = vst [vmem:[#allocation31_spill] sm:$0xff] %v11698_v24  ;;  %v4555_v28 = vpop.permute.xlu1 %4554 }
 0x725   : > { %v6209_v15 = vadd.f32 %v6144_v30, %v11698_v24 }
 0x727   : > { %6273 = vst [vmem:[%s9606_s29 + $0x1f8] sm:$0xff] %v6209_v15 }
 0x728   : > { %6422 = vmatmul.bf16.gmra.mxu3 %v12544_v14 }
 0x729   : > { %v6383_v12 = vpop.f32.mrf.mxu3 }
 0x72a   : > { %v6384_v17 = vadd.f32 %v11709_v9, %v6383_v12  ;;  %v4722_v12 = vperm.slane %v4555_v28, %v11368_v47 }
 0x72b   : > { %v4567_v44 = vpop.permute.xlu0 %4566 }
 0x72c   : > { %7735 = vtanh.f32 %v6384_v17  ;;  %v4564_v14 = vpop.permute.xlu1 %4563  ;;  %v12546_v17 = vld [vmem:[#allocation45_spill] sm:$0xff]  ;;  %v4723_v37 = vsel %vm4601_vm4, %v4722_v12, %v4721_v49  ;;  %v4730_v28 = vperm.slane %v4567_v44, %v11511_v50  ;;  %vm12555_vm4 = vcmask 1048512  }
 0x72d   : > { %v12548_v24 = vpack.c.bf16 %v12546_v17, %v12547_v26  ;;  %v4728_v55 = vperm.slane %v4564_v14, %v11486_v60  ;;  %v4732_v14 = vperm.slane %v4570_v45, %v11506_v56  ;;  %v12550_v17 = vld [vmem:[#allocation46_spill] sm:$0xff] }
 0x731   : > { %v6385_v27 = vpop.f32.mrf.mxu3 }
 0x732   : > { %v7736_v30 = vpop.eup %7735  ;;  %v6386_v15 = vadd.f32 %v11709_v9, %v6385_v27  ;;  %v4724_v27 = vperm.slane %v4558_v59, %v11489_v34 }
 0x733   : > { %6607 = vst.msk [vmem:[%s11718_s0] sm:$0xff] %vm522_vm0, %v7736_v30  ;;  %v4693_v30 = vperm.slane %v11660_v33, %v11489_v34 }
 0x734   : > { %7737 = vtanh.f32 %v6386_v15  ;;  %v4573_v47 = vpop.permute.xlu1 %4572  ;;  %v4725_v26 = vsel %vm4605_vm3, %v4724_v27, %v4723_v37  ;;  %v4579_v15 = vpop.permute.xlu2 %4578  ;;  %v12551_v27 = vpack.c.bf16 %v12549_v1, %v12550_v17 }
 0x735   : > { %v4694_v49 = vsel %vm4605_vm3, %v4693_v30, %v11514_v54  ;;  %v4727_v34 = vsel %vm4609_vm7, %v4726_v58, %v4725_v26  ;;  %v4697_v54 = vperm.slane %v11662_v53, %v11486_v60  ;;  %v4701_v60 = vperm.slane %v11664_v20, %v11506_v56  ;;  %vm12556_vm3 = vmmov %vm12555_vm4 }
 0x736   : > { %v4705_v26 = vperm.slane %v11675_v40, %v11525_v32  ;;  %v4707_v40 = vperm.slane %v11673_v8, %v11530_v25 }
 0x738   : > { %6427 = vmatmul.bf16.gmra.mxu3 %v12548_v24  ;;  %v4576_v24 = vpop.permute.xlu0 %4575 }
 0x739   : > { %v6388_v22 = vpop.f32.mrf.mxu3  ;;  %v4736_v45 = vperm.slane %v4576_v24, %v11525_v32  ;;  %v4738_v24 = vperm.slane %v4579_v15, %v11530_v25 }
 0x73a   : > { %v7738_v3 = vpop.eup %7737  ;;  %v6389_v41 = vadd.f32 %v11709_v9, %v6388_v22  ;;  %v4695_v22 = vperm.slane %v11658_v21, %v11483_v0  ;;  %v4734_v21 = vperm.slane %v4573_v47, %v11533_v38 }
 0x73b   : > { %6608 = vst.msk [vmem:[%s11718_s0 + $0x8] sm:$0xff] %vm522_vm0, %v7738_v3  ;;  %v4729_v3 = vsel %vm4613_vm10, %v4728_v55, %v4727_v34 }
 0x73c   : > { %7739 = vtanh.f32 %v6389_v41  ;;  %v4696_v37 = vsel %vm4609_vm7, %v4695_v22, %v4694_v49  ;;  %v4731_v0 = vsel %vm4617_vm15, %v4730_v28, %v4729_v3  ;;  %v4582_v12 = vpop.permute.xlu1 %4581  ;;  %v4703_v49 = vperm.slane %v11671_v16, %v11533_v38  ;;  %v4588_v16 = vpop.permute.xlu2 %4587 }
 0x73d   : > { %v4698_v44 = vsel %vm4613_vm10, %v4697_v54, %v4696_v37  ;;  %v4733_v53 = vsel %vm4621_vm8, %v4732_v14, %v4731_v0  ;;  %v4740_v20 = vperm.slane %v4582_v12, %v11559_v42  ;;  %v4744_v14 = vperm.slane %v4588_v16, %v11556_v61  ;;  %v12552_v12 = vld [vmem:[#allocation53_spill] sm:$0xff] }
 0x73e   : > { %v4700_v50 = vsel %vm4617_vm15, %v4699_v23, %v4698_v44  ;;  %v4735_v30 = vsel %vm4625_vm5, %v4734_v21, %v4733_v53  ;;  %v4711_v23 = vperm.slane %v11681_v46, %v11551_v19  ;;  %v4717_v53 = vperm.slane %v11693_v4, %v11573_v52 }
 0x73f   : > { %v4702_v47 = vsel %vm4621_vm8, %v4701_v60, %v4700_v50  ;;  %v4737_v56 = vsel %vm4629_vm12, %v4736_v45, %v4735_v30  ;;  %v12553_v50 = vld [vmem:[#allocation51_spill] sm:$0xff]  ;;  %vm4757_vm7 = vcmask 1042434   ;;  %vm4759_vm10 = vcmask 1041408  }
 0x740   : > { %v4585_v22 = vpop.permute.xlu0 %4584  ;;  %v4704_v3 = vsel %vm4625_vm5, %v4703_v49, %v4702_v47  ;;  %v4739_v38 = vsel %vm4633_vm1, %v4738_v24, %v4737_v56  ;;  %v12554_v1 = vpack.c.bf16 %v12552_v12, %v12553_v50  ;;  %v12558_v24 = vld [vmem:[#allocation58_spill] sm:$0xff] }
 0x741   : > { %v6390_v33 = vpop.f32.mrf.mxu3  ;;  %v4706_v32 = vsel %vm4629_vm12, %v4705_v26, %v4704_v3  ;;  %v4742_v28 = vperm.slane %v4585_v22, %v11551_v19  ;;  %v12559_v3 = vld [vmem:[#allocation55_spill] sm:$0xff] }
 0x742   : > { %v7740_v41 = vpop.eup %7739  ;;  %v6391_v59 = vadd.f32 %v11709_v9, %v6390_v33  ;;  %v4741_v33 = vsel %vm4637_vm9, %v4740_v20, %v4739_v38  ;;  %v4708_v37 = vsel %vm4633_vm1, %v4707_v40, %v4706_v32  ;;  %v12560_v32 = vpack.c.bf16 %v12558_v24, %v12559_v3 }
 0x743   : > { %6609 = vst.msk [vmem:[%s11718_s0 + $0x10] sm:$0xff] %vm522_vm0, %v7740_v41  ;;  %v4743_v25 = vsel %vm4641_vm11, %v4742_v28, %v4741_v33  ;;  %v12561_v28 = vld [vmem:[#allocation61_spill] sm:$0xff] }
 0x744   : > { %7741 = vtanh.f32 %v6391_v59  ;;  %v4591_v41 = vpop.permute.xlu1 %4590  ;;  %v4709_v59 = vperm.slane %v11679_v7, %v11559_v42  ;;  %v4713_v42 = vperm.slane %v11683_v39, %v11556_v61  ;;  %v4745_v7 = vsel %vm4645_vm13, %v4744_v14, %v4743_v25  ;;  %v12564_v14 = vld [vmem:[#allocation62_spill] sm:$0xff] }
 0x745   : > { %v4746_v8 = vperm.slane %v4591_v41, %v11578_v62  ;;  %v4715_v61 = vperm.slane %v11690_v18, %v11578_v62 }
 0x746   : > { %v4710_v15 = vsel %vm4637_vm9, %v4709_v59, %v4708_v37  ;;  %v12562_v37 = vld [vmem:[#allocation60_spill] sm:$0xff] }
 0x747   : > { %v4712_v19 = vsel %vm4641_vm11, %v4711_v23, %v4710_v15  ;;  %v4747_v46 = vsel %vm4649_vm6, %v4746_v8, %v4745_v7  ;;  %v12563_v23 = vpack.c.bf16 %v12561_v28, %v12562_v37  ;;  %v12565_v15 = vld [vmem:[#allocation10_spill] sm:$0xff] }
 0x748   : > { %6432 = vmatmul.bf16.gmra.mxu3 %v12551_v27  ;;  %v4594_v44 = vpop.permute.xlu0 %4593  ;;  %v4597_v27 = vpop.permute.xlu2 %4596  ;;  %v4714_v60 = vsel %vm4645_vm13, %v4713_v42, %v4712_v19 }
 0x749   : > { %v4748_v17 = vperm.slane %v4594_v44, %v11573_v52  ;;  %v4750_v47 = vperm.slane %v4597_v27, %v11617_v13  ;;  %v4716_v26 = vsel %vm4649_vm6, %v4715_v61, %v4714_v60  ;;  %v4719_v52 = vperm.slane %v11696_v31, %v11617_v13 }
 0x74a   : > { %v7742_v58 = vpop.eup %7741  ;;  %v12557_v31 = vlaneseq  ;;  %v12566_v44 = vpack.c.bf16 %v12564_v14, %v12565_v15 }
 0x74b   : > { %v6393_v55 = vpop.f32.mrf.mxu3  ;;  %6610 = vst.msk [vmem:[%s11718_s0 + $0x18] sm:$0xff] %vm522_vm0, %v7742_v58  ;;  %v4749_v39 = vsel %vm4653_vm14, %v4748_v17, %v4747_v46  ;;  %v4718_v58 = vsel %vm4653_vm14, %v4717_v53, %v4716_v26  ;;  %v12568_v17 = vld [vmem:[#allocation66_spill] sm:$0xff]  ;;  %v12571_v26 = vld [vmem:[#allocation12_spill] sm:$0xff] }
 0x74c   : > { %v6394_v34 = vadd.f32 %v11709_v9, %v6393_v55  ;;  %v4751_v62 = vsel %vm12555_vm4, %v4750_v47, %v4749_v39  ;;  %v4720_v18 = vsel %vm12556_vm3, %v4719_v52, %v4718_v58  ;;  %vm4763_vm15 = vcmp.lt.s32.totalorder %v12557_v31, 512  ;;  %v12570_v47 = vld [vmem:[#allocation69_spill] sm:$0xff] }
 0x74d   : > { %v4754_v4 = vrot.slane %v4751_v62, 5  ;;  %v4753_v49 = vrot.slane %v4720_v18, 6 }
 0x74e   : > { %7743 = vtanh.f32 %v6394_v34 }
 0x74f   : > { %v4758_v20 = vsel %vm4757_vm7, %v4753_v49, %v4754_v4 }
 0x750   : > { %v4760_v13 = vsel %vm4759_vm10, %v11677_v51, %v4758_v20 }
 0x751   : > { %4765 = vst.msk [vmem:[%s11827_s1] sm:$0xf] %vm4763_vm15, %v4760_v13 }
 0x753   : > { %v6395_v54 = vpop.f32.mrf.mxu3 }
 0x754   : > { %v7744_v0 = vpop.eup %7743  ;;  %v6396_v21 = vadd.f32 %v11709_v9, %v6395_v54 }
 0x755   : > { %6611 = vst.msk [vmem:[%s11718_s0 + $0x20] sm:$0xff] %vm522_vm0, %v7744_v0 }
 0x756   : > { %7745 = vtanh.f32 %v6396_v21 }
 0x758   : > { %6437 = vmatmul.bf16.gmra.mxu3 %v12554_v1  ;;  %v12567_v1 = vld [vmem:[#allocation68_spill] sm:$0xff] }
 0x759   : > { %v12569_v27 = vpack.c.bf16 %v12567_v1, %v12568_v17 }
 0x75b   : > { %v6398_v30 = vpop.f32.mrf.mxu3 }
 0x75c   : > { %v7746_v45 = vpop.eup %7745  ;;  %v6399_v55 = vadd.f32 %v11709_v9, %v6398_v30 }
 0x75d   : > { %6612 = vst.msk [vmem:[%s11718_s0 + $0x28] sm:$0xff] %vm522_vm0, %v7746_v45 }
 0x75e   : > { %7747 = vtanh.f32 %v6399_v55  ;;  %v12572_v55 = vpack.c.bf16 %v12570_v47, %v12571_v26  ;;  %v12583_v47 = vld [vmem:[#allocation72_spill] sm:$0xff] }
 0x763   : > { %v6400_v22 = vpop.f32.mrf.mxu3 }
 0x764   : > { %v7748_v34 = vpop.eup %7747  ;;  %v6401_v56 = vadd.f32 %v11709_v9, %v6400_v22  ;;  %v12573_v22 = vld [vmem:[#allocation17_spill] sm:$0xff] }
 0x765   : > { %6613 = vst.msk [vmem:[%s11718_s0 + $0x30] sm:$0xff] %vm522_vm0, %v7748_v34  ;;  %v12574_v34 = vld [vmem:[#allocation70_spill] sm:$0xff] }
 0x766   : > { %7749 = vtanh.f32 %v6401_v56  ;;  %v12575_v56 = vpack.c.bf16 %v12573_v22, %v12574_v34 }
 0x768   : > { %6442 = vmatmul.bf16.gmra.mxu3 %v12560_v32 }
 0x76b   : > { %v6403_v40 = vpop.f32.mrf.mxu3 }
 0x76c   : > { %v7750_v38 = vpop.eup %7749  ;;  %v6404_v16 = vadd.f32 %v11709_v9, %v6403_v40  ;;  %v12576_v40 = vpack.c.bf16 %v10936_v63, %v10870_v2  ;;  %v12577_v2 = vpack.c.bf16 %v11011_v43, %v11002_v11  ;;  %v12578_v11 = vpack.c.bf16 %v11067_v5, %v11045_v36 }
 0x76d   : > { %6614 = vst.msk [vmem:[%s11718_s0 + $0x38] sm:$0xff] %vm522_vm0, %v7750_v38  ;;  %v12579_v36 = vpack.c.bf16 %v11116_v57, %v11095_v29  ;;  %v12580_v29 = vpack.c.bf16 %v11163_v6, %v11136_v48  ;;  %v12581_v48 = vpack.c.bf16 %v11223_v35, %v11204_v10 }
 0x76e   : > { %7751 = vtanh.f32 %v6404_v16 }
 0x773   : > { %v6405_v51 = vpop.f32.mrf.mxu3 }
 0x774   : > { %v7752_v33 = vpop.eup %7751  ;;  %v6406_v41 = vadd.f32 %v11709_v9, %v6405_v51 }
 0x775   : > { %6615 = vst.msk [vmem:[%s11718_s0 + $0x40] sm:$0xff] %vm522_vm0, %v7752_v33 }
 0x776   : > { %7753 = vtanh.f32 %v6406_v41 }
 0x778   : > { %6447 = vmatmul.bf16.gmra.mxu3 %v12563_v23 }
 0x77b   : > { %v6408_v59 = vpop.f32.mrf.mxu3 }
 0x77c   : > { %v7754_v54 = vpop.eup %7753  ;;  %v6409_v0 = vadd.f32 %v11709_v9, %v6408_v59 }
 0x77d   : > { %6616 = vst.msk [vmem:[%s11718_s0 + $0x48] sm:$0xff] %vm522_vm0, %v7754_v54 }
 0x77e   : > { %7755 = vtanh.f32 %v6409_v0 }
 0x783   : > { %v6410_v25 = vpop.f32.mrf.mxu3 }
 0x784   : > { %v7756_v8 = vpop.eup %7755  ;;  %v6411_v21 = vadd.f32 %v11709_v9, %v6410_v25 }
 0x785   : > { %6617 = vst.msk [vmem:[%s11718_s0 + $0x50] sm:$0xff] %vm522_vm0, %v7756_v8 }
 0x786   : > { %7757 = vtanh.f32 %v6411_v21 }
 0x788   : > { %6452 = vmatmul.bf16.gmra.mxu3 %v12566_v44 }
 0x78b   : > { %v6413_v19 = vpop.f32.mrf.mxu3 }
 0x78c   : > { %v7758_v42 = vpop.eup %7757  ;;  %v6414_v7 = vadd.f32 %v11709_v9, %v6413_v19 }
 0x78d   : > { %6618 = vst.msk [vmem:[%s11718_s0 + $0x58] sm:$0xff] %vm522_vm0, %v7758_v42 }
 0x78e   : > { %7759 = vtanh.f32 %v6414_v7 }
 0x793   : > { %v6415_v46 = vpop.f32.mrf.mxu3 }
 0x794   : > { %v7760_v12 = vpop.eup %7759  ;;  %v6416_v50 = vadd.f32 %v11709_v9, %v6415_v46 }
 0x795   : > { %6619 = vst.msk [vmem:[%s11718_s0 + $0x60] sm:$0xff] %vm522_vm0, %v7760_v12 }
 0x796   : > { %7761 = vtanh.f32 %v6416_v50 }
 0x798   : > { %6457 = vmatmul.bf16.gmra.mxu3 %v12569_v27 }
 0x79b   : > { %v6418_v60 = vpop.f32.mrf.mxu3 }
 0x79c   : > { %v7762_v53 = vpop.eup %7761  ;;  %v6419_v61 = vadd.f32 %v11709_v9, %v6418_v60 }
 0x79d   : > { %6620 = vst.msk [vmem:[%s11718_s0 + $0x68] sm:$0xff] %vm522_vm0, %v7762_v53 }
 0x79e   : > { %7763 = vtanh.f32 %v6419_v61 }
 0x7a3   : > { %v6420_v39 = vpop.f32.mrf.mxu3 }
 0x7a4   : > { %v7764_v30 = vpop.eup %7763  ;;  %v6421_v45 = vadd.f32 %v11709_v9, %v6420_v39 }
 0x7a5   : > { %6621 = vst.msk [vmem:[%s11718_s0 + $0x70] sm:$0xff] %vm522_vm0, %v7764_v30 }
 0x7a6   : > { %7765 = vtanh.f32 %v6421_v45  ;;  %v12582_v45 = vld [vmem:[#allocation73_spill] sm:$0xff] }
 0x7a7   : > { %v12584_v10 = vpack.c.bf16 %v12582_v45, %v12583_v47  ;;  %v12603_v45 = vld [vmem:[#allocation31_spill] sm:$0xff] }
 0x7a8   : > { %6462 = vmatmul.bf16.gmra.mxu3 %v12572_v55  ;;  %v12604_v47 = vld [vmem:[#allocation27_spill] sm:$0xff] }
 0x7ab   : > { %v6423_v58 = vpop.f32.mrf.mxu3 }
 0x7ac   : > { %v7766_v52 = vpop.eup %7765  ;;  %v6424_v62 = vadd.f32 %v11709_v9, %v6423_v58 }
 0x7ad   : > { %6622 = vst.msk [vmem:[%s11718_s0 + $0x78] sm:$0xff] %vm522_vm0, %v7766_v52 }
 0x7ae   : > { %7767 = vtanh.f32 %v6424_v62 }
 0x7b3   : > { %v6425_v18 = vpop.f32.mrf.mxu3 }
 0x7b4   : > { %v7768_v4 = vpop.eup %7767  ;;  %v6426_v49 = vadd.f32 %v11709_v9, %v6425_v18  ;;  %v12585_v18 = vld [vmem:[#allocation77_spill] sm:$0xff] }
 0x7b5   : > { %6623 = vst.msk [vmem:[%s11718_s0 + $0x80] sm:$0xff] %vm522_vm0, %v7768_v4  ;;  %v12586_v4 = vld [vmem:[#allocation74_spill] sm:$0xff] }
 0x7b6   : > { %7769 = vtanh.f32 %v6426_v49  ;;  %v12587_v49 = vpack.c.bf16 %v12585_v18, %v12586_v4 }
 0x7b8   : > { %6467 = vmatmul.bf16.gmra.mxu3 %v12575_v56 }
 0x7bb   : > { %v6428_v20 = vpop.f32.mrf.mxu3 }
 0x7bc   : > { %v7770_v13 = vpop.eup %7769  ;;  %v6429_v31 = vadd.f32 %v11709_v9, %v6428_v20 }
 0x7bd   : > { %6624 = vst.msk [vmem:[%s11718_s0 + $0x88] sm:$0xff] %vm522_vm0, %v7770_v13 }
 0x7be   : > { %7771 = vtanh.f32 %v6429_v31 }
 0x7c3   : > { %v6430_v24 = vpop.f32.mrf.mxu3 }
 0x7c4   : > { %v7772_v3 = vpop.eup %7771  ;;  %v6431_v32 = vadd.f32 %v11709_v9, %v6430_v24  ;;  %v12588_v24 = vld [vmem:[#allocation80_spill] sm:$0xff] }
 0x7c5   : > { %6625 = vst.msk [vmem:[%s11718_s0 + $0x90] sm:$0xff] %vm522_vm0, %v7772_v3  ;;  %v12589_v3 = vld [vmem:[#allocation78_spill] sm:$0xff] }
 0x7c6   : > { %7773 = vtanh.f32 %v6431_v32  ;;  %v12590_v32 = vpack.c.bf16 %v12588_v24, %v12589_v3 }
 0x7c8   : > { %6472 = vmatmul.bf16.gmra.mxu3 %v12576_v40 }
 0x7cb   : > { %v6433_v38 = vpop.f32.mrf.mxu3 }
 0x7cc   : > { %v7774_v16 = vpop.eup %7773  ;;  %v6434_v51 = vadd.f32 %v11709_v9, %v6433_v38 }
 0x7cd   : > { %6626 = vst.msk [vmem:[%s11718_s0 + $0x98] sm:$0xff] %vm522_vm0, %v7774_v16 }
 0x7ce   : > { %7775 = vtanh.f32 %v6434_v51 }
 0x7d3   : > { %v6435_v33 = vpop.f32.mrf.mxu3 }
 0x7d4   : > { %v7776_v41 = vpop.eup %7775  ;;  %v6436_v28 = vadd.f32 %v11709_v9, %v6435_v33 }
 0x7d5   : > { %6627 = vst.msk [vmem:[%s11718_s0 + $0xa0] sm:$0xff] %vm522_vm0, %v7776_v41 }
 0x7d6   : > { %7777 = vtanh.f32 %v6436_v28  ;;  %v12591_v28 = vld [vmem:[#allocation82_spill] sm:$0xff] }
 0x7d8   : > { %6477 = vmatmul.bf16.gmra.mxu3 %v12577_v2  ;;  %v12592_v2 = vld [vmem:[#allocation81_spill] sm:$0xff] }
 0x7db   : > { %v6438_v63 = vpop.f32.mrf.mxu3 }
 0x7dc   : > { %v7778_v37 = vpop.eup %7777  ;;  %v6439_v23 = vadd.f32 %v11709_v9, %v6438_v63  ;;  %v12593_v63 = vpack.c.bf16 %v12591_v28, %v12592_v2 }
 0x7dd   : > { %6628 = vst.msk [vmem:[%s11718_s0 + $0xa8] sm:$0xff] %vm522_vm0, %v7778_v37 }
 0x7de   : > { %7779 = vtanh.f32 %v6439_v23 }
 0x7e3   : > { %v6440_v59 = vpop.f32.mrf.mxu3 }
 0x7e4   : > { %v7780_v54 = vpop.eup %7779  ;;  %v6441_v0 = vadd.f32 %v11709_v9, %v6440_v59 }
 0x7e5   : > { %6629 = vst.msk [vmem:[%s11718_s0 + $0xb0] sm:$0xff] %vm522_vm0, %v7780_v54 }
 0x7e6   : > { %7781 = vtanh.f32 %v6441_v0 }
 0x7e8   : > { %6482 = vmatmul.bf16.gmra.mxu3 %v12578_v11 }
 0x7eb   : > { %v6443_v43 = vpop.f32.mrf.mxu3 }
 0x7ec   : > { %v7782_v25 = vpop.eup %7781  ;;  %v6444_v8 = vadd.f32 %v11709_v9, %v6443_v43  ;;  %v12594_v43 = vld [vmem:[#allocation84_spill] sm:$0xff] }
 0x7ed   : > { %6630 = vst.msk [vmem:[%s11718_s0 + $0xb8] sm:$0xff] %vm522_vm0, %v7782_v25  ;;  %v12595_v25 = vld [vmem:[#allocation83_spill] sm:$0xff] }
 0x7ee   : > { %7783 = vtanh.f32 %v6444_v8  ;;  %v12596_v8 = vpack.c.bf16 %v12594_v43, %v12595_v25 }
 0x7f3   : > { %v6445_v21 = vpop.f32.mrf.mxu3 }
 0x7f4   : > { %v7784_v14 = vpop.eup %7783  ;;  %v6446_v15 = vadd.f32 %v11709_v9, %v6445_v21 }
 0x7f5   : > { %6631 = vst.msk [vmem:[%s11718_s0 + $0xc0] sm:$0xff] %vm522_vm0, %v7784_v14 }
 0x7f6   : > { %7785 = vtanh.f32 %v6446_v15 }
 0x7f8   : > { %6487 = vmatmul.bf16.gmra.mxu3 %v12579_v36 }
 0x7fb   : > { %v6448_v5 = vpop.f32.mrf.mxu3 }
 0x7fc   : > { %v7786_v44 = vpop.eup %7785  ;;  %v6449_v19 = vadd.f32 %v11709_v9, %v6448_v5 }
 0x7fd   : > { %6632 = vst.msk [vmem:[%s11718_s0 + $0xc8] sm:$0xff] %vm522_vm0, %v7786_v44 }
 0x7fe   : > { %7787 = vtanh.f32 %v6449_v19  ;;  %v12597_v19 = vld [vmem:[#allocation86_spill] sm:$0xff] }
 0x803   : > { %v6450_v42 = vpop.f32.mrf.mxu3 }
 0x804   : > { %v7788_v7 = vpop.eup %7787  ;;  %v6451_v46 = vadd.f32 %v11709_v9, %v6450_v42  ;;  %v12598_v42 = vld [vmem:[#allocation85_spill] sm:$0xff] }
 0x805   : > { %6633 = vst.msk [vmem:[%s11718_s0 + $0xd0] sm:$0xff] %vm522_vm0, %v7788_v7  ;;  %v12599_v7 = vpack.c.bf16 %v12597_v19, %v12598_v42 }
 0x806   : > { %7789 = vtanh.f32 %v6451_v46 }
 0x808   : > { %6492 = vmatmul.bf16.gmra.mxu3 %v12580_v29 }
 0x80b   : > { %v6453_v57 = vpop.f32.mrf.mxu3 }
 0x80c   : > { %v7790_v12 = vpop.eup %7789  ;;  %v6454_v50 = vadd.f32 %v11709_v9, %v6453_v57 }
 0x80d   : > { %6634 = vst.msk [vmem:[%s11718_s0 + $0xd8] sm:$0xff] %vm522_vm0, %v7790_v12 }
 0x80e   : > { %7791 = vtanh.f32 %v6454_v50 }
 0x813   : > { %v6455_v1 = vpop.f32.mrf.mxu3 }
 0x814   : > { %v7792_v17 = vpop.eup %7791  ;;  %v6456_v27 = vadd.f32 %v11709_v9, %v6455_v1 }
 0x815   : > { %6635 = vst.msk [vmem:[%s11718_s0 + $0xe0] sm:$0xff] %vm522_vm0, %v7792_v17  ;;  %v12600_v17 = vld [vmem:[#allocation89_spill] sm:$0xff] }
 0x816   : > { %7793 = vtanh.f32 %v6456_v27  ;;  %v12601_v27 = vld [vmem:[#allocation87_spill] sm:$0xff] }
 0x818   : > { %6497 = vmatmul.bf16.gmra.mxu3 %v12581_v48  ;;  %v12602_v48 = vpack.c.bf16 %v12600_v17, %v12601_v27 }
 0x81b   : > { %v6458_v6 = vpop.f32.mrf.mxu3 }
 0x81c   : > { %v7794_v60 = vpop.eup %7793  ;;  %v6459_v53 = vadd.f32 %v11709_v9, %v6458_v6 }
 0x81d   : > { %6636 = vst.msk [vmem:[%s11718_s0 + $0xe8] sm:$0xff] %vm522_vm0, %v7794_v60 }
 0x81e   : > { %7795 = vtanh.f32 %v6459_v53 }
 0x823   : > { %v6460_v61 = vpop.f32.mrf.mxu3 }
 0x824   : > { %v7796_v39 = vpop.eup %7795  ;;  %v6461_v30 = vadd.f32 %v11709_v9, %v6460_v61 }
 0x825   : > { %6637 = vst.msk [vmem:[%s11718_s0 + $0xf0] sm:$0xff] %vm522_vm0, %v7796_v39 }
 0x826   : > { %7797 = vtanh.f32 %v6461_v30 }
 0x828   : > { %6502 = vmatmul.bf16.gmra.mxu3 %v12584_v10  ;;  %v12605_v10 = vpack.c.bf16 %v12603_v45, %v12604_v47 }
 0x82b   : > { %v6463_v35 = vpop.f32.mrf.mxu3 }
 0x82c   : > { %v7798_v26 = vpop.eup %7797  ;;  %v6464_v55 = vadd.f32 %v11709_v9, %v6463_v35 }
 0x82d   : > { %6638 = vst.msk [vmem:[%s11718_s0 + $0xf8] sm:$0xff] %vm522_vm0, %v7798_v26 }
 0x82e   : > { %7799 = vtanh.f32 %v6464_v55 }
 0x833   : > { %v6465_v58 = vpop.f32.mrf.mxu3 }
 0x834   : > { %v7800_v52 = vpop.eup %7799  ;;  %v6466_v62 = vadd.f32 %v11709_v9, %v6465_v58 }
 0x835   : > { %6639 = vst.msk [vmem:[%s11718_s0 + $0x100] sm:$0xff] %vm522_vm0, %v7800_v52 }
 0x836   : > { %7801 = vtanh.f32 %v6466_v62 }
 0x838   : > { %6507 = vmatmul.bf16.gmra.mxu3 %v12587_v49 }
 0x83b   : > { %v6468_v22 = vpop.f32.mrf.mxu3 }
 0x83c   : > { %v7802_v34 = vpop.eup %7801  ;;  %v6469_v56 = vadd.f32 %v11709_v9, %v6468_v22 }
 0x83d   : > { %6640 = vst.msk [vmem:[%s11718_s0 + $0x108] sm:$0xff] %vm522_vm0, %v7802_v34 }
 0x83e   : > { %7803 = vtanh.f32 %v6469_v56 }
 0x843   : > { %v6470_v20 = vpop.f32.mrf.mxu3 }
 0x844   : > { %v7804_v13 = vpop.eup %7803  ;;  %v6471_v31 = vadd.f32 %v11709_v9, %v6470_v20 }
 0x845   : > { %6641 = vst.msk [vmem:[%s11718_s0 + $0x110] sm:$0xff] %vm522_vm0, %v7804_v13 }
 0x846   : > { %7805 = vtanh.f32 %v6471_v31 }
 0x848   : > { %6512 = vmatmul.bf16.gmra.mxu3 %v12590_v32 }
 0x84b   : > { %v6473_v40 = vpop.f32.mrf.mxu3 }
 0x84c   : > { %v7806_v38 = vpop.eup %7805  ;;  %v6474_v16 = vadd.f32 %v11709_v9, %v6473_v40 }
 0x84d   : > { %6642 = vst.msk [vmem:[%s11718_s0 + $0x118] sm:$0xff] %vm522_vm0, %v7806_v38 }
 0x84e   : > { %7807 = vtanh.f32 %v6474_v16 }
 0x853   : > { %v6475_v51 = vpop.f32.mrf.mxu3 }
 0x854   : > { %v7808_v33 = vpop.eup %7807  ;;  %v6476_v41 = vadd.f32 %v11709_v9, %v6475_v51 }
 0x855   : > { %6643 = vst.msk [vmem:[%s11718_s0 + $0x120] sm:$0xff] %vm522_vm0, %v7808_v33 }
 0x856   : > { %7809 = vtanh.f32 %v6476_v41 }
 0x858   : > { %6517 = vmatmul.bf16.gmra.mxu3 %v12593_v63 }
 0x85b   : > { %v6478_v37 = vpop.f32.mrf.mxu3 }
 0x85c   : > { %v7810_v23 = vpop.eup %7809  ;;  %v6479_v59 = vadd.f32 %v11709_v9, %v6478_v37 }
 0x85d   : > { %6644 = vst.msk [vmem:[%s11718_s0 + $0x128] sm:$0xff] %vm522_vm0, %v7810_v23 }
 0x85e   : > { %7811 = vtanh.f32 %v6479_v59 }
 0x863   : > { %v6480_v54 = vpop.f32.mrf.mxu3 }
 0x864   : > { %v7812_v0 = vpop.eup %7811  ;;  %v6481_v11 = vadd.f32 %v11709_v9, %v6480_v54 }
 0x865   : > { %6645 = vst.msk [vmem:[%s11718_s0 + $0x130] sm:$0xff] %vm522_vm0, %v7812_v0 }
 0x866   : > { %7813 = vtanh.f32 %v6481_v11 }
 0x868   : > { %6522 = vmatmul.bf16.gmra.mxu3 %v12596_v8 }
 0x86b   : > { %v6483_v21 = vpop.f32.mrf.mxu3 }
 0x86c   : > { %v7814_v14 = vpop.eup %7813  ;;  %v6484_v15 = vadd.f32 %v11709_v9, %v6483_v21 }
 0x86d   : > { %6646 = vst.msk [vmem:[%s11718_s0 + $0x138] sm:$0xff] %vm522_vm0, %v7814_v14 }
 0x86e   : > { %7815 = vtanh.f32 %v6484_v15 }
 0x873   : > { %v6485_v36 = vpop.f32.mrf.mxu3 }
 0x874   : > { %v7816_v5 = vpop.eup %7815  ;;  %v6486_v44 = vadd.f32 %v11709_v9, %v6485_v36 }
 0x875   : > { %6647 = vst.msk [vmem:[%s11718_s0 + $0x140] sm:$0xff] %vm522_vm0, %v7816_v5 }
 0x876   : > { %7817 = vtanh.f32 %v6486_v44 }
 0x878   : > { %6527 = vmatmul.bf16.gmra.mxu3 %v12599_v7 }
 0x87b   : > { %v6488_v46 = vpop.f32.mrf.mxu3 }
 0x87c   : > { %v7818_v29 = vpop.eup %7817  ;;  %v6489_v57 = vadd.f32 %v11709_v9, %v6488_v46 }
 0x87d   : > { %6648 = vst.msk [vmem:[%s11718_s0 + $0x148] sm:$0xff] %vm522_vm0, %v7818_v29 }
 0x87e   : > { %7819 = vtanh.f32 %v6489_v57 }
 0x883   : > { %v6490_v12 = vpop.f32.mrf.mxu3 }
 0x884   : > { %v7820_v50 = vpop.eup %7819  ;;  %v6491_v1 = vadd.f32 %v11709_v9, %v6490_v12 }
 0x885   : > { %6649 = vst.msk [vmem:[%s11718_s0 + $0x150] sm:$0xff] %vm522_vm0, %v7820_v50 }
 0x886   : > { %7821 = vtanh.f32 %v6491_v1 }
 0x888   : > { %6532 = vmatmul.bf16.gmra.mxu3 %v12602_v48 }
 0x88b   : > { %v6493_v6 = vpop.f32.mrf.mxu3 }
 0x88c   : > { %v7822_v60 = vpop.eup %7821  ;;  %v6494_v53 = vadd.f32 %v11709_v9, %v6493_v6 }
 0x88d   : > { %6650 = vst.msk [vmem:[%s11718_s0 + $0x158] sm:$0xff] %vm522_vm0, %v7822_v60 }
 0x88e   : > { %7823 = vtanh.f32 %v6494_v53 }
 0x893   : > { %v6495_v61 = vpop.f32.mrf.mxu3 }
 0x894   : > { %v7824_v39 = vpop.eup %7823  ;;  %v6496_v30 = vadd.f32 %v11709_v9, %v6495_v61 }
 0x895   : > { %6651 = vst.msk [vmem:[%s11718_s0 + $0x160] sm:$0xff] %vm522_vm0, %v7824_v39 }
 0x896   : > { %7825 = vtanh.f32 %v6496_v30 }
 0x898   : > { %6537 = vmatmul.bf16.gmra.mxu3 %v12605_v10 }
 0x89b   : > { %v6498_v35 = vpop.f32.mrf.mxu3 }
 0x89c   : > { %v7826_v26 = vpop.eup %7825  ;;  %v6499_v55 = vadd.f32 %v11709_v9, %v6498_v35 }
 0x89d   : > { %6652 = vst.msk [vmem:[%s11718_s0 + $0x168] sm:$0xff] %vm522_vm0, %v7826_v26 }
 0x89e   : > { %7827 = vtanh.f32 %v6499_v55 }
 0x8a3   : > { %v6500_v58 = vpop.f32.mrf.mxu3 }
 0x8a4   : > { %v7828_v52 = vpop.eup %7827  ;;  %v6501_v62 = vadd.f32 %v11709_v9, %v6500_v58 }
 0x8a5   : > { %6653 = vst.msk [vmem:[%s11718_s0 + $0x170] sm:$0xff] %vm522_vm0, %v7828_v52 }
 0x8a6   : > { %7829 = vtanh.f32 %v6501_v62 }
 0x8ab   : > { %v6503_v18 = vpop.f32.mrf.mxu3 }
 0x8ac   : > { %v7830_v4 = vpop.eup %7829  ;;  %v6504_v49 = vadd.f32 %v11709_v9, %v6503_v18 }
 0x8ad   : > { %6654 = vst.msk [vmem:[%s11718_s0 + $0x178] sm:$0xff] %vm522_vm0, %v7830_v4 }
 0x8ae   : > { %7831 = vtanh.f32 %v6504_v49 }
 0x8af   : > { %7892 = shalt.err (!%p7889_p3)
}
 0x8b0   : > { %7554 = dma.vmem_to_hbm [thread:$0]  (%p8063_p5), %s6695_s15, 64, %s6697_s14, %s6672_s4  }
 0x8b1   : > { %s6708_s2 = sshll.u32 %s9606_s29, 4  ;;  %s6710_s21 = sshll.u32 %s6707_s3, 4  ;;  %s6709_s2 = int_to_ptr.vmem [resolvable:$true] %s6708_s2  ;;  %s6711_s21 = int_to_ptr.hbm [resolvable:$true] %s6710_s21 }
 0x8b2   : > { %s6677_s5 = scalar_lea.sflag [#allocation5], %s9582_s24  ;;  %s7907_s6 = sshra.s32 %s6711_s21, 4  ;;  %s7908_s6 = int_to_ptr.hbm [resolvable:$true] %s7907_s6 }
 0x8b3   : > { %v6505_v22 = vpop.f32.mrf.mxu3  ;;  %s7909_s7 = scalar_lea.hbm %s7908_s6, 512  ;;  %s7913_s3 = scalar_lea.hbm %s12119_s10, 1024 }
 0x8b4   : > { %v7832_v34 = vpop.eup %7831  ;;  %v6506_v56 = vadd.f32 %v11709_v9, %v6505_v22  ;;  %p7910_p4 = scmp.ne.s32.totalorder %s7908_s6, %s7909_s7  ;;  %p7914_p9 = scmp.lt.s32.totalorder %s7908_s6, %s12119_s10 }
 0x8b5   : > { %6655 = vst.msk [vmem:[%s11718_s0 + $0x180] sm:$0xff] %vm522_vm0, %v7832_v34  ;;  %p7915_p10 = scmp.lt.s32.totalorder %s7913_s3, %s7909_s7 }
 0x8b6   : > { %7833 = vtanh.f32 %v6506_v56  ;;  %p7911_p7 = pnand %p7910_p4, %p8063_p5 }
 0x8b7   : > { %p7916_p11 = por %p7915_p10, %p7914_p9 }
 0x8b8   : > { %p7912_p8 = pneg %p7911_p7 }
 0x8ba   : > { %p7917_p12 = pnand %p7916_p11, %p7912_p8 }
 0x8bc   : > { %7920 = shalt.err (!%p7917_p12)
}
 0x8bd   : > { %s7963_s24 = smov 128   ;;  %s7964_s14 = smov 8   ;;  %v6508_v20 = vpop.f32.mrf.mxu3  ;;  %v7834_v13 = vpop.eup %7833 }
 0x8be   : > { %7555 = dma.vmem_to_hbm [thread:$0]  (%p8063_p5), %s6709_s2, 8192, %s6711_s21, %s6677_s5, %s7963_s24, %s7963_s24, %s7964_s14   ;;  %v6509_v31 = vadd.f32 %v11709_v9, %v6508_v20 }
 0x8bf   : > { %6656 = vst.msk [vmem:[%s11718_s0 + $0x188] sm:$0xff] %vm522_vm0, %v7834_v13 }
 0x8c0   : > { %7835 = vtanh.f32 %v6509_v31 }
 0x8c5   : > { %v6510_v24 = vpop.f32.mrf.mxu3 }
 0x8c6   : > { %v7836_v3 = vpop.eup %7835  ;;  %v6511_v32 = vadd.f32 %v11709_v9, %v6510_v24 }
 0x8c7   : > { %6657 = vst.msk [vmem:[%s11718_s0 + $0x190] sm:$0xff] %vm522_vm0, %v7836_v3 }
 0x8c8   : > { %7837 = vtanh.f32 %v6511_v32 }
 0x8cd   : > { %v6513_v40 = vpop.f32.mrf.mxu3 }
 0x8ce   : > { %v7838_v38 = vpop.eup %7837  ;;  %v6514_v16 = vadd.f32 %v11709_v9, %v6513_v40 }
 0x8cf   : > { %6658 = vst.msk [vmem:[%s11718_s0 + $0x198] sm:$0xff] %vm522_vm0, %v7838_v38 }
 0x8d0   : > { %7839 = vtanh.f32 %v6514_v16 }
 0x8d5   : > { %v6515_v51 = vpop.f32.mrf.mxu3 }
 0x8d6   : > { %v7840_v33 = vpop.eup %7839  ;;  %v6516_v41 = vadd.f32 %v11709_v9, %v6515_v51 }
 0x8d7   : > { %6659 = vst.msk [vmem:[%s11718_s0 + $0x1a0] sm:$0xff] %vm522_vm0, %v7840_v33 }
 0x8d8   : > { %7841 = vtanh.f32 %v6516_v41 }
 0x8dd   : > { %v6518_v28 = vpop.f32.mrf.mxu3 }
 0x8de   : > { %v7842_v2 = vpop.eup %7841  ;;  %v6519_v63 = vadd.f32 %v11709_v9, %v6518_v28 }
 0x8df   : > { %6660 = vst.msk [vmem:[%s11718_s0 + $0x1a8] sm:$0xff] %vm522_vm0, %v7842_v2 }
 0x8e0   : > { %7843 = vtanh.f32 %v6519_v63 }
 0x8e5   : > { %v6520_v37 = vpop.f32.mrf.mxu3 }
 0x8e6   : > { %v7844_v23 = vpop.eup %7843  ;;  %v6521_v59 = vadd.f32 %v11709_v9, %v6520_v37 }
 0x8e7   : > { %6661 = vst.msk [vmem:[%s11718_s0 + $0x1b0] sm:$0xff] %vm522_vm0, %v7844_v23 }
 0x8e8   : > { %7845 = vtanh.f32 %v6521_v59 }
 0x8ed   : > { %v6523_v54 = vpop.f32.mrf.mxu3 }
 0x8ee   : > { %v7846_v0 = vpop.eup %7845  ;;  %v6524_v11 = vadd.f32 %v11709_v9, %v6523_v54 }
 0x8ef   : > { %6662 = vst.msk [vmem:[%s11718_s0 + $0x1b8] sm:$0xff] %vm522_vm0, %v7846_v0 }
 0x8f0   : > { %7847 = vtanh.f32 %v6524_v11 }
 0x8f5   : > { %v6525_v43 = vpop.f32.mrf.mxu3 }
 0x8f6   : > { %v7848_v25 = vpop.eup %7847  ;;  %v6526_v8 = vadd.f32 %v11709_v9, %v6525_v43 }
 0x8f7   : > { %6663 = vst.msk [vmem:[%s11718_s0 + $0x1c0] sm:$0xff] %vm522_vm0, %v7848_v25 }
 0x8f8   : > { %7849 = vtanh.f32 %v6526_v8 }
 0x8fd   : > { %v6528_v21 = vpop.f32.mrf.mxu3 }
 0x8fe   : > { %v7850_v14 = vpop.eup %7849  ;;  %v6529_v15 = vadd.f32 %v11709_v9, %v6528_v21 }
 0x8ff   : > { %6664 = vst.msk [vmem:[%s11718_s0 + $0x1c8] sm:$0xff] %vm522_vm0, %v7850_v14 }
 0x900   : > { %7851 = vtanh.f32 %v6529_v15 }
 0x905   : > { %v6530_v36 = vpop.f32.mrf.mxu3 }
 0x906   : > { %v7852_v5 = vpop.eup %7851  ;;  %v6531_v44 = vadd.f32 %v11709_v9, %v6530_v36 }
 0x907   : > { %6665 = vst.msk [vmem:[%s11718_s0 + $0x1d0] sm:$0xff] %vm522_vm0, %v7852_v5 }
 0x908   : > { %7853 = vtanh.f32 %v6531_v44 }
 0x90d   : > { %v6533_v19 = vpop.f32.mrf.mxu3 }
 0x90e   : > { %v7854_v42 = vpop.eup %7853  ;;  %v6534_v7 = vadd.f32 %v11709_v9, %v6533_v19 }
 0x90f   : > { %6666 = vst.msk [vmem:[%s11718_s0 + $0x1d8] sm:$0xff] %vm522_vm0, %v7854_v42 }
 0x910   : > { %7855 = vtanh.f32 %v6534_v7 }
 0x915   : > { %v6535_v46 = vpop.f32.mrf.mxu3 }
 0x916   : > { %v7856_v29 = vpop.eup %7855  ;;  %v6536_v57 = vadd.f32 %v11709_v9, %v6535_v46 }
 0x917   : > { %6667 = vst.msk [vmem:[%s11718_s0 + $0x1e0] sm:$0xff] %vm522_vm0, %v7856_v29 }
 0x918   : > { %7857 = vtanh.f32 %v6536_v57 }
 0x91d   : > { %v6538_v12 = vpop.f32.mrf.mxu3 }
 0x91e   : > { %v7858_v50 = vpop.eup %7857  ;;  %v6539_v1 = vadd.f32 %v11709_v9, %v6538_v12 }
 0x91f   : > { %6668 = vst.msk [vmem:[%s11718_s0 + $0x1e8] sm:$0xff] %vm522_vm0, %v7858_v50 }
 0x920   : > { %7859 = vtanh.f32 %v6539_v1 }
 0x925   : > { %v6540_v17 = vpop.f32.mrf.mxu3 }
 0x926   : > { %v7860_v27 = vpop.eup %7859  ;;  %v6541_v48 = vadd.f32 %v11709_v9, %v6540_v17 }
 0x927   : > { %6669 = vst.msk [vmem:[%s11718_s0 + $0x1f0] sm:$0xff] %vm522_vm0, %v7860_v27 }
 0x928   : > { %7861 = vtanh.f32 %v6541_v48 }
 0x92e   : > { %v7862_v6 = vpop.eup %7861 }
 0x92f   : > { %6670 = vst.msk [vmem:[%s11718_s0 + $0x1f8] sm:$0xff] %vm522_vm0, %v7862_v6 }
 0x930 PF: > { %p7565_p5 = scmp.ge.s32.totalorder %s7959_s20, 2  ;;  %s6729_s27 = sand.u32 1, %s7947_s17  }
 0x931   : > { %s6730_s16 = scalar_lea.sflag [#allocation3], %s6729_s27 }
 0x932   : > { %p7559_p13 = pnand %p7565_p5, %p8067_p6 }
 0x934   : > { %p7560_p0 = pneg %p7559_p13 }
 0x936   : > { %7938 = dma.done.wait (%p7560_p0), %s6730_s16, 64  }
 0x937   : > { %7940 = vsyncadd (%p7560_p0), %s6730_s16, 4294967232  ;;  %s6740_s12 = scalar_lea.sflag [#allocation5], %s6729_s27 }
 0x938   : > { %7942 = dma.done.wait (%p7560_p0), %s6740_s12, 8192  }
 0x939   : > { %7944 = vsyncadd (%p7560_p0), %s6740_s12, 4294959104  ;;  %p25_p1 = scmp.ge.s32.totalorder %s8050_s23, 4   ;;  %s12606_s17 = smov %s7951_s18 }
 0x93a   : > { %s12607_s18 = smov %s7955_s19  ;;  %s12608_s19 = smov %s8061_s26 }
 0x93b   : > { %s12609_s20 = smov %s8050_s23  ;;  %27 = sbr.rel (!%p25_p1) target bundleno = 14 (0xe), region = 127 }
 0x940   :  { %6754 = vsyncpa [#allocation3], 1 }
 0x941   :  { %6756 = vsyncpa [#allocation3 + $0x1], 1 }
 0x942   :  { %6757 = vsyncpa [#allocation5], 1 }
 0x943   :  { %6759 = vsyncpa [#allocation5 + $0x1], 1 }

</bundles_post_ra>
